<compile_context>
chip_gen: v6e
topology: v6e:2x2x1
jax: 0.10.0
libtpu: 0.0.40
codegen_flags: <defaults>
</compile_context>

<pallas_src>
import jax
import jax.numpy as jnp
from jax import lax
from jax.experimental import pallas as pl
from jax.experimental.pallas import tpu as pltpu

EPS = 1e-5
LANE = 128  # TPU lane width: channel dims padded to this for lane-dense vregs


def bottleneck_kernel(rowid_ref, colid_ref, x_ref,
                      w1_ref, b1_ref,
                      w2_ref, b2_ref,
                      w3_ref, b3_ref,
                      o_ref):
    # x_ref: (1, H, W, Ci) f32 ; o_ref: (1, H, W, Co) f32 ; Ci == Co (residual)
    _, H, W, Ci = x_ref.shape
    HW = H * W

    # ---- conv1 (1x1, BN1 scale pre-folded into w1) + bias + relu ------------
    x_bf = x_ref[0].reshape(HW, Ci).astype(jnp.bfloat16)
    h1 = jnp.dot(x_bf, w1_ref[...], preferred_element_type=jnp.float32)
    h1 = jnp.maximum(h1 + b1_ref[...], 0.0)                        # (HW, Cw) f32

    # ---- conv2 (3x3, padding=1) as a SINGLE im2col matmul -------------------
    # Spatial taps via XLU sublane rolls of the flat (HW, Cw) image plus
    # boundary-validity masks built from host-precomputed pixel row/col ids.
    py = rowid_ref[...]            # (HW, 1) i32: pixel row index
    px = colid_ref[...]            # (HW, 1) i32: pixel col index
    cols = []
    for oy in (-1, 0, 1):
        for ox in (-1, 0, 1):
            s = oy * W + ox        # flat shift for tap (oy, ox)
            shifted = h1 if s == 0 else pltpu.roll(h1, shift=(-s) % HW, axis=0)
            if oy == 0 and ox == 0:
                masked = shifted                     # center tap: always valid
            else:
                valid = None
                if oy != 0:
                    valid = (py + oy >= 0) & (py + oy < H)
                if ox != 0:
                    cvalid = (px + ox >= 0) & (px + ox < W)
                    valid = cvalid if valid is None else (valid & cvalid)
                masked = jnp.where(valid, shifted, 0.0)
            cols.append(masked.astype(jnp.bfloat16))
    im2col = jnp.concatenate(cols, axis=-1)                         # (HW, 9*Cw) bf16
    h2 = jnp.dot(im2col, w2_ref[...], preferred_element_type=jnp.float32)
    h2 = jnp.maximum(h2 + b2_ref[...], 0.0)                         # (HW, Cw) f32

    # ---- conv3 (1x1) + bias + residual + relu --------------------------------
    h3 = jnp.dot(h2.astype(jnp.bfloat16), w3_ref[...],
                 preferred_element_type=jnp.float32)
    h3 = h3 + b3_ref[...]
    identity = x_ref[0].reshape(HW, Ci)   # re-read f32 residual (short live range)
    out = jnp.maximum(h3 + identity, 0.0)
    o_ref[...] = out.reshape(o_ref.shape).astype(o_ref.dtype)


def _round_up_lane(c):
    return -(-c // LANE) * LANE


def _pad_axis(a, axis, size):
    pad = size - a.shape[axis]
    if pad == 0:
        return a
    widths = [(0, 0)] * a.ndim
    widths[axis] = (0, pad)
    return jnp.pad(a, widths)


def bottleneck_forward(x_nchw, w1_k, s1, b1, w2_k, s2, b2, w3_k, s3, b3):
    """x_nchw: (N, Cin, H, W) f32.  Kernel-layout weights:
       w1_k (Cin, width), w2_k (3, 3, width, width), w3_k (width, Cout);
       s*/b*: folded BN scale/bias of shape (1, C)."""
    N, Cin, H, W = x_nchw.shape
    width = w1_k.shape[1]
    Cout = w3_k.shape[1]
    assert Cin == Cout, "residual requires Cin == Cout (stride=1, downsample=None)"

    Ci, Cw, Co = _round_up_lane(Cin), _round_up_lane(width), _round_up_lane(Cout)
    HW = H * W

    # NCHW -> NHWC; channels zero-padded to 128 lanes (lane-dense activations
    # and unmasked 128-lane output stores).
    x = jnp.transpose(x_nchw, (0, 2, 3, 1)).astype(jnp.float32)
    x = _pad_axis(x, 3, Ci)

    # Fold BN scale into the conv weights (per-output-channel linear scale),
    # zero-pad to lane width, ship to the kernel in bf16 (half the weight DMA).
    w1f = w1_k * s1                                  # (Cin, width)
    w2f = w2_k * s2.reshape(1, 1, 1, -1)             # (3, 3, width, width)
    w3f = w3_k * s3                                  # (width, Cout)
    w1 = _pad_axis(_pad_axis(w1f, 0, Ci), 1, Cw).astype(jnp.bfloat16)
    w2 = _pad_axis(_pad_axis(w2f, 2, Cw), 3, Cw).reshape(9 * Cw, Cw)
    w2 = w2.astype(jnp.bfloat16)
    w3 = _pad_axis(_pad_axis(w3f, 0, Cw), 1, Co).astype(jnp.bfloat16)
    b1p = _pad_axis(b1, 1, Cw).astype(jnp.float32)
    b2p = _pad_axis(b2, 1, Cw).astype(jnp.float32)
    b3p = _pad_axis(b3, 1, Co).astype(jnp.float32)

    # Pixel row/col index maps for the 3x3 boundary masks (precomputed on the
    # host; avoids in-kernel integer div/mod or reshape-relayouts).
    rowid = jnp.repeat(jnp.arange(H, dtype=jnp.int32), W).reshape(HW, 1)
    colid = jnp.tile(jnp.arange(W, dtype=jnp.int32), H).reshape(HW, 1)

    flops = 2 * N * HW * (Ci * Cw + 9 * Cw * Cw + Cw * Co)
    bytes_accessed = (x.size * 4 + N * HW * Co * 4 +
                      (w1.size + w2.size + w3.size) * 2 +
                      (b1p.size + b2p.size + b3p.size) * 4 +
                      (rowid.size + colid.size) * 4)

    out = pl.pallas_call(
        bottleneck_kernel,
        out_shape=jax.ShapeDtypeStruct((N, H, W, Co), jnp.float32),
        grid_spec=pltpu.PrefetchScalarGridSpec(
            num_scalar_prefetch=0,
            grid=(N,),
            in_specs=[
                pl.BlockSpec((HW, 1), lambda n: (0, 0)),              # rowid
                pl.BlockSpec((HW, 1), lambda n: (0, 0)),              # colid
                pl.BlockSpec((1, H, W, Ci), lambda n: (n, 0, 0, 0)),  # x
                pl.BlockSpec((Ci, Cw), lambda n: (0, 0)),             # w1 (scale folded)
                pl.BlockSpec((1, Cw), lambda n: (0, 0)),              # b1
                pl.BlockSpec((9 * Cw, Cw), lambda n: (0, 0)),         # w2 (im2col, scale folded)
                pl.BlockSpec((1, Cw), lambda n: (0, 0)),              # b2
                pl.BlockSpec((Cw, Co), lambda n: (0, 0)),             # w3 (scale folded)
                pl.BlockSpec((1, Co), lambda n: (0, 0)),              # b3
            ],
            out_specs=pl.BlockSpec((1, H, W, Co), lambda n: (n, 0, 0, 0)),
        ),
        compiler_params=pltpu.CompilerParams(
            dimension_semantics=("parallel",),
            vmem_limit_bytes=32 * 1024 * 1024,
        ),
        cost_estimate=pl.CostEstimate(flops=flops, transcendentals=0,
                                      bytes_accessed=bytes_accessed),
        # TODO(synk): for large ResNet stages (e.g. 56x56x256) add a spatial
        # row-block grid axis with a 1-row halo so the working set fits v7x's
        # 64 MiB VMEM and both TensorCores get a parallel axis to shard.
    )(rowid, colid, x, w1, b1p, w2, b2p, w3, b3p)

    out = out[..., :Cout]                      # drop padded channels
    return jnp.transpose(out, (0, 3, 1, 2))    # NHWC -> NCHW


def _bn_fold(gamma, beta, mean, var):
    scale = gamma / jnp.sqrt(var + EPS)
    bias = beta - mean * scale
    return scale.reshape(1, -1), bias.reshape(1, -1)


def _ref_forward(x, w1_t, bn1, w2_t, bn2, w3_t, bn3):
    # Pure-JAX (XLA conv, f32) reference mirroring PyTorch NCHW semantics.
    def bn(y, g, b, m, v):
        g, b, m, v = (t[None, :, None, None] for t in (g, b, m, v))
        return (y - m) / jnp.sqrt(v + EPS) * g + b

    dn = ('NCHW', 'OIHW', 'NCHW')
    out = lax.conv_general_dilated(x, w1_t, (1, 1), 'VALID', dimension_numbers=dn)
    out = jax.nn.relu(bn(out, *bn1))
    out = lax.conv_general_dilated(out, w2_t, (1, 1), ((1, 1), (1, 1)),
                                   dimension_numbers=dn)
    out = jax.nn.relu(bn(out, *bn2))
    out = lax.conv_general_dilated(out, w3_t, (1, 1), 'VALID', dimension_numbers=dn)
    out = bn(out, *bn3)
    return jax.nn.relu(out + x)


if __name__ == "__main__":
    # Bottleneck(inplanes=16, planes=4) -> width=4, out_channels = 4*4 = 16
    N, H, W = 2, 16, 16
    planes = 4
    inplanes = planes * 4          # residual requires inplanes == planes*expansion
    width = planes                 # base_width=64, groups=1
    cout = planes * 4

    keys = jax.random.split(jax.random.PRNGKey(0), 16)
    x = jax.random.normal(keys[0], (N, inplanes, H, W), jnp.float32)

    # Conv weights in PyTorch OIHW layout (deterministic synthetic init).
    w1_t = jax.random.normal(keys[1], (width, inplanes, 1, 1), jnp.float32) * 0.1
    w2_t = jax.random.normal(keys[2], (width, width, 3, 3), jnp.float32) * 0.1
    w3_t = jax.random.normal(keys[3], (cout, width, 1, 1), jnp.float32) * 0.1

    def bn_params(kg, kb, km, kv, c):
        gamma = 1.0 + 0.1 * jax.random.normal(kg, (c,), jnp.float32)
        beta = 0.1 * jax.random.normal(kb, (c,), jnp.float32)
        mean = 0.1 * jax.random.normal(km, (c,), jnp.float32)
        var = 1.0 + 0.1 * jax.random.uniform(kv, (c,), jnp.float32)
        return gamma, beta, mean, var

    bn1 = bn_params(keys[4], keys[5], keys[6], keys[7], width)
    bn2 = bn_params(keys[8], keys[9], keys[10], keys[11], width)
    bn3 = bn_params(keys[12], keys[13], keys[14], keys[15], cout)

    # Kernel-layout weights: 1x1 -> (Cin, Cout) matmul; 3x3 -> (kh, kw, Cin, Cout)
    w1_k = jnp.transpose(w1_t[:, :, 0, 0], (1, 0))
    w2_k = jnp.transpose(w2_t, (2, 3, 1, 0))
    w3_k = jnp.transpose(w3_t[:, :, 0, 0], (1, 0))
    s1, b1 = _bn_fold(*bn1)
    s2, b2 = _bn_fold(*bn2)
    s3, b3 = _bn_fold(*bn3)

    out = bottleneck_forward(x, w1_k, s1, b1, w2_k, s2, b2, w3_k, s3, b3)
    out = jax.block_until_ready(out)

    ref = _ref_forward(x, w1_t, bn1, w2_t, bn2, w3_t, bn3)
    err = float(jnp.max(jnp.abs(out - ref)))
    # Kernel uses bf16 MXU inputs (f32 accumulation / bias / residual), so allow
    # bf16-level rounding vs. the pure-f32 reference.
    assert err < 3e-2, f"max abs error {err}"
    print("KERNEL_OK")
</pallas_src>

<mosaic_0001>
module attributes {stable_mosaic.version = 11 : i64} {
  func.func @bottleneck_kernel(%arg0: i32, %arg1: memref<256x1xi32, #tpu.memory_space<vmem>>, %arg2: memref<256x1xi32, #tpu.memory_space<vmem>>, %arg3: memref<1x16x16x128xf32, #tpu.memory_space<vmem>>, %arg4: memref<128x128xbf16, #tpu.memory_space<vmem>>, %arg5: memref<1x128xf32, #tpu.memory_space<vmem>>, %arg6: memref<1152x128xbf16, #tpu.memory_space<vmem>>, %arg7: memref<1x128xf32, #tpu.memory_space<vmem>>, %arg8: memref<128x128xbf16, #tpu.memory_space<vmem>>, %arg9: memref<1x128xf32, #tpu.memory_space<vmem>>, %arg10: memref<1x16x16x128xf32, #tpu.memory_space<vmem>>) attributes {dimension_semantics = [#tpu.dimension_semantics<parallel>], iteration_bounds = array<i64: 2>, scalar_prefetch = 0 : i64, scratch_operands = 0 : i64, tpu.core_type = #tpu.core_type<tc>, window_params = [{pipeline_mode = #tpu.pipeline_mode<synchronous>, transform_indices = @transform_0, window_bounds = array<i64: 256, 1>}, {pipeline_mode = #tpu.pipeline_mode<synchronous>, transform_indices = @transform_1, window_bounds = array<i64: 256, 1>}, {transform_indices = @transform_2, window_bounds = array<i64: 1, 16, 16, 128>}, {pipeline_mode = #tpu.pipeline_mode<synchronous>, transform_indices = @transform_3, window_bounds = array<i64: 128, 128>}, {pipeline_mode = #tpu.pipeline_mode<synchronous>, transform_indices = @transform_4, window_bounds = array<i64: 1, 128>}, {pipeline_mode = #tpu.pipeline_mode<synchronous>, transform_indices = @transform_5, window_bounds = array<i64: 1152, 128>}, {pipeline_mode = #tpu.pipeline_mode<synchronous>, transform_indices = @transform_6, window_bounds = array<i64: 1, 128>}, {pipeline_mode = #tpu.pipeline_mode<synchronous>, transform_indices = @transform_7, window_bounds = array<i64: 128, 128>}, {pipeline_mode = #tpu.pipeline_mode<synchronous>, transform_indices = @transform_8, window_bounds = array<i64: 1, 128>}, {transform_indices = @transform_9, window_bounds = array<i64: 1, 16, 16, 128>}]} {
    %c0 = arith.constant 0 : index
    %c0_0 = arith.constant 0 : index
    %c0_1 = arith.constant 0 : index
    %c0_2 = arith.constant 0 : index
    %0 = vector.load %arg3[%c0, %c0_0, %c0_1, %c0_2] : memref<1x16x16x128xf32, #tpu.memory_space<vmem>>, vector<1x16x16x128xf32>
    %1 = vector.shape_cast %0 : vector<1x16x16x128xf32> to vector<16x16x128xf32>
    %2 = vector.shape_cast %1 : vector<16x16x128xf32> to vector<256x128xf32>
    %3 = arith.truncf %2 : vector<256x128xf32> to vector<256x128xbf16>
    %c0_3 = arith.constant 0 : index
    %c0_4 = arith.constant 0 : index
    %4 = vector.load %arg4[%c0_3, %c0_4] : memref<128x128xbf16, #tpu.memory_space<vmem>>, vector<128x128xbf16>
    %cst = arith.constant dense<0.000000e+00> : vector<256x128xf32>
    %5 = tpu.matmul %3, %4, %cst {dimension_numbers = #tpu.dot_dimension_numbers<[1], [0], [0], [1], [0, 0, 1, 1], [], []>} : vector<256x128xbf16>, vector<128x128xbf16>, vector<256x128xf32> -> vector<256x128xf32>
    %c0_5 = arith.constant 0 : index
    %c0_6 = arith.constant 0 : index
    %6 = vector.load %arg5[%c0_5, %c0_6] : memref<1x128xf32, #tpu.memory_space<vmem>>, vector<1x128xf32>
    %7 = vector.broadcast %6 : vector<1x128xf32> to vector<256x128xf32>
    %8 = arith.addf %5, %7 : vector<256x128xf32>
    %cst_7 = arith.constant 0.000000e+00 : f32
    %9 = vector.broadcast %cst_7 : f32 to vector<256x128xf32>
    %10 = arith.maximumf %8, %9 : vector<256x128xf32>
    %c0_8 = arith.constant 0 : index
    %c0_9 = arith.constant 0 : index
    %11 = vector.load %arg1[%c0_8, %c0_9] : memref<256x1xi32, #tpu.memory_space<vmem>>, vector<256x1xi32>
    %c0_10 = arith.constant 0 : index
    %c0_11 = arith.constant 0 : index
    %12 = vector.load %arg2[%c0_10, %c0_11] : memref<256x1xi32, #tpu.memory_space<vmem>>, vector<256x1xi32>
    %c17_i32 = arith.constant 17 : i32
    %13 = tpu.dynamic_rotate %10 by %c17_i32 dim 0 : vector<256x128xf32>, i32 -> vector<256x128xf32>
    %c-1_i32 = arith.constant -1 : i32
    %14 = vector.broadcast %c-1_i32 : i32 to vector<256x1xi32>
    %15 = arith.addi %11, %14 : vector<256x1xi32>
    %c0_i32 = arith.constant 0 : i32
    %16 = vector.broadcast %c0_i32 : i32 to vector<256x1xi32>
    %17 = arith.cmpi sge, %15, %16 : vector<256x1xi32>
    %c-1_i32_12 = arith.constant -1 : i32
    %18 = vector.broadcast %c-1_i32_12 : i32 to vector<256x1xi32>
    %19 = arith.addi %11, %18 : vector<256x1xi32>
    %c16_i32 = arith.constant 16 : i32
    %20 = vector.broadcast %c16_i32 : i32 to vector<256x1xi32>
    %21 = arith.cmpi slt, %19, %20 : vector<256x1xi32>
    %22 = arith.andi %17, %21 : vector<256x1xi1>
    %c-1_i32_13 = arith.constant -1 : i32
    %23 = vector.broadcast %c-1_i32_13 : i32 to vector<256x1xi32>
    %24 = arith.addi %12, %23 : vector<256x1xi32>
    %c0_i32_14 = arith.constant 0 : i32
    %25 = vector.broadcast %c0_i32_14 : i32 to vector<256x1xi32>
    %26 = arith.cmpi sge, %24, %25 : vector<256x1xi32>
    %c-1_i32_15 = arith.constant -1 : i32
    %27 = vector.broadcast %c-1_i32_15 : i32 to vector<256x1xi32>
    %28 = arith.addi %12, %27 : vector<256x1xi32>
    %c16_i32_16 = arith.constant 16 : i32
    %29 = vector.broadcast %c16_i32_16 : i32 to vector<256x1xi32>
    %30 = arith.cmpi slt, %28, %29 : vector<256x1xi32>
    %31 = arith.andi %26, %30 : vector<256x1xi1>
    %32 = arith.andi %22, %31 : vector<256x1xi1>
    %cst_17 = arith.constant 0.000000e+00 : f32
    %33 = vector.shape_cast %32 : vector<256x1xi1> to vector<256x1xi1>
    %34 = vector.broadcast %33 : vector<256x1xi1> to vector<256x128xi1>
    %35 = vector.broadcast %cst_17 : f32 to vector<256x128xf32>
    %36 = arith.select %34, %13, %35 : vector<256x128xi1>, vector<256x128xf32>
    %37 = arith.truncf %36 : vector<256x128xf32> to vector<256x128xbf16>
    %c16_i32_18 = arith.constant 16 : i32
    %38 = tpu.dynamic_rotate %10 by %c16_i32_18 dim 0 : vector<256x128xf32>, i32 -> vector<256x128xf32>
    %c-1_i32_19 = arith.constant -1 : i32
    %39 = vector.broadcast %c-1_i32_19 : i32 to vector<256x1xi32>
    %40 = arith.addi %11, %39 : vector<256x1xi32>
    %c0_i32_20 = arith.constant 0 : i32
    %41 = vector.broadcast %c0_i32_20 : i32 to vector<256x1xi32>
    %42 = arith.cmpi sge, %40, %41 : vector<256x1xi32>
    %c-1_i32_21 = arith.constant -1 : i32
    %43 = vector.broadcast %c-1_i32_21 : i32 to vector<256x1xi32>
    %44 = arith.addi %11, %43 : vector<256x1xi32>
    %c16_i32_22 = arith.constant 16 : i32
    %45 = vector.broadcast %c16_i32_22 : i32 to vector<256x1xi32>
    %46 = arith.cmpi slt, %44, %45 : vector<256x1xi32>
    %47 = arith.andi %42, %46 : vector<256x1xi1>
    %cst_23 = arith.constant 0.000000e+00 : f32
    %48 = vector.shape_cast %47 : vector<256x1xi1> to vector<256x1xi1>
    %49 = vector.broadcast %48 : vector<256x1xi1> to vector<256x128xi1>
    %50 = vector.broadcast %cst_23 : f32 to vector<256x128xf32>
    %51 = arith.select %49, %38, %50 : vector<256x128xi1>, vector<256x128xf32>
    %52 = arith.truncf %51 : vector<256x128xf32> to vector<256x128xbf16>
    %c15_i32 = arith.constant 15 : i32
    %53 = tpu.dynamic_rotate %10 by %c15_i32 dim 0 : vector<256x128xf32>, i32 -> vector<256x128xf32>
    %c-1_i32_24 = arith.constant -1 : i32
    %54 = vector.broadcast %c-1_i32_24 : i32 to vector<256x1xi32>
    %55 = arith.addi %11, %54 : vector<256x1xi32>
    %c0_i32_25 = arith.constant 0 : i32
    %56 = vector.broadcast %c0_i32_25 : i32 to vector<256x1xi32>
    %57 = arith.cmpi sge, %55, %56 : vector<256x1xi32>
    %c-1_i32_26 = arith.constant -1 : i32
    %58 = vector.broadcast %c-1_i32_26 : i32 to vector<256x1xi32>
    %59 = arith.addi %11, %58 : vector<256x1xi32>
    %c16_i32_27 = arith.constant 16 : i32
    %60 = vector.broadcast %c16_i32_27 : i32 to vector<256x1xi32>
    %61 = arith.cmpi slt, %59, %60 : vector<256x1xi32>
    %62 = arith.andi %57, %61 : vector<256x1xi1>
    %c1_i32 = arith.constant 1 : i32
    %63 = vector.broadcast %c1_i32 : i32 to vector<256x1xi32>
    %64 = arith.addi %12, %63 : vector<256x1xi32>
    %c0_i32_28 = arith.constant 0 : i32
    %65 = vector.broadcast %c0_i32_28 : i32 to vector<256x1xi32>
    %66 = arith.cmpi sge, %64, %65 : vector<256x1xi32>
    %c1_i32_29 = arith.constant 1 : i32
    %67 = vector.broadcast %c1_i32_29 : i32 to vector<256x1xi32>
    %68 = arith.addi %12, %67 : vector<256x1xi32>
    %c16_i32_30 = arith.constant 16 : i32
    %69 = vector.broadcast %c16_i32_30 : i32 to vector<256x1xi32>
    %70 = arith.cmpi slt, %68, %69 : vector<256x1xi32>
    %71 = arith.andi %66, %70 : vector<256x1xi1>
    %72 = arith.andi %62, %71 : vector<256x1xi1>
    %cst_31 = arith.constant 0.000000e+00 : f32
    %73 = vector.shape_cast %72 : vector<256x1xi1> to vector<256x1xi1>
    %74 = vector.broadcast %73 : vector<256x1xi1> to vector<256x128xi1>
    %75 = vector.broadcast %cst_31 : f32 to vector<256x128xf32>
    %76 = arith.select %74, %53, %75 : vector<256x128xi1>, vector<256x128xf32>
    %77 = arith.truncf %76 : vector<256x128xf32> to vector<256x128xbf16>
    %c1_i32_32 = arith.constant 1 : i32
    %78 = tpu.dynamic_rotate %10 by %c1_i32_32 dim 0 : vector<256x128xf32>, i32 -> vector<256x128xf32>
    %c-1_i32_33 = arith.constant -1 : i32
    %79 = vector.broadcast %c-1_i32_33 : i32 to vector<256x1xi32>
    %80 = arith.addi %12, %79 : vector<256x1xi32>
    %c0_i32_34 = arith.constant 0 : i32
    %81 = vector.broadcast %c0_i32_34 : i32 to vector<256x1xi32>
    %82 = arith.cmpi sge, %80, %81 : vector<256x1xi32>
    %c-1_i32_35 = arith.constant -1 : i32
    %83 = vector.broadcast %c-1_i32_35 : i32 to vector<256x1xi32>
    %84 = arith.addi %12, %83 : vector<256x1xi32>
    %c16_i32_36 = arith.constant 16 : i32
    %85 = vector.broadcast %c16_i32_36 : i32 to vector<256x1xi32>
    %86 = arith.cmpi slt, %84, %85 : vector<256x1xi32>
    %87 = arith.andi %82, %86 : vector<256x1xi1>
    %cst_37 = arith.constant 0.000000e+00 : f32
    %88 = vector.shape_cast %87 : vector<256x1xi1> to vector<256x1xi1>
    %89 = vector.broadcast %88 : vector<256x1xi1> to vector<256x128xi1>
    %90 = vector.broadcast %cst_37 : f32 to vector<256x128xf32>
    %91 = arith.select %89, %78, %90 : vector<256x128xi1>, vector<256x128xf32>
    %92 = arith.truncf %91 : vector<256x128xf32> to vector<256x128xbf16>
    %93 = arith.truncf %10 : vector<256x128xf32> to vector<256x128xbf16>
    %c255_i32 = arith.constant 255 : i32
    %94 = tpu.dynamic_rotate %10 by %c255_i32 dim 0 : vector<256x128xf32>, i32 -> vector<256x128xf32>
    %c1_i32_38 = arith.constant 1 : i32
    %95 = vector.broadcast %c1_i32_38 : i32 to vector<256x1xi32>
    %96 = arith.addi %12, %95 : vector<256x1xi32>
    %c0_i32_39 = arith.constant 0 : i32
    %97 = vector.broadcast %c0_i32_39 : i32 to vector<256x1xi32>
    %98 = arith.cmpi sge, %96, %97 : vector<256x1xi32>
    %c1_i32_40 = arith.constant 1 : i32
    %99 = vector.broadcast %c1_i32_40 : i32 to vector<256x1xi32>
    %100 = arith.addi %12, %99 : vector<256x1xi32>
    %c16_i32_41 = arith.constant 16 : i32
    %101 = vector.broadcast %c16_i32_41 : i32 to vector<256x1xi32>
    %102 = arith.cmpi slt, %100, %101 : vector<256x1xi32>
    %103 = arith.andi %98, %102 : vector<256x1xi1>
    %cst_42 = arith.constant 0.000000e+00 : f32
    %104 = vector.shape_cast %103 : vector<256x1xi1> to vector<256x1xi1>
    %105 = vector.broadcast %104 : vector<256x1xi1> to vector<256x128xi1>
    %106 = vector.broadcast %cst_42 : f32 to vector<256x128xf32>
    %107 = arith.select %105, %94, %106 : vector<256x128xi1>, vector<256x128xf32>
    %108 = arith.truncf %107 : vector<256x128xf32> to vector<256x128xbf16>
    %c241_i32 = arith.constant 241 : i32
    %109 = tpu.dynamic_rotate %10 by %c241_i32 dim 0 : vector<256x128xf32>, i32 -> vector<256x128xf32>
    %c1_i32_43 = arith.constant 1 : i32
    %110 = vector.broadcast %c1_i32_43 : i32 to vector<256x1xi32>
    %111 = arith.addi %11, %110 : vector<256x1xi32>
    %c0_i32_44 = arith.constant 0 : i32
    %112 = vector.broadcast %c0_i32_44 : i32 to vector<256x1xi32>
    %113 = arith.cmpi sge, %111, %112 : vector<256x1xi32>
    %c1_i32_45 = arith.constant 1 : i32
    %114 = vector.broadcast %c1_i32_45 : i32 to vector<256x1xi32>
    %115 = arith.addi %11, %114 : vector<256x1xi32>
    %c16_i32_46 = arith.constant 16 : i32
    %116 = vector.broadcast %c16_i32_46 : i32 to vector<256x1xi32>
    %117 = arith.cmpi slt, %115, %116 : vector<256x1xi32>
    %118 = arith.andi %113, %117 : vector<256x1xi1>
    %c-1_i32_47 = arith.constant -1 : i32
    %119 = vector.broadcast %c-1_i32_47 : i32 to vector<256x1xi32>
    %120 = arith.addi %12, %119 : vector<256x1xi32>
    %c0_i32_48 = arith.constant 0 : i32
    %121 = vector.broadcast %c0_i32_48 : i32 to vector<256x1xi32>
    %122 = arith.cmpi sge, %120, %121 : vector<256x1xi32>
    %c-1_i32_49 = arith.constant -1 : i32
    %123 = vector.broadcast %c-1_i32_49 : i32 to vector<256x1xi32>
    %124 = arith.addi %12, %123 : vector<256x1xi32>
    %c16_i32_50 = arith.constant 16 : i32
    %125 = vector.broadcast %c16_i32_50 : i32 to vector<256x1xi32>
    %126 = arith.cmpi slt, %124, %125 : vector<256x1xi32>
    %127 = arith.andi %122, %126 : vector<256x1xi1>
    %128 = arith.andi %118, %127 : vector<256x1xi1>
    %cst_51 = arith.constant 0.000000e+00 : f32
    %129 = vector.shape_cast %128 : vector<256x1xi1> to vector<256x1xi1>
    %130 = vector.broadcast %129 : vector<256x1xi1> to vector<256x128xi1>
    %131 = vector.broadcast %cst_51 : f32 to vector<256x128xf32>
    %132 = arith.select %130, %109, %131 : vector<256x128xi1>, vector<256x128xf32>
    %133 = arith.truncf %132 : vector<256x128xf32> to vector<256x128xbf16>
    %c240_i32 = arith.constant 240 : i32
    %134 = tpu.dynamic_rotate %10 by %c240_i32 dim 0 : vector<256x128xf32>, i32 -> vector<256x128xf32>
    %c1_i32_52 = arith.constant 1 : i32
    %135 = vector.broadcast %c1_i32_52 : i32 to vector<256x1xi32>
    %136 = arith.addi %11, %135 : vector<256x1xi32>
    %c0_i32_53 = arith.constant 0 : i32
    %137 = vector.broadcast %c0_i32_53 : i32 to vector<256x1xi32>
    %138 = arith.cmpi sge, %136, %137 : vector<256x1xi32>
    %c1_i32_54 = arith.constant 1 : i32
    %139 = vector.broadcast %c1_i32_54 : i32 to vector<256x1xi32>
    %140 = arith.addi %11, %139 : vector<256x1xi32>
    %c16_i32_55 = arith.constant 16 : i32
    %141 = vector.broadcast %c16_i32_55 : i32 to vector<256x1xi32>
    %142 = arith.cmpi slt, %140, %141 : vector<256x1xi32>
    %143 = arith.andi %138, %142 : vector<256x1xi1>
    %cst_56 = arith.constant 0.000000e+00 : f32
    %144 = vector.shape_cast %143 : vector<256x1xi1> to vector<256x1xi1>
    %145 = vector.broadcast %144 : vector<256x1xi1> to vector<256x128xi1>
    %146 = vector.broadcast %cst_56 : f32 to vector<256x128xf32>
    %147 = arith.select %145, %134, %146 : vector<256x128xi1>, vector<256x128xf32>
    %148 = arith.truncf %147 : vector<256x128xf32> to vector<256x128xbf16>
    %c239_i32 = arith.constant 239 : i32
    %149 = tpu.dynamic_rotate %10 by %c239_i32 dim 0 : vector<256x128xf32>, i32 -> vector<256x128xf32>
    %c1_i32_57 = arith.constant 1 : i32
    %150 = vector.broadcast %c1_i32_57 : i32 to vector<256x1xi32>
    %151 = arith.addi %11, %150 : vector<256x1xi32>
    %c0_i32_58 = arith.constant 0 : i32
    %152 = vector.broadcast %c0_i32_58 : i32 to vector<256x1xi32>
    %153 = arith.cmpi sge, %151, %152 : vector<256x1xi32>
    %c1_i32_59 = arith.constant 1 : i32
    %154 = vector.broadcast %c1_i32_59 : i32 to vector<256x1xi32>
    %155 = arith.addi %11, %154 : vector<256x1xi32>
    %c16_i32_60 = arith.constant 16 : i32
    %156 = vector.broadcast %c16_i32_60 : i32 to vector<256x1xi32>
    %157 = arith.cmpi slt, %155, %156 : vector<256x1xi32>
    %158 = arith.andi %153, %157 : vector<256x1xi1>
    %c1_i32_61 = arith.constant 1 : i32
    %159 = vector.broadcast %c1_i32_61 : i32 to vector<256x1xi32>
    %160 = arith.addi %12, %159 : vector<256x1xi32>
    %c0_i32_62 = arith.constant 0 : i32
    %161 = vector.broadcast %c0_i32_62 : i32 to vector<256x1xi32>
    %162 = arith.cmpi sge, %160, %161 : vector<256x1xi32>
    %c1_i32_63 = arith.constant 1 : i32
    %163 = vector.broadcast %c1_i32_63 : i32 to vector<256x1xi32>
    %164 = arith.addi %12, %163 : vector<256x1xi32>
    %c16_i32_64 = arith.constant 16 : i32
    %165 = vector.broadcast %c16_i32_64 : i32 to vector<256x1xi32>
    %166 = arith.cmpi slt, %164, %165 : vector<256x1xi32>
    %167 = arith.andi %162, %166 : vector<256x1xi1>
    %168 = arith.andi %158, %167 : vector<256x1xi1>
    %cst_65 = arith.constant 0.000000e+00 : f32
    %169 = vector.shape_cast %168 : vector<256x1xi1> to vector<256x1xi1>
    %170 = vector.broadcast %169 : vector<256x1xi1> to vector<256x128xi1>
    %171 = vector.broadcast %cst_65 : f32 to vector<256x128xf32>
    %172 = arith.select %170, %149, %171 : vector<256x128xi1>, vector<256x128xf32>
    %173 = arith.truncf %172 : vector<256x128xf32> to vector<256x128xbf16>
    %174 = tpu.concatenate %37, %52, %77, %92, %93, %108, %133, %148, %173 in 1 : vector<256x128xbf16>, vector<256x128xbf16>, vector<256x128xbf16>, vector<256x128xbf16>, vector<256x128xbf16>, vector<256x128xbf16>, vector<256x128xbf16>, vector<256x128xbf16>, vector<256x128xbf16> -> vector<256x1152xbf16>
    %c0_66 = arith.constant 0 : index
    %c0_67 = arith.constant 0 : index
    %175 = vector.load %arg6[%c0_66, %c0_67] : memref<1152x128xbf16, #tpu.memory_space<vmem>>, vector<1152x128xbf16>
    %cst_68 = arith.constant dense<0.000000e+00> : vector<256x128xf32>
    %176 = tpu.matmul %174, %175, %cst_68 {dimension_numbers = #tpu.dot_dimension_numbers<[1], [0], [0], [1], [0, 0, 1, 1], [], []>} : vector<256x1152xbf16>, vector<1152x128xbf16>, vector<256x128xf32> -> vector<256x128xf32>
    %c0_69 = arith.constant 0 : index
    %c0_70 = arith.constant 0 : index
    %177 = vector.load %arg7[%c0_69, %c0_70] : memref<1x128xf32, #tpu.memory_space<vmem>>, vector<1x128xf32>
    %178 = vector.broadcast %177 : vector<1x128xf32> to vector<256x128xf32>
    %179 = arith.addf %176, %178 : vector<256x128xf32>
    %cst_71 = arith.constant 0.000000e+00 : f32
    %180 = vector.broadcast %cst_71 : f32 to vector<256x128xf32>
    %181 = arith.maximumf %179, %180 : vector<256x128xf32>
    %182 = arith.truncf %181 : vector<256x128xf32> to vector<256x128xbf16>
    %c0_72 = arith.constant 0 : index
    %c0_73 = arith.constant 0 : index
    %183 = vector.load %arg8[%c0_72, %c0_73] : memref<128x128xbf16, #tpu.memory_space<vmem>>, vector<128x128xbf16>
    %cst_74 = arith.constant dense<0.000000e+00> : vector<256x128xf32>
    %184 = tpu.matmul %182, %183, %cst_74 {dimension_numbers = #tpu.dot_dimension_numbers<[1], [0], [0], [1], [0, 0, 1, 1], [], []>} : vector<256x128xbf16>, vector<128x128xbf16>, vector<256x128xf32> -> vector<256x128xf32>
    %c0_75 = arith.constant 0 : index
    %c0_76 = arith.constant 0 : index
    %185 = vector.load %arg9[%c0_75, %c0_76] : memref<1x128xf32, #tpu.memory_space<vmem>>, vector<1x128xf32>
    %186 = vector.broadcast %185 : vector<1x128xf32> to vector<256x128xf32>
    %187 = arith.addf %184, %186 : vector<256x128xf32>
    %c0_77 = arith.constant 0 : index
    %c0_78 = arith.constant 0 : index
    %c0_79 = arith.constant 0 : index
    %c0_80 = arith.constant 0 : index
    %188 = vector.load %arg3[%c0_77, %c0_78, %c0_79, %c0_80] : memref<1x16x16x128xf32, #tpu.memory_space<vmem>>, vector<1x16x16x128xf32>
    %189 = vector.shape_cast %188 : vector<1x16x16x128xf32> to vector<16x16x128xf32>
    %190 = vector.shape_cast %189 : vector<16x16x128xf32> to vector<256x128xf32>
    %191 = arith.addf %187, %190 : vector<256x128xf32>
    %cst_81 = arith.constant 0.000000e+00 : f32
    %192 = vector.broadcast %cst_81 : f32 to vector<256x128xf32>
    %193 = arith.maximumf %191, %192 : vector<256x128xf32>
    %194 = vector.shape_cast %193 : vector<256x128xf32> to vector<1x16x16x128xf32>
    %c0_82 = arith.constant 0 : index
    %c0_83 = arith.constant 0 : index
    %c0_84 = arith.constant 0 : index
    %c0_85 = arith.constant 0 : index
    %195 = vector.load %arg10[%c0_82, %c0_83, %c0_84, %c0_85] : memref<1x16x16x128xf32, #tpu.memory_space<vmem>>, vector<1x16x16x128xf32>
    tpu.vector_store %arg10[%c0_82, %c0_83, %c0_84, %c0_85], %194 {strides = array<i32>} : memref<1x16x16x128xf32, #tpu.memory_space<vmem>>, vector<1x16x16x128xf32>,
    return
  }
  func.func @transform_0(%arg0: i32) -> (i32, i32) {
    %c0_i32 = arith.constant 0 : i32
    %c0_i32_0 = arith.constant 0 : i32
    %c0_i32_1 = arith.constant 0 : i32
    return %c0_i32, %c0_i32_0 : i32, i32
  }
  func.func @transform_1(%arg0: i32) -> (i32, i32) {
    %c0_i32 = arith.constant 0 : i32
    %c0_i32_0 = arith.constant 0 : i32
    %c0_i32_1 = arith.constant 0 : i32
    return %c0_i32, %c0_i32_0 : i32, i32
  }
  func.func @transform_2(%arg0: i32) -> (i32, i32, i32, i32) {
    %c0_i32 = arith.constant 0 : i32
    %c0_i32_0 = arith.constant 0 : i32
    %c0_i32_1 = arith.constant 0 : i32
    %c0_i32_2 = arith.constant 0 : i32
    return %arg0, %c0_i32, %c0_i32_0, %c0_i32_1 : i32, i32, i32, i32
  }
  func.func @transform_3(%arg0: i32) -> (i32, i32) {
    %c0_i32 = arith.constant 0 : i32
    %c0_i32_0 = arith.constant 0 : i32
    %c0_i32_1 = arith.constant 0 : i32
    return %c0_i32, %c0_i32_0 : i32, i32
  }
  func.func @transform_4(%arg0: i32) -> (i32, i32) {
    %c0_i32 = arith.constant 0 : i32
    %c0_i32_0 = arith.constant 0 : i32
    %c0_i32_1 = arith.constant 0 : i32
    return %c0_i32, %c0_i32_0 : i32, i32
  }
  func.func @transform_5(%arg0: i32) -> (i32, i32) {
    %c0_i32 = arith.constant 0 : i32
    %c0_i32_0 = arith.constant 0 : i32
    %c0_i32_1 = arith.constant 0 : i32
    return %c0_i32, %c0_i32_0 : i32, i32
  }
  func.func @transform_6(%arg0: i32) -> (i32, i32) {
    %c0_i32 = arith.constant 0 : i32
    %c0_i32_0 = arith.constant 0 : i32
    %c0_i32_1 = arith.constant 0 : i32
    return %c0_i32, %c0_i32_0 : i32, i32
  }
  func.func @transform_7(%arg0: i32) -> (i32, i32) {
    %c0_i32 = arith.constant 0 : i32
    %c0_i32_0 = arith.constant 0 : i32
    %c0_i32_1 = arith.constant 0 : i32
    return %c0_i32, %c0_i32_0 : i32, i32
  }
  func.func @transform_8(%arg0: i32) -> (i32, i32) {
    %c0_i32 = arith.constant 0 : i32
    %c0_i32_0 = arith.constant 0 : i32
    %c0_i32_1 = arith.constant 0 : i32
    return %c0_i32, %c0_i32_0 : i32, i32
  }
  func.func @transform_9(%arg0: i32) -> (i32, i32, i32, i32) {
    %c0_i32 = arith.constant 0 : i32
    %c0_i32_0 = arith.constant 0 : i32
    %c0_i32_1 = arith.constant 0 : i32
    %c0_i32_2 = arith.constant 0 : i32
    return %arg0, %c0_i32, %c0_i32_0, %c0_i32_1 : i32, i32, i32, i32
  }
}

</mosaic_0001>

<bundles_post_ra>
// kernel: tpu_custom_call.1
= control target key start
LH: loop header
LB: loop body
LE: loop exit
PB: predicated region body
PF: predicated region fallthrough
CT: control target
= control target key end

     0   :  { %14 = vsyncpa [#allocation3], 0  ;;  %s11198_s0 = inlined_call_operand.vmem [shape: s32[256,1], index: 0, kind: input, shape index: {}]   ;;  %s11199_s1 = inlined_call_operand.vmem [shape: s32[256,1], index: 1, kind: input, shape index: {}]   ;;  %s11200_s2 = inlined_call_operand.vmem [shape: f32[2,16,16,128], index: 2, kind: input, shape index: {}]   ;;  %s11201_s3 = inlined_call_operand.hbm [shape: bf16[128,128], index: 3, kind: input, shape index: {}]   ;;  %s11202_s4 = inlined_call_operand.vmem [shape: f32[1,128], index: 4, kind: input, shape index: {}]   ;;  %s11203_s5 = inlined_call_operand.hbm [shape: bf16[1152,128], index: 5, kind: input, shape index: {}]   ;;  %s11204_s6 = inlined_call_operand.vmem [shape: f32[1,128], index: 6, kind: input, shape index: {}]   ;;  %s11205_s7 = inlined_call_operand.hbm [shape: bf16[128,128], index: 7, kind: input, shape index: {}]   ;;  %s11206_s8 = inlined_call_operand.vmem [shape: f32[1,128], index: 8, kind: input, shape index: {}]   ;;  %s11207_s9 = inlined_call_operand.hbm [shape: f32[2,16,16,128], index: 9, kind: output, shape index: {}]  }
   0x1   :  { %15 = vsyncpa [#allocation6], 0 }
   0x2   :  { %16 = vsyncpa [#allocation4], 0 }
   0x3   :  { %18 = vsyncpa [#allocation4 + $0x1], 0  ;;  %s6720_s30 = smov 0   ;;  %s6722_s10 = smov 0  }
   0x4   :  { %s6724_s11 = smov 0   ;;  %s6726_s12 = smov 0  }
   0x5 LB: > { %s6741_s13 = sadd.s32 4294967295, %s6659_s12   ;;  %s5075_s14 = sadd.s32 4294967294, %s6659_s12   ;;  %s6659_s12 = sphi %s6726_s12, %s12867_s12   ;;  %s6655_s11 = sphi %s6724_s11, %s12866_s11   ;;  %s6651_s10 = sphi %s6722_s10, %s12865_s10   ;;  %s6647_s30 = sphi %s6720_s30, %s12864_s30  }
   0x6   : > { %s6745_s15 = sadd.s32 1, %s6659_s12   ;;  %s225_s16 = sadd.s32 1, %s6655_s11 }
   0x7   : > { %s222_s17 = ssub.s32 %s6659_s12, %s6745_s15  ;;  %p235_p0 = scmp.ne.s32.totalorder %s6655_s11, %s6651_s10 }
   0x8   : > { %p223_p1 = scmp.eq.s32.totalorder %s222_s17, 0  ;;  %p236_p2 = scmp.eq.s32.totalorder %s6741_s13, 1 }
   0x9   : > { %p241_p3 = scmp.ne.s32.totalorder %s6651_s10, %s6647_s30  ;;  %p242_p4 = scmp.eq.s32.totalorder %s5075_s14, 1 }
   0xa   : > { %s6756_s18 = scalar_select %p223_p1, %s6655_s11, %s225_s16  }
   0xb   : > { %p6758_p5 = por %p236_p2, %p235_p0  ;;  %p6762_p6 = por %p242_p4, %p241_p3 }
   0xc   : > { %p5076_p7 = scmp.ge.s32.totalorder %s6659_s12, 1  ;;  %p249_p8 = scmp.lt.s32.totalorder %s6659_s12, 3 }
   0xd   : > { %s11680_s19 = scalar_select %p6758_p5, 1, 0 }
   0xe   : > { %s11681_s20 = scalar_select %p6762_p6, 1, 0 }
   0xf   : > { %p11208_p9 = scmp.eq.s32.totalorder %s6741_s13, 0  ;;  %p6769_p10 = pnand %p5076_p7, %p249_p8 }
  0x10   : > { %s6661_s22 = smov [#allocation5]   ;;  %s6662_s25 = smov [#allocation2]  }
  0x11   : > { %p6264_p11 = pneg %p6769_p10  ;;  %s283_s23 = sshll.u32 %s6661_s22, 4  ;;  %s284_s23 = int_to_ptr.vmem [resolvable:$true] %s283_s23 }
  0x12   : > { %s267_s26 = sshll.u32 %s6662_s25, 4  ;;  %s6663_s27 = smov [#allocation7]   ;;  %s268_s26 = int_to_ptr.vmem [resolvable:$true] %s267_s26 }
  0x13   : > { %p6777_p12 = pnand %p11208_p9, %p6264_p11  ;;  %s299_s28 = sshll.u32 %s6663_s27, 4  ;;  %s300_s28 = int_to_ptr.vmem [resolvable:$true] %s299_s28 }
  0x14   : > { %s6524_s29 = scalar_lea.vmem %s284_s23, 9216  ;;  %p6532_p3 = scmp.lt.s32.totalorder %s284_s23, %s284_s23 }
  0x15   : > { %p6515_p13 = pneg %p6777_p12  ;;  %p6525_p0 = scmp.ne.s32.totalorder %s284_s23, %s6524_s29 }
  0x16   : > { %p6533_p4 = scmp.lt.s32.totalorder %s6524_s29, %s6524_s29 }
  0x17   : > { %p6527_p1 = pnand %p6525_p0, %p6515_p13 }
  0x18   : > { %p6534_p7 = por %p6533_p4, %p6532_p3 }
  0x19   : > { %p6528_p2 = pneg %p6527_p1 }
  0x1b   : > { %p6535_p8 = pnand %p6534_p7, %p6528_p2 }
  0x1d   : > { %6538 = shalt.err (!%p6535_p8)
}
  0x1e   : > { %s6664_s14 = smov 64   ;;  %s6665_s16 = smov 4  }
  0x1f   : > { %6270 = dma.hbm_to_vmem [thread:$0]  (!%p6777_p12), %s11203_s5, 9216, %s284_s23, [#allocation6], %s6664_s14, %s6664_s14, %s6665_s16  }
  0x20   : > { %s6550_s25 = scalar_lea.vmem %s268_s26, 1024  ;;  %p6558_p9 = scmp.lt.s32.totalorder %s268_s26, %s268_s26 }
  0x21   : > { %p6551_p11 = scmp.ne.s32.totalorder %s268_s26, %s6550_s25  ;;  %p6559_p6 = scmp.lt.s32.totalorder %s6550_s25, %s6550_s25 }
  0x23   : > { %p6553_p0 = pnand %p6551_p11, %p6515_p13  ;;  %p6560_p3 = por %p6559_p6, %p6558_p9 }
  0x25   : > { %p6554_p1 = pneg %p6553_p0 }
  0x27   : > { %p6561_p2 = pnand %p6560_p3, %p6554_p1 }
  0x29   : > { %6564 = shalt.err (!%p6561_p2)
}
  0x2a   : > { %6267 = dma.hbm_to_vmem [thread:$0]  (!%p6777_p12), %s11201_s3, 1024, %s268_s26, [#allocation3], %s6664_s14, %s6664_s14, %s6665_s16  }
  0x2b   : > { %s6576_s23 = scalar_lea.vmem %s300_s28, 1024  ;;  %p6584_p11 = scmp.lt.s32.totalorder %s300_s28, %s300_s28 }
  0x2c   : > { %p6577_p4 = scmp.ne.s32.totalorder %s300_s28, %s6576_s23  ;;  %p6585_p0 = scmp.lt.s32.totalorder %s6576_s23, %s6576_s23 }
  0x2e   : > { %p6579_p7 = pnand %p6577_p4, %p6515_p13  ;;  %p6586_p5 = por %p6585_p0, %p6584_p11 }
  0x30   : > { %p6580_p8 = pneg %p6579_p7 }
  0x32   : > { %p6587_p6 = pnand %p6586_p5, %p6580_p8 }
  0x34   : > { %6590 = shalt.err (!%p6587_p6)
}
  0x35   : > { %6273 = dma.hbm_to_vmem [thread:$0]  (!%p6777_p12), %s11205_s7, 1024, %s300_s28, [#allocation6], %s6664_s14, %s6664_s14, %s6665_s16  }
  0x36   : > { %326 = sbr.rel (%p6769_p10) target bundleno = 1191 (0x4a7), region = 56 }
  0x3b   : > { %p11684_p9 = scmp.eq.s32.totalorder %s6741_s13, 0 }
  0x3d   : > { %6634 = dma.done.wait (%p11684_p9), [#allocation3], 1024   ;;  %p11685_p13 = pmov %p11684_p9 }
  0x3e   : > { %p11686_p1 = pmov %p11684_p9 }
  0x3f   : > { %6636 = vsyncadd (%p11685_p13), [#allocation3], 4294966272 }
  0x40   : > { %6638 = dma.done.wait (%p11686_p1), [#allocation6], 10240   ;;  %p11687_p5 = pmov %p11686_p1 }
  0x41   : > { %v11308_v0 = vmov 0   ;;  %v6327_v1 = vld [vmem:[#allocation2 + $0x38] sm:$0xff]   ;;  %v690_v2 = vld [vmem:[%s11198_s0 + $0x10] sm:$0xff]  ;;  %v688_v4 = vld [vmem:[%s11198_s0] sm:$0xff]  ;;  %v11688_v14 = vmov 0  ;;  %v11690_v17 = vmov 0 }
  0x42   : > { %6640 = vsyncadd (%p11687_p5), [#allocation6], 4294957056  ;;  %6326 = vset.pattern.permute.xlu1 %v11308_v0  ;;  %6325 = vset.pattern.permute.xlu0 %v11308_v0  ;;  %v722_v3 = vld [vmem:[%s11199_s1 + $0x10] sm:$0xff]  ;;  %v821_v5 = vadd.s32 4294967295, %v690_v2  ;;  %v720_v7 = vld [vmem:[%s11199_s1] sm:$0xff]  ;;  %v819_v8 = vadd.s32 4294967295, %v688_v4 }
  0x43   : > { %6234 = vmatprep.subr.bf16.mxu1 %v6327_v1  ;;  %v949_v6 = vadd.s32 4294967295, %v722_v3  ;;  %6090 = vmatprep.subr.bf16.mxu0 %v6327_v1  ;;  %v947_v9 = vadd.s32 4294967295, %v720_v7  ;;  %v6328_v10 = vld [vmem:[#allocation2 + $0x30] sm:$0xff]   ;;  %v691_v11 = vld [vmem:[%s11198_s0 + $0x18] sm:$0xff]  ;;  %v689_v13 = vld [vmem:[%s11198_s0 + $0x8] sm:$0xff]  ;;  %v11695_v26 = vmov 0 }
  0x44   : > { %6242 = vmatpush3.bf16.msra.mxu1 %v6327_v1  ;;  %6091 = vmatpush3.bf16.msra.mxu0 %v6327_v1  ;;  %vm853_vm0 = vcmp.ge.s32.totalorder %v821_v5, 0  ;;  %vm885_vm1 = vcmp.lt.s32.totalorder %v821_v5, 16  ;;  %v723_v12 = vld [vmem:[%s11199_s1 + $0x18] sm:$0xff]  ;;  %vm851_vm5 = vcmp.ge.s32.totalorder %v819_v8, 0  ;;  %vm883_vm6 = vcmp.lt.s32.totalorder %v819_v8, 16  ;;  %v721_v15 = vld [vmem:[%s11199_s1 + $0x8] sm:$0xff] }
  0x45   : > { %vm981_vm2 = vcmp.ge.s32.totalorder %v949_v6, 0  ;;  %vm1013_vm3 = vcmp.lt.s32.totalorder %v949_v6, 16  ;;  %vm6840_vm4 = vmand %vm853_vm0, %vm885_vm1  ;;  %6235 = vmatprep.subr.bf16.mxu1 %v6328_v10  ;;  %v6329_v16 = vld [vmem:[#allocation2 + $0x28] sm:$0xff]   ;;  %6092 = vmatprep.subr.bf16.mxu0 %v6328_v10  ;;  %vm979_vm8 = vcmp.ge.s32.totalorder %v947_v9, 0  ;;  %vm1011_vm9 = vcmp.lt.s32.totalorder %v947_v9, 16  ;;  %v692_v27 = vld [vmem:[%s11198_s0 + $0x20] sm:$0xff] }
  0x46   : > { %v11689_v14 = vsel %vm6840_vm4, 4294967295, %v11688_v14  ;;  %vm6847_vm7 = vmand %vm981_vm2, %vm1013_vm3  ;;  %v822_v18 = vadd.s32 4294967295, %v691_v11  ;;  %v950_v19 = vadd.s32 4294967295, %v723_v12  ;;  %v820_v20 = vadd.s32 4294967295, %v689_v13  ;;  %v693_v21 = vld [vmem:[%s11198_s0 + $0x28] sm:$0xff]  ;;  %v6330_v28 = vld [vmem:[#allocation2 + $0x20] sm:$0xff]  }
  0x47   : > { %v11691_v17 = vsel %vm6847_vm7, 4294967295, %v11690_v17  ;;  %vm1077_vm10 = vmand %vm6840_vm4, %vm6847_vm7  ;;  %v948_v24 = vadd.s32 4294967295, %v721_v15  ;;  %v725_v25 = vld [vmem:[%s11199_s1 + $0x28] sm:$0xff]  ;;  %v824_v29 = vadd.s32 4294967295, %v693_v21  ;;  %v724_v30 = vld [vmem:[%s11199_s1 + $0x20] sm:$0xff]  ;;  %v11700_v34 = vmov 0 }
  0x48   : > { %11692 = vst [vmem:[#allocation12_spill] sm:$0xff] %v11691_v17  ;;  %6243 = vmatpush3.bf16.msra.mxu1 %v6328_v10  ;;  %6093 = vmatpush3.bf16.msra.mxu0 %v6328_v10  ;;  %v1109_v22 = vsel %vm1077_vm10, 1, %v11308_v0  ;;  %vm6861_vm11 = vmand %vm851_vm5, %vm883_vm6  ;;  %vm854_vm12 = vcmp.ge.s32.totalorder %v822_v18, 0  ;;  %vm886_vm13 = vcmp.lt.s32.totalorder %v822_v18, 16  ;;  %vm982_vm15 = vcmp.ge.s32.totalorder %v950_v19, 0  ;;  %p370_p10 = scmp.lt.s32.totalorder %s6741_s13, 1 }
  0x49   : > { %6236 = vmatprep.subr.bf16.mxu1 %v6329_v16  ;;  %6094 = vmatprep.subr.bf16.mxu0 %v6329_v16  ;;  %vm6870_vm14 = vmand %vm979_vm8, %vm1011_vm9  ;;  %vm1014_vm0 = vcmp.lt.s32.totalorder %v950_v19, 16  ;;  %vm852_vm3 = vcmp.ge.s32.totalorder %v820_v20, 0  ;;  %vm884_vm5 = vcmp.lt.s32.totalorder %v820_v20, 16  ;;  %v952_v33 = vadd.s32 4294967295, %v725_v25  ;;  %v695_v37 = vld [vmem:[%s11198_s0 + $0x38] sm:$0xff]  ;;  %v694_v44 = vld [vmem:[%s11198_s0 + $0x30] sm:$0xff] }
  0x4a   : > { %1146 = vperm.xlu1 %6326, %v1109_v22   ;;  %v11696_v26 = vsel %vm6870_vm14, 4294967295, %v11695_v26  ;;  %vm1075_vm1 = vmand %vm6861_vm11, %vm6870_vm14  ;;  %vm980_vm8 = vcmp.ge.s32.totalorder %v948_v24, 0  ;;  %vm1012_vm9 = vcmp.lt.s32.totalorder %v948_v24, 16  ;;  %v823_v35 = vadd.s32 4294967295, %v692_v27  ;;  %v6331_v38 = vld [vmem:[#allocation2 + $0x18] sm:$0xff]   ;;  %s6930_s25 = scalar_select %p370_p10, %s6741_s13, 1 }
  0x4b   : > { %11697 = vst [vmem:[#allocation13_spill] sm:$0xff] %v11696_v26  ;;  %v1107_v31 = vsel %vm1075_vm1, 1, %v11308_v0  ;;  %vm6887_vm2 = vmand %vm854_vm12, %vm886_vm13  ;;  %v951_v36 = vadd.s32 4294967295, %v724_v30  ;;  %vm856_vm13 = vcmp.ge.s32.totalorder %v824_v29, 0  ;;  %v727_v41 = vld [vmem:[%s11199_s1 + $0x38] sm:$0xff]  ;;  %v11705_v42 = vmov 0 }
  0x4c   : > { %6244 = vmatpush3.bf16.msra.mxu1 %v6329_v16  ;;  %6095 = vmatpush3.bf16.msra.mxu0 %v6329_v16  ;;  %vm6892_vm6 = vmand %vm982_vm15, %vm1014_vm0  ;;  %vm888_vm15 = vcmp.lt.s32.totalorder %v824_v29, 16  ;;  %vm984_vm1 = vcmp.ge.s32.totalorder %v952_v33, 0  ;;  %v826_v43 = vadd.s32 4294967295, %v695_v37  ;;  %v11708_v46 = vmov 0  ;;  %v726_v48 = vld [vmem:[%s11199_s1 + $0x30] sm:$0xff]  ;;  %v697_v52 = vld [vmem:[%s11198_s0 + $0x48] sm:$0xff] }
  0x4d   : > { %1140 = vperm.xlu0 %6325, %v1107_v31   ;;  %v11701_v34 = vsel %vm6892_vm6, 4294967295, %v11700_v34  ;;  %6237 = vmatprep.subr.bf16.mxu1 %v6330_v28  ;;  %vm1078_vm10 = vmand %vm6887_vm2, %vm6892_vm6  ;;  %v954_v47 = vadd.s32 4294967295, %v727_v41  ;;  %v6332_v49 = vld [vmem:[#allocation2 + $0x10] sm:$0xff]   ;;  %v11710_v50 = vmov 0  ;;  %v825_v51 = vadd.s32 4294967295, %v694_v44  ;;  %v729_v56 = vld [vmem:[%s11199_s1 + $0x48] sm:$0xff] }
  0x4e   : > { %11702 = vst [vmem:[#allocation14_spill] sm:$0xff] %v11701_v34  ;;  %6096 = vmatprep.subr.bf16.mxu0 %v6330_v28  ;;  %v1110_v39 = vsel %vm1078_vm10, 1, %v11308_v0  ;;  %vm6907_vm12 = vmand %vm852_vm3, %vm884_vm5  ;;  %vm1016_vm10 = vcmp.lt.s32.totalorder %v952_v33, 16  ;;  %v11713_v54 = vmov 0  ;;  %v953_v55 = vadd.s32 4294967295, %v726_v48  ;;  %v696_v58 = vld [vmem:[%s11198_s0 + $0x40] sm:$0xff] }
  0x4f   : > { %1149 = vperm.xlu1 %6326, %v1110_v39   ;;  %vm6916_vm0 = vmand %vm980_vm8, %vm1012_vm9  ;;  %vm855_vm8 = vcmp.ge.s32.totalorder %v823_v35, 0  ;;  %vm887_vm9 = vcmp.lt.s32.totalorder %v823_v35, 16  ;;  %v11716_v57 = vmov 0  ;;  %v6333_v59 = vld [vmem:[#allocation2 + $0x8] sm:$0xff]   ;;  %s5568_s28 = sshll.u32 %s6930_s25, 8  ;;  %v828_v60 = vadd.s32 4294967295, %v697_v52 }
  0x50   : > { %v11706_v42 = vsel %vm6916_vm0, 4294967295, %v11705_v42  ;;  %6245 = vmatpush3.bf16.msra.mxu1 %v6330_v28  ;;  %vm1076_vm3 = vmand %vm6907_vm12, %vm6916_vm0  ;;  %6097 = vmatpush3.bf16.msra.mxu0 %v6330_v28  ;;  %v728_v61 = vld [vmem:[%s11199_s1 + $0x40] sm:$0xff]  ;;  %v11719_v63 = vmov 0  ;;  %v956_v1 = vadd.s32 4294967295, %v729_v56  ;;  %v11722_v2 = vmov 0  ;;  %v699_v3 = vld [vmem:[%s11198_s0 + $0x58] sm:$0xff]  ;;  %s6998_s17 = scalar_lea.vmem %s11200_s2, %s5568_s28 }
  0x51   : > { %11707 = vst [vmem:[#allocation15_spill] sm:$0xff] %v11706_v42  ;;  %6238 = vmatprep.subr.bf16.mxu1 %v6331_v38  ;;  %v1108_v45 = vsel %vm1076_vm3, 1, %v11308_v0  ;;  %vm6934_vm5 = vmand %vm856_vm13, %vm888_vm15  ;;  %6098 = vmatprep.subr.bf16.mxu0 %v6331_v38  ;;  %vm1015_vm15 = vcmp.lt.s32.totalorder %v951_v36, 16  ;;  %vm890_vm13 = vcmp.lt.s32.totalorder %v826_v43, 16  ;;  %vm985_vm0 = vcmp.ge.s32.totalorder %v953_v55, 0  ;;  %v731_v6 = vld [vmem:[%s11199_s1 + $0x58] sm:$0xff] }
  0x52   : > { %v11709_v46 = vsel %vm6934_vm5, 4294967295, %v11708_v46  ;;  %1143 = vperm.xlu0 %6325, %v1108_v45   ;;  %vm6943_vm7 = vmand %vm984_vm1, %vm1016_vm10  ;;  %vm858_vm10 = vcmp.ge.s32.totalorder %v826_v43, 0  ;;  %v827_v4 = vadd.s32 4294967295, %v696_v58  ;;  %v955_v5 = vadd.s32 4294967295, %v728_v61  ;;  %v6334_v7 = vld [vmem:[#allocation2] sm:$0xff]   ;;  %v698_v10 = vld [vmem:[%s11198_s0 + $0x50] sm:$0xff] }
  0x53   : > { %v11711_v50 = vsel %vm6943_vm7, 4294967295, %v11710_v50  ;;  %vm1080_vm3 = vmand %vm6934_vm5, %vm6943_vm7  ;;  %vm11715_vm7 = vcmp.ge.s32.totalorder %v951_v36, 0  ;;  %v11725_v9 = vmov 0  ;;  %v11727_v11 = vmov 0  ;;  %v392_v12 = vld [vmem:[%s6998_s17 + $0x80] sm:$0xff]  ;;  %v393_v15 = vld [vmem:[%s6998_s17 + $0x88] sm:$0xff] }
  0x54   : > { %11712 = vst [vmem:[#allocation16_spill] sm:$0xff] %v11711_v50  ;;  %6246 = vmatpush3.bf16.msra.mxu1 %v6331_v38  ;;  %v1112_v53 = vsel %vm1080_vm3, 1, %v11308_v0  ;;  %vm6956_vm1 = vmand %vm855_vm8, %vm887_vm9  ;;  %6099 = vmatpush3.bf16.msra.mxu0 %v6331_v38  ;;  %vm1018_vm8 = vcmp.lt.s32.totalorder %v954_v47, 16  ;;  %vm889_vm3 = vcmp.lt.s32.totalorder %v825_v51, 16  ;;  %v830_v13 = vadd.s32 4294967295, %v699_v3  ;;  %v730_v20 = vld [vmem:[%s11199_s1 + $0x50] sm:$0xff] }
  0x55   : > { %v11714_v54 = vsel %vm6956_vm1, 4294967295, %v11713_v54  ;;  %6239 = vmatprep.subr.bf16.mxu1 %v6332_v49  ;;  %1155 = vperm.xlu1 %6326, %v1112_v53   ;;  %vm6964_vm6 = vmand %vm11715_vm7, %vm1015_vm15  ;;  %vm857_vm15 = vcmp.ge.s32.totalorder %v825_v51, 0  ;;  %v11730_v18 = vmov 0  ;;  %v958_v19 = vadd.s32 4294967295, %v731_v6  ;;  %v701_v24 = vld [vmem:[%s11198_s0 + $0x68] sm:$0xff]  ;;  %v394_v27 = vld [vmem:[%s6998_s17 + $0x90] sm:$0xff] }
  0x56   : > { %v11717_v57 = vsel %vm6964_vm6, 4294967295, %v11716_v57  ;;  %6100 = vmatprep.subr.bf16.mxu0 %v6332_v49  ;;  %vm1079_vm9 = vmand %vm6956_vm1, %vm6964_vm6  ;;  %vm11721_vm6 = vcmp.ge.s32.totalorder %v954_v47, 0  ;;  %vm1017_vm1 = vcmp.lt.s32.totalorder %v953_v55, 16  ;;  %v11732_v21 = vmov 0  ;;  %v395_v28 = vld [vmem:[%s6998_s17 + $0x98] sm:$0xff]  ;;  %v733_v33 = vld [vmem:[%s11199_s1 + $0x68] sm:$0xff] }
  0x57   : > { %11718 = vst [vmem:[#allocation17_spill] sm:$0xff] %v11717_v57  ;;  %v1111_v62 = vsel %vm1079_vm9, 1, %v11308_v0  ;;  %vm6982_vm7 = vmand %vm858_vm10, %vm890_vm13  ;;  %vm860_vm10 = vcmp.ge.s32.totalorder %v828_v60, 0  ;;  %v829_v22 = vadd.s32 4294967295, %v698_v10  ;;  %v416_v25 = vpack.c.bf16 %v393_v15, %v392_v12  ;;  %v396_v36 = vld [vmem:[%s6998_s17 + $0xa0] sm:$0xff]  ;;  %v397_v41 = vld [vmem:[%s6998_s17 + $0xa8] sm:$0xff] }
  0x58   : > { %v11720_v63 = vsel %vm6982_vm7, 4294967295, %v11719_v63  ;;  %6247 = vmatpush3.bf16.msra.mxu1 %v6332_v49  ;;  %1152 = vperm.xlu0 %6325, %v1111_v62   ;;  %vm6988_vm14 = vmand %vm11721_vm6, %vm1018_vm8  ;;  %vm892_vm8 = vcmp.lt.s32.totalorder %v828_v60, 16  ;;  %v11735_v30 = vmov 0  ;;  %v957_v31 = vadd.s32 4294967295, %v730_v20  ;;  %v700_v38 = vld [vmem:[%s11198_s0 + $0x60] sm:$0xff]  ;;  %v703_v51 = vld [vmem:[%s11198_s0 + $0x78] sm:$0xff] }
  0x59   : > { %v11723_v2 = vsel %vm6988_vm14, 4294967295, %v11722_v2  ;;  %6240 = vmatprep.subr.bf16.mxu1 %v6333_v59  ;;  %vm1082_vm6 = vmand %vm6982_vm7, %vm6988_vm14  ;;  %6101 = vmatpush3.bf16.msra.mxu0 %v6332_v49  ;;  %vm1020_vm14 = vcmp.lt.s32.totalorder %v956_v1, 16  ;;  %v11738_v35 = vmov 0  ;;  %v832_v37 = vadd.s32 4294967295, %v701_v24  ;;  %v732_v47 = vld [vmem:[%s11199_s1 + $0x60] sm:$0xff]  ;;  %v398_v53 = vld [vmem:[%s6998_s17 + $0xb0] sm:$0xff] }
  0x5a   : > { %11724 = vst [vmem:[#allocation18_spill] sm:$0xff] %v11723_v2  ;;  %v1114_v8 = vsel %vm1082_vm6, 1, %v11308_v0  ;;  %vm7010_vm13 = vmand %vm857_vm15, %vm889_vm3  ;;  %6102 = vmatprep.subr.bf16.mxu0 %v6333_v59  ;;  %vm988_vm6 = vcmp.ge.s32.totalorder %v956_v1, 0  ;;  %6122 = vmatprep.mubr.bf16.mxu1 %v416_v25  ;;  %v417_v39 = vpack.c.bf16 %v395_v28, %v394_v27  ;;  %v11742_v44 = vmov 0  ;;  %v399_v55 = vld [vmem:[%s6998_s17 + $0xb8] sm:$0xff]  ;;  %v702_v62 = vld [vmem:[%s11198_s0 + $0x70] sm:$0xff] }
  0x5b   : > { %v11726_v9 = vsel %vm7010_vm13, 4294967295, %v11725_v9  ;;  %1161 = vperm.xlu1 %6326, %v1114_v8   ;;  %vm7019_vm9 = vmand %vm985_vm0, %vm1017_vm1  ;;  %vm859_vm0 = vcmp.ge.s32.totalorder %v827_v4, 0  ;;  %vm891_vm1 = vcmp.lt.s32.totalorder %v827_v4, 16  ;;  %v960_v45 = vadd.s32 4294967295, %v733_v33  ;;  %v735_v60 = vld [vmem:[%s11199_s1 + $0x78] sm:$0xff]  ;;  %v400_v4 = vld [vmem:[%s6998_s17 + $0xc0] sm:$0xff] }
  0x5c   : > { %v11728_v11 = vsel %vm7019_vm9, 4294967295, %v11727_v11  ;;  %6248 = vmatpush3.bf16.msra.mxu1 %v6333_v59  ;;  %vm1081_vm3 = vmand %vm7010_vm13, %vm7019_vm9  ;;  %v418_v48 = vpack.c.bf16 %v397_v41, %v396_v36  ;;  %v11745_v49 = vmov 0  ;;  %v831_v52 = vadd.s32 4294967295, %v700_v38  ;;  %v734_v10 = vld [vmem:[%s11199_s1 + $0x70] sm:$0xff]  ;;  %v705_v15 = vld [vmem:[%s11198_s0 + $0x88] sm:$0xff]  ;;  %s367_s24 = sand.u32 1, %s6651_s10  }
  0x5d   : > { %11729 = vst [vmem:[#allocation19_spill] sm:$0xff] %v11728_v11  ;;  %6241 = vmatprep.subr.bf16.mxu1 %v6334_v7  ;;  %v1113_v16 = vsel %vm1081_vm3, 1, %v11308_v0  ;;  %vm7031_vm15 = vmand %vm860_vm10, %vm892_vm8  ;;  %6103 = vmatpush3.bf16.msra.mxu0 %v6333_v59  ;;  %vm1019_vm8 = vcmp.lt.s32.totalorder %v955_v5, 16  ;;  %vm894_vm10 = vcmp.lt.s32.totalorder %v830_v13, 16  ;;  %v11749_v58 = vmov 0  ;;  %v737_v24 = vld [vmem:[%s11199_s1 + $0x88] sm:$0xff] }
  0x5e   : > { %v11731_v18 = vsel %vm7031_vm15, 4294967295, %v11730_v18  ;;  %1158 = vperm.xlu0 %6325, %v1113_v16   ;;  %vm7040_vm9 = vmand %vm988_vm6, %vm1020_vm14  ;;  %6104 = vmatprep.subr.bf16.mxu0 %v6334_v7  ;;  %vm11744_vm6 = vcmp.ge.s32.totalorder %v958_v19, 0  ;;  %v959_v59 = vadd.s32 4294967295, %v732_v47  ;;  %v11752_v61 = vmov 0  ;;  %v704_v25 = vld [vmem:[%s11198_s0 + $0x80] sm:$0xff]  ;;  %v402_v28 = vld [vmem:[%s6998_s17 + $0xd0] sm:$0xff] }
  0x5f   : > { %v11733_v21 = vsel %vm7040_vm9, 4294967295, %v11732_v21  ;;  %vm1084_vm3 = vmand %vm7031_vm15, %vm7040_vm9  ;;  %vm11737_vm9 = vcmp.ge.s32.totalorder %v955_v5, 0  ;;  %vm1024_vm13 = vcmp.lt.s32.totalorder %v960_v45, 16  ;;  %v834_v1 = vadd.s32 4294967295, %v703_v51  ;;  %v401_v5 = vld [vmem:[%s6998_s17 + $0xc8] sm:$0xff]  ;;  %v404_v33 = vld [vmem:[%s6998_s17 + $0xe0] sm:$0xff] }
  0x60   : > { %11734 = vst [vmem:[#allocation20_spill] sm:$0xff] %v11733_v21  ;;  %6249 = vmatpush3.bf16.msra.mxu1 %v6334_v7  ;;  %v1116_v29 = vsel %vm1084_vm3, 1, %v11308_v0  ;;  %vm7056_vm14 = vmand %vm859_vm0, %vm891_vm1  ;;  %vm1022_vm1 = vcmp.lt.s32.totalorder %v958_v19, 16  ;;  %vm893_vm0 = vcmp.lt.s32.totalorder %v829_v22, 16  ;;  %v419_v3 = vpack.c.bf16 %v399_v55, %v398_v53  ;;  %v405_v36 = vld [vmem:[%s6998_s17 + $0xe8] sm:$0xff]  ;;  %v736_v41 = vld [vmem:[%s11199_s1 + $0x80] sm:$0xff] }
  0x61   : > { %v11736_v30 = vsel %vm7056_vm14, 4294967295, %v11735_v30  ;;  %1167 = vperm.xlu1 %6326, %v1116_v29   ;;  %vm7065_vm15 = vmand %vm11737_vm9, %vm1019_vm8  ;;  %6105 = vmatpush3.bf16.msra.mxu0 %v6334_v7  ;;  %vm11741_vm9 = vcmp.ge.s32.totalorder %v830_v13, 0  ;;  %v11755_v7 = vmov 0  ;;  %v962_v8 = vadd.s32 4294967295, %v735_v60  ;;  %v403_v29 = vld [vmem:[%s6998_s17 + $0xd8] sm:$0xff]  ;;  %v377_v60 = vld [vmem:[%s6998_s17 + $0x8] sm:$0xff] }
  0x62   : > { %v11739_v35 = vsel %vm7065_vm15, 4294967295, %v11738_v35  ;;  %vm1083_vm3 = vmand %vm7056_vm14, %vm7065_vm15  ;;  %vm1021_vm14 = vcmp.lt.s32.totalorder %v957_v31, 16  ;;  %v11757_v12 = vmov 0  ;;  %v833_v13 = vadd.s32 4294967295, %v702_v62  ;;  %v739_v51 = vld [vmem:[%s11199_s1 + $0x98] sm:$0xff]  ;;  %v6424_v32 = vld [vmem:[%s11199_s1 + $0x40] sm:$0xff] }
  0x63   : > { %11740 = vst [vmem:[#allocation21_spill] sm:$0xff] %v11739_v35  ;;  %v1115_v43 = vsel %vm1083_vm3, 1, %v11308_v0  ;;  %vm7081_vm8 = vmand %vm11741_vm9, %vm894_vm10  ;;  %6123 = vmatmul.mubr.bf16.vlgmr.msra.gmra.mxu1 %v417_v39  ;;  %vm864_vm9 = vcmp.ge.s32.totalorder %v832_v37, 0  ;;  %vm896_vm3 = vcmp.lt.s32.totalorder %v832_v37, 16  ;;  %v420_v16 = vpack.c.bf16 %v401_v5, %v400_v4  ;;  %v738_v4 = vld [vmem:[%s11199_s1 + $0x90] sm:$0xff]  ;;  %v709_v5 = vld [vmem:[%s11198_s0 + $0xa8] sm:$0xff] }
  0x64   : > { %v11743_v44 = vsel %vm7081_vm8, 4294967295, %v11742_v44  ;;  %1164 = vperm.xlu0 %6325, %v1115_v43   ;;  %vm7090_vm15 = vmand %vm11744_vm6, %vm1022_vm1  ;;  %6126 = vmatprep.mubr.bf16.mxu1 %v418_v48  ;;  %vm11748_vm6 = vcmp.ge.s32.totalorder %v829_v22, 0  ;;  %v11760_v20 = vmov 0  ;;  %v961_v22 = vadd.s32 4294967295, %v734_v10  ;;  %v707_v48 = vld [vmem:[%s11198_s0 + $0x98] sm:$0xff]  ;;  %s5085_s14 = sshll.u32 %s367_s24, 8 }
  0x65   : > { %v11746_v49 = vsel %vm7090_vm15, 4294967295, %v11745_v49  ;;  %vm1086_vm10 = vmand %vm7081_vm8, %vm7090_vm15  ;;  %vm11751_vm15 = vcmp.ge.s32.totalorder %v957_v31, 0  ;;  %v11762_v27 = vmov 0  ;;  %v836_v31 = vadd.s32 4294967295, %v705_v15  ;;  %v407_v15 = vld [vmem:[%s6998_s17 + $0xf8] sm:$0xff]  ;;  %s11054_s16 = scalar_lea.vmem [#allocation8], %s5085_s14 }
  0x66   : > { %11747 = vst [vmem:[#allocation22_spill] sm:$0xff] %v11746_v49  ;;  %v1118_v56 = vsel %vm1086_vm10, 1, %v11308_v0  ;;  %vm7106_vm1 = vmand %vm11748_vm6, %vm893_vm0  ;;  %vm992_vm10 = vcmp.ge.s32.totalorder %v960_v45, 0  ;;  %vm895_vm6 = vcmp.lt.s32.totalorder %v831_v52, 16  ;;  %v11766_v38 = vmov 0  ;;  %s5569_s25 = sshll.u32 %s6741_s13, 12 }
  0x67   : > { %v11750_v58 = vsel %vm7106_vm1, 4294967295, %v11749_v58  ;;  %1173 = vperm.xlu1 %6326, %v1118_v56   ;;  %vm7115_vm8 = vmand %vm11751_vm15, %vm1021_vm14  ;;  %vm863_vm14 = vcmp.ge.s32.totalorder %v831_v52, 0  ;;  %v964_v39 = vadd.s32 4294967295, %v737_v24  ;;  %v11770_v43 = vmov 0  ;;  %v379_v24 = vld [vmem:[%s6998_s17 + $0x18] sm:$0xff]  ;;  %s4982_s27 = sshll.u32 %s11054_s16, 4  ;;  %s11150_s22 = scalar_lea.hbm %s11207_s9, %s5569_s25  ;;  %s11152_s27 = int_to_ptr.vmem [resolvable:$true] %s4982_s27 }
  0x68   : > { %v11753_v61 = vsel %vm7115_vm8, 4294967295, %v11752_v61  ;;  %vm1085_vm0 = vmand %vm7106_vm1, %vm7115_vm8  ;;  %vm991_vm1 = vcmp.ge.s32.totalorder %v959_v59, 0  ;;  %v835_v45 = vadd.s32 4294967295, %v704_v25  ;;  %v421_v47 = vpack.c.bf16 %v403_v29, %v402_v28  ;;  %s11158_s13 = scalar_lea.sflag [#allocation4], %s367_s24  ;;  %s6591_s21 = scalar_lea.vmem %s11152_s27, 4096 }
  0x69   : > { %11754 = vst [vmem:[#allocation23_spill] sm:$0xff] %v11753_v61  ;;  %v1117_v6 = vsel %vm1085_vm0, 1, %v11308_v0  ;;  %vm7130_vm15 = vmand %vm864_vm9, %vm896_vm3  ;;  %vm1023_vm0 = vcmp.lt.s32.totalorder %v959_v59, 16  ;;  %v422_v52 = vpack.c.bf16 %v405_v36, %v404_v33  ;;  %v11773_v55 = vmov 0  ;;  %v376_v59 = vld [vmem:[%s6998_s17] sm:$0xff]  ;;  %v741_v33 = vld [vmem:[%s11199_s1 + $0xa8] sm:$0xff]  ;;  %p6592_p12 = scmp.ne.s32.totalorder %s11152_s27, %s6591_s21 }
  0x6a   : > { %v11756_v7 = vsel %vm7130_vm15, 4294967295, %v11755_v7  ;;  %1170 = vperm.xlu0 %6325, %v1117_v6   ;;  %vm7138_vm8 = vmand %vm992_vm10, %vm1024_vm13  ;;  %vm898_vm10 = vcmp.lt.s32.totalorder %v834_v1, 16  ;;  %v963_v56 = vadd.s32 4294967295, %v736_v41  ;;  %v11776_v62 = vmov 0  ;;  %v708_v41 = vld [vmem:[%s11198_s0 + $0xa0] sm:$0xff]  ;;  %p12862_p3 = scmp.ne.s32.totalorder %s11680_s19, 0 }
  0x6b   : > { %v11758_v12 = vsel %vm7138_vm8, 4294967295, %v11757_v12  ;;  %vm1088_vm3 = vmand %vm7130_vm15, %vm7138_vm8  ;;  %6127 = vmatmul.mubr.bf16.gmra.mxu1 %v419_v3  ;;  %vm11769_vm8 = vcmp.ge.s32.totalorder %v962_v8, 0  ;;  %vm1028_vm15 = vcmp.lt.s32.totalorder %v964_v39, 16  ;;  %v838_v3 = vadd.s32 4294967295, %v707_v48  ;;  %v380_v48 = vld [vmem:[%s6998_s17 + $0x20] sm:$0xff] }
  0x6c   : > { %11759 = vst [vmem:[#allocation24_spill] sm:$0xff] %v11758_v12  ;;  %v1120_v19 = vsel %vm1088_vm3, 1, %v11308_v0  ;;  %vm7150_vm13 = vmand %vm863_vm14, %vm895_vm6  ;;  %6130 = vmatprep.mubr.bf16.mxu1 %v420_v16  ;;  %vm865_vm6 = vcmp.ge.s32.totalorder %v833_v13, 0  ;;  %vm897_vm3 = vcmp.lt.s32.totalorder %v833_v13, 16  ;;  %v966_v10 = vadd.s32 4294967295, %v739_v51  ;;  %v406_v13 = vld [vmem:[%s6998_s17 + $0xf0] sm:$0xff]  ;;  %p6593_p2 = pnand %p6592_p12, %p12862_p3 }
  0x6d   : > { %v11761_v20 = vsel %vm7150_vm13, 4294967295, %v11760_v20  ;;  %1179 = vperm.xlu1 %6326, %v1120_v19   ;;  %vm7161_vm14 = vmand %vm991_vm1, %vm1023_vm0  ;;  %vm11765_vm1 = vcmp.ge.s32.totalorder %v834_v1, 0  ;;  %v706_v1 = vld [vmem:[%s11198_s0 + $0x90] sm:$0xff]  ;;  %v408_v16 = vpack.c.bf16 %v377_v60, %v376_v59  ;;  %v11781_v19 = vmov 0  ;;  %v381_v51 = vld [vmem:[%s6998_s17 + $0x28] sm:$0xff] }
  0x6e   : > { %v11763_v27 = vsel %vm7161_vm14, 4294967295, %v11762_v27  ;;  %vm1087_vm9 = vmand %vm7150_vm13, %vm7161_vm14  ;;  %vm11768_vm14 = vcmp.lt.s32.totalorder %v962_v8, 16  ;;  %v11779_v8 = vmov 0  ;;  %v837_v25 = vadd.s32 4294967295, %v706_v1  ;;  %v711_v59 = vld [vmem:[%s11198_s0 + $0xb8] sm:$0xff]  ;;  %v382_v60 = vld [vmem:[%s6998_s17 + $0x30] sm:$0xff]  ;;  %p6594_p4 = pneg %p6593_p2 }
  0x6f   : > { %11764 = vst [vmem:[#allocation25_spill] sm:$0xff] %v11763_v27  ;;  %v1119_v37 = vsel %vm1087_vm9, 1, %v11308_v0  ;;  %vm7176_vm0 = vmand %vm11765_vm1, %vm898_vm10  ;;  %vm1025_vm10 = vcmp.lt.s32.totalorder %v961_v22, 16  ;;  %vm900_vm9 = vcmp.lt.s32.totalorder %v836_v31, 16  ;;  %v965_v28 = vadd.s32 4294967295, %v738_v4  ;;  %6106 = vmatprep.mubr.bf16.mxu0 %v408_v16  ;;  %v383_v4 = vld [vmem:[%s6998_s17 + $0x38] sm:$0xff] }
  0x70   : > { %v11767_v38 = vsel %vm7176_vm0, 4294967295, %v11766_v38  ;;  %1176 = vperm.xlu0 %6325, %v1119_v37   ;;  %vm7185_vm13 = vmand %vm11769_vm8, %vm11768_vm14  ;;  %vm868_vm14 = vcmp.ge.s32.totalorder %v836_v31, 0  ;;  %v11785_v31 = vmov 0  ;;  %v423_v36 = vpack.c.bf16 %v407_v15, %v406_v13  ;;  %v385_v13 = vld [vmem:[%s6998_s17 + $0x48] sm:$0xff] }
  0x71   : > { %v11771_v43 = vsel %vm7185_vm13, 4294967295, %v11770_v43  ;;  %vm1090_vm1 = vmand %vm7176_vm0, %vm7185_vm13  ;;  %vm11775_vm13 = vcmp.ge.s32.totalorder %v961_v22, 0  ;;  %v378_v22 = vld [vmem:[%s6998_s17 + $0x10] sm:$0xff]  ;;  %v11788_v37 = vmov 0  ;;  %v11793_v1 = vmov 0 }
  0x72   : > { %11772 = vst [vmem:[#allocation26_spill] sm:$0xff] %v11771_v43  ;;  %v1122_v53 = vsel %vm1090_vm1, 1, %v11308_v0  ;;  %vm7201_vm8 = vmand %vm865_vm6, %vm897_vm3  ;;  %vm996_vm1 = vcmp.ge.s32.totalorder %v964_v39, 0  ;;  %v840_v39 = vadd.s32 4294967295, %v709_v5  ;;  %v384_v5 = vld [vmem:[%s6998_s17 + $0x40] sm:$0xff]  ;;  %v11798_v16 = vmov 0 }
  0x73   : > { %v11774_v55 = vsel %vm7201_vm8, 4294967295, %v11773_v55  ;;  %1185 = vperm.xlu1 %6326, %v1122_v53   ;;  %vm7209_vm0 = vmand %vm11775_vm13, %vm1025_vm10  ;;  %6131 = vmatmul.mubr.bf16.gmra.mxu1 %v421_v47  ;;  %vm899_vm10 = vcmp.lt.s32.totalorder %v835_v45, 16  ;;  %v409_v47 = vpack.c.bf16 %v379_v24, %v378_v22  ;;  %v11791_v53 = vmov 0 }
  0x74   : > { %v11777_v62 = vsel %vm7209_vm0, 4294967295, %v11776_v62  ;;  %vm1089_vm6 = vmand %vm7201_vm8, %vm7209_vm0  ;;  %6134 = vmatprep.mubr.bf16.mxu1 %v422_v52  ;;  %vm1027_vm0 = vcmp.lt.s32.totalorder %v963_v56, 16  ;;  %vm1030_vm8 = vcmp.lt.s32.totalorder %v966_v10, 16  ;;  %v11801_v24 = vmov 0 }
  0x75   : > { %11778 = vst [vmem:[#allocation27_spill] sm:$0xff] %v11777_v62  ;;  %v1121_v6 = vsel %vm1089_vm6, 1, %v11308_v0  ;;  %vm7229_vm13 = vmand %vm868_vm14, %vm900_vm9  ;;  %vm902_vm6 = vcmp.lt.s32.totalorder %v838_v3, 16  ;;  %6107 = vmatmul.mubr.bf16.vlgmr.msra.gmra.mxu0 %v409_v47 }
  0x76   : > { %v11780_v8 = vsel %vm7229_vm13, 4294967295, %v11779_v8  ;;  %1182 = vperm.xlu0 %6325, %v1121_v6   ;;  %vm7237_vm3 = vmand %vm996_vm1, %vm1028_vm15  ;;  %vm11784_vm15 = vcmp.ge.s32.totalorder %v835_v45, 0  ;;  %vm870_vm1 = vcmp.ge.s32.totalorder %v838_v3, 0  ;;  %v740_v45 = vld [vmem:[%s11199_s1 + $0xa0] sm:$0xff]  ;;  %v743_v3 = vld [vmem:[%s11199_s1 + $0xb8] sm:$0xff]  ;;  %v839_v6 = vadd.s32 4294967295, %v708_v41 }
  0x77   : > { %v11782_v19 = vsel %vm7237_vm3, 4294967295, %v11781_v19  ;;  %vm1092_vm9 = vmand %vm7229_vm13, %vm7237_vm3  ;;  %vm11787_vm3 = vcmp.ge.s32.totalorder %v963_v56, 0  ;;  %v968_v56 = vadd.s32 4294967295, %v741_v33  ;;  %v967_v22 = vadd.s32 4294967295, %v740_v45  ;;  %v710_v33 = vld [vmem:[%s11198_s0 + $0xb0] sm:$0xff] }
  0x78   : > { %11783 = vst [vmem:[#allocation28_spill] sm:$0xff] %v11782_v19  ;;  %v1124_v29 = vsel %vm1092_vm9, 1, %v11308_v0  ;;  %vm7250_vm14 = vmand %vm11784_vm15, %vm899_vm10  ;;  %vm998_vm9 = vcmp.ge.s32.totalorder %v966_v10, 0  ;;  %v410_v10 = vpack.c.bf16 %v381_v51, %v380_v48  ;;  %v11806_v45 = vmov 0  ;;  %v713_v48 = vld [vmem:[%s11198_s0 + $0xc8] sm:$0xff] }
  0x79   : > { %v11786_v31 = vsel %vm7250_vm14, 4294967295, %v11785_v31  ;;  %1191 = vperm.xlu1 %6326, %v1124_v29   ;;  %vm7258_vm13 = vmand %vm11787_vm3, %vm1027_vm0  ;;  %v842_v29 = vadd.s32 4294967295, %v711_v59  ;;  %vm903_vm15 = vcmp.lt.s32.totalorder %v839_v6, 16  ;;  %v970_v47 = vadd.s32 4294967295, %v743_v3  ;;  %v386_v59 = vld [vmem:[%s6998_s17 + $0x50] sm:$0xff] }
  0x7a   : > { %v11789_v37 = vsel %vm7258_vm13, 4294967295, %v11788_v37  ;;  %vm1091_vm0 = vmand %vm7250_vm14, %vm7258_vm13  ;;  %vm11800_vm14 = vcmp.ge.s32.totalorder %v965_v28, 0  ;;  %vm1032_vm13 = vcmp.lt.s32.totalorder %v968_v56, 16  ;;  %6110 = vmatprep.mubr.bf16.mxu0 %v410_v10  ;;  %v11809_v51 = vmov 0  ;;  %v388_v10 = vld [vmem:[%s6998_s17 + $0x60] sm:$0xff] }
  0x7b   : > { %11790 = vst [vmem:[#allocation29_spill] sm:$0xff] %v11789_v37  ;;  %v1123_v52 = vsel %vm1091_vm0, 1, %v11308_v0  ;;  %vm7277_vm3 = vmand %vm870_vm1, %vm902_vm6  ;;  %vm1029_vm1 = vcmp.lt.s32.totalorder %v965_v28, 16  ;;  %6135 = vmatmul.mubr.bf16.gmra.mxu1 %v423_v36  ;;  %v742_v28 = vld [vmem:[%s11199_s1 + $0xb0] sm:$0xff]  ;;  %v412_v36 = vpack.c.bf16 %v385_v13, %v384_v5  ;;  %v11813_v3 = vmov 0  ;;  %v712_v5 = vld [vmem:[%s11198_s0 + $0xc0] sm:$0xff] }
  0x7c   : > { %v11792_v53 = vsel %vm7277_vm3, 4294967295, %v11791_v53  ;;  %1188 = vperm.xlu0 %6325, %v1123_v52   ;;  %vm7287_vm0 = vmand %vm998_vm9, %vm1030_vm8  ;;  %vm11796_vm8 = vcmp.lt.s32.totalorder %v837_v25, 16  ;;  %vm11797_vm9 = vcmp.ge.s32.totalorder %v837_v25, 0  ;;  %v411_v25 = vpack.c.bf16 %v383_v4, %v382_v60  ;;  %v745_v52 = vld [vmem:[%s11199_s1 + $0xc8] sm:$0xff] }
  0x7d   : > { %v11794_v1 = vsel %vm7287_vm0, 4294967295, %v11793_v1  ;;  %vm1094_vm10 = vmand %vm7277_vm3, %vm7287_vm0  ;;  %v969_v4 = vadd.s32 4294967295, %v742_v28  ;;  %v11816_v13 = vmov 0  ;;  %v972_v28 = vadd.s32 4294967295, %v745_v52 }
  0x7e   : > { %11795 = vst [vmem:[#allocation30_spill] sm:$0xff] %v11794_v1  ;;  %v1126_v15 = vsel %vm1094_vm10, 1, %v11308_v0  ;;  %vm7304_vm6 = vmand %vm11797_vm9, %vm11796_vm8  ;;  %6111 = vmatmul.mubr.bf16.gmra.mxu0 %v411_v25  ;;  %vm11815_vm9 = vcmp.ge.s32.totalorder %v967_v22, 0  ;;  %v11821_v25 = vmov 0  ;;  %v843_v52 = vadd.s32 4294967295, %v712_v5  ;;  %v746_v5 = vld [vmem:[%s11199_s1 + $0xd0] sm:$0xff] }
  0x7f   : > { %v11799_v16 = vsel %vm7304_vm6, 4294967295, %v11798_v16  ;;  %1197 = vperm.xlu1 %6326, %v1126_v15   ;;  %vm7310_vm7 = vmand %vm11800_vm14, %vm1029_vm1  ;;  %vm11804_vm14 = vcmp.lt.s32.totalorder %v840_v39, 16  ;;  %vm11805_vm1 = vcmp.ge.s32.totalorder %v840_v39, 0  ;;  %v841_v39 = vadd.s32 4294967295, %v710_v33  ;;  %6114 = vmatprep.mubr.bf16.mxu0 %v412_v36  ;;  %v744_v33 = vld [vmem:[%s11199_s1 + $0xc0] sm:$0xff]  ;;  %v715_v36 = vld [vmem:[%s11198_s0 + $0xd8] sm:$0xff] }
  0x80   : > { %v11802_v24 = vsel %vm7310_vm7, 4294967295, %v11801_v24  ;;  %vm1093_vm10 = vmand %vm7304_vm6, %vm7310_vm7  ;;  %vm11808_vm7 = vcmp.ge.s32.totalorder %v968_v56, 0  ;;  %v387_v56 = vld [vmem:[%s6998_s17 + $0x58] sm:$0xff]  ;;  %v844_v15 = vadd.s32 4294967295, %v713_v48 }
  0x81   : > { %11803 = vst [vmem:[#allocation31_spill] sm:$0xff] %v11802_v24  ;;  %v1125_v41 = vsel %vm1093_vm10, 1, %v11308_v0  ;;  %vm7327_vm8 = vmand %vm11805_vm1, %vm11804_vm14  ;;  %vm1031_vm14 = vcmp.lt.s32.totalorder %v967_v22, 16  ;;  %vm905_vm6 = vcmp.lt.s32.totalorder %v841_v39, 16 }
  0x82   : > { %v11807_v45 = vsel %vm7327_vm8, 4294967295, %v11806_v45  ;;  %1194 = vperm.xlu0 %6325, %v1125_v41   ;;  %vm7336_vm0 = vmand %vm11808_vm7, %vm1032_vm13  ;;  %vm11812_vm7 = vcmp.ge.s32.totalorder %v839_v6, 0  ;;  %v389_v6 = vld [vmem:[%s6998_s17 + $0x68] sm:$0xff]  ;;  %v413_v41 = vpack.c.bf16 %v387_v56, %v386_v59  ;;  %v971_v59 = vadd.s32 4294967295, %v744_v33  ;;  %v714_v56 = vld [vmem:[%s11198_s0 + $0xd0] sm:$0xff] }
  0x83   : > { %v11810_v51 = vsel %vm7336_vm0, 4294967295, %v11809_v51  ;;  %vm1096_vm1 = vmand %vm7327_vm8, %vm7336_vm0  ;;  %v414_v48 = vpack.c.bf16 %v389_v6, %v388_v10  ;;  %v11831_v10 = vmov 0  ;;  %v846_v6 = vadd.s32 4294967295, %v715_v36 }
  0x84   : > { %11811 = vst [vmem:[#allocation32_spill] sm:$0xff] %v11810_v51  ;;  %v1128_v60 = vsel %vm1096_vm1, 1, %v11308_v0  ;;  %vm7352_vm13 = vmand %vm11812_vm7, %vm903_vm15  ;;  %vm1002_vm1 = vcmp.ge.s32.totalorder %v970_v47, 0  ;;  %vm1034_vm15 = vcmp.lt.s32.totalorder %v970_v47, 16  ;;  %v11824_v47 = vmov 0 }
  0x85   : > { %v11814_v3 = vsel %vm7352_vm13, 4294967295, %v11813_v3  ;;  %1203 = vperm.xlu1 %6326, %v1128_v60   ;;  %vm7362_vm0 = vmand %vm11815_vm9, %vm1031_vm14  ;;  %vm11819_vm9 = vcmp.lt.s32.totalorder %v842_v29, 16  ;;  %vm11820_vm14 = vcmp.ge.s32.totalorder %v842_v29, 0  ;;  %v747_v29 = vld [vmem:[%s11199_s1 + $0xd8] sm:$0xff]  ;;  %v11838_v36 = vmov 0 }
  0x86   : > { %v11817_v13 = vsel %vm7362_vm0, 4294967295, %v11816_v13  ;;  %vm1095_vm7 = vmand %vm7352_vm13, %vm7362_vm0  ;;  %vm1001_vm0 = vcmp.ge.s32.totalorder %v969_v4, 0  ;;  %vm908_vm13 = vcmp.lt.s32.totalorder %v844_v15, 16  ;;  %6115 = vmatmul.mubr.bf16.gmra.mxu0 %v413_v41  ;;  %v974_v33 = vadd.s32 4294967295, %v747_v29 }
  0x87   : > { %11818 = vst [vmem:[#allocation33_spill] sm:$0xff] %v11817_v13  ;;  %v1127_v22 = vsel %vm1095_vm7, 1, %v11308_v0  ;;  %vm7377_vm8 = vmand %vm11820_vm14, %vm11819_vm9  ;;  %vm1033_vm7 = vcmp.lt.s32.totalorder %v969_v4, 16  ;;  %v11828_v4 = vmov 0  ;;  %vm876_vm14 = vcmp.ge.s32.totalorder %v844_v15, 0  ;;  %6118 = vmatprep.mubr.bf16.mxu0 %v414_v48  ;;  %v749_v15 = vld [vmem:[%s11199_s1 + $0xe8] sm:$0xff] }
  0x88   : > { %v11822_v25 = vsel %vm7377_vm8, 4294967295, %v11821_v25  ;;  %1200 = vperm.xlu0 %6325, %v1127_v22   ;;  %vm7384_vm10 = vmand %vm1002_vm1, %vm1034_vm15  ;;  %vm11827_vm1 = vcmp.ge.s32.totalorder %v841_v39, 0  ;;  %v390_v39 = vld [vmem:[%s6998_s17 + $0x70] sm:$0xff]  ;;  %v717_v22 = vld [vmem:[%s11198_s0 + $0xe8] sm:$0xff]  ;;  %v11834_v41 = vmov 0  ;;  %vm1035_vm3 = vcmp.lt.s32.totalorder %v971_v59, 16 }
  0x89   : > { %11823 = vst [vmem:[#allocation34_spill] sm:$0xff] %v11822_v25  ;;  %v11825_v47 = vsel %vm7384_vm10, 4294967295, %v11824_v47  ;;  %vm1098_vm9 = vmand %vm7377_vm8, %vm7384_vm10  ;;  %vm1003_vm8 = vcmp.ge.s32.totalorder %v971_v59, 0  ;;  %v845_v29 = vadd.s32 4294967295, %v714_v56  ;;  %v973_v48 = vadd.s32 4294967295, %v746_v5  ;;  %v748_v56 = vld [vmem:[%s11199_s1 + $0xe0] sm:$0xff] }
  0x8a   : > { %11826 = vst [vmem:[#allocation35_spill] sm:$0xff] %v11825_v47  ;;  %v1130_v60 = vsel %vm1098_vm9, 1, %v11308_v0  ;;  %vm7401_vm15 = vmand %vm11827_vm1, %vm905_vm6  ;;  %vm1036_vm9 = vcmp.lt.s32.totalorder %v972_v28, 16  ;;  %vm907_vm1 = vcmp.lt.s32.totalorder %v843_v52, 16  ;;  %v11844_v5 = vmov 0  ;;  %v6338_v13 = vld [vmem:[#allocation5 + $0x30] sm:$0xff]  }
  0x8b   : > { %v11829_v4 = vsel %vm7401_vm15, 4294967295, %v11828_v4  ;;  %1209 = vperm.xlu1 %6326, %v1130_v60   ;;  %vm7408_vm10 = vmand %vm1001_vm0, %vm1033_vm7  ;;  %v391_v60 = vld [vmem:[%s6998_s17 + $0x78] sm:$0xff]  ;;  %vm875_vm7 = vcmp.ge.s32.totalorder %v843_v52, 0 }
  0x8c   : > { %11830 = vst [vmem:[#allocation36_spill] sm:$0xff] %v11829_v4  ;;  %v11832_v10 = vsel %vm7408_vm10, 4294967295, %v11831_v10  ;;  %vm1097_vm6 = vmand %vm7401_vm15, %vm7408_vm10  ;;  %vm11837_vm10 = vcmp.ge.s32.totalorder %v972_v28, 0  ;;  %v716_v28 = vld [vmem:[%s11198_s0 + $0xe0] sm:$0xff] }
  0x8d   : > { %11833 = vst [vmem:[#allocation37_spill] sm:$0xff] %v11832_v10  ;;  %v1129_v47 = vsel %vm1097_vm6, 1, %v11308_v0  ;;  %vm7424_vm0 = vmand %vm876_vm14, %vm908_vm13  ;;  %v11841_v10 = vmov 0  ;;  %vm878_vm14 = vcmp.ge.s32.totalorder %v846_v6, 0  ;;  %vm1037_vm6 = vcmp.lt.s32.totalorder %v973_v48, 16 }
  0x8e   : > { %v11835_v41 = vsel %vm7424_vm0, 4294967295, %v11834_v41  ;;  %1206 = vperm.xlu0 %6325, %v1129_v47   ;;  %vm7430_vm15 = vmand %vm11837_vm10, %vm1036_vm9  ;;  %v415_v47 = vpack.c.bf16 %v391_v60, %v390_v39  ;;  %vm910_vm9 = vcmp.lt.s32.totalorder %v846_v6, 16  ;;  %v848_v39 = vadd.s32 4294967295, %v717_v22  ;;  %v719_v6 = vld [vmem:[%s11198_s0 + $0xf8] sm:$0xff] }
  0x8f   : > { %11836 = vst [vmem:[#allocation38_spill] sm:$0xff] %v11835_v41  ;;  %v11839_v36 = vsel %vm7430_vm15, 4294967295, %v11838_v36  ;;  %vm1100_vm13 = vmand %vm7424_vm0, %vm7430_vm15  ;;  %vm1038_vm0 = vcmp.lt.s32.totalorder %v974_v33, 16  ;;  %v11847_v60 = vmov 0  ;;  %v751_v22 = vld [vmem:[%s11199_s1 + $0xf8] sm:$0xff] }
  0x90   : > { %11840 = vst [vmem:[#allocation39_spill] sm:$0xff] %v11839_v36  ;;  %v1132_v52 = vsel %vm1100_vm13, 1, %v11308_v0  ;;  %vm7445_vm10 = vmand %vm875_vm7, %vm907_vm1  ;;  %vm909_vm13 = vcmp.lt.s32.totalorder %v845_v29, 16  ;;  %6119 = vmatmul.mubr.bf16.gmra.mxu0 %v415_v47  ;;  %v847_v36 = vadd.s32 4294967295, %v716_v28  ;;  %v11854_v47 = vmov 0  }
  0x91   : > { %v11842_v10 = vsel %vm7445_vm10, 4294967295, %v11841_v10  ;;  %1215 = vperm.xlu1 %6326, %v1132_v52   ;;  %vm7453_vm15 = vmand %vm1003_vm8, %vm1035_vm3  ;;  %v976_v52 = vadd.s32 4294967295, %v749_v15  ;;  %vm11850_vm8 = vcmp.ge.s32.totalorder %v974_v33, 0  ;;  %v975_v15 = vadd.s32 4294967295, %v748_v56 }
  0x92   : > { %11843 = vst [vmem:[#allocation40_spill] sm:$0xff] %v11842_v10  ;;  %v11845_v5 = vsel %vm7453_vm15, 4294967295, %v11844_v5  ;;  %vm1099_vm7 = vmand %vm7445_vm10, %vm7453_vm15  ;;  %v11856_v33 = vmov 0  ;;  %vm11859_vm15 = vcmp.ge.s32.totalorder %v973_v48, 0  ;;  %v11860_v28 = vmov 0 }
  0x93   : > { %11846 = vst [vmem:[#allocation41_spill] sm:$0xff] %v11845_v5  ;;  %v1131_v59 = vsel %vm1099_vm7, 1, %v11308_v0  ;;  %vm7465_vm3 = vmand %vm878_vm14, %vm910_vm9  ;;  %v11851_v5 = vmov 0  ;;  %v718_v0 = vld [vmem:[%s11198_s0 + $0xf0] sm:$0xff]  ;;  %vm1008_vm9 = vcmp.ge.s32.totalorder %v976_v52, 0  ;;  %v850_v56 = vadd.s32 4294967295, %v719_v6 }
  0x94   : > { %v11848_v60 = vsel %vm7465_vm3, 4294967295, %v11847_v60  ;;  %1212 = vperm.xlu0 %6325, %v1131_v59   ;;  %vm7473_vm1 = vmand %vm11850_vm8, %vm1038_vm0  ;;  %vm11855_vm0 = vcmp.ge.s32.totalorder %v845_v29, 0  ;;  %vm912_vm8 = vcmp.lt.s32.totalorder %v848_v39, 16  ;;  %v978_v29 = vadd.s32 4294967295, %v751_v22 }
  0x95   : > { %11849 = vst [vmem:[#allocation42_spill] sm:$0xff] %v11848_v60  ;;  %v11852_v5 = vsel %vm7473_vm1, 4294967295, %v11851_v5  ;;  %vm1102_vm14 = vmand %vm7465_vm3, %vm7473_vm1  ;;  %vm1040_vm1 = vcmp.lt.s32.totalorder %v976_v52, 16  ;;  %v11867_v6 = vmov 0  ;;  %vm1007_vm5 = vcmp.ge.s32.totalorder %v975_v15, 0 }
  0x96   : > { %11853 = vst [vmem:[#allocation43_spill] sm:$0xff] %v11852_v5  ;;  %v1134_v59 = vsel %vm1102_vm14, 1, %v11854_v47  ;;  %vm7487_vm7 = vmand %vm11855_vm0, %vm909_vm13  ;;  %v750_v5 = vld [vmem:[%s11199_s1 + $0xf0] sm:$0xff]  ;;  %vm879_vm14 = vcmp.ge.s32.totalorder %v847_v36, 0  ;;  %vm911_vm0 = vcmp.lt.s32.totalorder %v847_v36, 16  ;;  %vm1039_vm4 = vcmp.lt.s32.totalorder %v975_v15, 16 }
  0x97   : > { %v11857_v33 = vsel %vm7487_vm7, 4294967295, %v11856_v33  ;;  %1221 = vperm.xlu1 %6326, %v1134_v59   ;;  %vm7492_vm10 = vmand %vm11859_vm15, %vm1037_vm6  ;;  %vm11863_vm15 = vcmp.ge.s32.totalorder %v848_v39, 0  ;;  %v11864_v59 = vmov 0  ;;  %v849_v52 = vadd.s32 4294967295, %v718_v0 }
  0x98   : > { %11858 = vst [vmem:[#allocation44_spill] sm:$0xff] %v11857_v33  ;;  %v11861_v28 = vsel %vm7492_vm10, 4294967295, %v11860_v28  ;;  %vm1101_vm13 = vmand %vm7487_vm7, %vm7492_vm10  ;;  %vm914_vm7 = vcmp.lt.s32.totalorder %v850_v56, 16  ;;  %v11870_v22 = vmov 0  ;;  %v977_v36 = vadd.s32 4294967295, %v750_v5 }
  0x99   : > { %11862 = vst [vmem:[#allocation45_spill] sm:$0xff] %v11861_v28  ;;  %v1133_v48 = vsel %vm1101_vm13, 1, %v11854_v47  ;;  %vm7505_vm6 = vmand %vm11863_vm15, %vm912_vm8  ;;  %vm882_vm13 = vcmp.ge.s32.totalorder %v850_v56, 0  ;;  %vm1042_vm15 = vcmp.lt.s32.totalorder %v978_v29, 16  ;;  %v11876_v15 = vmov 0  ;;  %v6336_v28 = vld [vmem:[#allocation5 + $0x38] sm:$0xff]  }
  0x9a   : > { %v11865_v59 = vsel %vm7505_vm6, 4294967295, %v11864_v59  ;;  %1218 = vperm.xlu0 %6325, %v1133_v48   ;;  %vm7509_vm3 = vmand %vm1008_vm9, %vm1040_vm1  ;;  %v11873_v48 = vmov 0  ;;  %vm1010_vm9 = vcmp.ge.s32.totalorder %v978_v29, 0  ;;  %v11879_v5 = vmov 0 }
  0x9b   : > { %11866 = vst [vmem:[#allocation46_spill] sm:$0xff] %v11865_v59  ;;  %v11868_v6 = vsel %vm7509_vm3, 4294967295, %v11867_v6  ;;  %vm1104_vm10 = vmand %vm7505_vm6, %vm7509_vm3  ;;  %vm881_vm6 = vcmp.ge.s32.totalorder %v849_v52, 0  ;;  %v11882_v29 = vmov 0 }
  0x9c   : > { %11869 = vst [vmem:[#allocation47_spill] sm:$0xff] %v11868_v6  ;;  %v1136_v39 = vsel %vm1104_vm10, 1, %v11854_v47  ;;  %vm7518_vm8 = vmand %vm879_vm14, %vm911_vm0  ;;  %vm913_vm14 = vcmp.lt.s32.totalorder %v849_v52, 16  ;;  %vm1041_vm0 = vcmp.lt.s32.totalorder %v977_v36, 16  ;;  %v11884_v52 = vmov 0 }
  0x9d   : > { %v11871_v22 = vsel %vm7518_vm8, 4294967295, %v11870_v22  ;;  %1227 = vperm.xlu1 %6326, %v1136_v39   ;;  %vm7522_vm1 = vmand %vm1007_vm5, %vm1039_vm4  ;;  %vm1009_vm5 = vcmp.ge.s32.totalorder %v977_v36, 0  ;;  %v1316_v39 = vsel %vm6907_vm12, 1, %v11854_v47 }
  0x9e   : > { %11872 = vst [vmem:[#allocation48_spill] sm:$0xff] %v11871_v22  ;;  %v11874_v48 = vsel %vm7522_vm1, 4294967295, %v11873_v48  ;;  %vm1103_vm3 = vmand %vm7518_vm8, %vm7522_vm1  ;;  %v6350_v22 = vld [vmem:[#allocation5 + $0x10] sm:$0xff]  }
  0x9f   : > { %11875 = vst [vmem:[#allocation49_spill] sm:$0xff] %v11874_v48  ;;  %v1135_v0 = vsel %vm1103_vm3, 1, %v11854_v47  ;;  %vm7531_vm10 = vmand %vm882_vm13, %vm914_vm7 }
  0xa0   : > { %v11877_v15 = vsel %vm7531_vm10, 4294967295, %v11876_v15  ;;  %1224 = vperm.xlu0 %6325, %v1135_v0   ;;  %vm7535_vm4 = vmand %vm1010_vm9, %vm1042_vm15  ;;  %v1315_v0 = vsel %vm6861_vm11, 1, %v11854_v47  ;;  %vm11889_vm9 = vnez %v11714_v54  ;;  %vm11890_vm15 = vnez %v11720_v63 }
  0xa1   : > { %11878 = vst [vmem:[#allocation50_spill] sm:$0xff] %v11877_v15  ;;  %v11880_v5 = vsel %vm7535_vm4, 4294967295, %v11879_v5  ;;  %vm1106_vm1 = vmand %vm7531_vm10, %vm7535_vm4  ;;  %vm11896_vm4 = vnez %v11756_v7  ;;  %v6351_v15 = vld [vmem:[#allocation5 + $0xe8] sm:$0xff]  }
  0xa2   : > { %11881 = vst [vmem:[#allocation51_spill] sm:$0xff] %v11880_v5  ;;  %v1138_v56 = vsel %vm1106_vm1, 1, %v11854_v47  ;;  %vm7544_vm3 = vmand %vm881_vm6, %vm913_vm14  ;;  %vm11887_vm6 = vnez %v11689_v14  ;;  %vm11888_vm1 = vnez %v11709_v46  ;;  %vm11891_vm14 = vnez %v11726_v9 }
  0xa3   : > { %v11883_v29 = vsel %vm7544_vm3, 4294967295, %v11882_v29  ;;  %1233 = vperm.xlu1 %6326, %v1138_v56   ;;  %vm7548_vm7 = vmand %vm1009_vm5, %vm1041_vm0  ;;  %v1318_v56 = vsel %vm6887_vm2, 1, %v11854_v47  ;;  %v1320_v5 = vsel %vm11888_vm1, 1, %v11854_v47  ;;  %vm11892_vm5 = vnez %v11731_v18 }
  0xa4   : > { %v11885_v52 = vsel %vm7548_vm7, 4294967295, %v11884_v52  ;;  %vm1105_vm13 = vmand %vm7544_vm3, %vm7548_vm7  ;;  %vm11893_vm0 = vnez %v11736_v30  ;;  %vm11895_vm7 = vnez %v11750_v58 }
  0xa5   : > { %11886 = vst [vmem:[#allocation52_spill] sm:$0xff] %v11885_v52  ;;  %v1137_v36 = vsel %vm1105_vm13, 1, %v11854_v47  ;;  %v1317_v52 = vsel %vm11887_vm6, 1, %v11854_v47  ;;  %vm11894_vm13 = vnez %v11743_v44 }
  0xa6   : > { %1230 = vperm.xlu0 %6325, %v1137_v36   ;;  %v1322_v36 = vsel %vm11890_vm15, 1, %v11854_v47 }
  0xa7   : > { %1351 = vperm.xlu1 %6326, %v1316_v39   ;;  %v1319_v39 = vsel %vm11889_vm9, 1, %v11854_v47 }
  0xaa   : > { %1348 = vperm.xlu0 %6325, %v1315_v0   ;;  %v1321_v0 = vsel %vm11891_vm14, 1, %v11854_v47 }
  0xab   : > { %1357 = vperm.xlu1 %6326, %v1318_v56   ;;  %v1324_v56 = vsel %vm11892_vm5, 1, %v11854_v47  ;;  %vm11897_vm5 = vnez %v11761_v20 }
  0xae   : > { %1354 = vperm.xlu0 %6325, %v1317_v52   ;;  %v1326_v52 = vsel %vm11894_vm13, 1, %v11854_v47  ;;  %vm11899_vm13 = vnez %v11774_v55 }
  0xaf   : > { %1363 = vperm.xlu1 %6326, %v1320_v5   ;;  %v1323_v5 = vsel %vm11893_vm0, 1, %v11854_v47  ;;  %vm11898_vm0 = vnez %v11767_v38 }
  0xb2   : > { %1360 = vperm.xlu0 %6325, %v1319_v39   ;;  %v1325_v39 = vsel %vm11895_vm7, 1, %v11854_v47  ;;  %vm11900_vm7 = vnez %v11780_v8 }
  0xb3   : > { %1369 = vperm.xlu1 %6326, %v1322_v36   ;;  %v1328_v36 = vsel %vm11896_vm4, 1, %v11854_v47 }
  0xb6   : > { %1366 = vperm.xlu0 %6325, %v1321_v0   ;;  %v1327_v0 = vsel %vm11897_vm5, 1, %v11854_v47  ;;  %vm11902_vm5 = vnez %v11786_v31 }
  0xb7   : > { %1375 = vperm.xlu1 %6326, %v1324_v56   ;;  %v1330_v56 = vsel %vm11898_vm0, 1, %v11854_v47  ;;  %vm11904_vm0 = vnez %v11792_v53 }
  0xba   : > { %1372 = vperm.xlu0 %6325, %v1323_v5   ;;  %v1329_v5 = vsel %vm11899_vm13, 1, %v11854_v47  ;;  %vm11907_vm13 = vnez %v11807_v45 }
  0xbb   : > { %1381 = vperm.xlu1 %6326, %v1326_v52   ;;  %v1332_v52 = vsel %vm11900_vm7, 1, %v11854_v47  ;;  %vm11906_vm7 = vnez %v11799_v16 }
  0xbc   : > { %v1333_v6 = vsel %vm11906_vm7, 1, %v11854_v47  ;;  %vm11909_vm7 = vnez %v11822_v25  ;;  %v6339_v25 = vld [vmem:[#allocation5 + $0x68] sm:$0xff]  }
  0xbe   : > { %1378 = vperm.xlu0 %6325, %v1325_v39  }
  0xbf   : > { %1387 = vperm.xlu1 %6326, %v1328_v36   ;;  %v1331_v36 = vsel %vm11902_vm5, 1, %v11854_v47  ;;  %vm11916_vm5 = vnez %v11848_v60  ;;  %v6346_v60 = vld [vmem:[#allocation5 + $0x18] sm:$0xff]  }
  0xc2   : > { %1384 = vperm.xlu0 %6325, %v1327_v0   ;;  %v1334_v0 = vsel %vm11904_vm0, 1, %v11854_v47  ;;  %vm11908_vm0 = vnez %v11814_v3 }
  0xc3   : > { %1393 = vperm.xlu1 %6326, %v1330_v56  }
  0xc5   : > { %v7608_v39 = vpop.permute.xlu1 %1146 }
  0xc6   : > { %11901 = vst [vmem:[#allocation53_spill] sm:$0xff] %v7608_v39  ;;  %1390 = vperm.xlu0 %6325, %v1329_v5   ;;  %v6335_v5 = vld [vmem:[#allocation5 + $0x78] sm:$0xff]  }
  0xc7   : > { %1399 = vperm.xlu1 %6326, %v1332_v52   ;;  %v1336_v52 = vsel %vm11907_vm13, 1, %v11854_v47  ;;  %5594 = vmatprep.subr.bf16.mxu1 %v6335_v5  ;;  %vm11911_vm13 = vnez %v11829_v4 }
  0xc8   : > { %v7613_v48 = vpop.permute.xlu0 %1140  ;;  %5595 = vmatpush3.bf16.msra.mxu1 %v6336_v28  ;;  %v1337_v28 = vsel %vm11911_vm13, 1, %v11854_v47 }
  0xc9   : > { %11903 = vst [vmem:[#allocation54_spill] sm:$0xff] %v7613_v48 }
  0xca   : > { %1396 = vperm.xlu0 %6325, %v1331_v36   ;;  %v7618_v56 = vpop.permute.xlu1 %1149  ;;  %v1335_v36 = vsel %vm11908_vm0, 1, %v11854_v47 }
  0xcb   : > { %11905 = vst [vmem:[#allocation55_spill] sm:$0xff] %v7618_v56  ;;  %1405 = vperm.xlu1 %6326, %v1334_v0   ;;  %v6337_v0 = vld [vmem:[#allocation5 + $0x70] sm:$0xff]   ;;  %v1338_v56 = vsel %vm11909_vm7, 1, %v11854_v47  ;;  %vm11913_vm7 = vnez %v11835_v41 }
  0xcc   : > { %5596 = vmatprep.subr.bf16.mxu1 %v6337_v0  ;;  %v6417_v0 = vld [vmem:[%s11199_s1 + $0x18] sm:$0xff] }
  0xcd   : > { %v7626_v39 = vpop.permute.xlu0 %1143  ;;  %5597 = vmatpush3.bf16.msra.mxu1 %v6338_v13  ;;  %v6416_v13 = vld [vmem:[%s11199_s1] sm:$0xff]  ;;  %v1591_v4 = vadd.s32 1, %v6417_v0 }
  0xce   : > { %1402 = vperm.xlu0 %6325, %v1333_v6   ;;  %v6415_v6 = vld [vmem:[%s11199_s1 + $0x8] sm:$0xff]  ;;  %5598 = vmatprep.subr.bf16.mxu1 %v6339_v25  ;;  %v6342_v0 = vld [vmem:[#allocation5 + $0x20] sm:$0xff]  }
  0xcf   : > { %1411 = vperm.xlu1 %6326, %v1336_v52   ;;  %v1589_v5 = vadd.s32 1, %v6415_v6  ;;  %vm1655_vm9 = vcmp.lt.s32.totalorder %v1591_v4, 16 }
  0xd0   : > { %v7634_v48 = vpop.permute.xlu1 %1155 }
  0xd1   : > { %11910 = vst [vmem:[#allocation56_spill] sm:$0xff] %v7634_v48  ;;  %v1340_v48 = vsel %vm11913_vm7, 1, %v11854_v47  ;;  %vm11915_vm7 = vnez %v11842_v10  ;;  %vm1621_vm13 = vcmp.ge.s32.totalorder %v1589_v5, 0  ;;  %vm1653_vm0 = vcmp.lt.s32.totalorder %v1589_v5, 16  ;;  %v6352_v10 = vld [vmem:[#allocation5 + $0x48] sm:$0xff]  }
  0xd2   : > { %1408 = vperm.xlu0 %6325, %v1335_v36   ;;  %v6340_v36 = vld [vmem:[#allocation5 + $0x28] sm:$0xff]   ;;  %v1339_v41 = vsel %vm11915_vm7, 1, %v11854_v47  ;;  %vm7663_vm1 = vmand %vm1621_vm13, %vm1653_vm0  ;;  %vm11925_vm0 = vnez %v11865_v59  ;;  %vm11926_vm13 = vcmp.ge.s32.totalorder %v1591_v4, 0  ;;  %v1343_v4 = vsel %vm7518_vm8, 1, %v11854_v47 }
  0xd3   : > { %1417 = vperm.xlu1 %6326, %v1338_v56   ;;  %v7642_v52 = vpop.permute.xlu0 %1152  ;;  %v1588_v56 = vadd.s32 1, %v6416_v13  ;;  %5599 = vmatpush3.bf16.msra.mxu1 %v6340_v36  ;;  %v1342_v13 = vsel %vm11916_vm5, 1, %v11854_v47  ;;  %vm11921_vm5 = vnez %v11857_v33  ;;  %v11922_v36 = vmov 0  ;;  %vm7681_vm7 = vmand %vm11926_vm13, %vm1655_vm9  ;;  %v6345_v33 = vld [vmem:[#allocation5 + $0xb8] sm:$0xff]  }
  0xd4   : > { %11912 = vst [vmem:[#allocation57_spill] sm:$0xff] %v7642_v52  ;;  %v6341_v52 = vld [vmem:[#allocation5 + $0x60] sm:$0xff]   ;;  %v11932_v59 = vmov 0 }
  0xd5   : > { %vm1620_vm4 = vcmp.ge.s32.totalorder %v1588_v56, 0  ;;  %vm1652_vm14 = vcmp.lt.s32.totalorder %v1588_v56, 16  ;;  %5600 = vmatprep.subr.bf16.mxu1 %v6341_v52  ;;  %v1341_v56 = vsel %vm11921_vm5, 1, %v11854_v47  ;;  %v6344_v52 = vld [vmem:[#allocation5 + $0x58] sm:$0xff]  }
  0xd6   : > { %1414 = vperm.xlu0 %6325, %v1337_v28   ;;  %v7653_v6 = vpop.permute.xlu1 %1161  ;;  %v6418_v28 = vld [vmem:[%s11199_s1 + $0x10] sm:$0xff]  ;;  %vm7673_vm15 = vmand %vm1620_vm4, %vm1652_vm14 }
  0xd7   : > { %11914 = vst [vmem:[#allocation58_spill] sm:$0xff] %v7653_v6  ;;  %1423 = vperm.xlu1 %6326, %v1340_v48   ;;  %v11918_v48 = vmov 0  ;;  %v1590_v5 = vadd.s32 1, %v6418_v28  ;;  %5601 = vmatpush3.bf16.msra.mxu1 %v6342_v0  ;;  %v11923_v36 = vsel %vm7673_vm15, 4294967295, %v11922_v36  ;;  %v11927_v6 = vmov 0  ;;  %vm11942_vm8 = vmand %vm6861_vm11, %vm7673_vm15 }
  0xd8   : > { %v11919_v48 = vsel %vm7663_vm1, 4294967295, %v11918_v48  ;;  %11924 = vst [vmem:[#allocation61_spill] sm:$0xff] %v11923_v36  ;;  %v11928_v6 = vsel %vm7681_vm7, 4294967295, %v11927_v6  ;;  %5602 = vmatprep.subr.bf16.mxu1 %v6344_v52 }
  0xd9   : > { %v7661_v25 = vpop.permute.xlu0 %1158  ;;  %11920 = vst [vmem:[#allocation60_spill] sm:$0xff] %v11919_v48  ;;  %11929 = vst [vmem:[#allocation62_spill] sm:$0xff] %v11928_v6  ;;  %vm1622_vm14 = vcmp.ge.s32.totalorder %v1590_v5, 0  ;;  %vm1654_vm13 = vcmp.lt.s32.totalorder %v1590_v5, 16  ;;  %v1345_v5 = vsel %vm7544_vm3, 1, %v11854_v47 }
  0xda   : > { %11917 = vst [vmem:[#allocation59_spill] sm:$0xff] %v7661_v25  ;;  %1420 = vperm.xlu0 %6325, %v1339_v41   ;;  %v6343_v41 = vld [vmem:[#allocation5 + $0xf8] sm:$0xff]   ;;  %v1344_v25 = vsel %vm11925_vm0, 1, %v11854_v47  ;;  %vm7715_vm4 = vmand %vm1622_vm14, %vm1654_vm13 }
  0xdb   : > { %1429 = vperm.xlu1 %6326, %v1342_v13   ;;  %v6419_v13 = vld [vmem:[%s11199_s1 + $0x28] sm:$0xff]  ;;  %5706 = vmatprep.subr.bf16.mxu0 %v6343_v41  ;;  %v11933_v59 = vsel %vm7715_vm4, 4294967295, %v11932_v59  ;;  %vm11936_vm13 = vmand %vm6907_vm12, %vm7663_vm1 }
  0xdc   : > { %v1593_v0 = vadd.s32 1, %v6419_v13  ;;  %v7688_v28 = vpop.permute.xlu1 %1167  ;;  %5707 = vmatpush3.bf16.msra.mxu0 %v6345_v33  ;;  %5603 = vmatpush3.bf16.msra.mxu1 %v6346_v60  ;;  %v6347_v13 = vld [vmem:[#allocation5 + $0xf0] sm:$0xff]   ;;  %11934 = vst [vmem:[#allocation65_spill] sm:$0xff] %v11933_v59  ;;  %v6421_v60 = vld [vmem:[%s11199_s1 + $0x38] sm:$0xff] }
  0xdd   : > { %11930 = vst [vmem:[#allocation63_spill] sm:$0xff] %v7688_v28  ;;  %v6348_v33 = vld [vmem:[#allocation5 + $0x50] sm:$0xff]   ;;  %5708 = vmatprep.subr.bf16.mxu0 %v6347_v13  ;;  %v1749_v13 = vsel %vm11936_vm13, 1, %v11854_v47 }
  0xde   : > { %1426 = vperm.xlu0 %6325, %v1341_v56   ;;  %v6420_v56 = vld [vmem:[%s11199_s1 + $0x20] sm:$0xff]  ;;  %v6349_v28 = vld [vmem:[#allocation5 + $0xb0] sm:$0xff]   ;;  %5604 = vmatprep.subr.bf16.mxu1 %v6348_v33  ;;  %v6354_v33 = vld [vmem:[#allocation5 + $0x8] sm:$0xff]   ;;  %vm11937_vm12 = vcmp.lt.s32.totalorder %v1593_v0, 16  ;;  %vm11938_vm13 = vcmp.ge.s32.totalorder %v1593_v0, 0 }
  0xdf   : > { %1435 = vperm.xlu1 %6326, %v1344_v25   ;;  %v1592_v41 = vadd.s32 1, %v6420_v56  ;;  %v7708_v52 = vpop.permute.xlu0 %1164  ;;  %v1346_v25 = vsel %vm7531_vm10, 1, %v11854_v47  ;;  %v1595_v56 = vadd.s32 1, %v6421_v60  ;;  %vm7744_vm9 = vmand %vm11938_vm13, %vm11937_vm12  ;;  %v6423_v60 = vld [vmem:[%s11199_s1 + $0x48] sm:$0xff]  ;;  %v6355_v0 = vld [vmem:[#allocation5 + $0xe0] sm:$0xff]  }
  0xe0   : > { %11931 = vst [vmem:[#allocation64_spill] sm:$0xff] %v7708_v52  ;;  %5709 = vmatpush3.bf16.msra.mxu0 %v6349_v28  ;;  %5605 = vmatpush3.bf16.msra.mxu1 %v6350_v22  ;;  %v6422_v22 = vld [vmem:[%s11199_s1 + $0x30] sm:$0xff]  ;;  %vm11948_vm13 = vmand %vm6887_vm2, %vm7681_vm7  ;;  %vm11956_vm2 = vnez %v11714_v54 }
  0xe1   : > { %v1594_v28 = vadd.s32 1, %v6422_v22  ;;  %5710 = vmatprep.subr.bf16.mxu0 %v6351_v15  ;;  %5606 = vmatprep.subr.bf16.mxu1 %v6352_v10  ;;  %v1748_v10 = vsel %vm11942_vm8, 1, %v11854_v47  ;;  %vm11943_vm3 = vcmp.lt.s32.totalorder %v1592_v41, 16  ;;  %vm11944_vm14 = vcmp.ge.s32.totalorder %v1592_v41, 0  ;;  %v6358_v22 = vld [vmem:[#allocation5] sm:$0xff]   ;;  %v6362_v54 = vld [vmem:[#allocation5 + $0x90] sm:$0xff]  }
  0xe2   : > { %1432 = vperm.xlu0 %6325, %v1343_v4   ;;  %v7722_v52 = vpop.permute.xlu1 %1173  ;;  %v6353_v4 = vld [vmem:[#allocation5 + $0xa8] sm:$0xff]   ;;  %vm7759_vm12 = vmand %vm11944_vm14, %vm11943_vm3  ;;  %v11945_v15 = vmov 0  ;;  %v1751_v23 = vsel %vm11948_vm13, 1, %v11854_v47  ;;  %vm11949_vm10 = vcmp.lt.s32.totalorder %v1595_v56, 16  ;;  %vm11950_vm0 = vcmp.ge.s32.totalorder %v1595_v56, 0 }
  0xe3   : > { %11935 = vst [vmem:[#allocation66_spill] sm:$0xff] %v7722_v52  ;;  %1441 = vperm.xlu1 %6326, %v1346_v25   ;;  %v11939_v25 = vmov 0  ;;  %v1597_v52 = vadd.s32 1, %v6423_v60  ;;  %v11946_v15 = vsel %vm7759_vm12, 4294967295, %v11945_v15  ;;  %vm7771_vm11 = vmand %vm11950_vm0, %vm11949_vm10  ;;  %vm11955_vm8 = vnez %v11709_v46  ;;  %v6359_v60 = vld [vmem:[#allocation5 + $0xd8] sm:$0xff]  }
  0xe4   : > { %v11940_v25 = vsel %vm7744_vm9, 4294967295, %v11939_v25  ;;  %5711 = vmatpush3.bf16.msra.mxu0 %v6353_v4  ;;  %11947 = vst [vmem:[#allocation68_spill] sm:$0xff] %v11946_v15  ;;  %5607 = vmatpush3.bf16.msra.mxu1 %v6354_v33  ;;  %v6357_v4 = vld [vmem:[#allocation5 + $0xa0] sm:$0xff]   ;;  %vm1721_vm3 = vmand %vm11955_vm8, %vm7744_vm9  ;;  %v1596_v56 = vadd.s32 1, %v6424_v32  ;;  %vm11958_vm10 = vnez %v11720_v63  ;;  %vm11960_vm7 = vcmp.lt.s32.totalorder %v1594_v28, 16  ;;  %v6363_v32 = vld [vmem:[#allocation5 + $0xc8] sm:$0xff]  }
  0xe5   : > { %v7740_v40 = vpop.permute.xlu0 %1170  ;;  %11941 = vst [vmem:[#allocation67_spill] sm:$0xff] %v11940_v25  ;;  %5712 = vmatprep.subr.bf16.mxu0 %v6355_v0  ;;  %vm1629_vm0 = vcmp.ge.s32.totalorder %v1597_v52, 0  ;;  %vm1661_vm13 = vcmp.lt.s32.totalorder %v1597_v52, 16  ;;  %vm11957_vm14 = vmand %vm11887_vm6, %vm7715_vm4  ;;  %v1753_v14 = vsel %vm1721_vm3, 1, %v11854_v47  ;;  %vm11961_vm15 = vcmp.ge.s32.totalorder %v1594_v28, 0  ;;  %v6360_v0 = vld [vmem:[#allocation5 + $0x98] sm:$0xff]  }
  0xe6   : > { %1438 = vperm.xlu0 %6325, %v1345_v5   ;;  %v6356_v5 = vld [vmem:[#allocation5 + $0x40] sm:$0xff]   ;;  %v1750_v33 = vsel %vm11957_vm14, 1, %v11854_v47  ;;  %vm7808_vm6 = vmand %vm11961_vm15, %vm11960_vm7  ;;  %vm1628_vm5 = vcmp.ge.s32.totalorder %v1596_v56, 0  ;;  %vm1660_vm4 = vcmp.lt.s32.totalorder %v1596_v56, 16  ;;  %vm11970_vm15 = vnez %v11726_v9 }
  0xe7   : > { %1784 = vperm.xlu1 %6326, %v1749_v13   ;;  %v11951_v13 = vmov 0  ;;  %5608 = vmatprep.subr.bf16.mxu1 %v6356_v5  ;;  %vm7812_vm14 = vmand %vm1629_vm0, %vm1661_vm13  ;;  %v11965_v5 = vmov 0  ;;  %vm11972_vm0 = vnez %v11731_v18 }
  0xe8   : > { %v11952_v13 = vsel %vm7771_vm11, 4294967295, %v11951_v13  ;;  %v7775_v41 = vpop.permute.xlu1 %1179  ;;  %5713 = vmatpush3.bf16.msra.mxu0 %v6357_v4  ;;  %5609 = vmatpush3.bf16.msra.mxu1 %v6358_v22  ;;  %v11966_v5 = vsel %vm7812_vm14, 4294967295, %v11965_v5  ;;  %vm11969_vm7 = vmand %vm11956_vm2, %vm7759_vm12  ;;  %v11973_v22 = vmov 0 }
  0xe9   : > { %11953 = vst [vmem:[#allocation69_spill] sm:$0xff] %v11952_v13  ;;  %11954 = vst [vmem:[#allocation70_spill] sm:$0xff] %v7775_v41  ;;  %5714 = vmatprep.subr.bf16.mxu0 %v6359_v60  ;;  %v1752_v28 = vsel %vm11969_vm7, 1, %v11854_v47 }
  0xea   : > { %1781 = vperm.xlu0 %6325, %v1748_v10   ;;  %v11962_v10 = vmov 0  ;;  %11967 = vst [vmem:[#allocation73_spill] sm:$0xff] %v11966_v5  ;;  %vm1722_vm8 = vmand %vm11970_vm15, %vm7808_vm6  ;;  %vm11983_vm15 = vnez %v11701_v34 }
  0xeb   : > { %1790 = vperm.xlu1 %6326, %v1751_v23   ;;  %v7798_v52 = vpop.permute.xlu0 %1176  ;;  %v11963_v10 = vsel %vm7808_vm6, 4294967295, %v11962_v10  ;;  %v6361_v23 = vld [vmem:[#allocation5 + $0xd0] sm:$0xff]   ;;  %vm11971_vm3 = vmand %vm11958_vm10, %vm7771_vm11  ;;  %v1754_v63 = vsel %vm1722_vm8, 1, %v11854_v47  ;;  %vm11977_vm10 = vnez %v11736_v30  ;;  %vm11985_vm8 = vnez %v11691_v17 }
  0xec   : > { %11959 = vst [vmem:[#allocation71_spill] sm:$0xff] %v7798_v52  ;;  %11964 = vst [vmem:[#allocation72_spill] sm:$0xff] %v11963_v10  ;;  %5715 = vmatpush3.bf16.msra.mxu0 %v6360_v0  ;;  %v1755_v4 = vsel %vm11971_vm3, 1, %v11854_v47  ;;  %v6365_v0 = vld [vmem:[#allocation5 + $0xc0] sm:$0xff]   ;;  %vm11986_vm3 = vnez %v11711_v50 }
  0xed   : > { %vm1725_vm13 = vmand %vm11972_vm0, %vm7812_vm14  ;;  %5716 = vmatprep.subr.bf16.mxu0 %v6361_v23  ;;  %v6366_v23 = vld [vmem:[#allocation5 + $0x80] sm:$0xff]   ;;  %vm11988_vm0 = vnez %v11717_v57 }
  0xee   : > { %1787 = vperm.xlu0 %6325, %v1750_v33   ;;  %v7816_v46 = vpop.permute.xlu1 %1185  ;;  %vm7838_vm2 = vmand %vm1628_vm5, %vm1660_vm4  ;;  %v1757_v56 = vsel %vm1725_vm13, 1, %v11854_v47  ;;  %v6364_v33 = vld [vmem:[#allocation5 + $0x88] sm:$0xff]   ;;  %vm11980_vm5 = vnez %v11706_v42  ;;  %vm11982_vm4 = vnez %v11696_v26  ;;  %vm11990_vm13 = vnez %v11723_v2  ;;  %v6436_v26 = vld [vmem:[%s11199_s1 + $0xa0] sm:$0xff] }
  0xef   : > { %11968 = vst [vmem:[#allocation74_spill] sm:$0xff] %v7816_v46  ;;  %1796 = vperm.xlu1 %6326, %v1753_v14   ;;  %v11974_v22 = vsel %vm7838_vm2, 4294967295, %v11973_v22  ;;  %vm1724_vm7 = vmand %vm11977_vm10, %vm7838_vm2 }
  0xf0   : > { %11975 = vst [vmem:[#allocation75_spill] sm:$0xff] %v11974_v22  ;;  %5717 = vmatpush3.bf16.msra.mxu0 %v6362_v54  ;;  %v1756_v60 = vsel %vm1724_vm7, 1, %v11854_v47  ;;  %v1959_v54 = vsel %vm11983_vm15, 1, %v11854_v47 }
  0xf1   : > { %v7842_v9 = vpop.permute.xlu0 %1182  ;;  %5718 = vmatprep.subr.bf16.mxu0 %v6363_v32  ;;  %v1958_v32 = vsel %vm11985_vm8, 1, %v11854_v47 }
  0xf2   : > { %11976 = vst [vmem:[#allocation76_spill] sm:$0xff] %v7842_v9  ;;  %1793 = vperm.xlu0 %6325, %v1752_v28   ;;  %v1957_v28 = vsel %vm11980_vm5, 1, %v11854_v47 }
  0xf3   : > { %1802 = vperm.xlu1 %6326, %v1755_v4   ;;  %v1956_v4 = vsel %vm11982_vm4, 1, %v11854_v47 }
  0xf4   : > { %v7850_v18 = vpop.permute.xlu1 %1191  ;;  %5719 = vmatpush3.bf16.msra.mxu0 %v6364_v33 }
  0xf5   : > { %11978 = vst [vmem:[#allocation77_spill] sm:$0xff] %v7850_v18  ;;  %5720 = vmatprep.subr.bf16.mxu0 %v6365_v0 }
  0xf6   : > { %1799 = vperm.xlu0 %6325, %v1754_v63  }
  0xf7   : > { %1808 = vperm.xlu1 %6326, %v1757_v56   ;;  %v7853_v14 = vpop.permute.xlu0 %1188  ;;  %v1961_v56 = vsel %vm11986_vm3, 1, %v11854_v47  ;;  %vm11993_vm3 = vnez %v11733_v21 }
  0xf8   : > { %11979 = vst [vmem:[#allocation78_spill] sm:$0xff] %v7853_v14  ;;  %5721 = vmatpush3.bf16.msra.mxu0 %v6366_v23  ;;  %v1965_v2 = vsel %vm11993_vm3, 1, %v11854_v47  ;;  %vm11999_vm3 = vnez %v11746_v49  ;;  %v1608_v14 = vadd.s32 1, %v6436_v26 }
  0xf9   : > { %v1967_v21 = vsel %vm11999_vm3, 1, %v11854_v47  ;;  %vm12005_vm3 = vnez %v11753_v61 }
  0xfa   : > { %1805 = vperm.xlu0 %6325, %v1756_v60   ;;  %v7858_v30 = vpop.permute.xlu1 %1197  ;;  %v6425_v60 = vld [vmem:[%s11199_s1 + $0x58] sm:$0xff] }
  0xfb   : > { %11981 = vst [vmem:[#allocation79_spill] sm:$0xff] %v7858_v30  ;;  %1992 = vperm.xlu1 %6326, %v1957_v28   ;;  %v1599_v0 = vadd.s32 1, %v6425_v60  ;;  %v1960_v28 = vsel %vm11988_vm0, 1, %v11854_v47  ;;  %vm11992_vm0 = vnez %v11728_v11 }
  0xfc   : > { %v1962_v60 = vsel %vm11992_vm0, 1, %v11854_v47  ;;  %vm11998_vm0 = vnez %v11739_v35 }
  0xfd   : > { %v7866_v63 = vpop.permute.xlu0 %1194  ;;  %vm1631_vm10 = vcmp.ge.s32.totalorder %v1599_v0, 0  ;;  %vm1663_vm7 = vcmp.lt.s32.totalorder %v1599_v0, 16  ;;  %v6427_v0 = vld [vmem:[%s11199_s1 + $0x68] sm:$0xff] }
  0xfe   : > { %11984 = vst [vmem:[#allocation80_spill] sm:$0xff] %v7866_v63  ;;  %1989 = vperm.xlu0 %6325, %v1956_v4   ;;  %v1963_v4 = vsel %vm11990_vm13, 1, %v11854_v47  ;;  %vm7900_vm13 = vmand %vm1631_vm10, %vm1663_vm7  ;;  %vm12001_vm10 = vnez %v11743_v44 }
  0xff   : > { %1998 = vperm.xlu1 %6326, %v1959_v54   ;;  %vm1727_vm7 = vmand %vm12001_vm10, %vm7900_vm13 }
 0x100   : > { %v7874_v33 = vpop.permute.xlu1 %1203  ;;  %v1759_v44 = vsel %vm1727_vm7, 1, %v11854_v47  ;;  %vm12012_vm7 = vnez %v11758_v12 }
 0x101   : > { %11987 = vst [vmem:[#allocation81_spill] sm:$0xff] %v7874_v33 }
 0x102   : > { %1995 = vperm.xlu0 %6325, %v1958_v32   ;;  %v6426_v32 = vld [vmem:[%s11199_s1 + $0x50] sm:$0xff] }
 0x103   : > { %2004 = vperm.xlu1 %6326, %v1961_v56   ;;  %v7882_v23 = vpop.permute.xlu0 %1200  ;;  %v1598_v56 = vadd.s32 1, %v6426_v32  ;;  %v1964_v32 = vsel %vm11998_vm0, 1, %v11854_v47 }
 0x104   : > { %11989 = vst [vmem:[#allocation82_spill] sm:$0xff] %v7882_v23 }
 0x105   : > { %vm1630_vm8 = vcmp.ge.s32.totalorder %v1598_v56, 0  ;;  %vm1662_vm15 = vcmp.lt.s32.totalorder %v1598_v56, 16  ;;  %v12002_v56 = vmov 0 }
 0x106   : > { %2001 = vperm.xlu0 %6325, %v1960_v28   ;;  %v7887_v54 = vpop.permute.xlu1 %1209  ;;  %v11995_v28 = vmov 0  ;;  %vm7919_vm4 = vmand %vm1630_vm8, %vm1662_vm15  ;;  %vm12007_vm15 = vnez %v11750_v58  ;;  %v1969_v58 = vsel %vm12012_vm7, 1, %v11854_v47 }
 0x107   : > { %11991 = vst [vmem:[#allocation83_spill] sm:$0xff] %v7887_v54  ;;  %2010 = vperm.xlu1 %6326, %v1963_v4   ;;  %v11996_v28 = vsel %vm7900_vm13, 4294967295, %v11995_v28  ;;  %v1601_v4 = vadd.s32 1, %v6427_v0  ;;  %v12003_v56 = vsel %vm7919_vm4, 4294967295, %v12002_v56  ;;  %v1966_v0 = vsel %vm12005_vm3, 1, %v11854_v47  ;;  %vm1726_vm8 = vmand %vm12007_vm15, %vm7919_vm4 }
 0x108   : > { %11997 = vst [vmem:[#allocation85_spill] sm:$0xff] %v11996_v28  ;;  %12004 = vst [vmem:[#allocation87_spill] sm:$0xff] %v12003_v56  ;;  %v1758_v61 = vsel %vm1726_vm8, 1, %v11854_v47  ;;  %vm12018_vm8 = vnez %v11763_v27 }
 0x109   : > { %v7898_v57 = vpop.permute.xlu0 %1206  ;;  %vm1633_vm5 = vcmp.ge.s32.totalorder %v1601_v4, 0  ;;  %vm1665_vm2 = vcmp.lt.s32.totalorder %v1601_v4, 16  ;;  %v12008_v4 = vmov 0 }
 0x10a   : > { %11994 = vst [vmem:[#allocation84_spill] sm:$0xff] %v7898_v57  ;;  %2007 = vperm.xlu0 %6325, %v1962_v60   ;;  %vm7936_vm10 = vmand %vm1633_vm5, %vm1665_vm2  ;;  %vm12013_vm2 = vnez %v11756_v7  ;;  %v1968_v7 = vsel %vm12018_vm8, 1, %v11854_v47 }
 0x10b   : > { %2016 = vperm.xlu1 %6326, %v1965_v2   ;;  %v6428_v2 = vld [vmem:[%s11199_s1 + $0x60] sm:$0xff]  ;;  %v12009_v4 = vsel %vm7936_vm10, 4294967295, %v12008_v4  ;;  %vm1729_vm5 = vmand %vm12013_vm2, %vm7936_vm10 }
 0x10c   : > { %v7913_v11 = vpop.permute.xlu1 %1215  ;;  %v1600_v60 = vadd.s32 1, %v6428_v2  ;;  %12010 = vst [vmem:[#allocation89_spill] sm:$0xff] %v12009_v4  ;;  %v1761_v35 = vsel %vm1729_vm5, 1, %v11854_v47  ;;  %vm12025_vm5 = vnez %v11771_v43 }
 0x10d   : > { %12000 = vst [vmem:[#allocation86_spill] sm:$0xff] %v7913_v11 }
 0x10e   : > { %2013 = vperm.xlu0 %6325, %v1964_v32   ;;  %vm1632_vm0 = vcmp.ge.s32.totalorder %v1600_v60, 0  ;;  %vm1664_vm13 = vcmp.lt.s32.totalorder %v1600_v60, 16  ;;  %v12015_v60 = vmov 0 }
 0x10f   : > { %2022 = vperm.xlu1 %6326, %v1967_v21   ;;  %v7929_v49 = vpop.permute.xlu0 %1212  ;;  %v6429_v21 = vld [vmem:[%s11199_s1 + $0x78] sm:$0xff]  ;;  %vm7955_vm15 = vmand %vm1632_vm0, %vm1664_vm13  ;;  %vm12020_vm0 = vnez %v11761_v20  ;;  %v1971_v20 = vsel %vm12025_vm5, 1, %v11854_v47 }
 0x110   : > { %12006 = vst [vmem:[#allocation88_spill] sm:$0xff] %v7929_v49  ;;  %v1603_v2 = vadd.s32 1, %v6429_v21  ;;  %v12016_v60 = vsel %vm7955_vm15, 4294967295, %v12015_v60  ;;  %vm1728_vm13 = vmand %vm12020_vm0, %vm7955_vm15 }
 0x111   : > { %12017 = vst [vmem:[#allocation92_spill] sm:$0xff] %v12016_v60  ;;  %v1760_v27 = vsel %vm1728_vm13, 1, %v11854_v47  ;;  %vm12031_vm13 = vnez %v11777_v62 }
 0x112   : > { %2019 = vperm.xlu0 %6325, %v1966_v0   ;;  %v7940_v32 = vpop.permute.xlu1 %1221  ;;  %vm1635_vm3 = vcmp.ge.s32.totalorder %v1603_v2, 0  ;;  %vm1667_vm4 = vcmp.lt.s32.totalorder %v1603_v2, 16  ;;  %v6431_v2 = vld [vmem:[%s11199_s1 + $0x88] sm:$0xff] }
 0x113   : > { %12011 = vst [vmem:[#allocation90_spill] sm:$0xff] %v7940_v32  ;;  %1814 = vperm.xlu1 %6326, %v1759_v44   ;;  %v6430_v44 = vld [vmem:[%s11199_s1 + $0x70] sm:$0xff]  ;;  %vm7972_vm2 = vmand %vm1635_vm3, %vm1667_vm4  ;;  %vm12026_vm4 = vnez %v11767_v38  ;;  %v1970_v38 = vsel %vm12031_vm13, 1, %v11854_v47  ;;  %v784_v32 = vlaneseq }
 0x114   : > { %v1602_v21 = vadd.s32 1, %v6430_v44  ;;  %vm1731_vm3 = vmand %vm12026_vm4, %vm7972_vm2 }
 0x115   : > { %v7953_v0 = vpop.permute.xlu0 %1218  ;;  %v1763_v43 = vsel %vm1731_vm3, 1, %v11854_v47  ;;  %vm12037_vm3 = vnez %v11782_v19  ;;  %v8063_v50 = vshrl.u32 %v784_v32, 7  ;;  %v12047_v32 = vmov 0 }
 0x116   : > { %12014 = vst [vmem:[#allocation91_spill] sm:$0xff] %v7953_v0  ;;  %1811 = vperm.xlu0 %6325, %v1758_v61   ;;  %v12021_v61 = vmov 0  ;;  %vm1634_vm7 = vcmp.ge.s32.totalorder %v1602_v21, 0  ;;  %vm1666_vm10 = vcmp.lt.s32.totalorder %v1602_v21, 16  ;;  %v12027_v21 = vmov 0 }
 0x117   : > { %2028 = vperm.xlu1 %6326, %v1969_v58   ;;  %v12022_v61 = vsel %vm7972_vm2, 4294967295, %v12021_v61  ;;  %v1605_v58 = vadd.s32 1, %v6431_v2  ;;  %vm7989_vm0 = vmand %vm1634_vm7, %vm1666_vm10  ;;  %vm12032_vm10 = vnez %v11774_v55  ;;  %v1973_v62 = vsel %vm12037_vm3, 1, %v11854_v47  ;;  %v8025_v55 = vld [vmem:[%s11202_s4] ss:$0 sm:$0xff] }
 0x118   : > { %v7965_v12 = vpop.permute.xlu1 %1227  ;;  %12023 = vst [vmem:[#allocation94_spill] sm:$0xff] %v12022_v61  ;;  %v12028_v21 = vsel %vm7989_vm0, 4294967295, %v12027_v21  ;;  %vm1730_vm7 = vmand %vm12032_vm10, %vm7989_vm0  ;;  %vm12038_vm10 = vnez %v11780_v8  ;;  %v6433_v8 = vld [vmem:[%s11199_s1 + $0x98] sm:$0xff] }
 0x119   : > { %12019 = vst [vmem:[#allocation93_spill] sm:$0xff] %v7965_v12  ;;  %12029 = vst [vmem:[#allocation96_spill] sm:$0xff] %v12028_v21  ;;  %vm1637_vm8 = vcmp.ge.s32.totalorder %v1605_v58, 0  ;;  %vm1669_vm15 = vcmp.lt.s32.totalorder %v1605_v58, 16  ;;  %v12034_v58 = vmov 0 }
 0x11a   : > { %2025 = vperm.xlu0 %6325, %v1968_v7   ;;  %vm8008_vm4 = vmand %vm1637_vm8, %vm1669_vm15 }
 0x11b   : > { %v7979_v44 = vpop.permute.xlu0 %1224  ;;  %1820 = vperm.xlu1 %6326, %v1761_v35   ;;  %v6432_v35 = vld [vmem:[%s11199_s1 + $0x80] sm:$0xff]  ;;  %v12035_v58 = vsel %vm8008_vm4, 4294967295, %v12034_v58  ;;  %vm1733_vm15 = vmand %vm12038_vm10, %vm8008_vm4 }
 0x11c   : > { %12024 = vst [vmem:[#allocation95_spill] sm:$0xff] %v7979_v44  ;;  %v1604_v2 = vadd.s32 1, %v6432_v35  ;;  %12036 = vst [vmem:[#allocation99_spill] sm:$0xff] %v12035_v58  ;;  %v1765_v49 = vsel %vm1733_vm15, 1, %v11854_v47  ;;  %vm12046_vm15 = vnez %v11923_v36  ;;  %v6435_v58 = vld [vmem:[%s11199_s1 + $0xa8] sm:$0xff] }
 0x11e   : > { %1817 = vperm.xlu0 %6325, %v1760_v27   ;;  %v7993_v7 = vpop.permute.xlu1 %1233  ;;  %vm1636_vm5 = vcmp.ge.s32.totalorder %v1604_v2, 0  ;;  %vm1668_vm2 = vcmp.lt.s32.totalorder %v1604_v2, 16 }
 0x11f   : > { %12030 = vst [vmem:[#allocation97_spill] sm:$0xff] %v7993_v7  ;;  %2034 = vperm.xlu1 %6326, %v1971_v20   ;;  %v1762_v20 = vsel %vm1730_vm7, 1, %v11854_v47  ;;  %vm8029_vm8 = vmand %vm1636_vm5, %vm1668_vm2  ;;  %v1607_v7 = vadd.s32 1, %v6433_v8  ;;  %vm12042_vm7 = vnez %v11789_v37  ;;  %vm12043_vm2 = vnez %v11786_v31 }
 0x120   : > { %v1972_v12 = vsel %vm12042_vm7, 1, %v11854_v47  ;;  %vm1732_vm5 = vmand %vm12043_vm2, %vm8029_vm8 }
 0x121   : > { %v8006_v27 = vpop.permute.xlu0 %1230  ;;  %vm1639_vm10 = vcmp.ge.s32.totalorder %v1607_v7, 0  ;;  %vm1671_vm7 = vcmp.lt.s32.totalorder %v1607_v7, 16 }
 0x122   : > { %12033 = vst [vmem:[#allocation98_spill] sm:$0xff] %v8006_v27  ;;  %2031 = vperm.xlu0 %6325, %v1970_v38   ;;  %v8012_v35 = vpop.permute.xlu1 %1351  ;;  %vm8077_vm2 = vmand %vm1639_vm10, %vm1671_vm7  ;;  %vm12052_vm7 = vnez %v11794_v1  ;;  %vm11450_vm10 = vcmp.lt.s32.totalorder %v8063_v50, 1  ;;  %v12058_v1 = vmov 0 }
 0x123   : > { %1826 = vperm.xlu1 %6326, %v1763_v43   ;;  %v6124_v38 = vpop.f32.mrf.mxu1  ;;  %v12039_v43 = vmov 0  ;;  %v12048_v32 = vsel %vm8077_vm2, 4294967295, %v12047_v32 }
 0x124   : > { %v12040_v43 = vsel %vm8029_vm8, 4294967295, %v12039_v43  ;;  %v602_v2 = vadd.f32 %v6124_v38, %v8025_v55  ;;  %12049 = vst [vmem:[#allocation103_spill] sm:$0xff] %v12048_v32 }
 0x125   : > { %v8027_v27 = vpop.permute.xlu0 %1348  ;;  %12041 = vst [vmem:[#allocation100_spill] sm:$0xff] %v12040_v43  ;;  %v593_v44 = vpop.f32.mrf.mxu1 }
 0x126   : > { %1823 = vperm.xlu0 %6325, %v1762_v20   ;;  %v8034_v19 = vpop.permute.xlu1 %1357  ;;  %v594_v0 = vadd.f32 %v8025_v55, %v593_v44  ;;  %v8048_v20 = vmax.f32 %v602_v2, 0.0  ;;  %v6434_v44 = vld [vmem:[%s11199_s1 + $0x90] sm:$0xff]  ;;  %v1764_v2 = vsel %vm1732_vm5, 1, %v11854_v47  ;;  %vm12053_vm5 = vnez %v11792_v53 }
 0x127   : > { %2040 = vperm.xlu1 %6326, %v1973_v62   ;;  %v6125_v38 = vpop.f32.mrf.mxu1  ;;  %v1606_v11 = vadd.s32 1, %v6434_v44 }
 0x128   : > { %12044 = vst [vmem:[#allocation101_spill] sm:$0xff] %v8048_v20  ;;  %v605_v62 = vadd.f32 %v6125_v38, %v8025_v55  ;;  %v8058_v57 = vmax.f32 %v594_v0, 0.0  ;;  %v2181_v38 = vsel %vm7663_vm1, 1, %v11854_v47  ;;  %v770_v23 = vrot.slane %v8048_v20, 7 }
 0x129   : > { %v8050_v8 = vpop.permute.xlu0 %1354  ;;  %v596_v31 = vpop.f32.mrf.mxu1  ;;  %vm12057_vm1 = vcmp.ge.s32.totalorder %v1606_v11, 0 }
 0x12a   : > { %2037 = vperm.xlu0 %6325, %v1972_v12   ;;  %v8053_v37 = vpop.permute.xlu1 %1363  ;;  %12045 = vst [vmem:[#allocation102_spill] sm:$0xff] %v8058_v57  ;;  %v8061_v54 = vmax.f32 %v605_v62, 0.0  ;;  %v6367_v12 = vld [vmem:[#allocation5 + $0x178] sm:$0xff]   ;;  %v597_v33 = vadd.f32 %v8025_v55, %v596_v31  ;;  %v1975_v62 = vsel %vm12052_vm7, 1, %v11854_v47  ;;  %vm12056_vm7 = vcmp.lt.s32.totalorder %v1606_v11, 16 }
 0x12b   : > { %1832 = vperm.xlu1 %6326, %v1765_v49   ;;  %v6128_v44 = vpop.f32.mrf.mxu1  ;;  %v2180_v49 = vsel %vm12046_vm15, 1, %v11854_v47  ;;  %5818 = vmatprep.subr.bf16.mxu1 %v6367_v12  ;;  %vm1735_vm15 = vmand %vm12053_vm5, %vm8077_vm2  ;;  %v12061_v30 = vrot.slane %v8058_v57, 7 }
 0x12c   : > { %v8084_v48 = vpack.c.bf16 %v8061_v54, %v8048_v20  ;;  %v618_v31 = vadd.f32 %v6128_v44, %v8025_v55  ;;  %v8090_v36 = vmax.f32 %v597_v33, 0.0  ;;  %vm8116_vm3 = vmand %vm12057_vm1, %vm12056_vm7  ;;  %vm12062_vm1 = vnez %v11802_v24 }
 0x12d   : > { %v8070_v0 = vpop.permute.xlu0 %1360  ;;  %v609_v34 = vpop.f32.mrf.mxu1  ;;  %v12059_v1 = vsel %vm8116_vm3, 4294967295, %v12058_v1  ;;  %vm11458_vm7 = vcmp.lt.s32.totalorder %v8063_v50, 7 }
 0x12e   : > { %12050 = vst [vmem:[#allocation104_spill] sm:$0xff] %v8084_v48  ;;  %1829 = vperm.xlu0 %6325, %v1764_v2   ;;  %v8087_v17 = vpop.permute.xlu1 %1369  ;;  %12051 = vst [vmem:[#allocation105_spill] sm:$0xff] %v8090_v36  ;;  %v610_v44 = vadd.f32 %v8025_v55, %v609_v34  ;;  %v769_v33 = vrot.slane %v8090_v36, 7  ;;  %v8106_v12 = vpack.c.bf16 %v8090_v36, %v8058_v57  ;;  %v12055_v48 = vrot.slane %v8061_v54, 7 }
 0x12f   : > { %2216 = vperm.xlu1 %6326, %v2181_v38   ;;  %v6129_v38 = vpop.f32.mrf.mxu1  ;;  %12060 = vst [vmem:[#allocation107_spill] sm:$0xff] %v12059_v1  ;;  %v8120_v43 = vmax.f32 %v618_v31, 0.0  ;;  %v1974_v31 = vsel %vm12062_vm1, 1, %v11854_v47  ;;  %vm12064_vm1 = vcmp.lt.s32.totalorder %v8063_v50, 1  ;;  %v12066_v24 = vrot.slane %v8090_v36, 1 }
 0x130   : > { %12054 = vst [vmem:[#allocation106_spill] sm:$0xff] %v8106_v12  ;;  %v799_v34 = vsel %vm11450_vm10, %v770_v23, %v12055_v48  ;;  %v621_v2 = vadd.f32 %v6129_v38, %v8025_v55  ;;  %v1609_v48 = vadd.s32 1, %v6435_v58  ;;  %v8132_v11 = vsel %vm11450_vm10, %v12061_v30, %v769_v33 }
 0x131   : > { %v8112_v7 = vpop.permute.xlu0 %1366  ;;  %v612_v63 = vpop.f32.mrf.mxu1  ;;  %v1767_v58 = vsel %vm1735_vm15, 1, %v11854_v47  ;;  %vm12063_vm10 = vnez %v11799_v16  ;;  %v12065_v38 = vrot.slane %v8048_v20, 1  ;;  %v12100_v20 = vld [vmem:[#allocation37_spill] sm:$0xff] }
 0x132   : > { %2213 = vperm.xlu0 %6325, %v2180_v49   ;;  %v8123_v12 = vpop.permute.xlu1 %1375  ;;  %v8137_v49 = vmax.f32 %v621_v2, 0.0  ;;  %vm1734_vm13 = vmand %vm12063_vm10, %vm8116_vm3  ;;  %v613_v30 = vadd.f32 %v8025_v55, %v612_v63  ;;  %v800_v2 = vsel %vm12064_vm1, %v769_v33, %v770_v23  ;;  %vm1641_vm15 = vcmp.ge.s32.totalorder %v1609_v48, 0 }
 0x133   : > { %2046 = vperm.xlu1 %6326, %v1975_v62   ;;  %v6132_v62 = vpop.f32.mrf.mxu1  ;;  %v8159_v53 = vsel %vm11458_vm7, %v12066_v24, %v12065_v38  ;;  %vm1673_vm5 = vcmp.lt.s32.totalorder %v1609_v48, 16  ;;  %v8173_v24 = vmax.f32 %v610_v44, 0.0  ;;  %v1766_v26 = vsel %vm1734_vm13, 1, %v11854_v47 }
 0x134   : > { %12067 = vst [vmem:[#allocation108_spill] sm:$0xff] %v8159_v53  ;;  %v8168_v63 = vpack.c.bf16 %v8137_v49, %v8120_v43  ;;  %v634_v23 = vadd.f32 %v6132_v62, %v8025_v55  ;;  %v8175_v38 = vmax.f32 %v613_v30, 0.0  ;;  %vm12069_vm1 = vnez %v11928_v6  ;;  %vm8193_vm7 = vmand %vm1641_vm15, %vm1673_vm5 }
 0x135   : > { %v8161_v32 = vpop.permute.xlu0 %1372  ;;  %v625_v18 = vpop.f32.mrf.mxu1  ;;  %vm1672_vm10 = vcmp.lt.s32.totalorder %v1608_v14, 16  ;;  %vm12077_vm15 = vnez %v11810_v51  ;;  %vm12078_vm5 = vnez %v11807_v45  ;;  %v12082_v51 = vmov 0 }
 0x136   : > { %12068 = vst [vmem:[#allocation109_spill] sm:$0xff] %v8168_v63  ;;  %2043 = vperm.xlu0 %6325, %v1974_v31   ;;  %v8171_v33 = vpop.permute.xlu1 %1381  ;;  %v626_v62 = vadd.f32 %v8025_v55, %v625_v18  ;;  %v2183_v31 = vsel %vm12069_vm1, 1, %v11854_v47  ;;  %v8189_v44 = vpack.c.bf16 %v8175_v38, %v8173_v24  ;;  %v8197_v16 = vmax.f32 %v634_v23, 0.0  ;;  %v8207_v21 = vpop.f32.mrf.mxu0  ;;  %vm1737_vm13 = vmand %vm12078_vm5, %vm8193_vm7 }
 0x137   : > { %1838 = vperm.xlu1 %6326, %v1767_v58   ;;  %v6133_v48 = vpop.f32.mrf.mxu1  ;;  %v12071_v58 = vmov 0  ;;  %vm12075_vm1 = vnez %v11933_v59  ;;  %v1977_v23 = vsel %vm12077_vm15, 1, %v11854_v47  ;;  %v8220_v59 = vpack.c.bf16 %v799_v34, %v800_v2 }
 0x138   : > { %12070 = vst [vmem:[#allocation110_spill] sm:$0xff] %v8189_v44  ;;  %v12072_v58 = vsel %vm8193_vm7, 4294967295, %v12071_v58  ;;  %v637_v63 = vadd.f32 %v6133_v48, %v8025_v55  ;;  %v2182_v44 = vsel %vm12075_vm1, 1, %v11854_v47  ;;  %vm12081_vm1 = vcmp.ge.s32.totalorder %v1608_v14, 0  ;;  %v529_v9 = vpop.f32.mrf.mxu0  ;;  %v12089_v14 = vld [vmem:[#allocation33_spill] sm:$0xff] }
 0x139   : > { %v8191_v30 = vpop.permute.xlu0 %1378  ;;  %12073 = vst [vmem:[#allocation111_spill] sm:$0xff] %v12072_v58  ;;  %v628_v6 = vpop.f32.mrf.mxu1  ;;  %12079 = vst [vmem:[#allocation114_spill] sm:$0xff] %v8220_v59  ;;  %vm12101_vm4 = vnez %v12100_v20  ;;  %v12103_v20 = vmov 0 }
 0x13a   : > { %1835 = vperm.xlu0 %6325, %v1766_v26   ;;  %v8200_v18 = vpop.permute.xlu1 %1387  ;;  %v8205_v1 = vmax.f32 %v637_v63, 0.0  ;;  %v6437_v26 = vld [vmem:[%s11199_s1 + $0xb8] sm:$0xff]  ;;  %v629_v48 = vadd.f32 %v8025_v55, %v628_v6  ;;  %vm8225_vm3 = vmand %vm12081_vm1, %vm1672_vm10  ;;  %vm12090_vm1 = vnez %v12089_v14  ;;  %vm12091_vm10 = vnez %v11814_v3 }
 0x13b   : > { %12074 = vst [vmem:[#allocation112_spill] sm:$0xff] %v8200_v18  ;;  %2222 = vperm.xlu1 %6326, %v2183_v31   ;;  %v1611_v31 = vadd.s32 1, %v6437_v26  ;;  %v6136_v63 = vpop.f32.mrf.mxu1  ;;  %v12083_v51 = vsel %vm8225_vm3, 4294967295, %v12082_v51  ;;  %v8235_v26 = vmax.f32 %v626_v62, 0.0  ;;  %v1976_v59 = vsel %vm12090_vm1, 1, %v11854_v47  ;;  %vm1736_vm15 = vmand %vm12091_vm10, %vm8225_vm3  ;;  %v12175_v18 = vld [vmem:[#allocation42_spill] sm:$0xff] }
 0x13c   : > { %12076 = vst [vmem:[#allocation113_spill] sm:$0xff] %v8205_v1  ;;  %12084 = vst [vmem:[#allocation116_spill] sm:$0xff] %v12083_v51  ;;  %v8231_v61 = vpack.c.bf16 %v8205_v1, %v8197_v16  ;;  %v8237_v6 = vmax.f32 %v629_v48, 0.0  ;;  %v650_v34 = vadd.f32 %v6136_v63, %v8025_v55  ;;  %v8244_v1 = vpop.f32.mrf.mxu0  ;;  %v1769_v62 = vsel %vm1737_vm13, 1, %v11854_v47  ;;  %v12093_v48 = vld [vmem:[#allocation54_spill] sm:$0xff]  ;;  %v12094_v63 = vld [vmem:[#allocation55_spill] sm:$0xff] }
 0x13d   : > { %v8222_v42 = vpop.permute.xlu0 %1384  ;;  %12087 = vst [vmem:[#allocation119_spill] sm:$0xff] %v8235_v26  ;;  %v641_v2 = vpop.f32.mrf.mxu1  ;;  %vm1643_vm2 = vcmp.ge.s32.totalorder %v1611_v31, 0  ;;  %vm1675_vm8 = vcmp.lt.s32.totalorder %v1611_v31, 16  ;;  %v2184_v14 = vsel %vm7759_vm12, 1, %v11854_v47  ;;  %v8282_v15 = vsel %vm12101_vm4, 1, %v11854_v47 }
 0x13e   : > { %12080 = vst [vmem:[#allocation115_spill] sm:$0xff] %v8222_v42  ;;  %12085 = vst [vmem:[#allocation117_spill] sm:$0xff] %v8231_v61  ;;  %2219 = vperm.xlu0 %6325, %v2182_v44   ;;  %v8233_v46 = vpop.permute.xlu1 %1393  ;;  %v642_v52 = vadd.f32 %v8025_v55, %v641_v2  ;;  %v8258_v44 = vpack.c.bf16 %v8237_v6, %v8235_v26  ;;  %v2185_v2 = vsel %vm7744_vm9, 1, %v11854_v47  ;;  %v6438_v61 = vld [vmem:[%s11199_s1 + $0xb0] sm:$0xff]  ;;  %v532_v58 = vpop.f32.mrf.mxu0  ;;  %v6368_v26 = vld [vmem:[#allocation5 + $0x138] sm:$0xff]   ;;  %vm12160_vm4 = vcmp.lt.s32.totalorder %v8063_v50, 1 }
 0x13f   : > { %12086 = vst [vmem:[#allocation118_spill] sm:$0xff] %v8233_v46  ;;  %12088 = vst [vmem:[#allocation120_spill] sm:$0xff] %v8237_v6  ;;  %2052 = vperm.xlu1 %6326, %v1977_v23   ;;  %v6137_v23 = vpop.f32.mrf.mxu1  ;;  %v12096_v46 = vld [vmem:[#allocation53_spill] sm:$0xff]  ;;  %v8284_v6 = vmax.f32 %v650_v34, 0.0  ;;  %v530_v31 = vadd.f32 %v8025_v55, %v529_v9 }
 0x140   : > { %12092 = vst [vmem:[#allocation121_spill] sm:$0xff] %v8258_v44  ;;  %v1610_v44 = vadd.s32 1, %v6438_v61  ;;  %v653_v42 = vadd.f32 %v6137_v23, %v8025_v55  ;;  %vm8296_vm13 = vmand %vm1643_vm2, %vm1675_vm8  ;;  %v6439_v34 = vld [vmem:[%s11199_s1 + $0xc8] sm:$0xff]  ;;  %v8313_v53 = vmax.f32 %v642_v52, 0.0  ;;  %vm12114_vm8 = vcmp.eq.s32.totalorder %v8027_v27, 1 }
 0x141   : > { %v8262_v45 = vpop.permute.xlu0 %1390  ;;  %12102 = vst [vmem:[#allocation53_spill] sm:$0xff] %v8284_v6  ;;  %v644_v61 = vpop.f32.mrf.mxu1  ;;  %v12104_v20 = vsel %vm8296_vm13, 4294967295, %v12103_v20  ;;  %v1613_v23 = vadd.s32 1, %v6439_v34  ;;  %v782_v3 = vrot.slane %v8284_v6, 7  ;;  %v12119_v27 = vmov 0  ;;  %vm12162_vm3 = vmmov %vm12160_vm4 }
 0x142   : > { %12095 = vst [vmem:[#allocation54_spill] sm:$0xff] %v8262_v45  ;;  %2049 = vperm.xlu0 %6325, %v1976_v59   ;;  %v8274_v41 = vpop.permute.xlu1 %1399  ;;  %v12098_v45 = vld [vmem:[#allocation35_spill] sm:$0xff]  ;;  %v1768_v59 = vsel %vm1736_vm15, 1, %v11854_v47  ;;  %12105 = vst [vmem:[#allocation122_spill] sm:$0xff] %v12104_v20  ;;  %v8308_v51 = vmax.f32 %v653_v42, 0.0  ;;  %v12111_v42 = vld [vmem:[#allocation34_spill] sm:$0xff] }
 0x143   : > { %12097 = vst [vmem:[#allocation55_spill] sm:$0xff] %v8274_v41  ;;  %vm12099_vm5 = vnez %v12098_v45  ;;  %1844 = vperm.xlu1 %6326, %v1769_v62   ;;  %v645_v62 = vadd.f32 %v8025_v55, %v644_v61  ;;  %v8304_v45 = vpop.f32.mrf.mxu0  ;;  %12108 = vst [vmem:[#allocation125_spill] sm:$0xff] %v8313_v53  ;;  %vm12112_vm10 = vnez %v12111_v42  ;;  %vm12115_vm15 = vcmp.eq.s32.totalorder %v8012_v35, 1  ;;  %v12148_v20 = vld [vmem:[#allocation57_spill] sm:$0xff] }
 0x144   : > { %v1979_v25 = vsel %vm12099_vm5, 1, %v11854_v47  ;;  %12106 = vst [vmem:[#allocation123_spill] sm:$0xff] %v8308_v51  ;;  %v8329_v52 = vpack.c.bf16 %v8308_v51, %v8284_v6  ;;  %vm5170_vm2 = vmpackc.low %vm12115_vm15, %vm12114_vm8  ;;  %vm12117_vm1 = vcmp.lt.s32.totalorder %v1610_v44, 16  ;;  %vm12118_vm5 = vcmp.ge.s32.totalorder %v1610_v44, 0 }
 0x145   : > { %v8311_v41 = vpop.permute.xlu0 %1396  ;;  %v8315_v36 = vmax.f32 %v645_v62, 0.0  ;;  %v8317_v34 = vpop.f32.mrf.mxu0  ;;  %v533_v62 = vadd.f32 %v8025_v55, %v532_v58  ;;  %vm8348_vm12 = vmand %vm12118_vm5, %vm12117_vm1  ;;  %v12122_v35 = vrot.slane %v8308_v51, 7  ;;  %vm12123_vm15 = vcmp.lt.s32.totalorder %v8063_v50, 1 }
 0x146   : > { %12107 = vst [vmem:[#allocation124_spill] sm:$0xff] %v8311_v41  ;;  %1841 = vperm.xlu0 %6325, %v1768_v59   ;;  %v8320_v61 = vpop.permute.xlu1 %1405  ;;  %12113 = vst [vmem:[#allocation34_spill] sm:$0xff] %v8329_v52  ;;  %v6440_v59 = vld [vmem:[%s11199_s1 + $0xc0] sm:$0xff]  ;;  %v12120_v27 = vsel %vm8348_vm12, 4294967295, %v12119_v27  ;;  %5172 = vmatprep.mubr.msk.bf16.mxu1 %vm5170_vm2, %v8329_v52  ;;  %vm12128_vm2 = vcmp.eq.s32.totalorder %v12093_v48, 1  ;;  %vm12135_vm8 = vcmp.eq.s32.totalorder %v12094_v63, 1 }
 0x147   : > { %12109 = vst [vmem:[#allocation126_spill] sm:$0xff] %v8315_v36  ;;  %12110 = vst [vmem:[#allocation127_spill] sm:$0xff] %v8320_v61  ;;  %2228 = vperm.xlu1 %6326, %v2185_v2   ;;  %v1612_v61 = vadd.s32 1, %v6440_v59  ;;  %v8342_v41 = vpack.c.bf16 %v8315_v36, %v8313_v53  ;;  %v8344_v6 = vpop.f32.mrf.mxu0  ;;  %v787_v58 = vsel %vm12123_vm15, %v782_v3, %v12122_v35  ;;  %v8356_v2 = vmax.f32 %v530_v31, 0.0  ;;  %v6441_v59 = vld [vmem:[%s11199_s1 + $0xd8] sm:$0xff]  ;;  %v12139_v48 = vld [vmem:[#allocation36_spill] sm:$0xff] }
 0x148   : > { %12121 = vst [vmem:[#allocation129_spill] sm:$0xff] %v12120_v27  ;;  %v1615_v9 = vadd.s32 1, %v6441_v59  ;;  %v12126_v53 = vrot.slane %v8315_v36, 7  ;;  %vm12127_vm5 = vmmov %vm12123_vm15  ;;  %v541_v35 = vadd.f32 %v8244_v1, %v8025_v55  ;;  %vm12129_vm15 = vcmp.eq.s32.totalorder %v7626_v39, 1  ;;  %v6370_v59 = vld [vmem:[#allocation5 + $0x130] sm:$0xff]  }
 0x149   : > { %12116 = vst [vmem:[#allocation128_spill] sm:$0xff] %v8342_v41  ;;  %12124 = vst [vmem:[#allocation130_spill] sm:$0xff] %v8356_v2  ;;  %v8363_v44 = vpop.permute.xlu0 %1402  ;;  %v538_v41 = vadd.f32 %v8207_v21, %v8025_v55  ;;  %v548_v52 = vpop.f32.mrf.mxu0  ;;  %v8387_v1 = vmax.f32 %v533_v62, 0.0  ;;  %v6369_v62 = vld [vmem:[#allocation5 + $0x170] sm:$0xff]   ;;  %v12143_v42 = vmov 0  ;;  %v12161_v13 = vrot.slane %v8308_v51, 7 }
 0x14a   : > { %12125 = vst [vmem:[#allocation131_spill] sm:$0xff] %v8363_v44  ;;  %v788_v31 = vsel %vm12127_vm5, %v12126_v53, %v782_v3  ;;  %vm8377_vm1 = vmpackc.low %vm12129_vm15, %vm12128_vm2  ;;  %2225 = vperm.xlu0 %6325, %v2184_v14   ;;  %v8382_v21 = vpop.permute.xlu1 %1411  ;;  %v752_v53 = vrot.slane %v8356_v2, 7  ;;  %vm12134_vm5 = vcmp.eq.s32.totalorder %v12096_v46, 1  ;;  %vm12140_vm15 = vnez %v12139_v48  ;;  %v6442_v46 = vld [vmem:[%s11199_s1 + $0xd0] sm:$0xff] }
 0x14b   : > { %12132 = vst [vmem:[#allocation132_spill] sm:$0xff] %v8382_v21  ;;  %v8385_v3 = vpack.c.bf16 %v787_v58, %v788_v31  ;;  %vm8393_vm9 = vmpackc.low %vm12135_vm8, %vm12134_vm5  ;;  %2058 = vperm.xlu1 %6326, %v1979_v25   ;;  %v1614_v63 = vadd.s32 1, %v6442_v46  ;;  %v8410_v25 = vpop.f32.mrf.mxu0  ;;  %vm12141_vm8 = vcmp.lt.s32.totalorder %v1613_v23, 16  ;;  %vm12142_vm5 = vcmp.ge.s32.totalorder %v1613_v23, 0  ;;  %v12147_v46 = vld [vmem:[#allocation56_spill] sm:$0xff] }
 0x14c   : > { %vm12138_vm2 = vmand %vm12112_vm10, %vm8296_vm13  ;;  %v8421_v31 = vpack.c.bf16 %v8387_v1, %v8356_v2  ;;  %vm1647_vm10 = vcmp.ge.s32.totalorder %v1615_v9, 0  ;;  %v8434_v58 = vmax.f32 %v538_v41, 0.0  ;;  %v8436_v21 = vmax.f32 %v541_v35, 0.0  ;;  %v6443_v41 = vld [vmem:[%s11199_s1 + $0xe8] sm:$0xff] }
 0x14d   : > { %12133 = vst [vmem:[#allocation133_spill] sm:$0xff] %v8385_v3  ;;  %v1771_v14 = vsel %vm12138_vm2, 1, %v11854_v47  ;;  %vm8414_vm0 = vmand %vm12142_vm5, %vm12141_vm8  ;;  %vm1679_vm2 = vcmp.lt.s32.totalorder %v1615_v9, 16  ;;  %5175 = vmatmul.mubr.msk.bf16.vlgmr.msra.gmra.mxu1 %vm8377_vm1, %v8385_v3  ;;  %vm12149_vm8 = vcmp.eq.s32.totalorder %v8050_v8, 1  ;;  %vm12150_vm5 = vcmp.eq.s32.totalorder %v8034_v19, 1  ;;  %v8432_v23 = vpop.permute.xlu0 %1408  ;;  %v8438_v44 = vpop.f32.mrf.mxu0  ;;  %v12167_v9 = vld [vmem:[#allocation38_spill] sm:$0xff] }
 0x14e   : > { %v12144_v42 = vsel %vm8414_vm0, 4294967295, %v12143_v42  ;;  %12146 = vst [vmem:[#allocation134_spill] sm:$0xff] %v8421_v31  ;;  %vm5176_vm7 = vmpackc.low %vm12150_vm5, %vm12149_vm8  ;;  %5819 = vmatpush3.bf16.msra.mxu1 %v6368_v26  ;;  %2055 = vperm.xlu0 %6325, %v8282_v15   ;;  %v8441_v3 = vpop.permute.xlu1 %1417  ;;  %v2187_v8 = vsel %vm7771_vm11, 1, %v11854_v47  ;;  %vm12154_vm1 = vcmp.lt.s32.totalorder %v1612_v61, 16  ;;  %vm12155_vm8 = vcmp.ge.s32.totalorder %v1612_v61, 0 }
 0x14f   : > { %12145 = vst [vmem:[#allocation36_spill] sm:$0xff] %v12144_v42  ;;  %12151 = vst [vmem:[#allocation56_spill] sm:$0xff] %v8432_v23  ;;  %v12156_v19 = vmov 0  ;;  %5178 = vmatprep.mubr.msk.bf16.mxu1 %vm5176_vm7, %v8421_v31  ;;  %v1617_v26 = vadd.s32 1, %v6443_v41  ;;  %v12159_v15 = vrot.slane %v8387_v1, 7  ;;  %v818_v61 = vsel %vm12162_vm3, %v12161_v13, %v752_v53  ;;  %1850 = vperm.xlu1 %6326, %v1771_v14   ;;  %v6444_v13 = vld [vmem:[%s11199_s1 + $0xe0] sm:$0xff]  ;;  %v8479_v14 = vpop.f32.mrf.mxu0 }
 0x150   : > { %12152 = vst [vmem:[#allocation57_spill] sm:$0xff] %v8436_v21  ;;  %12153 = vst [vmem:[#allocation135_spill] sm:$0xff] %v8441_v3  ;;  %v6371_v3 = vld [vmem:[#allocation5 + $0x168] sm:$0xff]   ;;  %v12164_v41 = vmov 0  ;;  %5820 = vmatprep.subr.bf16.mxu1 %v6369_v62  ;;  %v754_v48 = vrot.slane %v8434_v58, 7  ;;  %v8497_v62 = vpack.c.bf16 %v8436_v21, %v8434_v58  ;;  %v546_v23 = vadd.f32 %v8025_v55, %v8317_v34  ;;  %v6445_v34 = vld [vmem:[%s11199_s1 + $0xf8] sm:$0xff] }
 0x151   : > { %vm8448_vm5 = vmand %vm12155_vm8, %vm12154_vm1  ;;  %v817_v35 = vsel %vm12160_vm4, %v752_v53, %v12159_v15  ;;  %v1616_v53 = vadd.s32 1, %v6444_v13  ;;  %v8489_v27 = vpop.permute.xlu0 %1414  ;;  %v12170_v13 = vld [vmem:[#allocation40_spill] sm:$0xff]  ;;  %v549_v36 = vadd.f32 %v8025_v55, %v548_v52  ;;  %v8504_v51 = vpop.f32.mrf.mxu0  ;;  %v6372_v15 = vld [vmem:[#allocation5 + $0x128] sm:$0xff]   ;;  %v1619_v52 = vadd.s32 1, %v6445_v34 }
 0x152   : > { %v12157_v19 = vsel %vm8448_vm5, 4294967295, %v12156_v19  ;;  %vm12163_vm7 = vmand %vm12140_vm15, %vm8348_vm12  ;;  %12169 = vst [vmem:[#allocation38_spill] sm:$0xff] %v8489_v27  ;;  %v8502_v2 = vpack.c.bf16 %v817_v35, %v818_v61  ;;  %5821 = vmatpush3.bf16.msra.mxu1 %v6370_v59  ;;  %v8506_v27 = vpop.permute.xlu1 %1423  ;;  %vm12177_vm8 = vcmp.eq.s32.totalorder %v12148_v20, 1  ;;  %vm12178_vm11 = vcmp.eq.s32.totalorder %v12147_v46, 1  ;;  %v6374_v42 = vld [vmem:[#allocation5 + $0x120] sm:$0xff]  }
 0x153   : > { %12158 = vst [vmem:[#allocation136_spill] sm:$0xff] %v12157_v19  ;;  %v1770_v31 = vsel %vm12163_vm7, 1, %v11854_v47  ;;  %vm8472_vm1 = vmand %vm1647_vm10, %vm1679_vm2  ;;  %vm12168_vm10 = vnez %v12167_v9  ;;  %vm12171_vm7 = vnez %v12170_v13  ;;  %5822 = vmatprep.subr.bf16.mxu1 %v6371_v3  ;;  %2234 = vperm.xlu1 %6326, %v2187_v8   ;;  %v2186_v59 = vsel %vm7808_vm6, 1, %v11854_v47  ;;  %v8532_v20 = vpop.f32.mrf.mxu0  ;;  %v6446_v3 = vld [vmem:[%s11199_s1 + $0xf0] sm:$0xff]  ;;  %v12230_v19 = vld [vmem:[#allocation45_spill] sm:$0xff] }
 0x154   : > { %v12165_v41 = vsel %vm8472_vm1, 4294967295, %v12164_v41  ;;  %12172 = vst [vmem:[#allocation40_spill] sm:$0xff] %v8497_v62  ;;  %12173 = vst [vmem:[#allocation138_spill] sm:$0xff] %v8502_v2  ;;  %1847 = vperm.xlu0 %6325, %v1770_v31   ;;  %v12179_v31 = vmov 0  ;;  %vm12181_vm2 = vcmp.lt.s32.totalorder %v1614_v63, 16  ;;  %vm12182_vm3 = vcmp.ge.s32.totalorder %v1614_v63, 0 }
 0x155   : > { %12166 = vst [vmem:[#allocation137_spill] sm:$0xff] %v12165_v41  ;;  %12174 = vst [vmem:[#allocation139_spill] sm:$0xff] %v8506_v27  ;;  %v12183_v35 = vmov 0  ;;  %v1618_v46 = vadd.s32 1, %v6446_v3  ;;  %v12188_v63 = vld [vmem:[#allocation39_spill] sm:$0xff]  ;;  %5181 = vmatmul.mubr.msk.bf16.gmra.mxu1 %vm8393_vm9, %v8502_v2  ;;  %v8547_v61 = vpop.permute.xlu0 %1420  ;;  %v8549_v34 = vmax.f32 %v546_v23, 0.0  ;;  %v8568_v10 = vpop.f32.mrf.mxu0 }
 0x156   : > { %vm8519_vm12 = vmpackc.low %vm12178_vm11, %vm12177_vm8  ;;  %vm12186_vm11 = vcmp.eq.s32.totalorder %v8070_v0, 1  ;;  %vm12187_vm8 = vcmp.eq.s32.totalorder %v8053_v37, 1  ;;  %12190 = vst [vmem:[#allocation140_spill] sm:$0xff] %v8547_v61  ;;  %vm12193_vm13 = vcmp.ge.s32.totalorder %v1617_v26, 0  ;;  %v12194_v3 = vmov 0  ;;  %5823 = vmatpush3.bf16.msra.mxu1 %v6372_v15  ;;  %v12211_v15 = vld [vmem:[#allocation44_spill] sm:$0xff] }
 0x157   : > { %v12180_v31 = vsel %vm8519_vm12, 4294967295, %v12179_v31  ;;  %vm8528_vm15 = vmand %vm12182_vm3, %vm12181_vm2  ;;  %vm12189_vm3 = vnez %v12188_v63  ;;  %12191 = vst [vmem:[#allocation141_spill] sm:$0xff] %v8549_v34  ;;  %vm12192_vm2 = vcmp.lt.s32.totalorder %v1617_v26, 16  ;;  %v8557_v37 = vmax.f32 %v549_v36, 0.0  ;;  %v8570_v26 = vpop.permute.xlu1 %1429  ;;  %v12203_v36 = vld [vmem:[#allocation41_spill] sm:$0xff]  ;;  %v6121_v9 = vpop.f32.mrf.mxu0  ;;  %v12216_v27 = vld [vmem:[#allocation48_spill] sm:$0xff] }
 0x158   : > { %v12184_v35 = vsel %vm8528_vm15, 4294967295, %v12183_v35  ;;  %vm5182_vm6 = vmpackc.low %vm12187_vm8, %vm12186_vm11  ;;  %v1981_v8 = vsel %vm12189_vm3, 1, %v11854_v47  ;;  %v12198_v0 = vrot.slane %v8436_v21, 7  ;;  %vm12199_vm11 = vcmp.lt.s32.totalorder %v8063_v50, 1  ;;  %2231 = vperm.xlu0 %6325, %v2186_v59   ;;  %12202 = vst [vmem:[#allocation144_spill] sm:$0xff] %v8570_v26  ;;  %v6373_v59 = vld [vmem:[#allocation5 + $0x160] sm:$0xff]  }
 0x159   : > { %12185 = vst [vmem:[#allocation42_spill] sm:$0xff] %v12184_v35  ;;  %vm8553_vm1 = vmand %vm12193_vm13, %vm12192_vm2  ;;  %5184 = vmatprep.mubr.msk.bf16.mxu1 %vm5182_vm6, %v8497_v62  ;;  %v12200_v63 = vrot.slane %v8387_v1, 7  ;;  %vm12204_vm13 = vnez %v12203_v36  ;;  %vm12206_vm8 = vcmp.lt.s32.totalorder %v1616_v53, 16  ;;  %vm12207_vm2 = vcmp.ge.s32.totalorder %v1616_v53, 0  ;;  %2064 = vperm.xlu1 %6326, %v1981_v8   ;;  %v12213_v8 = vld [vmem:[#allocation46_spill] sm:$0xff]  ;;  %v8603_v26 = vpop.permute.xlu0 %1426 }
 0x15a   : > { %v12195_v3 = vsel %vm8553_vm1, 4294967295, %v12194_v3  ;;  %12197 = vst [vmem:[#allocation143_spill] sm:$0xff] %v8557_v37  ;;  %v815_v39 = vsel %vm12199_vm11, %v754_v48, %v12198_v0  ;;  %vm12201_vm9 = vmmov %vm12199_vm11  ;;  %v1980_v62 = vsel %vm12204_vm13, 1, %v11854_v47  ;;  %vm12212_vm13 = vnez %v12211_v15  ;;  %5824 = vmatprep.subr.bf16.mxu1 %v6373_v59  ;;  %v6376_v15 = vld [vmem:[#allocation5 + $0x118] sm:$0xff]  }
 0x15b   : > { %12196 = vst [vmem:[#allocation142_spill] sm:$0xff] %v12195_v3  ;;  %v816_v23 = vsel %vm12201_vm9, %v12200_v63, %v754_v48  ;;  %vm12205_vm6 = vmand %vm12168_vm10, %vm8414_vm0  ;;  %v12208_v48 = vmov 0  ;;  %vm1651_vm9 = vcmp.ge.s32.totalorder %v1619_v52, 0  ;;  %vm1683_vm4 = vcmp.lt.s32.totalorder %v1619_v52, 16  ;;  %5825 = vmatpush3.bf16.msra.mxu1 %v6374_v42  ;;  %v6448_v3 = vld [vmem:[%s11198_s0] sm:$0xff] }
 0x15c   : > { %v1773_v0 = vsel %vm12205_vm6, 1, %v11854_v47  ;;  %vm8583_vm11 = vmand %vm12207_vm2, %vm12206_vm8  ;;  %v554_v53 = vadd.f32 %v8304_v45, %v8025_v55  ;;  %v557_v63 = vadd.f32 %v8344_v6, %v8025_v55  ;;  %vm12214_vm6 = vnez %v12213_v8  ;;  %12215 = vst [vmem:[#allocation44_spill] sm:$0xff] %v8603_v26  ;;  %2061 = vperm.xlu0 %6325, %v1980_v62   ;;  %v8618_v26 = vpop.permute.xlu1 %1435  ;;  %v12228_v62 = vld [vmem:[#allocation43_spill] sm:$0xff] }
 0x15d   : > { %v12209_v48 = vsel %vm8583_vm11, 4294967295, %v12208_v48  ;;  %v8601_v36 = vpack.c.bf16 %v815_v39, %v816_v23  ;;  %v756_v61 = vrot.slane %v8549_v34, 7  ;;  %vm12217_vm2 = vnez %v12216_v27  ;;  %v12219_v39 = vld [vmem:[#allocation58_spill] sm:$0xff]  ;;  %v12220_v23 = vld [vmem:[#allocation59_spill] sm:$0xff]  ;;  %12221 = vst [vmem:[#allocation48_spill] sm:$0xff] %v8618_v26  ;;  %vm12222_vm12 = vmmov %vm8448_vm5  ;;  %1856 = vperm.xlu1 %6326, %v1773_v0  }
 0x15e   : > { %12210 = vst [vmem:[#allocation145_spill] sm:$0xff] %v12209_v48  ;;  %v8613_v6 = vpack.c.bf16 %v8557_v37, %v8549_v34  ;;  %v589_v2 = vadd.f32 %v6121_v9, %v8025_v55  ;;  %vm12223_vm10 = vmand %vm12171_vm7, %vm12222_vm12  ;;  %v2189_v34 = vsel %vm7812_vm14, 1, %v11854_v47  ;;  %v12224_v9 = vmov 0  ;;  %v6375_v0 = vld [vmem:[#allocation5 + $0x158] sm:$0xff]  }
 0x15f   : > { %v1772_v45 = vsel %vm12223_vm10, 1, %v11854_v47  ;;  %vm8631_vm5 = vmand %vm1651_vm9, %vm1683_vm4  ;;  %vm12227_vm8 = vnez %v11974_v22  ;;  %vm12229_vm7 = vnez %v12228_v62  ;;  %vm12231_vm10 = vnez %v12230_v19  ;;  %v8687_v19 = vpop.permute.xlu0 %1432  ;;  %5826 = vmatprep.subr.bf16.mxu1 %v6375_v0  ;;  %v12264_v0 = vld [vmem:[#allocation51_spill] sm:$0xff] }
 0x160   : > { %12218 = vst [vmem:[#allocation46_spill] sm:$0xff] %v8613_v6  ;;  %v12225_v9 = vsel %vm8631_vm5, 4294967295, %v12224_v9  ;;  %v2188_v13 = vsel %vm12227_vm8, 1, %v11854_v47  ;;  %v1983_v59 = vsel %vm12229_vm7, 1, %v11854_v47  ;;  %v8644_v5 = vsel %vm12231_vm10, 1, %v11854_v47  ;;  %12247 = vst [vmem:[#allocation147_spill] sm:$0xff] %v8687_v19  ;;  %1853 = vperm.xlu0 %6325, %v1772_v45   ;;  %v8702_v35 = vpop.permute.xlu1 %1441  ;;  %5827 = vmatpush3.bf16.msra.mxu1 %v6376_v15 }
 0x161   : > { %12226 = vst [vmem:[#allocation58_spill] sm:$0xff] %v12225_v9  ;;  %vm12232_vm4 = vnez %v12175_v18  ;;  %vm12233_vm9 = vnez %v12165_v41  ;;  %vm12235_vm14 = vcmp.lt.s32.totalorder %v1618_v46, 16  ;;  %vm12236_vm12 = vcmp.ge.s32.totalorder %v1618_v46, 0  ;;  %12253 = vst [vmem:[#allocation149_spill] sm:$0xff] %v8702_v35  ;;  %v12260_v45 = vld [vmem:[#allocation50_spill] sm:$0xff]  ;;  %2240 = vperm.xlu1 %6326, %v2189_v34   ;;  %v12267_v15 = vld [vmem:[#allocation63_spill] sm:$0xff] }
 0x162   : > { %vm12234_vm3 = vmand %vm12232_vm4, %vm12233_vm9  ;;  %v12237_v52 = vmov 0  ;;  %vm12240_vm7 = vcmp.eq.s32.totalorder %v8112_v7, 1  ;;  %vm12241_vm10 = vcmp.eq.s32.totalorder %v8087_v17, 1  ;;  %v8682_v17 = vmax.f32 %v554_v53, 0.0  ;;  %v6377_v34 = vld [vmem:[#allocation5 + $0x150] sm:$0xff]  }
 0x163   : > { %v8652_v42 = vsel %vm12234_vm3, 1, %v11854_v47  ;;  %vm8656_vm8 = vmand %vm12236_vm12, %vm12235_vm14  ;;  %vm12243_vm12 = vnez %v11996_v28  ;;  %vm12244_vm14 = vnez %v12003_v56  ;;  %vm12246_vm3 = vnez %v12180_v31  ;;  %v8762_v48 = vpop.permute.xlu0 %1438  ;;  %5828 = vmatprep.subr.bf16.mxu1 %v6377_v34 }
 0x164   : > { %v12238_v52 = vsel %vm8656_vm8, 4294967295, %v12237_v52  ;;  %vm5188_vm0 = vmpackc.low %vm12241_vm10, %vm12240_vm7  ;;  %v8675_v46 = vsel %vm12243_vm12, 1, %v11854_v47  ;;  %v8680_v7 = vsel %vm12244_vm14, 1, %v11854_v47  ;;  %12245 = vst [vmem:[#allocation146_spill] sm:$0xff] %v8682_v17  ;;  %5187 = vmatmul.mubr.msk.bf16.gmra.mxu1 %vm12246_vm3, %v8601_v36  ;;  %v8689_v62 = vmax.f32 %v557_v63, 0.0  ;;  %v12254_v63 = vld [vmem:[#allocation47_spill] sm:$0xff]  ;;  %2237 = vperm.xlu0 %6325, %v2188_v13  }
 0x165   : > { %12239 = vst [vmem:[#allocation59_spill] sm:$0xff] %v12238_v52  ;;  %vm12242_vm4 = vmand %vm12212_vm13, %vm8528_vm15  ;;  %5190 = vmatprep.mubr.msk.bf16.mxu1 %vm5188_vm0, %v8613_v6  ;;  %v8692_v28 = vmax.f32 %v589_v2, 0.0  ;;  %v12249_v22 = vrot.slane %v8557_v37, 7  ;;  %vm12250_vm13 = vcmp.lt.s32.totalorder %v8063_v50, 1  ;;  %v12251_v53 = vrot.slane %v8436_v21, 7  ;;  %v12256_v2 = vld [vmem:[#allocation49_spill] sm:$0xff]  ;;  %v8772_v21 = vpop.permute.xlu1 %1784  ;;  %2070 = vperm.xlu1 %6326, %v1983_v59  }
 0x166   : > { %v8670_v18 = vsel %vm12242_vm4, 1, %v11854_v47  ;;  %12248 = vst [vmem:[#allocation148_spill] sm:$0xff] %v8689_v62  ;;  %vm12252_vm7 = vmmov %vm12250_vm13  ;;  %vm12255_vm10 = vnez %v12254_v63  ;;  %vm12257_vm0 = vnez %v12256_v2  ;;  %v12268_v2 = vld [vmem:[#allocation64_spill] sm:$0xff]  ;;  %v758_v63 = vrot.slane %v8682_v17, 7  ;;  %v6447_v13 = vld [vmem:[%s11198_s0 + $0x8] sm:$0xff] }
 0x167   : > { %v813_v56 = vsel %vm12250_vm13, %v756_v61, %v12249_v22  ;;  %v814_v31 = vsel %vm12252_vm7, %v12251_v53, %v756_v61  ;;  %v8707_v6 = vsel %vm12255_vm10, 1, %v11854_v47  ;;  %v8712_v41 = vsel %vm12257_vm0, 1, %v11854_v47  ;;  %vm12258_vm4 = vmand %vm12214_vm6, %vm8553_vm1  ;;  %12270 = vst [vmem:[#allocation63_spill] sm:$0xff] %v8762_v48  ;;  %v6380_v59 = vld [vmem:[#allocation5 + $0x108] sm:$0xff]   ;;  %v6383_v52 = vld [vmem:[#allocation5 + $0x140] sm:$0xff]  }
 0x168   : > { %v8720_v22 = vsel %vm12258_vm4, 1, %v11854_v47  ;;  %vm12259_vm3 = vmand %vm12217_vm2, %vm8583_vm11  ;;  %vm12261_vm13 = vnez %v12260_v45  ;;  %vm12262_vm6 = vnez %v12009_v4  ;;  %vm12263_vm4 = vnez %v12016_v60  ;;  %v6378_v4 = vld [vmem:[#allocation5 + $0x110] sm:$0xff]   ;;  %2067 = vperm.xlu0 %6325, %v8644_v5  }
 0x169   : > { %v8728_v61 = vsel %vm12259_vm3, 1, %v11854_v47  ;;  %v8738_v8 = vsel %vm12262_vm6, 1, %v11854_v47  ;;  %v8743_v27 = vsel %vm12263_vm4, 1, %v11854_v47  ;;  %vm12265_vm2 = vnez %v12264_v0  ;;  %vm12274_vm10 = vmand %vm12261_vm13, %vm8631_vm5  ;;  %5829 = vmatpush3.bf16.msra.mxu1 %v6378_v4  ;;  %1862 = vperm.xlu1 %6326, %v8652_v42   ;;  %v12287_v5 = vld [vmem:[#allocation66_spill] sm:$0xff]  ;;  %v6384_v42 = vld [vmem:[#allocation5 + $0x100] sm:$0xff]  }
 0x16a   : > { %v8748_v53 = vsel %vm12265_vm2, 1, %v11854_v47  ;;  %vm12266_vm3 = vnez %v11883_v29  ;;  %v562_v60 = vadd.f32 %v8025_v55, %v8438_v44  ;;  %v8760_v0 = vpack.c.bf16 %v813_v56, %v814_v31  ;;  %v12272_v56 = vld [vmem:[#allocation52_spill] sm:$0xff]  ;;  %v8822_v29 = vpop.permute.xlu0 %1781 }
 0x16b   : > { %vm1746_vm0 = vmand %vm12266_vm3, %vm8656_vm8  ;;  %v8767_v35 = vpack.c.bf16 %v8689_v62, %v8682_v17  ;;  %v565_v19 = vadd.f32 %v8025_v55, %v8504_v51  ;;  %vm12273_vm7 = vnez %v12272_v56  ;;  %v8785_v31 = vsel %vm12274_vm10, 1, %v11854_v47 }
 0x16c   : > { %12269 = vst [vmem:[#allocation50_spill] sm:$0xff] %v8760_v0  ;;  %v8777_v44 = vsel %vm12273_vm7, 1, %v11854_v47  ;;  %v8793_v51 = vsel %vm1746_vm0, 1, %v11854_v47  ;;  %v8798_v34 = vadd.s32 1, %v6447_v13  ;;  %vm12275_vm6 = vcmp.eq.s32.totalorder %v12220_v23, 1  ;;  %v6379_v13 = vld [vmem:[#allocation5 + $0x148] sm:$0xff]   ;;  %1859 = vperm.xlu0 %6325, %v8670_v18  }
 0x16d   : > { %12271 = vst [vmem:[#allocation64_spill] sm:$0xff] %v8767_v35  ;;  %vm12276_vm10 = vcmp.eq.s32.totalorder %v12219_v39, 1  ;;  %v8810_v56 = vadd.s32 1, %v6448_v3  ;;  %vm12277_vm0 = vcmp.eq.s32.totalorder %v8161_v32, 1  ;;  %vm12278_vm3 = vcmp.eq.s32.totalorder %v8123_v12, 1  ;;  %5830 = vmatprep.subr.bf16.mxu1 %v6379_v13  ;;  %2246 = vperm.xlu1 %6326, %v8675_v46   ;;  %v12300_v18 = vld [vmem:[#allocation108_spill] sm:$0xff] }
 0x16e   : > { %vm5191_vm13 = vmpackc.low %vm12276_vm10, %vm12275_vm6  ;;  %v772_v39 = vrot.slane %v8173_v24, 7  ;;  %v8819_v26 = vmax.f32 %v562_v60, 0.0  ;;  %v8824_v3 = vmax.f32 %v565_v19, 0.0  ;;  %v12280_v32 = vrot.slane %v8689_v62, 7  ;;  %5831 = vmatpush3.bf16.msra.mxu1 %v6380_v59  ;;  %v8867_v48 = vpop.permute.xlu0 %1787  ;;  %v12306_v46 = vld [vmem:[#allocation115_spill] sm:$0xff] }
 0x16f   : > { %vm5194_vm7 = vmpackc.low %vm12278_vm3, %vm12277_vm0  ;;  %5193 = vmatmul.mubr.msk.bf16.gmra.mxu1 %vm5191_vm13, %v8760_v0  ;;  %vm12281_vm6 = vcmp.lt.s32.totalorder %v8063_v50, 1  ;;  %v12282_v4 = vrot.slane %v8557_v37, 7  ;;  %v12284_v23 = vrot.slane %v8058_v57, 7  ;;  %v12285_v45 = vrot.slane %v8692_v28, 7  ;;  %5832 = vmatprep.subr.bf16.mxu1 %v6383_v52 }
 0x170   : > { %12279 = vst [vmem:[#allocation150_spill] sm:$0xff] %v8819_v26  ;;  %5196 = vmatprep.mubr.msk.bf16.mxu1 %vm5194_vm7, %v8767_v35  ;;  %v811_v12 = vsel %vm12281_vm6, %v758_v63, %v12280_v32  ;;  %vm12283_vm10 = vmmov %vm12281_vm6  ;;  %v8845_v32 = vpop.permute.xlu1 %1790  ;;  %v8871_v37 = vpack.c.bf16 %v8824_v3, %v8819_v26  ;;  %v12296_v59 = vrot.slane %v8058_v57, 1  ;;  %vm12299_vm7 = vcmp.eq.s32.totalorder %v12267_v15, 1  ;;  %v12317_v15 = vld [vmem:[#allocation101_spill] sm:$0xff]  ;;  %v12320_v57 = vld [vmem:[#allocation70_spill] sm:$0xff]  ;;  %2243 = vperm.xlu0 %6325, %v8680_v7  }
 0x171   : > { %v812_v60 = vsel %vm12283_vm10, %v12282_v4, %v758_v63  ;;  %vm12286_vm13 = vmmov %vm12281_vm6  ;;  %v570_v63 = vadd.f32 %v8410_v25, %v8025_v55  ;;  %v773_v4 = vrot.slane %v8175_v38, 7  ;;  %v760_v25 = vrot.slane %v8819_v26, 7  ;;  %v12321_v26 = vld [vmem:[#allocation71_spill] sm:$0xff]  ;;  %2076 = vperm.xlu1 %6326, %v8707_v6  }
 0x172   : > { %v802_v19 = vsel %vm12286_vm13, %v12285_v45, %v12284_v23  ;;  %v573_v23 = vadd.f32 %v8479_v14, %v8025_v55  ;;  %v8859_v35 = vpack.c.bf16 %v811_v12, %v812_v60  ;;  %v6381_v45 = vld [vmem:[#allocation5 + $0x1f8] sm:$0xff]   ;;  %vm1453_vm6 = vcmp.eq.s32.totalorder %v8191_v30, 1  ;;  %v12290_v14 = vld [vmem:[#allocation112_spill] sm:$0xff]  ;;  %5833 = vmatpush3.bf16.msra.mxu1 %v6384_v42 }
 0x173   : > { %v8862_v9 = vpack.c.bf16 %v8132_v11, %v802_v19  ;;  %12291 = vst [vmem:[#allocation112_spill] sm:$0xff] %v8871_v37  ;;  %v12292_v12 = vld [vmem:[#allocation119_spill] sm:$0xff]  ;;  %v8878_v13 = vmax.f32 %v570_v63, 0.0  ;;  %vm12297_vm13 = vcmp.lt.s32.totalorder %v8063_v50, 7  ;;  %5930 = vmatprep.subr.bf16.mxu0 %v6381_v45  ;;  %vm12298_vm10 = vcmp.eq.s32.totalorder %v12268_v2, 1  ;;  %v12307_v2 = vld [vmem:[#allocation120_spill] sm:$0xff] }
 0x174   : > { %12288 = vst [vmem:[#allocation66_spill] sm:$0xff] %v8859_v35  ;;  %v776_v60 = vrot.slane %v12292_v12, 7  ;;  %v8876_v19 = vpop.permute.xlu1 %1796  ;;  %vm5197_vm3 = vmpackc.low %vm12299_vm7, %vm12298_vm10  ;;  %v8891_v52 = vmax.f32 %v573_v23, 0.0  ;;  %vm12302_vm0 = vcmp.lt.s32.totalorder %v8063_v50, 1  ;;  %v12303_v11 = vrot.slane %v8061_v54, 7  ;;  %2073 = vperm.xlu0 %6325, %v8712_v41  }
 0x175   : > { %12289 = vst [vmem:[#allocation151_spill] sm:$0xff] %v8862_v9  ;;  %12293 = vst [vmem:[#allocation119_spill] sm:$0xff] %v8878_v13  ;;  %v12294_v9 = vld [vmem:[#allocation105_spill] sm:$0xff]  ;;  %vm12305_vm7 = vcmp.eq.s32.totalorder %v8171_v33, 1  ;;  %v12309_v23 = vrot.slane %v8824_v3, 7  ;;  %v12310_v33 = vrot.slane %v8689_v62, 7  ;;  %v578_v6 = vadd.f32 %v8025_v55, %v8568_v10  ;;  %1868 = vperm.xlu1 %6326, %v8720_v22  }
 0x176   : > { %v12295_v17 = vrot.slane %v12294_v9, 1  ;;  %v797_v9 = vsel %vm12302_vm0, %v772_v39, %v773_v4  ;;  %vm5200_vm10 = vmpackc.low %vm12305_vm7, %vm1453_vm6  ;;  %vm2453_vm14 = vcmp.lt.s32.totalorder %v8798_v34, 16 }
 0x177   : > { %5199 = vmatmul.mubr.msk.bf16.gmra.mxu1 %vm5197_vm3, %v8859_v35  ;;  %vm12311_vm6 = vmmov %vm12302_vm0  ;;  %vm12315_vm3 = vcmp.lt.s32.totalorder %v8063_v50, 7 }
 0x178   : > { %v1570_v0 = vsel %vm12297_vm13, %v12296_v59, %v12295_v17  ;;  %vm12304_vm13 = vmmov %vm12302_vm0  ;;  %v809_v59 = vsel %vm12302_vm0, %v760_v25, %v12309_v23  ;;  %5202 = vmatprep.mubr.msk.bf16.mxu1 %vm5200_vm10, %v8871_v37  ;;  %v810_v30 = vsel %vm12311_vm6, %v12310_v33, %v760_v25  ;;  %v12322_v25 = vld [vmem:[#allocation123_spill] sm:$0xff]  ;;  %1865 = vperm.xlu0 %6325, %v8728_v61  }
 0x179   : > { %v8894_v63 = vpack.c.bf16 %v12300_v18, %v1570_v0  ;;  %v798_v17 = vsel %vm12304_vm13, %v12303_v11, %v772_v39  ;;  %v12308_v0 = vld [vmem:[#allocation53_spill] sm:$0xff]  ;;  %v8914_v39 = vpop.permute.xlu0 %1793  ;;  %v12313_v11 = vrot.slane %v8173_v24, 1  ;;  %v12314_v18 = vrot.slane %v8061_v54, 1  ;;  %vm12319_vm13 = vmmov %vm12315_vm3  ;;  %v580_v54 = vpop.f32.mrf.mxu0  ;;  %2252 = vperm.xlu1 %6326, %v8738_v8  }
 0x17a   : > { %v8921_v42 = vpack.c.bf16 %v797_v9, %v798_v17  ;;  %v1554_v9 = vrot.slane %v12322_v25, 1  ;;  %v12323_v17 = vld [vmem:[#allocation130_spill] sm:$0xff]  ;;  %v12327_v25 = vrot.slane %v8120_v43, 7  ;;  %vm12329_vm6 = vmmov %vm12302_vm0 }
 0x17b   : > { %12301 = vst [vmem:[#allocation105_spill] sm:$0xff] %v8894_v63  ;;  %v1567_v45 = vsel %vm12315_vm3, %v12314_v18, %v12313_v11  ;;  %v12316_v23 = vmov %v12314_v18  ;;  %v12318_v63 = vrot.slane %v12317_v15, 1  ;;  %v762_v11 = vrot.slane %v8878_v13, 7  ;;  %vm12348_vm2 = vmmov %vm12315_vm3 }
 0x17c   : > { %12312 = vst [vmem:[#allocation108_spill] sm:$0xff] %v8921_v42  ;;  %v8940_v42 = vpop.permute.xlu1 %1802  ;;  %v8949_v15 = vpack.c.bf16 %v8891_v52, %v8878_v13  ;;  %v12328_v33 = vmov %v12327_v25  ;;  %v12333_v13 = vrot.slane %v8175_v38, 1  ;;  %v12347_v41 = vrot.slane %v12323_v17, 1  ;;  %2249 = vperm.xlu0 %6325, %v8743_v27  }
 0x17d   : > { %v1568_v37 = vsel %vm12319_vm13, %v12318_v63, %v12316_v23  ;;  %v12326_v23 = vrot.slane %v8137_v49, 7  ;;  %vm12336_vm13 = vmmov %vm12315_vm3  ;;  %2082 = vperm.xlu1 %6326, %v8748_v53   ;;  %v12385_v27 = vrot.slane %v8434_v58, 1  ;;  %v12391_v53 = vld [vmem:[#allocation138_spill] sm:$0xff] }
 0x17e   : > { %v8943_v18 = vpack.c.bf16 %v1567_v45, %v1568_v37  ;;  %12325 = vst [vmem:[#allocation120_spill] sm:$0xff] %v8949_v15  ;;  %v796_v37 = vsel %vm12329_vm6, %v773_v4, %v12328_v33  ;;  %v8963_v45 = vpack.c.bf16 %v809_v59, %v810_v30  ;;  %v12334_v4 = vmov %v12333_v13  ;;  %vm12339_vm6 = vmmov %vm12302_vm0 }
 0x17f   : > { %v795_v7 = vsel %vm12302_vm0, %v12327_v25, %v12326_v23  ;;  %v8973_v23 = vpop.permute.xlu0 %1799  ;;  %v581_v25 = vadd.f32 %v8025_v55, %v580_v54  ;;  %v12335_v33 = vrot.slane %v8173_v24, 1  ;;  %v12337_v59 = vrot.slane %v12307_v2, 7  ;;  %v12341_v55 = vld [vmem:[#allocation113_spill] sm:$0xff] }
 0x180   : > { %12324 = vst [vmem:[#allocation115_spill] sm:$0xff] %v8943_v18  ;;  %12330 = vst [vmem:[#allocation53_spill] sm:$0xff] %v8963_v45  ;;  %v8965_v63 = vpack.c.bf16 %v795_v7, %v796_v37  ;;  %v12332_v18 = vrot.slane %v8120_v43, 1  ;;  %v12338_v7 = vrot.slane %v8137_v49, 7  ;;  %v779_v54 = vrot.slane %v12341_v55, 7  ;;  %v8995_v37 = vpop.permute.xlu1 %1808  ;;  %2079 = vperm.xlu0 %6325, %v8777_v44   ;;  %v12410_v44 = vld [vmem:[#allocation94_spill] sm:$0xff] }
 0x181   : > { %v1566_v10 = vsel %vm12336_vm13, %v12335_v33, %v12334_v4  ;;  %v793_v30 = vsel %vm12302_vm0, %v776_v60, %v12337_v59  ;;  %v1548_v24 = vrot.slane %v12307_v2, 1  ;;  %vm12342_vm13 = vcmp.eq.s32.totalorder %v7740_v40, 1  ;;  %v12344_v4 = vld [vmem:[#allocation74_spill] sm:$0xff]  ;;  %1874 = vperm.xlu1 %6326, %v8785_v31  }
 0x182   : > { %12331 = vst [vmem:[#allocation101_spill] sm:$0xff] %v8965_v63  ;;  %v1565_v62 = vsel %vm12315_vm3, %v12333_v13, %v12332_v18  ;;  %v794_v13 = vsel %vm12339_vm6, %v12338_v7, %v776_v60  ;;  %v12340_v18 = vld [vmem:[#allocation118_spill] sm:$0xff]  ;;  %vm12343_vm0 = vcmp.eq.s32.totalorder %v12287_v5, 1  ;;  %v12345_v60 = vld [vmem:[#allocation76_spill] sm:$0xff]  ;;  %v12346_v59 = vrot.slane %v12308_v0, 1 }
 0x183   : > { %vm5203_vm7 = vmpackc.low %vm12343_vm0, %vm12342_vm13  ;;  %v1587_v38 = vsel %vm12348_vm2, %v1554_v9, %v12347_v41  ;;  %v9013_v40 = vpack.c.bf16 %v1565_v62, %v1566_v10  ;;  %vm12350_vm13 = vcmp.eq.s32.totalorder %v12306_v46, 1  ;;  %vm12351_vm0 = vcmp.eq.s32.totalorder %v12290_v14, 1  ;;  %v12360_v10 = vld [vmem:[#allocation125_spill] sm:$0xff] }
 0x184   : > { %v1556_v7 = vsel %vm12315_vm3, %v12346_v59, %v1554_v9  ;;  %vm5206_vm10 = vmpackc.low %vm12351_vm0, %vm12350_vm13  ;;  %5205 = vmatmul.mubr.msk.bf16.gmra.mxu1 %vm5203_vm7, %v8963_v45  ;;  %v12352_v5 = vrot.slane %v8891_v52, 7  ;;  %v12354_v33 = vrot.slane %v8824_v3, 7  ;;  %v9028_v22 = vpack.c.bf16 %v793_v30, %v794_v13  ;;  %1871 = vperm.xlu0 %6325, %v8793_v51   ;;  %v6450_v51 = vld [vmem:[%s11198_s0 + $0x18] sm:$0xff] }
 0x185   : > { %12349 = vst [vmem:[#allocation70_spill] sm:$0xff] %v9013_v40  ;;  %vm12353_vm3 = vmmov %vm12339_vm6  ;;  %v12357_v62 = vrot.slane %v12292_v12, 1  ;;  %v12358_v46 = vrot.slane %v8137_v49, 1  ;;  %vm12359_vm13 = vcmp.lt.s32.totalorder %v8063_v50, 7  ;;  %v780_v41 = vrot.slane %v12360_v10, 7  ;;  %v9037_v40 = vpop.permute.xlu0 %1805  ;;  %5208 = vmatprep.mubr.msk.bf16.mxu1 %vm5206_vm10, %v8949_v15 }
 0x186   : > { %v807_v59 = vsel %vm12353_vm3, %v762_v11, %v12352_v5  ;;  %vm12355_vm2 = vmmov %vm12353_vm3  ;;  %12356 = vst [vmem:[#allocation71_spill] sm:$0xff] %v9028_v22  ;;  %v9039_v63 = vmax.f32 %v578_v6, 0.0  ;;  %v12362_v13 = vrot.slane %v8120_v43, 1  ;;  %v12364_v5 = vld [vmem:[#allocation54_spill] sm:$0xff]  ;;  %v1993_v6 = vpop.permute.xlu1 %1992  ;;  %v12366_v15 = vrot.slane %v8197_v16, 7 }
 0x187   : > { %v808_v9 = vsel %vm12355_vm2, %v12354_v33, %v762_v11  ;;  %v1563_v14 = vsel %vm12359_vm13, %v12358_v46, %v12357_v62  ;;  %v9043_v11 = vmax.f32 %v581_v25, 0.0  ;;  %v12361_v30 = vmov %v12358_v46  ;;  %vm12363_vm0 = vmmov %vm12359_vm13 }
 0x188   : > { %v1564_v33 = vsel %vm12363_vm0, %v12362_v13, %v12361_v30  ;;  %vm1457_vm3 = vcmp.eq.s32.totalorder %v12364_v5, 1  ;;  %v1551_v62 = vrot.slane %v12360_v10, 1  ;;  %vm12367_vm10 = vmmov %vm12355_vm2  ;;  %v9060_v49 = vpack.c.bf16 %v1587_v38, %v1556_v7 }
 0x189   : > { %v9054_v46 = vpack.c.bf16 %v1563_v14, %v1564_v33  ;;  %v791_v25 = vsel %vm12367_vm10, %v12366_v15, %v779_v54  ;;  %v1524_v43 = vrot.slane %v8387_v1, 1  ;;  %v764_v30 = vrot.slane %v9039_v63, 7  ;;  %vm12372_vm0 = vmmov %vm12355_vm2  ;;  %v1990_v8 = vpop.permute.xlu0 %1989 }
 0x18a   : > { %12368 = vst [vmem:[#allocation130_spill] sm:$0xff] %v9060_v49  ;;  %v9065_v13 = vpack.c.bf16 %v807_v59, %v808_v9  ;;  %vm2085_vm13 = vcmp.eq.s32.totalorder %v1993_v6, 1  ;;  %v765_v61 = vrot.slane %v9043_v11, 7  ;;  %v12370_v14 = vmov %v12366_v15  ;;  %v1999_v9 = vpop.permute.xlu1 %1998 }
 0x18b   : > { %12365 = vst [vmem:[#allocation123_spill] sm:$0xff] %v9054_v46  ;;  %v12371_v33 = vrot.slane %v12307_v2, 7  ;;  %vm12373_vm10 = vcmp.eq.s32.totalorder %v12321_v26, 1  ;;  %vm12374_vm7 = vcmp.eq.s32.totalorder %v12320_v57, 1  ;;  %v9086_v38 = vpack.c.bf16 %v9043_v11, %v9039_v63  ;;  %v12378_v2 = vld [vmem:[#allocation126_spill] sm:$0xff] }
 0x18c   : > { %12369 = vst [vmem:[#allocation118_spill] sm:$0xff] %v9065_v13  ;;  %vm9079_vm6 = vmpackc.low %vm12374_vm7, %vm12373_vm10  ;;  %v12379_v59 = vrot.slane %v12378_v2, 7  ;;  %vm12380_vm7 = vcmp.eq.s32.totalorder %v12340_v18, 1  ;;  %vm2084_vm2 = vcmp.eq.s32.totalorder %v1990_v8, 1  ;;  %v12383_v5 = vrot.slane %v8197_v16, 1  ;;  %v6386_v16 = vld [vmem:[#allocation5 + $0x1b0] sm:$0xff]  }
 0x18d   : > { %v792_v15 = vsel %vm12372_vm0, %v12371_v33, %v12370_v14  ;;  %vm9098_vm10 = vmpackc.low %vm12380_vm7, %vm1457_vm3  ;;  %v790_v33 = vsel %vm12372_vm0, %v779_v54, %v780_v41  ;;  %vm12384_vm3 = vcmp.lt.s32.totalorder %v8063_v50, 7  ;;  %v12387_v54 = vrot.slane %v12292_v12, 1  ;;  %5211 = vmatmul.mubr.msk.bf16.gmra.mxu1 %vm9079_vm6, %v9065_v13 }
 0x18e   : > { %v9088_v7 = vpack.c.bf16 %v791_v25, %v792_v15  ;;  %v789_v26 = vsel %vm12372_vm0, %v780_v41, %v12379_v59  ;;  %v6449_v25 = vld [vmem:[%s11202_s4] ss:$0 sm:$0xff]  ;;  %v1561_v18 = vsel %vm12384_vm3, %v1548_v24, %v12383_v5  ;;  %v6382_v15 = vld [vmem:[#allocation5 + $0x1b8] sm:$0xff]   ;;  %vm5266_vm7 = vmpackc.low %vm2085_vm13, %vm2084_vm2  ;;  %vm12390_vm2 = vcmp.eq.s32.totalorder %v8772_v21, 1  ;;  %5214 = vmatprep.mubr.msk.bf16.mxu1 %vm9098_vm10, %v9086_v38 }
 0x18f   : > { %v586_v14 = vadd.f32 %v6449_v25, %v8532_v20  ;;  %vm12386_vm4 = vmmov %vm12384_vm3  ;;  %v9120_v20 = vpack.c.bf16 %v789_v26, %v790_v33  ;;  %v6385_v59 = vld [vmem:[#allocation5 + $0x1f0] sm:$0xff]   ;;  %5268 = vmatprep.mubr.msk.bf16.mxu0 %vm5266_vm7, %v12391_v53  ;;  %vm2087_vm12 = vcmp.eq.s32.totalorder %v1999_v9, 1  ;;  %v12392_v6 = vrot.slane %v12323_v17, 1  ;;  %v1996_v25 = vpop.permute.xlu0 %1995 }
 0x190   : > { %12377 = vst [vmem:[#allocation113_spill] sm:$0xff] %v9088_v7  ;;  %v1585_v8 = vsel %vm12386_vm4, %v1524_v43, %v12385_v27  ;;  %vm12388_vm0 = vmmov %vm12384_vm3  ;;  %vm12389_vm3 = vcmp.eq.s32.totalorder %v8822_v29, 1  ;;  %v12394_v12 = vrot.slane %v8891_v52, 7  ;;  %v1552_v21 = vrot.slane %v12378_v2, 1  ;;  %v6387_v27 = vld [vmem:[#allocation5 + $0x1e8] sm:$0xff]   ;;  %v12485_v53 = vld [vmem:[#allocation150_spill] sm:$0xff] }
 0x191   : > { %v1562_v41 = vsel %vm12388_vm0, %v12387_v54, %v1548_v24  ;;  %vm5269_vm13 = vmpackc.low %vm12390_vm2, %vm12389_vm3  ;;  %v12401_v33 = vmov %v12383_v5  ;;  %vm12403_vm10 = vcmp.eq.s32.totalorder %v12345_v60, 1  ;;  %vm12404_vm2 = vcmp.eq.s32.totalorder %v12344_v4, 1  ;;  %v12408_v60 = vld [vmem:[#allocation124_spill] sm:$0xff] }
 0x192   : > { %vm12393_vm4 = vmmov %vm12388_vm0  ;;  %vm12395_vm0 = vcmp.lt.s32.totalorder %v8063_v50, 1  ;;  %v9142_v24 = vpack.c.bf16 %v1561_v18, %v1562_v41  ;;  %5271 = vmatmul.mubr.msk.bf16.vlgmr.msra.gmra.mxu0 %vm5269_vm13, %v9060_v49  ;;  %v9174_v5 = vmax.f32 %v586_v14, 0.0  ;;  %v2005_v18 = vpop.permute.xlu1 %2004  ;;  %v12413_v31 = vmov 0  ;;  %v12491_v49 = vld [vmem:[#allocation81_spill] sm:$0xff] }
 0x193   : > { %v1586_v26 = vsel %vm12393_vm4, %v12392_v6, %v1524_v43  ;;  %v806_v29 = vsel %vm12395_vm0, %v12394_v12, %v764_v30  ;;  %vm12397_vm6 = vmmov %vm12395_vm0  ;;  %v12398_v43 = vrot.slane %v12341_v55, 1  ;;  %vm2420_vm0 = vcmp.ge.s32.totalorder %v8810_v56, 0  ;;  %5931 = vmatpush3.bf16.msra.mxu0 %v6382_v15  ;;  %v12407_v55 = vld [vmem:[#allocation55_spill] sm:$0xff]  ;;  %v2002_v41 = vpop.permute.xlu0 %2001  ;;  %v12422_v12 = vld [vmem:[#allocation57_spill] sm:$0xff] }
 0x194   : > { %12396 = vst [vmem:[#allocation74_spill] sm:$0xff] %v9142_v24  ;;  %v805_v17 = vsel %vm12397_vm6, %v764_v30, %v765_v61  ;;  %vm12399_vm7 = vmmov %vm12393_vm4  ;;  %vm2452_vm6 = vcmp.lt.s32.totalorder %v8810_v56, 16  ;;  %v9182_v4 = vpack.c.bf16 %v1585_v8, %v1586_v26  ;;  %5932 = vmatprep.subr.bf16.mxu0 %v6385_v59  ;;  %v766_v54 = vrot.slane %v9174_v5, 7 }
 0x195   : > { %v1559_v1 = vsel %vm12399_vm7, %v12398_v43, %v1551_v62  ;;  %v12400_v2 = vmov %v12398_v43  ;;  %vm12402_vm3 = vmmov %vm12393_vm4  ;;  %vm2086_vm4 = vcmp.eq.s32.totalorder %v1996_v25, 1  ;;  %v9191_v15 = vpack.c.bf16 %v8692_v28, %v9174_v5  ;;  %v12423_v25 = vld [vmem:[#allocation141_spill] sm:$0xff]  ;;  %v12424_v43 = vld [vmem:[#allocation15_spill] sm:$0xff] }
 0x196   : > { %v1560_v57 = vsel %vm12402_vm3, %v12401_v33, %v12400_v2  ;;  %vm9169_vm13 = vmpackc.low %vm12404_vm2, %vm12403_vm10  ;;  %12409 = vst [vmem:[#allocation76_spill] sm:$0xff] %v9182_v4  ;;  %vm12411_vm2 = vnez %v12410_v44  ;;  %v9201_v9 = vpack.c.bf16 %v805_v17, %v806_v29  ;;  %v12417_v59 = vmov 0  ;;  %v9226_v56 = vpop.permute.xlu1 %2010  ;;  %v6389_v33 = vld [vmem:[#allocation5 + $0x1e0] sm:$0xff]  }
 0x197   : > { %vm5272_vm10 = vmpackc.low %vm2087_vm12, %vm2086_vm4  ;;  %v2195_v14 = vsel %vm12411_vm2, 1, %v11854_v47  ;;  %vm12412_vm12 = vcmp.ge.s32.totalorder %v8798_v34, 0  ;;  %v9203_v8 = vpack.c.bf16 %v1559_v1, %v1560_v57  ;;  %v12419_v34 = vrot.slane %v12308_v0, 1  ;;  %5933 = vmatpush3.bf16.msra.mxu0 %v6386_v16  ;;  %v12428_v0 = vld [vmem:[#allocation96_spill] sm:$0xff]  ;;  %v2008_v57 = vpop.permute.xlu0 %2007  ;;  %v12437_v16 = vld [vmem:[#allocation77_spill] sm:$0xff] }
 0x198   : > { %5274 = vmatprep.mubr.msk.bf16.mxu0 %vm5272_vm10, %v8601_v36  ;;  %vm9197_vm4 = vmand %vm12412_vm12, %vm2453_vm14  ;;  %12415 = vst [vmem:[#allocation125_spill] sm:$0xff] %v9201_v9  ;;  %v1526_v29 = vrot.slane %v12422_v12, 1  ;;  %v1527_v17 = vrot.slane %v12423_v25, 1  ;;  %2258 = vperm.xlu1 %6326, %v2195_v14   ;;  %vm12431_vm10 = vcmp.eq.s32.totalorder %v8845_v32, 1  ;;  %v12478_v25 = vld [vmem:[#allocation56_spill] sm:$0xff] }
 0x199   : > { %v12414_v31 = vsel %vm9197_vm4, 4294967295, %v12413_v31  ;;  %12416 = vst [vmem:[#allocation54_spill] sm:$0xff] %v9203_v8  ;;  %vm9211_vm3 = vmand %vm2420_vm0, %vm2452_vm6  ;;  %vm12425_vm0 = vnez %v12424_v43  ;;  %5934 = vmatprep.subr.bf16.mxu0 %v6387_v27  ;;  %vm12430_vm6 = vcmp.eq.s32.totalorder %v8867_v48, 1  ;;  %v2757_v2 = vsel %vm9197_vm4, 1, %v11854_v47  ;;  %5217 = vmatmul.mubr.msk.bf16.gmra.mxu1 %vm9169_vm13, %v9201_v9 }
 0x19a   : > { %v12418_v59 = vsel %vm9211_vm3, 4294967295, %v12417_v59  ;;  %vm12420_vm14 = vmmov %vm12399_vm7  ;;  %v12434_v48 = vrot.slane %v8692_v28, 7  ;;  %vm1252_vm13 = vcmp.eq.s32.totalorder %v12437_v16, 1  ;;  %v12441_v27 = vrot.slane %v8434_v58, 1 }
 0x19b   : > { %v1557_v6 = vsel %vm12420_vm14, %v1552_v21, %v12419_v34  ;;  %vm12421_vm12 = vmmov %vm12399_vm7  ;;  %vm12426_vm14 = vcmp.eq.s32.totalorder %v12408_v60, 1  ;;  %vm12429_vm7 = vnez %v12428_v0  ;;  %v9269_v60 = vpop.permute.xlu1 %2016  ;;  %v12443_v34 = vld [vmem:[#allocation127_spill] sm:$0xff]  ;;  %v9306_v43 = vpop.permute.xlu0 %2013 }
 0x19c   : > { %v1558_v26 = vsel %vm12421_vm12, %v1551_v62, %v1552_v21  ;;  %vm12427_vm12 = vcmp.eq.s32.totalorder %v12407_v55, 1  ;;  %v2194_v10 = vsel %vm12429_vm7, 1, %v11854_v47  ;;  %v2391_v62 = vadd.s32 1, %v6450_v51  ;;  %v6388_v21 = vld [vmem:[#allocation5 + $0x1a8] sm:$0xff]   ;;  %vm5275_vm8 = vmpackc.low %vm12431_vm10, %vm12430_vm6  ;;  %v12438_v55 = vld [vmem:[#allocation78_spill] sm:$0xff]  ;;  %2792 = vperm.xlu1 %6326, %v2757_v2  }
 0x19d   : > { %vm5218_vm2 = vmpackc.low %vm12427_vm12, %vm12426_vm14  ;;  %v9242_v1 = vpack.c.bf16 %v1557_v6, %v1558_v26  ;;  %vm12432_vm14 = vcmp.eq.s32.totalorder %v2002_v41, 1  ;;  %vm12433_vm12 = vcmp.eq.s32.totalorder %v2005_v18, 1  ;;  %5277 = vmatmul.mubr.msk.bf16.gmra.mxu0 %vm5275_vm8, %v9182_v4  ;;  %vm12435_vm10 = vcmp.lt.s32.totalorder %v8063_v50, 1  ;;  %2255 = vperm.xlu0 %6325, %v2194_v10   ;;  %v12439_v18 = vld [vmem:[#allocation50_spill] sm:$0xff]  ;;  %v12444_v6 = vld [vmem:[#allocation131_spill] sm:$0xff] }
 0x19e   : > { %vm5278_vm7 = vmpackc.low %vm12433_vm12, %vm12432_vm14  ;;  %5220 = vmatprep.mubr.msk.bf16.mxu1 %vm5218_vm2, %v9191_v15  ;;  %v803_v32 = vsel %vm12435_vm10, %v766_v54, %v12434_v48  ;;  %vm1251_vm5 = vcmp.eq.s32.totalorder %v12438_v55, 1  ;;  %vm12440_vm8 = vcmp.lt.s32.totalorder %v8063_v50, 7  ;;  %vm2423_vm14 = vcmp.ge.s32.totalorder %v2391_v62, 0  ;;  %5935 = vmatpush3.bf16.msra.mxu0 %v6388_v21  ;;  %v12446_v26 = vld [vmem:[#allocation13_spill] sm:$0xff]  ;;  %v6451_v21 = vld [vmem:[%s11198_s0 + $0x10] sm:$0xff] }
 0x19f   : > { %vm12436_vm6 = vmmov %vm12435_vm10  ;;  %5280 = vmatprep.mubr.msk.bf16.mxu0 %vm5278_vm7, %v12439_v18  ;;  %v1583_v14 = vsel %vm12440_vm8, %v1526_v29, %v1527_v17  ;;  %vm2455_vm12 = vcmp.lt.s32.totalorder %v2391_v62, 16  ;;  %vm1461_vm10 = vcmp.eq.s32.totalorder %v12444_v6, 1  ;;  %5936 = vmatprep.subr.bf16.mxu0 %v6389_v33  ;;  %v2390_v2 = vadd.s32 1, %v6451_v21  ;;  %v12452_v33 = vld [vmem:[#allocation146_spill] sm:$0xff]  ;;  %v9316_v16 = vpop.permute.xlu1 %2022 }
 0x1a0   : > { %v804_v30 = vsel %vm12436_vm6, %v765_v61, %v766_v54  ;;  %vm12442_vm2 = vmmov %vm12440_vm8  ;;  %v2756_v61 = vsel %vm9211_vm3, 1, %v11854_v47  ;;  %v6390_v54 = vld [vmem:[#allocation5 + $0x1a0] sm:$0xff]   ;;  %vm12447_vm8 = vnez %v12446_v26  ;;  %v11624_v48 = vrot.slane %v12452_v33, 1  ;;  %v6394_v21 = vld [vmem:[#allocation5 + $0x190] sm:$0xff]  }
 0x1a1   : > { %v1584_v41 = vsel %vm12442_vm2, %v12441_v27, %v1526_v29  ;;  %vm12445_vm6 = vmand %vm9197_vm4, %vm12425_vm0  ;;  %v9294_v12 = vpack.c.bf16 %v803_v32, %v804_v30  ;;  %v6391_v29 = vld [vmem:[#allocation5 + $0x1d8] sm:$0xff]   ;;  %2789 = vperm.xlu0 %6325, %v2756_v61   ;;  %v12454_v55 = vmov 0  ;;  %v12461_v61 = vld [vmem:[#allocation80_spill] sm:$0xff] }
 0x1a2   : > { %v2549_v58 = vsel %vm12445_vm6, 1, %v11854_v47  ;;  %vm9300_vm7 = vmpackc.low %vm1252_vm13, %vm1251_vm5  ;;  %v9308_v51 = vpack.c.bf16 %v1583_v14, %v1584_v41  ;;  %v12453_v32 = vld [vmem:[#allocation143_spill] sm:$0xff]  ;;  %vm12456_vm6 = vcmp.eq.s32.totalorder %v12443_v34, 1  ;;  %5937 = vmatpush3.bf16.msra.mxu0 %v6390_v54  ;;  %vm12462_vm13 = vcmp.eq.s32.totalorder %v8914_v39, 1  ;;  %v6393_v54 = vld [vmem:[#allocation5 + $0x1d0] sm:$0xff]  }
 0x1a3   : > { %12448 = vst [vmem:[#allocation126_spill] sm:$0xff] %v9294_v12  ;;  %v1528_v30 = vrot.slane %v12453_v32, 1  ;;  %vm9320_vm0 = vmand %vm2423_vm14, %vm2455_vm12  ;;  %2584 = vperm.xlu1 %6326, %v2549_v58   ;;  %v6392_v27 = vld [vmem:[#allocation5 + $0x198] sm:$0xff]   ;;  %5223 = vmatmul.mubr.msk.bf16.gmra.mxu1 %vm9300_vm7, %v9294_v12  ;;  %v9353_v58 = vpop.permute.xlu0 %2019  ;;  %vm2422_vm12 = vcmp.ge.s32.totalorder %v2390_v2, 0  ;;  %v9360_v39 = vpop.permute.xlu1 %1814  ;;  %vm12469_vm7 = vcmp.lt.s32.totalorder %v8063_v50, 7  ;;  %v12477_v32 = vld [vmem:[#allocation132_spill] sm:$0xff] }
 0x1a4   : > { %12451 = vst [vmem:[#allocation55_spill] sm:$0xff] %v9308_v51  ;;  %v12455_v55 = vsel %vm9320_vm0, 4294967295, %v12454_v55  ;;  %vm9328_vm2 = vmpackc.low %vm12456_vm6, %vm1461_vm10  ;;  %v12460_v41 = vld [vmem:[#allocation79_spill] sm:$0xff]  ;;  %vm12463_vm10 = vcmp.eq.s32.totalorder %v8876_v19, 1  ;;  %5938 = vmatprep.subr.bf16.mxu0 %v6391_v29  ;;  %v12468_v19 = vld [vmem:[#allocation106_spill] sm:$0xff]  ;;  %vm12548_vm1 = vcmp.eq.s32.totalorder %v9360_v39, 1 }
 0x1a5   : > { %vm12459_vm5 = vmand %vm9211_vm3, %vm12447_vm8  ;;  %v12464_v34 = vld [vmem:[#allocation99_spill] sm:$0xff]  ;;  %vm12466_vm8 = vcmp.eq.s32.totalorder %v2008_v57, 1  ;;  %5226 = vmatprep.mubr.msk.bf16.mxu1 %vm9328_vm2, %v12468_v19  ;;  %v12475_v29 = vld [vmem:[#allocation100_spill] sm:$0xff]  ;;  %vm12494_vm3 = vcmp.eq.s32.totalorder %v8940_v42, 1 }
 0x1a6   : > { %v2548_v62 = vsel %vm12459_vm5, 1, %v11854_v47  ;;  %vm5281_vm6 = vmpackc.low %vm12463_vm10, %vm12462_vm13  ;;  %vm12465_vm4 = vnez %v12464_v34  ;;  %vm12467_vm5 = vcmp.eq.s32.totalorder %v9226_v56, 1  ;;  %vm2454_vm13 = vcmp.lt.s32.totalorder %v2390_v2, 16  ;;  %5939 = vmatpush3.bf16.msra.mxu0 %v6392_v27  ;;  %v6452_v14 = vld [vmem:[%s11198_s0 + $0x28] sm:$0xff]  ;;  %v12482_v2 = vld [vmem:[#allocation14_spill] sm:$0xff] }
 0x1a7   : > { %v2197_v6 = vsel %vm12465_vm4, 1, %v11854_v47  ;;  %vm5284_vm14 = vmpackc.low %vm12467_vm5, %vm12466_vm8  ;;  %5283 = vmatmul.mubr.msk.bf16.gmra.mxu0 %vm5281_vm6, %v9308_v51  ;;  %2581 = vperm.xlu0 %6325, %v2548_v62   ;;  %v1581_v56 = vsel %vm12469_vm7, %v1528_v30, %v11624_v48  ;;  %vm12471_vm6 = vcmp.eq.s32.totalorder %v12461_v61, 1  ;;  %vm12472_vm8 = vcmp.eq.s32.totalorder %v12460_v41, 1  ;;  %v6395_v27 = vld [vmem:[#allocation5 + $0x1c8] sm:$0xff]   ;;  %v9397_v41 = vpop.permute.xlu0 %1811  ;;  %v12569_v34 = vld [vmem:[#allocation91_spill] sm:$0xff] }
 0x1a8   : > { %5286 = vmatprep.mubr.msk.bf16.mxu0 %vm5284_vm14, %v8859_v35  ;;  %vm12470_vm10 = vmmov %vm12469_vm7  ;;  %2264 = vperm.xlu1 %6326, %v2197_v6   ;;  %vm12476_vm14 = vnez %v12475_v29  ;;  %vm1463_vm7 = vcmp.eq.s32.totalorder %v12478_v25, 1  ;;  %v2393_v62 = vadd.s32 1, %v6452_v14  ;;  %v6453_v6 = vld [vmem:[%s11198_s0 + $0x20] sm:$0xff]  ;;  %v12492_v29 = vld [vmem:[#allocation82_spill] sm:$0xff]  ;;  %v1537_v35 = vrot.slane %v9174_v5, 1 }
 0x1a9   : > { %v1582_v57 = vsel %vm12470_vm10, %v1527_v17, %v1528_v30  ;;  %vm9374_vm2 = vmpackc.low %vm12472_vm8, %vm12471_vm6  ;;  %v2196_v10 = vsel %vm12476_vm14, 1, %v11854_v47  ;;  %v2759_v17 = vsel %vm9320_vm0, 1, %v11854_v47  ;;  %v12479_v30 = vmov 0  ;;  %5940 = vmatprep.subr.bf16.mxu0 %v6393_v54  ;;  %v12484_v54 = vld [vmem:[#allocation148_spill] sm:$0xff]  ;;  %v12496_v25 = vld [vmem:[#allocation151_spill] sm:$0xff] }
 0x1aa   : > { %vm9388_vm10 = vmand %vm2422_vm12, %vm2454_vm13  ;;  %v9399_v61 = vpack.c.bf16 %v1581_v56, %v1582_v57  ;;  %vm12483_vm12 = vnez %v12482_v2  ;;  %v2392_v14 = vadd.s32 1, %v6453_v6  ;;  %v1530_v48 = vrot.slane %v12484_v54, 1  ;;  %v9412_v56 = vpop.permute.xlu1 %2028  ;;  %v12486_v57 = vld [vmem:[#allocation12_spill] sm:$0xff]  ;;  %5941 = vmatpush3.bf16.msra.mxu0 %v6394_v21  ;;  %v6396_v54 = vld [vmem:[#allocation5 + $0x188] sm:$0xff]  }
 0x1ab   : > { %v12480_v30 = vsel %vm9388_vm10, 4294967295, %v12479_v30  ;;  %2261 = vperm.xlu0 %6325, %v2196_v10   ;;  %vm12487_vm5 = vnez %v12486_v57  ;;  %vm12488_vm14 = vcmp.eq.s32.totalorder %v12477_v32, 1  ;;  %v2758_v10 = vsel %vm9388_vm10, 1, %v11854_v47  ;;  %5229 = vmatmul.mubr.msk.bf16.gmra.mxu1 %vm9374_vm2, %v12496_v25  ;;  %v6397_v21 = vld [vmem:[#allocation5 + $0x1c0] sm:$0xff]   ;;  %v9448_v42 = vpop.permute.xlu0 %2025  ;;  %v12509_v6 = vld [vmem:[#allocation135_spill] sm:$0xff] }
 0x1ac   : > { %12481 = vst [vmem:[#allocation124_spill] sm:$0xff] %v9399_v61  ;;  %vm9422_vm4 = vmpackc.low %vm12488_vm14, %vm1463_vm7  ;;  %2798 = vperm.xlu1 %6326, %v2759_v17   ;;  %vm12493_vm13 = vcmp.eq.s32.totalorder %v8973_v23, 1  ;;  %5942 = vmatprep.subr.bf16.mxu0 %v6395_v27  ;;  %vm12497_vm7 = vcmp.eq.s32.totalorder %v9306_v43, 1  ;;  %vm12498_vm6 = vcmp.eq.s32.totalorder %v9269_v60, 1  ;;  %v12499_v23 = vld [vmem:[#allocation104_spill] sm:$0xff]  ;;  %v12500_v43 = vrot.slane %v12485_v53, 1 }
 0x1ad   : > { %vm5287_vm11 = vmpackc.low %vm12494_vm3, %vm12493_vm13  ;;  %vm2425_vm3 = vcmp.ge.s32.totalorder %v2393_v62, 0  ;;  %vm2457_vm13 = vcmp.lt.s32.totalorder %v2393_v62, 16  ;;  %5232 = vmatprep.mubr.msk.bf16.mxu1 %vm9422_vm4, %v12499_v23  ;;  %vm12501_vm2 = vcmp.lt.s32.totalorder %v8063_v50, 7  ;;  %v12502_v17 = vrot.slane %v12452_v33, 1  ;;  %v12518_v62 = vld [vmem:[#allocation119_spill] sm:$0xff] }
 0x1ae   : > { %vm12495_vm14 = vmand %vm9320_vm0, %vm12483_vm12  ;;  %v9455_v26 = vpop.permute.xlu1 %1820  ;;  %v1579_v60 = vsel %vm12501_vm2, %v1530_v48, %v12500_v43  ;;  %vm2456_vm12 = vcmp.lt.s32.totalorder %v2392_v14, 16  ;;  %vm12505_vm4 = vcmp.eq.s32.totalorder %v12491_v49, 1  ;;  %5943 = vmatpush3.bf16.msra.mxu0 %v6396_v54  ;;  %v12511_v49 = vld [vmem:[#allocation103_spill] sm:$0xff]  ;;  %v12516_v43 = vmov 0 }
 0x1af   : > { %v2551_v32 = vsel %vm12495_vm14, 1, %v11854_v47  ;;  %vm5290_vm8 = vmpackc.low %vm12498_vm6, %vm12497_vm7  ;;  %5289 = vmatmul.mubr.msk.bf16.gmra.mxu0 %vm5287_vm11, %v9399_v61  ;;  %2795 = vperm.xlu0 %6325, %v2758_v10   ;;  %vm2424_vm6 = vcmp.ge.s32.totalorder %v2392_v14, 0  ;;  %vm12504_vm14 = vcmp.eq.s32.totalorder %v12492_v29, 1  ;;  %v12510_v10 = vld [vmem:[#allocation38_spill] sm:$0xff]  ;;  %v9492_v57 = vpop.permute.xlu0 %1817 }
 0x1b0   : > { %5292 = vmatprep.mubr.msk.bf16.mxu0 %vm5290_vm8, %v8963_v45  ;;  %vm12503_vm11 = vmmov %vm12501_vm2  ;;  %2590 = vperm.xlu1 %6326, %v2551_v32   ;;  %v12513_v32 = vmov 0  ;;  %v1532_v45 = vrot.slane %v8824_v3, 1  ;;  %v12522_v3 = vld [vmem:[#allocation107_spill] sm:$0xff] }
 0x1b1   : > { %v1580_v27 = vsel %vm12503_vm11, %v12502_v17, %v1530_v48  ;;  %vm9469_vm7 = vmpackc.low %vm12505_vm4, %vm12504_vm14  ;;  %v6398_v48 = vld [vmem:[#allocation5 + $0x180] sm:$0xff]   ;;  %vm1465_vm11 = vcmp.eq.s32.totalorder %v12510_v10, 1  ;;  %vm12512_vm14 = vnez %v12511_v49  ;;  %5944 = vmatprep.subr.bf16.mxu0 %v6397_v21  ;;  %v11635_v17 = vrot.slane %v12518_v62, 1 }
 0x1b2   : > { %vm12508_vm8 = vmand %vm9388_vm10, %vm12487_vm5  ;;  %v2199_v29 = vsel %vm12512_vm14, 1, %v11854_v47  ;;  %v9494_v54 = vpack.c.bf16 %v1579_v60, %v1580_v27  ;;  %v9506_v21 = vpop.permute.xlu1 %2034  ;;  %v12519_v49 = vld [vmem:[#allocation16_spill] sm:$0xff]  ;;  %vm12523_vm14 = vnez %v12522_v3  ;;  %5945 = vmatpush3.bf16.msra.mxu0 %v6398_v48  ;;  %vm12524_vm10 = vcmp.eq.s32.totalorder %v9037_v40, 1  ;;  %v12526_v27 = vld [vmem:[#allocation114_spill] sm:$0xff] }
 0x1b3   : > { %v2550_v33 = vsel %vm12508_vm8, 1, %v11854_v47  ;;  %vm9486_vm4 = vmand %vm2425_vm3, %vm2457_vm13  ;;  %vm2095_vm3 = vcmp.eq.s32.totalorder %v9316_v16, 1  ;;  %vm2094_vm13 = vcmp.eq.s32.totalorder %v9353_v58, 1  ;;  %vm12520_vm5 = vnez %v12519_v49  ;;  %v6454_v58 = vld [vmem:[%s11198_s0 + $0x38] sm:$0xff]  ;;  %5235 = vmatmul.mubr.msk.bf16.gmra.mxu1 %vm9469_vm7, %v12526_v27  ;;  %v12529_v40 = vld [vmem:[#allocation84_spill] sm:$0xff] }
 0x1b4   : > { %v12514_v32 = vsel %vm9486_vm4, 4294967295, %v12513_v32  ;;  %12515 = vst [vmem:[#allocation94_spill] sm:$0xff] %v9494_v54  ;;  %vm9498_vm2 = vmand %vm2424_vm6, %vm2456_vm12  ;;  %2587 = vperm.xlu0 %6325, %v2550_v33   ;;  %vm12521_vm6 = vcmp.eq.s32.totalorder %v12509_v6, 1  ;;  %2270 = vperm.xlu1 %6326, %v2199_v29   ;;  %v2198_v16 = vsel %vm12523_vm14, 1, %v11854_v47  ;;  %v2395_v14 = vadd.s32 1, %v6454_v58  ;;  %v9532_v33 = vpop.permute.xlu0 %2031  ;;  %v12527_v6 = vld [vmem:[#allocation110_spill] sm:$0xff] }
 0x1b5   : > { %v12517_v43 = vsel %vm9498_vm2, 4294967295, %v12516_v43  ;;  %vm5236_vm12 = vmpackc.low %vm12521_vm6, %vm1465_vm11  ;;  %vm12525_vm8 = vcmp.eq.s32.totalorder %v8995_v37, 1  ;;  %v2761_v60 = vsel %vm9486_vm4, 1, %v11854_v47  ;;  %v12528_v48 = vld [vmem:[#allocation83_spill] sm:$0xff]  ;;  %vm1257_vm14 = vcmp.eq.s32.totalorder %v12529_v40, 1  ;;  %v12534_v40 = vld [vmem:[#allocation140_spill] sm:$0xff] }
 0x1b6   : > { %vm5293_vm0 = vmpackc.low %vm12525_vm8, %vm12524_vm10  ;;  %5238 = vmatprep.mubr.msk.bf16.mxu1 %vm5236_vm12, %v12527_v6  ;;  %vm1258_vm6 = vcmp.eq.s32.totalorder %v12528_v48, 1  ;;  %v9539_v37 = vpop.permute.xlu1 %1826  ;;  %vm12530_vm10 = vcmp.lt.s32.totalorder %v8063_v50, 7  ;;  %v12531_v10 = vrot.slane %v12485_v53, 1  ;;  %v2760_v58 = vsel %vm9498_vm2, 1, %v11854_v47 }
 0x1b7   : > { %vm5296_vm11 = vmpackc.low %vm2095_vm3, %vm2094_vm13  ;;  %5295 = vmatmul.mubr.msk.bf16.gmra.mxu0 %vm5293_vm0, %v9494_v54  ;;  %v1577_v2 = vsel %vm12530_vm10, %v1532_v45, %v11635_v17  ;;  %vm2427_vm7 = vcmp.ge.s32.totalorder %v2395_v14, 0  ;;  %vm2459_vm8 = vcmp.lt.s32.totalorder %v2395_v14, 16  ;;  %v12536_v17 = vld [vmem:[#allocation17_spill] sm:$0xff]  ;;  %v1534_v3 = vrot.slane %v8891_v52, 1  ;;  %v12549_v14 = vld [vmem:[#allocation111_spill] sm:$0xff] }
 0x1b8   : > { %2267 = vperm.xlu0 %6325, %v2198_v16   ;;  %5298 = vmatprep.mubr.msk.bf16.mxu0 %vm5296_vm11, %v9065_v13  ;;  %vm12532_vm0 = vmmov %vm12530_vm10  ;;  %v12533_v16 = vld [vmem:[#allocation139_spill] sm:$0xff]  ;;  %vm12537_vm11 = vnez %v12536_v17  ;;  %v11642_v48 = vrot.slane %v9039_v63, 1 }
 0x1b9   : > { %v1578_v29 = vsel %vm12532_vm0, %v12531_v10, %v1532_v45  ;;  %2804 = vperm.xlu1 %6326, %v2761_v60   ;;  %vm12535_vm12 = vmand %vm9486_vm4, %vm12520_vm5  ;;  %v9572_v60 = vpop.permute.xlu0 %1823  ;;  %v6455_v10 = vld [vmem:[%s11198_s0 + $0x30] sm:$0xff]  ;;  %vm2096_vm5 = vcmp.eq.s32.totalorder %v9448_v42, 1  ;;  %vm12544_vm3 = vcmp.eq.s32.totalorder %v12533_v16, 1  ;;  %v12546_v42 = vld [vmem:[#allocation88_spill] sm:$0xff] }
 0x1ba   : > { %v2553_v53 = vsel %vm12535_vm12, 1, %v11854_v47  ;;  %vm2520_vm10 = vmand %vm9498_vm2, %vm12537_vm11  ;;  %v9574_v49 = vpack.c.bf16 %v1577_v2, %v1578_v29  ;;  %v2394_v13 = vadd.s32 1, %v6455_v10  ;;  %v9583_v6 = vpop.permute.xlu1 %2040  ;;  %v12541_v2 = vmov 0  ;;  %v12552_v16 = vld [vmem:[#allocation109_spill] sm:$0xff]  ;;  %v12558_v45 = vld [vmem:[#allocation116_spill] sm:$0xff] }
 0x1bb   : > { %vm9566_vm0 = vmpackc.low %vm1258_vm6, %vm1257_vm14  ;;  %vm2097_vm14 = vcmp.eq.s32.totalorder %v9412_v56, 1  ;;  %vm12543_vm12 = vcmp.eq.s32.totalorder %v12534_v40, 1  ;;  %v2552_v52 = vsel %vm2520_vm10, 1, %v11854_v47  ;;  %v12545_v56 = vld [vmem:[#allocation86_spill] sm:$0xff]  ;;  %v12554_v40 = vrot.slane %v12518_v62, 1 }
 0x1bc   : > { %12540 = vst [vmem:[#allocation57_spill] sm:$0xff] %v9574_v49  ;;  %2801 = vperm.xlu0 %6325, %v2760_v58   ;;  %vm9587_vm6 = vmand %vm2427_vm7, %vm2459_vm8  ;;  %vm1260_vm4 = vcmp.eq.s32.totalorder %v12545_v56, 1  ;;  %vm1259_vm7 = vcmp.eq.s32.totalorder %v12546_v42, 1  ;;  %vm12547_vm8 = vcmp.eq.s32.totalorder %v9397_v41, 1  ;;  %v12551_v58 = vld [vmem:[#allocation108_spill] sm:$0xff]  ;;  %vm2426_vm11 = vcmp.ge.s32.totalorder %v2394_v13, 0 }
 0x1bd   : > { %v12542_v2 = vsel %vm9587_vm6, 4294967295, %v12541_v2  ;;  %vm5242_vm13 = vmpackc.low %vm12544_vm3, %vm12543_vm12  ;;  %2596 = vperm.xlu1 %6326, %v2553_v53   ;;  %vm12550_vm3 = vnez %v12549_v14  ;;  %5241 = vmatmul.mubr.msk.bf16.gmra.mxu1 %vm9566_vm0, %v12551_v58  ;;  %v9613_v17 = vpop.permute.xlu0 %2037  ;;  %vm2458_vm10 = vcmp.lt.s32.totalorder %v2394_v13, 16  ;;  %v2763_v62 = vsel %vm9587_vm6, 1, %v11854_v47 }
 0x1be   : > { %vm5299_vm15 = vmpackc.low %vm12548_vm1, %vm12547_vm8  ;;  %v2201_v29 = vsel %vm12550_vm3, 1, %v11854_v47  ;;  %5244 = vmatprep.mubr.msk.bf16.mxu1 %vm5242_vm13, %v12552_v16  ;;  %v9618_v39 = vpop.permute.xlu1 %1832  ;;  %vm12553_vm1 = vcmp.lt.s32.totalorder %v8063_v50, 7  ;;  %vm12559_vm13 = vnez %v12558_v45  ;;  %v1536_v45 = vrot.slane %v9043_v11, 1 }
 0x1bf   : > { %vm5302_vm12 = vmpackc.low %vm2097_vm14, %vm2096_vm5  ;;  %5301 = vmatmul.mubr.msk.bf16.gmra.mxu0 %vm5299_vm15, %v9574_v49  ;;  %v1575_v41 = vsel %vm12553_vm1, %v1534_v3, %v11642_v48  ;;  %v2200_v10 = vsel %vm12559_vm13, 1, %v11854_v47  ;;  %v12561_v48 = vld [vmem:[#allocation44_spill] sm:$0xff]  ;;  %vm1891_vm3 = vcmp.eq.s32.totalorder %v9539_v37, 1  ;;  %v1538_v37 = vrot.slane %v8692_v28, 1 }
 0x1c0   : > { %2593 = vperm.xlu0 %6325, %v2552_v52   ;;  %5304 = vmatprep.mubr.msk.bf16.mxu0 %vm5302_vm12, %v9201_v9  ;;  %vm12555_vm0 = vmmov %vm12553_vm1  ;;  %v12560_v52 = vld [vmem:[#allocation144_spill] sm:$0xff]  ;;  %vm1469_vm5 = vcmp.eq.s32.totalorder %v12561_v48, 1  ;;  %vm12570_vm1 = vcmp.eq.s32.totalorder %v9455_v26, 1  ;;  %v12575_v26 = vld [vmem:[#allocation121_spill] sm:$0xff] }
 0x1c1   : > { %v1576_v53 = vsel %vm12555_vm0, %v12554_v40, %v1534_v3  ;;  %vm9632_vm15 = vmpackc.low %vm1260_vm4, %vm1259_vm7  ;;  %2276 = vperm.xlu1 %6326, %v2201_v29   ;;  %vm1470_vm14 = vcmp.eq.s32.totalorder %v12560_v52, 1  ;;  %v12562_v3 = vmov 0  ;;  %vm1888_vm7 = vcmp.eq.s32.totalorder %v9492_v57, 1  ;;  %v9650_v56 = vpop.permute.xlu0 %1829  ;;  %v12564_v29 = vld [vmem:[#allocation18_spill] sm:$0xff]  ;;  %v6456_v40 = vld [vmem:[%s11198_s0 + $0x48] sm:$0xff] }
 0x1c2   : > { %vm9644_vm8 = vmand %vm2426_vm11, %vm2458_vm10  ;;  %v9652_v42 = vpack.c.bf16 %v1575_v41, %v1576_v53  ;;  %vm12565_vm12 = vnez %v12564_v29  ;;  %v2397_v9 = vadd.s32 1, %v6456_v40  ;;  %v9664_v14 = vpop.permute.xlu1 %2216  ;;  %v12566_v41 = vld [vmem:[#allocation19_spill] sm:$0xff]  ;;  %v6457_v53 = vld [vmem:[%s11198_s0 + $0x40] sm:$0xff]  ;;  %vm12574_vm10 = vcmp.eq.s32.totalorder %v9506_v21, 1 }
 0x1c3   : > { %v12563_v3 = vsel %vm9644_vm8, 4294967295, %v12562_v3  ;;  %vm12567_vm0 = vnez %v12566_v41  ;;  %v2396_v16 = vadd.s32 1, %v6457_v53  ;;  %vm5248_vm11 = vmpackc.low %vm1470_vm14, %vm1469_vm5  ;;  %v2762_v11 = vsel %vm9644_vm8, 1, %v11854_v47  ;;  %v12568_v40 = vld [vmem:[#allocation90_spill] sm:$0xff]  ;;  %v12572_v52 = vld [vmem:[#allocation101_spill] sm:$0xff] }
 0x1c4   : > { %2273 = vperm.xlu0 %6325, %v2200_v10   ;;  %v9680_v10 = vld [vmem:[#allocation5 + $0x238] sm:$0xff]   ;;  %vm5305_vm13 = vmpackc.low %vm12570_vm1, %vm1888_vm7  ;;  %vm12573_vm5 = vcmp.eq.s32.totalorder %v9532_v33, 1  ;;  %vm2429_vm7 = vcmp.ge.s32.totalorder %v2397_v9, 0  ;;  %vm2461_vm1 = vcmp.lt.s32.totalorder %v2397_v9, 16  ;;  %v12577_v33 = vrot.slane %v9039_v63, 1 }
 0x1c5   : > { %2810 = vperm.xlu1 %6326, %v2763_v62   ;;  %vm12571_vm14 = vmand %vm9587_vm6, %vm12565_vm12  ;;  %5247 = vmatmul.mubr.msk.bf16.gmra.mxu1 %vm9632_vm15, %v12572_v52  ;;  %v9702_v5 = vpop.permute.xlu0 %2213  ;;  %vm12576_vm15 = vcmp.lt.s32.totalorder %v8063_v50, 7  ;;  %v12588_v53 = vmov 0  ;;  %v12600_v62 = vld [vmem:[#allocation63_spill] sm:$0xff] }
 0x1c6   : > { %v2555_v48 = vsel %vm12571_vm14, 1, %v11854_v47  ;;  %vm5308_vm4 = vmpackc.low %vm12574_vm10, %vm12573_vm5  ;;  %5250 = vmatprep.mubr.msk.bf16.mxu1 %vm5248_vm11, %v12575_v26  ;;  %v9707_v57 = vpop.permute.xlu1 %2046  ;;  %v1573_v13 = vsel %vm12576_vm15, %v1536_v45, %v1537_v35  ;;  %vm2428_vm10 = vcmp.ge.s32.totalorder %v2396_v16, 0  ;;  %vm2460_vm14 = vcmp.lt.s32.totalorder %v2396_v16, 16  ;;  %6138 = vmatprep.subr.bf16.mxu1 %v9680_v10  ;;  %v12585_v16 = vld [vmem:[#allocation147_spill] sm:$0xff] }
 0x1c7   : > { %5307 = vmatmul.mubr.msk.bf16.gmra.mxu0 %vm5305_vm13, %v9652_v42  ;;  %vm12578_vm12 = vmmov %vm12576_vm15  ;;  %vm12579_vm13 = vcmp.eq.s32.totalorder %v12569_v34, 1  ;;  %vm12580_vm5 = vcmp.eq.s32.totalorder %v12568_v40, 1  ;;  %v12586_v34 = vld [vmem:[#allocation122_spill] sm:$0xff] }
 0x1c8   : > { %2807 = vperm.xlu0 %6325, %v2762_v11   ;;  %5310 = vmatprep.mubr.msk.bf16.mxu0 %vm5308_vm4, %v9294_v12  ;;  %v1574_v21 = vsel %vm12578_vm12, %v12577_v33, %v1536_v45  ;;  %vm9719_vm11 = vmpackc.low %vm12580_vm5, %vm12579_vm13  ;;  %v12584_v45 = vld [vmem:[#allocation48_spill] sm:$0xff]  ;;  %vm1471_vm12 = vcmp.eq.s32.totalorder %v12585_v16, 1  ;;  %vm12587_vm13 = vnez %v12586_v34  ;;  %v12601_v12 = vld [vmem:[#allocation102_spill] sm:$0xff] }
 0x1c9   : > { %2602 = vperm.xlu1 %6326, %v2555_v48   ;;  %vm12583_vm4 = vmand %vm9644_vm8, %vm12567_vm0  ;;  %vm1472_vm15 = vcmp.eq.s32.totalorder %v12584_v45, 1  ;;  %v2203_v29 = vsel %vm12587_vm13, 1, %v11854_v47  ;;  %vm1890_vm0 = vcmp.eq.s32.totalorder %v9572_v60, 1  ;;  %v2044_v41 = vpop.permute.xlu0 %2043  ;;  %v9743_v11 = vpack.c.bf16 %v1573_v13, %v1574_v21  ;;  %v12592_v48 = vld [vmem:[#allocation20_spill] sm:$0xff]  ;;  %v12594_v60 = vld [vmem:[#allocation129_spill] sm:$0xff] }
 0x1ca   : > { %v2554_v63 = vsel %vm12583_vm4, 1, %v11854_v47  ;;  %vm9737_vm5 = vmand %vm2429_vm7, %vm2461_vm1  ;;  %vm2101_vm8 = vcmp.eq.s32.totalorder %v9583_v6, 1  ;;  %vm2100_vm13 = vcmp.eq.s32.totalorder %v9613_v17, 1  ;;  %v9751_v9 = vpop.permute.xlu1 %1838  ;;  %vm12593_vm7 = vnez %v12592_v48  ;;  %v6458_v17 = vld [vmem:[%s11198_s0 + $0x58] sm:$0xff]  ;;  %v12596_v21 = vld [vmem:[#allocation117_spill] sm:$0xff] }
 0x1cb   : > { %v12589_v53 = vsel %vm9737_vm5, 4294967295, %v12588_v53  ;;  %vm9745_vm4 = vmand %vm2428_vm10, %vm2460_vm14  ;;  %vm12595_vm10 = vnez %v12594_v60  ;;  %v2765_v6 = vsel %vm9737_vm5, 1, %v11854_v47  ;;  %v2399_v33 = vadd.s32 1, %v6458_v17  ;;  %v12598_v45 = vld [vmem:[#allocation95_spill] sm:$0xff] }
 0x1cc   : > { %2599 = vperm.xlu0 %6325, %v2554_v63   ;;  %vm2525_vm1 = vmand %vm9737_vm5, %vm12593_vm7  ;;  %v2202_v13 = vsel %vm12595_vm10, 1, %v11854_v47  ;;  %v12597_v63 = vld [vmem:[#allocation93_spill] sm:$0xff]  ;;  %v2764_v17 = vsel %vm9745_vm4, 1, %v11854_v47  ;;  %vm12609_vm7 = vcmp.eq.s32.totalorder %v12600_v62, 1  ;;  %vm12618_vm10 = vcmp.eq.s32.totalorder %v9650_v56, 1 }
 0x1cd   : > { %vm5254_vm6 = vmpackc.low %vm1472_vm15, %vm1471_vm12  ;;  %2282 = vperm.xlu1 %6326, %v2203_v29   ;;  %5253 = vmatmul.mubr.msk.bf16.gmra.mxu1 %vm9719_vm11, %v9028_v22  ;;  %v9770_v28 = vpop.permute.xlu0 %1835  ;;  %vm1263_vm12 = vcmp.eq.s32.totalorder %v12598_v45, 1  ;;  %v12599_v29 = vld [vmem:[#allocation149_spill] sm:$0xff]  ;;  %v2557_v45 = vsel %vm2525_vm1, 1, %v11854_v47  ;;  %vm12619_vm5 = vcmp.eq.s32.totalorder %v9618_v39, 1 }
 0x1ce   : > { %vm5311_vm14 = vmpackc.low %vm1891_vm3, %vm1890_vm0  ;;  %5256 = vmatprep.mubr.msk.bf16.mxu1 %vm5254_vm6, %v12596_v21  ;;  %vm1264_vm3 = vcmp.eq.s32.totalorder %v12597_v63, 1  ;;  %v9777_v16 = vpop.permute.xlu1 %2222  ;;  %v12602_v21 = vrot.slane %v12601_v12, 1  ;;  %vm12603_vm6 = vcmp.lt.s32.totalorder %v8063_v50, 7  ;;  %vm2463_vm0 = vcmp.lt.s32.totalorder %v2399_v33, 16  ;;  %v12635_v56 = vld [vmem:[#allocation137_spill] sm:$0xff] }
 0x1cf   : > { %vm5314_vm15 = vmpackc.low %vm2101_vm8, %vm2100_vm13  ;;  %5313 = vmatmul.mubr.msk.bf16.gmra.mxu0 %vm5311_vm14, %v9743_v11  ;;  %vm12610_vm1 = vcmp.eq.s32.totalorder %v12599_v29, 1  ;;  %v12614_v29 = vmov 0 }
 0x1d0   : > { %2279 = vperm.xlu0 %6325, %v2202_v13   ;;  %5316 = vmatprep.mubr.msk.bf16.mxu0 %vm5314_vm15, %v12496_v25  ;;  %v1571_v26 = vsel %vm12603_vm6, %v1538_v37, %v12602_v21  ;;  %vm12604_vm8 = vmmov %vm12603_vm6 }
 0x1d1   : > { %2816 = vperm.xlu1 %6326, %v2765_v6   ;;  %v1572_v13 = vsel %vm12604_vm8, %v1537_v35, %v1538_v37  ;;  %v12605_v6 = vld [vmem:[#allocation21_spill] sm:$0xff]  ;;  %vm9802_vm6 = vmpackc.low %vm1264_vm3, %vm1263_vm12  ;;  %v9808_v50 = vpop.permute.xlu0 %2219  ;;  %v6459_v35 = vld [vmem:[%s11198_s0 + $0x50] sm:$0xff]  ;;  %vm2103_vm3 = vcmp.eq.s32.totalorder %v9707_v57, 1  ;;  %vm2102_vm12 = vcmp.eq.s32.totalorder %v2044_v41, 1 }
 0x1d2   : > { %vm12606_vm13 = vnez %v12605_v6  ;;  %v2398_v48 = vadd.s32 1, %v6459_v35  ;;  %vm9817_vm15 = vmpackc.low %vm12610_vm1, %vm12609_vm7  ;;  %v2053_v21 = vpop.permute.xlu1 %2052  ;;  %v9822_v63 = vpack.c.bf16 %v1571_v26, %v1572_v13  ;;  %vm12613_vm7 = vcmp.ge.s32.totalorder %v2399_v33, 0  ;;  %v12616_v57 = vld [vmem:[#allocation97_spill] sm:$0xff]  ;;  %v12617_v41 = vld [vmem:[#allocation98_spill] sm:$0xff] }
 0x1d3   : > { %vm2524_vm14 = vmand %vm9745_vm4, %vm12606_vm13  ;;  %vm1266_vm8 = vcmp.eq.s32.totalorder %v12616_v57, 1  ;;  %vm1265_vm11 = vcmp.eq.s32.totalorder %v12617_v41, 1  ;;  %v12620_v26 = vld [vmem:[#allocation36_spill] sm:$0xff]  ;;  %v12627_v35 = vmov 0  ;;  %v12629_v37 = vld [vmem:[#allocation22_spill] sm:$0xff] }
 0x1d4   : > { %2813 = vperm.xlu0 %6325, %v2764_v17   ;;  %v2556_v62 = vsel %vm2524_vm14, 1, %v11854_v47  ;;  %vm9832_vm1 = vmand %vm12613_vm7, %vm2463_vm0  ;;  %vm12621_vm9 = vnez %v12620_v26  ;;  %vm2430_vm13 = vcmp.ge.s32.totalorder %v2398_v48, 0  ;;  %vm2462_vm14 = vcmp.lt.s32.totalorder %v2398_v48, 16  ;;  %v12622_v13 = vld [vmem:[#allocation128_spill] sm:$0xff] }
 0x1d5   : > { %2608 = vperm.xlu1 %6326, %v2557_v45   ;;  %v12615_v29 = vsel %vm9832_vm1, 4294967295, %v12614_v29  ;;  %vm5317_vm2 = vmpackc.low %vm12619_vm5, %vm12618_vm10  ;;  %v2205_v17 = vsel %vm12621_vm9, 1, %v11854_v47  ;;  %5259 = vmatmul.mubr.msk.bf16.gmra.mxu1 %vm9802_vm6, %v9088_v7  ;;  %v2050_v33 = vpop.permute.xlu0 %2049  ;;  %v12625_v45 = vld [vmem:[#allocation136_spill] sm:$0xff]  ;;  %vm2308_vm6 = vcmp.eq.s32.totalorder %v9702_v5, 1  ;;  %v2767_v12 = vsel %vm9832_vm1, 1, %v11854_v47 }
 0x1d6   : > { %vm5320_vm0 = vmpackc.low %vm2103_vm3, %vm2102_vm12  ;;  %5262 = vmatprep.mubr.msk.bf16.mxu1 %vm9817_vm15, %v12622_v13  ;;  %v1845_v39 = vpop.permute.xlu1 %1844  ;;  %vm12626_vm10 = vnez %v12625_v45  ;;  %vm12630_vm3 = vnez %v12629_v37  ;;  %vm2105_vm7 = vcmp.eq.s32.totalorder %v2053_v21, 1  ;;  %v6461_v37 = vld [vmem:[%s11198_s0 + $0x60] sm:$0xff] }
 0x1d7   : > { %5319 = vmatmul.mubr.msk.bf16.gmra.mxu0 %vm5317_vm2, %v9822_v63  ;;  %vm9853_vm5 = vmpackc.low %vm1266_vm8, %vm1265_vm11  ;;  %v2204_v6 = vsel %vm12626_vm10, 1, %v11854_v47  ;;  %vm2309_vm2 = vcmp.eq.s32.totalorder %v9664_v14, 1  ;;  %vm1895_vm11 = vcmp.eq.s32.totalorder %v9751_v9, 1  ;;  %vm1894_vm8 = vcmp.eq.s32.totalorder %v9770_v28, 1  ;;  %v12633_v14 = vld [vmem:[#allocation105_spill] sm:$0xff] }
 0x1d8   : > { %2605 = vperm.xlu0 %6325, %v2556_v62   ;;  %5322 = vmatprep.mubr.msk.bf16.mxu0 %vm5320_vm0, %v12526_v27  ;;  %vm9865_vm15 = vmand %vm2430_vm13, %vm2462_vm14  ;;  %v6460_v62 = vld [vmem:[%s11198_s0 + $0x68] sm:$0xff]  ;;  %vm2104_vm0 = vcmp.eq.s32.totalorder %v2050_v33, 1  ;;  %v2400_v27 = vadd.s32 1, %v6461_v37  ;;  %v6400_v37 = vld [vmem:[#allocation5 + $0x230] sm:$0xff]  }
 0x1d9   : > { %2288 = vperm.xlu1 %6326, %v2205_v17   ;;  %v12628_v35 = vsel %vm9865_vm15, 4294967295, %v12627_v35  ;;  %v1842_v48 = vpop.permute.xlu0 %1841  ;;  %vm2527_vm12 = vmand %vm9832_vm1, %vm12630_vm3  ;;  %v2401_v57 = vadd.s32 1, %v6460_v62  ;;  %v12631_v17 = vld [vmem:[#allocation23_spill] sm:$0xff]  ;;  %v2766_v21 = vsel %vm9865_vm15, 1, %v11854_v47  ;;  %v12639_v62 = vmov 0 }
 0x1da   : > { %v9878_v41 = vpop.permute.xlu1 %2228  ;;  %vm12632_vm13 = vnez %v12631_v17  ;;  %vm5362_vm3 = vmpackc.low %vm2309_vm2, %vm2308_vm6  ;;  %v2559_v33 = vsel %vm2527_vm12, 1, %v11854_v47  ;;  %vm2432_vm9 = vcmp.ge.s32.totalorder %v2400_v27, 0  ;;  %vm2310_vm12 = vcmp.eq.s32.totalorder %v9808_v50, 1  ;;  %v12641_v50 = vld [vmem:[#allocation24_spill] sm:$0xff]  ;;  %v12645_v17 = vld [vmem:[#allocation134_spill] sm:$0xff] }
 0x1db   : > { %vm5323_vm14 = vmpackc.low %vm1895_vm11, %vm1894_vm8  ;;  %vm2433_vm2 = vcmp.ge.s32.totalorder %v2401_v57, 0  ;;  %vm2465_vm6 = vcmp.lt.s32.totalorder %v2401_v57, 16  ;;  %vm2464_vm11 = vcmp.lt.s32.totalorder %v2400_v27, 16  ;;  %vm2311_vm8 = vcmp.eq.s32.totalorder %v9777_v16, 1  ;;  %v12643_v57 = vld [vmem:[#allocation42_spill] sm:$0xff] }
 0x1dc   : > { %2285 = vperm.xlu0 %6325, %v2204_v6   ;;  %vm5326_vm10 = vmpackc.low %vm2105_vm7, %vm2104_vm0  ;;  %vm12636_vm7 = vnez %v12635_v56  ;;  %vm1897_vm0 = vcmp.eq.s32.totalorder %v1845_v39, 1 }
 0x1dd   : > { %2822 = vperm.xlu1 %6326, %v2767_v12   ;;  %5265 = vmatmul.mubr.msk.bf16.gmra.mxu1 %vm9853_vm5, %v9120_v20  ;;  %v2226_v5 = vpop.permute.xlu0 %2225  ;;  %vm12634_vm5 = vmand %vm9865_vm15, %vm12632_vm13  ;;  %v2207_v6 = vsel %vm12636_vm7, 1, %v11854_v47  ;;  %vm12642_vm15 = vnez %v12641_v50  ;;  %v12741_v12 = vld [vmem:[#allocation92_spill] sm:$0xff] }
 0x1de   : > { %5364 = vmatprep.mubr.msk.bf16.mxu1 %vm5362_vm3, %v9182_v4  ;;  %v2059_v28 = vpop.permute.xlu1 %2058  ;;  %v2558_v9 = vsel %vm12634_vm5, 1, %v11854_v47  ;;  %vm9920_vm3 = vmand %vm2432_vm9, %vm2464_vm11  ;;  %vm2312_vm11 = vcmp.eq.s32.totalorder %v2226_v5, 1  ;;  %v12647_v4 = vld [vmem:[#allocation25_spill] sm:$0xff]  ;;  %v6463_v5 = vld [vmem:[%s11198_s0 + $0x70] sm:$0xff] }
 0x1df   : > { %5325 = vmatmul.mubr.msk.bf16.gmra.mxu0 %vm5323_vm14, %v12633_v14  ;;  %vm1896_vm14 = vcmp.eq.s32.totalorder %v1842_v48, 1  ;;  %v12640_v62 = vsel %vm9920_vm3, 4294967295, %v12639_v62  ;;  %vm2107_vm13 = vcmp.eq.s32.totalorder %v2059_v28, 1 }
 0x1e0   : > { %2819 = vperm.xlu0 %6325, %v2766_v21   ;;  %5328 = vmatprep.mubr.msk.bf16.mxu0 %vm5326_vm10, %v12551_v58  ;;  %vm9916_vm10 = vmand %vm2433_vm2, %vm2465_vm6  ;;  %vm12644_vm6 = vnez %v12643_v57 }
 0x1e1   : > { %2614 = vperm.xlu1 %6326, %v2559_v33   ;;  %v2056_v27 = vpop.permute.xlu0 %2055  ;;  %vm2529_vm7 = vmand %vm9916_vm10, %vm12642_vm15  ;;  %v2206_v39 = vsel %vm12644_vm6, 1, %v11854_v47  ;;  %v2769_v48 = vsel %vm9916_vm10, 1, %v11854_v47  ;;  %v12646_v33 = vld [vmem:[#allocation115_spill] sm:$0xff] }
 0x1e2   : > { %vm2106_vm5 = vcmp.eq.s32.totalorder %v2056_v27, 1  ;;  %v1851_v16 = vpop.permute.xlu1 %1850  ;;  %vm5365_vm2 = vmpackc.low %vm2311_vm8, %vm2310_vm12  ;;  %v2768_v27 = vsel %vm9920_vm3, 1, %v11854_v47  ;;  %vm12648_vm8 = vnez %v12647_v4 }
 0x1e3   : > { %vm5329_vm1 = vmpackc.low %vm1897_vm0, %vm1896_vm14  ;;  %vm1899_vm0 = vcmp.eq.s32.totalorder %v1851_v16, 1  ;;  %v12649_v16 = vld [vmem:[#allocation142_spill] sm:$0xff] }
 0x1e4   : > { %2611 = vperm.xlu0 %6325, %v2558_v9   ;;  %vm5332_vm9 = vmpackc.low %vm2107_vm13, %vm2106_vm5  ;;  %v6462_v9 = vld [vmem:[%s11198_s0 + $0x78] sm:$0xff] }
 0x1e5   : > { %2294 = vperm.xlu1 %6326, %v2207_v6   ;;  %4142 = vmatmul.mubr.bf16.vlgmr.msra.gmra.mxu1 %v12645_v17  ;;  %v1848_v21 = vpop.permute.xlu0 %1847  ;;  %v2403_v6 = vadd.s32 1, %v6462_v9  ;;  %vm2528_vm12 = vmand %vm9920_vm3, %vm12648_vm8  ;;  %v2402_v9 = vadd.s32 1, %v6463_v5  ;;  %v12652_v5 = vld [vmem:[#allocation70_spill] sm:$0xff] }
 0x1e6   : > { %5367 = vmatprep.mubr.msk.bf16.mxu1 %vm5365_vm2, %v9308_v51  ;;  %v2235_v28 = vpop.permute.xlu1 %2234  ;;  %6139 = vmatpush3.bf16.msra.mxu1 %v9680_v10  ;;  %vm1898_vm14 = vcmp.eq.s32.totalorder %v1848_v21, 1  ;;  %v2560_v4 = vsel %vm2528_vm12, 1, %v11854_v47  ;;  %v12651_v21 = vld [vmem:[#allocation40_spill] sm:$0xff] }
 0x1e7   : > { %5331 = vmatmul.mubr.msk.bf16.gmra.mxu0 %vm5329_vm1, %v12646_v33  ;;  %vm2313_vm1 = vcmp.eq.s32.totalorder %v9878_v41, 1  ;;  %6140 = vmatprep.subr.bf16.mxu1 %v6400_v37  ;;  %vm2435_vm13 = vcmp.ge.s32.totalorder %v2403_v6, 0  ;;  %vm2467_vm15 = vcmp.lt.s32.totalorder %v2403_v6, 16  ;;  %vm5335_vm5 = vmpackc.low %vm1899_vm0, %vm1898_vm14  ;;  %v12653_v6 = vmov 0 }
 0x1e8   : > { %2291 = vperm.xlu0 %6325, %v2206_v39   ;;  %5334 = vmatprep.mubr.msk.bf16.mxu0 %vm5332_vm9, %v12572_v52  ;;  %v2561_v39 = vsel %vm2529_vm7, 1, %v11854_v47  ;;  %vm5368_vm7 = vmpackc.low %vm2313_vm1, %vm2312_vm11  ;;  %vm12650_vm9 = vnez %v12649_v16  ;;  %vm2434_vm1 = vcmp.ge.s32.totalorder %v2402_v9, 0  ;;  %vm2466_vm11 = vcmp.lt.s32.totalorder %v2402_v9, 16  ;;  %v12663_v52 = vld [vmem:[#allocation46_spill] sm:$0xff] }
 0x1e9   : > { %2828 = vperm.xlu1 %6326, %v2769_v48   ;;  %v6401_v48 = vld [vmem:[#allocation5 + $0x228] sm:$0xff]   ;;  %v2232_v10 = vpop.permute.xlu0 %2231  ;;  %v2209_v50 = vsel %vm12650_vm9, 1, %v11854_v47  ;;  %vm9967_vm8 = vmand %vm2435_vm13, %vm2467_vm15  ;;  %v12657_v9 = vmov 0 }
 0x1ea   : > { %v2065_v17 = vpop.permute.xlu1 %2064  ;;  %6141 = vmatpush3.bf16.msra.mxu1 %v6400_v37  ;;  %v12654_v6 = vsel %vm9967_vm8, 4294967295, %v12653_v6  ;;  %vm9979_vm15 = vmand %vm2434_vm1, %vm2466_vm11 }
 0x1eb   : > { %vm2109_vm2 = vcmp.eq.s32.totalorder %v2065_v17, 1  ;;  %6142 = vmatprep.subr.bf16.mxu1 %v6401_v48  ;;  %v12655_v17 = vld [vmem:[#allocation145_spill] sm:$0xff]  ;;  %v12658_v9 = vsel %vm9979_vm15, 4294967295, %v12657_v9 }
 0x1ec   : > { %2825 = vperm.xlu0 %6325, %v2768_v27   ;;  %vm12656_vm14 = vnez %v12655_v17 }
 0x1ed   : > { %2620 = vperm.xlu1 %6326, %v2561_v39   ;;  %4150 = vmatmul.mubr.bf16.gmra.mxu1 %v12651_v21  ;;  %v2062_v27 = vpop.permute.xlu0 %2061  ;;  %v2208_v37 = vsel %vm12656_vm14, 1, %v11854_v47  ;;  %v2771_v39 = vsel %vm9967_vm8, 1, %v11854_v47 }
 0x1ee   : > { %5370 = vmatprep.mubr.msk.bf16.mxu1 %vm5368_vm7, %v9399_v61  ;;  %vm2108_vm12 = vcmp.eq.s32.totalorder %v2062_v27, 1  ;;  %v1857_v41 = vpop.permute.xlu1 %1856  ;;  %6143 = vmatpush3.bf16.msra.mxu1 %v6401_v48  ;;  %vm2315_vm7 = vcmp.eq.s32.totalorder %v2235_v28, 1  ;;  %v12661_v27 = vld [vmem:[#allocation27_spill] sm:$0xff]  ;;  %v12675_v61 = vld [vmem:[#allocation29_spill] sm:$0xff] }
 0x1ef   : > { %5337 = vmatmul.mubr.msk.bf16.gmra.mxu0 %vm5335_vm5, %v12652_v5  ;;  %vm5338_vm0 = vmpackc.low %vm2109_vm2, %vm2108_vm12  ;;  %vm1901_vm13 = vcmp.eq.s32.totalorder %v1857_v41, 1  ;;  %vm2314_vm5 = vcmp.eq.s32.totalorder %v2232_v10, 1  ;;  %v6464_v41 = vld [vmem:[%s11198_s0 + $0x88] sm:$0xff]  ;;  %v2770_v10 = vsel %vm9979_vm15, 1, %v11854_v47 }
 0x1f0   : > { %2617 = vperm.xlu0 %6325, %v2560_v4   ;;  %5340 = vmatprep.mubr.msk.bf16.mxu0 %vm5338_vm0, %v9028_v22  ;;  %vm12662_vm0 = vnez %v12661_v27  ;;  %v2405_v22 = vadd.s32 1, %v6464_v41  ;;  %vm5371_vm11 = vmpackc.low %vm2315_vm7, %vm2314_vm5  ;;  %v6402_v41 = vld [vmem:[#allocation5 + $0x220] sm:$0xff]  }
 0x1f1   : > { %2300 = vperm.xlu1 %6326, %v2209_v50   ;;  %v1854_v4 = vpop.permute.xlu0 %1853  ;;  %v12659_v50 = vld [vmem:[#allocation26_spill] sm:$0xff]  ;;  %vm2530_vm9 = vmand %vm9979_vm15, %vm12662_vm0  ;;  %6144 = vmatprep.subr.bf16.mxu1 %v6402_v41 }
 0x1f2   : > { %vm12660_vm2 = vnez %v12659_v50  ;;  %vm1900_vm14 = vcmp.eq.s32.totalorder %v1854_v4, 1  ;;  %v2241_v48 = vpop.permute.xlu1 %2240  ;;  %v2562_v28 = vsel %vm2530_vm9, 1, %v11854_v47  ;;  %6145 = vmatpush3.bf16.msra.mxu1 %v6402_v41  ;;  %v12672_v41 = vld [vmem:[#allocation64_spill] sm:$0xff] }
 0x1f3   : > { %vm2531_vm12 = vmand %vm9967_vm8, %vm12660_vm2 }
 0x1f4   : > { %2297 = vperm.xlu0 %6325, %v2208_v37   ;;  %vm5341_vm1 = vmpackc.low %vm1901_vm13, %vm1900_vm14  ;;  %v6465_v37 = vld [vmem:[%s11198_s0 + $0x80] sm:$0xff]  ;;  %v2563_v50 = vsel %vm2531_vm12, 1, %v11854_v47  ;;  %vm2437_vm14 = vcmp.ge.s32.totalorder %v2405_v22, 0  ;;  %vm2469_vm13 = vcmp.lt.s32.totalorder %v2405_v22, 16 }
 0x1f5   : > { %2834 = vperm.xlu1 %6326, %v2771_v39   ;;  %v2404_v4 = vadd.s32 1, %v6465_v37  ;;  %4158 = vmatmul.mubr.bf16.gmra.mxu1 %v12663_v52  ;;  %v2238_v58 = vpop.permute.xlu0 %2237  ;;  %v12664_v37 = vld [vmem:[#allocation58_spill] sm:$0xff]  ;;  %vm10014_vm6 = vmand %vm2437_vm14, %vm2469_vm13 }
 0x1f6   : > { %5373 = vmatprep.mubr.msk.bf16.mxu1 %vm5371_vm11, %v9494_v54  ;;  %v2071_v39 = vpop.permute.xlu1 %2070  ;;  %vm12665_vm12 = vnez %v12664_v37  ;;  %vm2316_vm11 = vcmp.eq.s32.totalorder %v2238_v58, 1 }
 0x1f7   : > { %5343 = vmatmul.mubr.msk.bf16.gmra.mxu0 %vm5341_vm1, %v9054_v46  ;;  %vm2436_vm7 = vcmp.ge.s32.totalorder %v2404_v4, 0  ;;  %vm2468_vm5 = vcmp.lt.s32.totalorder %v2404_v4, 16  ;;  %vm2111_vm2 = vcmp.eq.s32.totalorder %v2071_v39, 1  ;;  %v2211_v54 = vsel %vm12665_vm12, 1, %v11854_v47  ;;  %v6403_v4 = vld [vmem:[#allocation5 + $0x218] sm:$0xff]  }
 0x1f8   : > { %2831 = vperm.xlu0 %6325, %v2770_v10   ;;  %vm2317_vm1 = vcmp.eq.s32.totalorder %v2241_v48, 1  ;;  %v12666_v10 = vmov 0  ;;  %vm10018_vm9 = vmand %vm2436_vm7, %vm2468_vm5  ;;  %v12670_v39 = vld [vmem:[#allocation59_spill] sm:$0xff]  ;;  %v2773_v48 = vsel %vm10014_vm6, 1, %v11854_v47  ;;  %6146 = vmatprep.subr.bf16.mxu1 %v6403_v4 }
 0x1f9   : > { %2626 = vperm.xlu1 %6326, %v2563_v50   ;;  %v2068_v22 = vpop.permute.xlu0 %2067  ;;  %v12667_v10 = vsel %vm10014_vm6, 4294967295, %v12666_v10  ;;  %v12668_v50 = vmov 0  ;;  %vm12671_vm12 = vnez %v12670_v39  ;;  %vm5374_vm15 = vmpackc.low %vm2317_vm1, %vm2316_vm11  ;;  %6147 = vmatpush3.bf16.msra.mxu1 %v6403_v4  ;;  %v12677_v4 = vld [vmem:[#allocation60_spill] sm:$0xff] }
 0x1fa   : > { %vm2110_vm8 = vcmp.eq.s32.totalorder %v2068_v22, 1  ;;  %v1863_v27 = vpop.permute.xlu1 %1862  ;;  %v12669_v50 = vsel %vm10018_vm9, 4294967295, %v12668_v50  ;;  %v2210_v58 = vsel %vm12671_vm12, 1, %v11854_v47  ;;  %v12673_v22 = vld [vmem:[#allocation28_spill] sm:$0xff]  ;;  %vm12678_vm11 = vnez %v12677_v4  ;;  %v12684_v4 = vld [vmem:[#allocation62_spill] sm:$0xff] }
 0x1fb   : > { %vm5344_vm0 = vmpackc.low %vm2111_vm2, %vm2110_vm8  ;;  %vm1903_vm14 = vcmp.eq.s32.totalorder %v1863_v27, 1  ;;  %vm12674_vm13 = vnez %v12673_v22  ;;  %v6404_v27 = vld [vmem:[#allocation5 + $0x210] sm:$0xff]   ;;  %vm12676_vm2 = vnez %v12675_v61  ;;  %v6405_v61 = vld [vmem:[#allocation5 + $0x208] sm:$0xff]   ;;  %vm12686_vm12 = vnez %v12455_v55 }
 0x1fc   : > { %2623 = vperm.xlu0 %6325, %v2562_v28   ;;  %5346 = vmatprep.mubr.msk.bf16.mxu0 %vm5344_vm0, %v9088_v7  ;;  %vm2533_vm8 = vmand %vm10014_vm6, %vm12674_vm13  ;;  %v2772_v7 = vsel %vm10018_vm9, 1, %v11854_v47  ;;  %vm12679_vm0 = vnez %v12414_v31  ;;  %v12683_v31 = vld [vmem:[#allocation112_spill] sm:$0xff] }
 0x1fd   : > { %2306 = vperm.xlu1 %6326, %v2211_v54   ;;  %4166 = vmatmul.mubr.bf16.gmra.mxu1 %v12672_v41  ;;  %v1860_v28 = vpop.permute.xlu0 %1859  ;;  %v2565_v22 = vsel %vm2533_vm8, 1, %v11854_v47  ;;  %v6406_v39 = vld [vmem:[#allocation5 + $0x200] sm:$0xff]  }
 0x1fe   : > { %5376 = vmatprep.mubr.msk.bf16.mxu1 %vm5374_vm15, %v9574_v49  ;;  %vm1902_vm7 = vcmp.eq.s32.totalorder %v1860_v28, 1  ;;  %v2247_v54 = vpop.permute.xlu1 %2246  ;;  %vm2532_vm15 = vmand %vm10018_vm9, %vm12676_vm2  ;;  %6148 = vmatprep.subr.bf16.mxu1 %v6404_v27  ;;  %v6466_v28 = vld [vmem:[%s11198_s0 + $0x98] sm:$0xff] }
 0x1ff   : > { %vm5347_vm5 = vmpackc.low %vm1903_vm14, %vm1902_vm7  ;;  %vm2319_vm1 = vcmp.eq.s32.totalorder %v2247_v54, 1  ;;  %v2407_v49 = vadd.s32 1, %v6466_v28  ;;  %6149 = vmatpush3.bf16.msra.mxu1 %v6404_v27  ;;  %v2564_v51 = vsel %vm2532_vm15, 1, %v11854_v47  ;;  %v12680_v54 = vld [vmem:[#allocation61_spill] sm:$0xff]  ;;  %vm12682_vm7 = vnez %v12418_v59  ;;  %v6467_v27 = vld [vmem:[%s11198_s0 + $0x90] sm:$0xff] }
 0x200   : > { %2303 = vperm.xlu0 %6325, %v2210_v58   ;;  %5349 = vmatmul.mubr.msk.bf16.gmra.mxu0 %vm5347_vm5, %v9142_v24  ;;  %vm2965_vm14 = vmand %vm12679_vm0, %vm12678_vm11  ;;  %vm12681_vm8 = vnez %v12680_v54  ;;  %vm12685_vm0 = vnez %v12684_v4  ;;  %v12692_v54 = vmov 0 }
 0x201   : > { %2840 = vperm.xlu1 %6326, %v2773_v48   ;;  %v2244_v58 = vpop.permute.xlu0 %2243  ;;  %vm2964_vm5 = vmand %vm12682_vm7, %vm12681_vm8  ;;  %6150 = vmatprep.subr.bf16.mxu1 %v6405_v61 }
 0x202   : > { %vm2318_vm13 = vcmp.eq.s32.totalorder %v2244_v58, 1  ;;  %v2077_v48 = vpop.permute.xlu1 %2076  ;;  %vm2967_vm9 = vmand %vm12686_vm12, %vm12685_vm0  ;;  %v2996_v25 = vsel %vm2964_vm5, 1, %v11854_v47 }
 0x203   : > { %vm5377_vm2 = vmpackc.low %vm2319_vm1, %vm2318_vm13  ;;  %vm2113_vm11 = vcmp.eq.s32.totalorder %v2077_v48, 1  ;;  %vm2439_vm1 = vcmp.ge.s32.totalorder %v2407_v49, 0  ;;  %6151 = vmatpush3.bf16.msra.mxu1 %v6405_v61 }
 0x204   : > { %2837 = vperm.xlu0 %6325, %v2772_v7   ;;  %v2997_v7 = vsel %vm2965_vm14, 1, %v11854_v47  ;;  %vm2471_vm14 = vcmp.lt.s32.totalorder %v2407_v49, 16  ;;  %v12687_v49 = vld [vmem:[#allocation65_spill] sm:$0xff]  ;;  %6152 = vmatprep.subr.bf16.mxu1 %v6406_v39 }
 0x205   : > { %2632 = vperm.xlu1 %6326, %v2565_v22   ;;  %4174 = vmatmul.mubr.bf16.gmra.mxu1 %v12683_v31  ;;  %v2074_v58 = vpop.permute.xlu0 %2073  ;;  %v2406_v22 = vadd.s32 1, %v6467_v27  ;;  %vm10084_vm3 = vmand %vm2439_vm1, %vm2471_vm14 }
 0x206   : > { %5379 = vmatprep.mubr.msk.bf16.mxu1 %vm5377_vm2, %v9652_v42  ;;  %vm2112_vm15 = vcmp.eq.s32.totalorder %v2074_v58, 1  ;;  %v1869_v28 = vpop.permute.xlu1 %1868  ;;  %v12695_v58 = vld [vmem:[#allocation30_spill] sm:$0xff] }
 0x207   : > { %vm5350_vm13 = vmpackc.low %vm2113_vm11, %vm2112_vm15  ;;  %vm1905_vm2 = vcmp.eq.s32.totalorder %v1869_v28, 1  ;;  %vm12688_vm11 = vnez %v12687_v49  ;;  %vm12689_vm15 = vnez %v12480_v30  ;;  %vm2438_vm8 = vcmp.ge.s32.totalorder %v2406_v22, 0  ;;  %6153 = vmatpush3.bf16.msra.mxu1 %v6406_v39 }
 0x208   : > { %2629 = vperm.xlu0 %6325, %v2564_v51   ;;  %5352 = vmatprep.mubr.msk.bf16.mxu0 %vm5350_vm13, %v9120_v20  ;;  %v2999_v51 = vsel %vm2967_vm9, 1, %v11854_v47  ;;  %vm2966_vm6 = vmand %vm12689_vm15, %vm12688_vm11  ;;  %vm2470_vm7 = vcmp.lt.s32.totalorder %v2406_v22, 16  ;;  %v2775_v30 = vsel %vm10084_vm3, 1, %v11854_v47  ;;  %vm12696_vm0 = vnez %v12695_v58  ;;  %v12697_v22 = vld [vmem:[#allocation31_spill] sm:$0xff]  ;;  %v12703_v58 = vld [vmem:[#allocation68_spill] sm:$0xff] }
 0x209   : > { %3032 = vperm.xlu1 %6326, %v2997_v7   ;;  %v1866_v59 = vpop.permute.xlu0 %1865  ;;  %v2998_v61 = vsel %vm2966_vm6, 1, %v11854_v47  ;;  %vm10093_vm9 = vmand %vm2438_vm8, %vm2470_vm7  ;;  %v12694_v7 = vld [vmem:[#allocation120_spill] sm:$0xff]  ;;  %vm12698_vm11 = vnez %v12697_v22  ;;  %vm12701_vm7 = vnez %v12514_v32 }
 0x20a   : > { %vm1904_vm5 = vcmp.eq.s32.totalorder %v1866_v59, 1  ;;  %v2253_v55 = vpop.permute.xlu1 %2252  ;;  %v12693_v54 = vsel %vm10093_vm9, 4294967295, %v12692_v54  ;;  %vm2535_vm1 = vmand %vm10084_vm3, %vm12696_vm0  ;;  %v2774_v4 = vsel %vm10093_vm9, 1, %v11854_v47  ;;  %v6468_v59 = vld [vmem:[%s11198_s0 + $0xa8] sm:$0xff] }
 0x20b   : > { %vm5353_vm13 = vmpackc.low %vm1905_vm2, %vm1904_vm5  ;;  %vm2321_vm12 = vcmp.eq.s32.totalorder %v2253_v55, 1  ;;  %v2567_v27 = vsel %vm2535_vm1, 1, %v11854_v47  ;;  %v2409_v55 = vadd.s32 1, %v6468_v59  ;;  %vm12704_vm1 = vnez %v12703_v58  ;;  %v12716_v58 = vld [vmem:[#allocation32_spill] sm:$0xff] }
 0x20c   : > { %3029 = vperm.xlu0 %6325, %v2996_v25   ;;  %5355 = vmatmul.mubr.msk.bf16.gmra.mxu0 %vm5353_vm13, %v9203_v8  ;;  %vm2534_vm15 = vmand %vm10093_vm9, %vm12698_vm11 }
 0x20d   : > { %3038 = vperm.xlu1 %6326, %v2999_v51   ;;  %4182 = vmatmul.mubr.bf16.gmra.mxu1 %v12694_v7  ;;  %v2250_v25 = vpop.permute.xlu0 %2249  ;;  %v12699_v51 = vld [vmem:[#allocation67_spill] sm:$0xff] }
 0x20e   : > { %vm2320_vm6 = vcmp.eq.s32.totalorder %v2250_v25, 1  ;;  %v2083_v39 = vpop.permute.xlu1 %2082  ;;  %vm12700_vm8 = vnez %v12699_v51 }
 0x20f   : > { %vm5380_vm14 = vmpackc.low %vm2321_vm12, %vm2320_vm6  ;;  %vm2115_vm2 = vcmp.eq.s32.totalorder %v2083_v39, 1  ;;  %vm12705_vm6 = vnez %v12517_v43  ;;  %v12706_v39 = vld [vmem:[#allocation69_spill] sm:$0xff] }
 0x210   : > { %3035 = vperm.xlu0 %6325, %v2998_v61   ;;  %5382 = vmatprep.mubr.msk.bf16.mxu1 %vm5380_vm14, %v9743_v11  ;;  %vm2969_vm5 = vmand %vm12701_vm7, %vm12700_vm8  ;;  %v2566_v61 = vsel %vm2534_vm15, 1, %v11854_v47  ;;  %vm12707_vm11 = vnez %v12706_v39  ;;  %vm2441_vm7 = vcmp.ge.s32.totalorder %v2409_v55, 0 }
 0x211   : > { %2846 = vperm.xlu1 %6326, %v2775_v30   ;;  %v2080_v28 = vpop.permute.xlu0 %2079  ;;  %v12702_v30 = vld [vmem:[#allocation133_spill] sm:$0xff]  ;;  %v3001_v25 = vsel %vm2969_vm5, 1, %v11854_v47  ;;  %vm2968_vm14 = vmand %vm12705_vm6, %vm12704_vm1  ;;  %vm2473_vm5 = vcmp.lt.s32.totalorder %v2409_v55, 16  ;;  %vm12711_vm6 = vnez %v12563_v3 }
 0x212   : > { %vm2114_vm13 = vcmp.eq.s32.totalorder %v2080_v28, 1  ;;  %v1875_v49 = vpop.permute.xlu1 %1874  ;;  %v3000_v43 = vsel %vm2968_vm14, 1, %v11854_v47  ;;  %v12709_v28 = vld [vmem:[#allocation72_spill] sm:$0xff] }
 0x213   : > { %vm5356_vm12 = vmpackc.low %vm2115_vm2, %vm2114_vm13  ;;  %vm1907_vm0 = vcmp.eq.s32.totalorder %v1875_v49, 1  ;;  %vm12708_vm2 = vnez %v12542_v2  ;;  %vm12710_vm1 = vnez %v12709_v28 }
 0x214   : > { %2843 = vperm.xlu0 %6325, %v2774_v4   ;;  %5358 = vmatprep.mubr.msk.bf16.mxu0 %vm5356_vm12, %v12702_v30  ;;  %vm2971_vm8 = vmand %vm12708_vm2, %vm12707_vm11  ;;  %v6469_v4 = vld [vmem:[%s11198_s0 + $0xa0] sm:$0xff] }
 0x215   : > { %2638 = vperm.xlu1 %6326, %v2567_v27   ;;  %4190 = vmatmul.mubr.bf16.gmra.mxu1 %v9086_v38  ;;  %v1872_v32 = vpop.permute.xlu0 %1871  ;;  %v2408_v27 = vadd.s32 1, %v6469_v4  ;;  %v3003_v2 = vsel %vm2971_vm8, 1, %v11854_v47  ;;  %vm2970_vm11 = vmand %vm12711_vm6, %vm12710_vm1 }
 0x216   : > { %vm1906_vm15 = vcmp.eq.s32.totalorder %v1872_v32, 1  ;;  %v2259_v22 = vpop.permute.xlu1 %2258  ;;  %vm10140_vm2 = vmand %vm2441_vm7, %vm2473_vm5  ;;  %v3002_v55 = vsel %vm2970_vm11, 1, %v11854_v47  ;;  %vm12717_vm7 = vnez %v12716_v58  ;;  %v6471_v58 = vld [vmem:[%s11198_s0 + $0xb0] sm:$0xff] }
 0x217   : > { %vm5359_vm13 = vmpackc.low %vm1907_vm0, %vm1906_vm15  ;;  %vm2323_vm12 = vcmp.eq.s32.totalorder %v2259_v22, 1  ;;  %vm2440_vm9 = vcmp.ge.s32.totalorder %v2408_v27, 0  ;;  %vm2472_vm0 = vcmp.lt.s32.totalorder %v2408_v27, 16  ;;  %v2777_v3 = vsel %vm10140_vm2, 1, %v11854_v47  ;;  %v12718_v27 = vld [vmem:[#allocation33_spill] sm:$0xff] }
 0x218   : > { %2635 = vperm.xlu0 %6325, %v2566_v61   ;;  %5361 = vmatmul.mubr.msk.bf16.gmra.mxu0 %vm5359_vm13, %v9242_v1  ;;  %vm10148_vm13 = vmand %vm2440_vm9, %vm2472_vm0  ;;  %v12714_v61 = vmov 0  ;;  %vm12719_vm6 = vnez %v12718_v27  ;;  %v12728_v27 = vld [vmem:[#allocation87_spill] sm:$0xff] }
 0x219   : > { %3044 = vperm.xlu1 %6326, %v3001_v25   ;;  %v2256_v51 = vpop.permute.xlu0 %2255  ;;  %v12715_v61 = vsel %vm10148_vm13, 4294967295, %v12714_v61  ;;  %vm2537_vm5 = vmand %vm10140_vm2, %vm12717_vm7  ;;  %v2776_v39 = vsel %vm10148_vm13, 1, %v11854_v47 }
 0x21a   : > { %vm2322_vm15 = vcmp.eq.s32.totalorder %v2256_v51, 1  ;;  %v2793_v59 = vpop.permute.xlu1 %2792  ;;  %v2569_v4 = vsel %vm2537_vm5, 1, %v11854_v47  ;;  %vm2536_vm11 = vmand %vm10148_vm13, %vm12719_vm6 }
 0x21b   : > { %vm5383_vm14 = vmpackc.low %vm2323_vm12, %vm2322_vm15  ;;  %vm2885_vm8 = vcmp.eq.s32.totalorder %v2793_v59, 1  ;;  %vm12722_vm15 = vnez %v12589_v53  ;;  %v2568_v51 = vsel %vm2536_vm11, 1, %v11854_v47  ;;  %v5610_v53 = vpop.f32.mrf.mxu1 }
 0x21c   : > { %3041 = vperm.xlu0 %6325, %v3000_v43   ;;  %5385 = vmatprep.mubr.msk.bf16.mxu1 %vm5383_vm14, %v9822_v63  ;;  %v12720_v43 = vld [vmem:[#allocation73_spill] sm:$0xff] }
 0x21d   : > { %3050 = vperm.xlu1 %6326, %v3003_v2   ;;  %v2790_v25 = vpop.permute.xlu0 %2789  ;;  %4198 = vmatmul.mubr.bf16.gmra.mxu1 %v9191_v15  ;;  %vm12721_vm0 = vnez %v12720_v43 }
 0x21e   : > { %vm2884_vm12 = vcmp.eq.s32.totalorder %v2790_v25, 1  ;;  %v2585_v32 = vpop.permute.xlu1 %2584  ;;  %vm2973_vm14 = vmand %vm12722_vm15, %vm12721_vm0  ;;  %v12725_v25 = vld [vmem:[#allocation85_spill] sm:$0xff]  ;;  %vm12727_vm0 = vnez %v12615_v29 }
 0x21f   : > { %vm5410_vm1 = vmpackc.low %vm2885_vm8, %vm2884_vm12  ;;  %vm2677_vm9 = vcmp.eq.s32.totalorder %v2585_v32, 1  ;;  %v3005_v59 = vsel %vm2973_vm14, 1, %v11854_v47  ;;  %vm12726_vm6 = vnez %v12725_v25  ;;  %v12735_v25 = vld [vmem:[#allocation35_spill] sm:$0xff] }
 0x220   : > { %3047 = vperm.xlu0 %6325, %v3002_v55   ;;  %5412 = vmatprep.mubr.msk.bf16.mxu0 %vm5410_vm1, %v12651_v21  ;;  %v6470_v21 = vld [vmem:[%s11198_s0 + $0xb8] sm:$0xff] }
 0x221   : > { %2852 = vperm.xlu1 %6326, %v2777_v3   ;;  %v2411_v28 = vadd.s32 1, %v6470_v21  ;;  %v12723_v55 = vld [vmem:[#allocation75_spill] sm:$0xff] }
 0x222   : > { %v2582_v22 = vpop.permute.xlu0 %2581  ;;  %vm12724_vm12 = vnez %v12723_v55  ;;  %v12733_v55 = vmov 0 }
 0x223   : > { %vm2676_vm8 = vcmp.eq.s32.totalorder %v2582_v22, 1  ;;  %v2265_v2 = vpop.permute.xlu1 %2264  ;;  %vm2972_vm1 = vmand %vm9745_vm4, %vm12724_vm12  ;;  %vm2443_vm15 = vcmp.ge.s32.totalorder %v2411_v28, 0  ;;  %vm2475_vm14 = vcmp.lt.s32.totalorder %v2411_v28, 16  ;;  %vm12730_vm12 = vnez %v12628_v35 }
 0x224   : > { %2849 = vperm.xlu0 %6325, %v2776_v39   ;;  %vm5413_vm7 = vmpackc.low %vm2677_vm9, %vm2676_vm8  ;;  %vm2325_vm5 = vcmp.eq.s32.totalorder %v2265_v2, 1  ;;  %v5611_v39 = vpop.f32.mrf.mxu1  ;;  %v3004_v40 = vsel %vm2972_vm1, 1, %v11854_v47  ;;  %v12731_v2 = vmov 0 }
 0x225   : > { %2644 = vperm.xlu1 %6326, %v2569_v4   ;;  %5415 = vmatmul.mubr.msk.bf16.vlgmr.msra.gmra.mxu0 %vm5413_vm7, %v8601_v36  ;;  %vm2975_vm9 = vmand %vm12727_vm0, %vm12726_vm6  ;;  %v2410_v36 = vadd.s32 1, %v6471_v58  ;;  %v10189_v4 = vadd.f32 %v5611_v39, %v5610_v53  ;;  %vm12729_vm7 = vnez %v12728_v27 }
 0x226   : > { %v2262_v3 = vpop.permute.xlu0 %2261  ;;  %v3007_v29 = vsel %vm2975_vm9, 1, %v11854_v47  ;;  %vm2974_vm6 = vmand %vm12730_vm12, %vm12729_vm7  ;;  %v5613_v22 = vpop.f32.mrf.mxu1 }
 0x227   : > { %vm2324_vm11 = vcmp.eq.s32.totalorder %v2262_v3, 1  ;;  %v2799_v32 = vpop.permute.xlu1 %2798  ;;  %vm10197_vm0 = vmand %vm2443_vm15, %vm2475_vm14  ;;  %vm2474_vm1 = vcmp.lt.s32.totalorder %v2410_v36, 16  ;;  %v3006_v35 = vsel %vm2974_vm6, 1, %v11854_v47 }
 0x228   : > { %2641 = vperm.xlu0 %6325, %v2568_v51   ;;  %vm5386_vm8 = vmpackc.low %vm2325_vm5, %vm2324_vm11  ;;  %vm2887_vm4 = vcmp.eq.s32.totalorder %v2799_v32, 1  ;;  %v12732_v2 = vsel %vm10197_vm0, 4294967295, %v12731_v2  ;;  %vm2442_vm5 = vcmp.ge.s32.totalorder %v2410_v36, 0  ;;  %v5614_v28 = vpop.f32.mrf.mxu1 }
 0x229   : > { %3056 = vperm.xlu1 %6326, %v3005_v59   ;;  %5388 = vmatprep.mubr.msk.bf16.mxu1 %vm5386_vm8, %v12633_v14  ;;  %v10203_v51 = vadd.f32 %v5614_v28, %v5613_v22  ;;  %v2779_v59 = vsel %vm10197_vm0, 1, %v11854_v47  ;;  %vm10209_vm14 = vmand %vm2442_vm5, %vm2474_vm1  ;;  %vm12736_vm8 = vnez %v12735_v25  ;;  %v12739_v22 = vld [vmem:[#allocation89_spill] sm:$0xff] }
 0x22a   : > { %v2796_v43 = vpop.permute.xlu0 %2795  ;;  %4206 = vmatmul.mubr.bf16.gmra.mxu1 %v12468_v19  ;;  %v12734_v55 = vsel %vm10209_vm14, 4294967295, %v12733_v55  ;;  %v5616_v53 = vpop.f32.mrf.mxu1  ;;  %v2778_v36 = vsel %vm10209_vm14, 1, %v11854_v47 }
 0x22b   : > { %vm2886_vm11 = vcmp.eq.s32.totalorder %v2796_v43, 1  ;;  %v2591_v21 = vpop.permute.xlu1 %2590 }
 0x22c   : > { %3053 = vperm.xlu0 %6325, %v3004_v40   ;;  %vm5416_vm9 = vmpackc.low %vm2887_vm4, %vm2886_vm11  ;;  %vm2679_vm15 = vcmp.eq.s32.totalorder %v2591_v21, 1  ;;  %v12737_v40 = vld [vmem:[#allocation37_spill] sm:$0xff]  ;;  %vm12740_vm11 = vnez %v12739_v22 }
 0x22d   : > { %3062 = vperm.xlu1 %6326, %v3007_v29   ;;  %5418 = vmatprep.mubr.msk.bf16.mxu0 %vm5416_vm9, %v12663_v52  ;;  %vm2539_vm4 = vmand %vm10197_vm0, %vm12736_vm8  ;;  %v5617_v52 = vpop.f32.mrf.mxu1  ;;  %vm12738_vm5 = vnez %v12737_v40 }
 0x22e   : > { %v10220_v32 = vadd.f32 %v5617_v52, %v5616_v53  ;;  %v2571_v39 = vsel %vm2539_vm4, 1, %v11854_v47  ;;  %vm2538_vm1 = vmand %vm10209_vm14, %vm12738_vm5  ;;  %vm12744_vm5 = vnez %v12410_v44 }
 0x22f   : > { %v2588_v3 = vpop.permute.xlu0 %2587  ;;  %v2271_v58 = vpop.permute.xlu1 %2270  ;;  %vm2977_vm9 = vmand %vm9916_vm10, %vm12740_vm11  ;;  %vm12742_vm10 = vnez %v12741_v12 }
 0x230   : > { %vm2678_vm7 = vcmp.eq.s32.totalorder %v2588_v3, 1  ;;  %3059 = vperm.xlu0 %6325, %v3006_v35   ;;  %vm2327_vm6 = vcmp.eq.s32.totalorder %v2271_v58, 1  ;;  %v5619_v29 = vpop.f32.mrf.mxu1  ;;  %v2570_v35 = vsel %vm2538_vm1, 1, %v11854_v47  ;;  %v3009_v53 = vsel %vm2977_vm9, 1, %v11854_v47  ;;  %v6473_v58 = vld [vmem:[%s11198_s0 + $0xc0] sm:$0xff] }
 0x231   : > { %vm5419_vm12 = vmpackc.low %vm2679_vm15, %vm2678_vm7  ;;  %2858 = vperm.xlu1 %6326, %v2779_v59   ;;  %vm12743_vm7 = vnez %v12640_v62  ;;  %v2412_v52 = vadd.s32 1, %v6473_v58 }
 0x232   : > { %5421 = vmatmul.mubr.msk.bf16.gmra.mxu0 %vm5419_vm12, %v12439_v18  ;;  %v6472_v18 = vld [vmem:[%s11198_s0 + $0xc8] sm:$0xff]  ;;  %v5620_v28 = vpop.f32.mrf.mxu1  ;;  %vm2976_vm12 = vmand %vm12743_vm7, %vm12742_vm10 }
 0x233   : > { %v2268_v27 = vpop.permute.xlu0 %2267  ;;  %v2413_v21 = vadd.s32 1, %v6472_v18  ;;  %v10236_v59 = vadd.f32 %v5620_v28, %v5619_v29  ;;  %v3008_v40 = vsel %vm2976_vm12, 1, %v11854_v47  ;;  %vm2444_vm7 = vcmp.ge.s32.totalorder %v2412_v52, 0 }
 0x234   : > { %vm2326_vm15 = vcmp.eq.s32.totalorder %v2268_v27, 1  ;;  %2855 = vperm.xlu0 %6325, %v2778_v36   ;;  %v2805_v43 = vpop.permute.xlu1 %2804  ;;  %v5622_v3 = vpop.f32.mrf.mxu1  ;;  %vm2476_vm12 = vcmp.lt.s32.totalorder %v2412_v52, 16 }
 0x235   : > { %vm5389_vm8 = vmpackc.low %vm2327_vm6, %vm2326_vm15  ;;  %2650 = vperm.xlu1 %6326, %v2571_v39   ;;  %vm2889_vm4 = vcmp.eq.s32.totalorder %v2805_v43, 1  ;;  %vm12745_vm6 = vnez %v12654_v6  ;;  %vm2445_vm9 = vcmp.ge.s32.totalorder %v2413_v21, 0  ;;  %vm2477_vm15 = vcmp.lt.s32.totalorder %v2413_v21, 16 }
 0x236   : > { %5391 = vmatprep.mubr.msk.bf16.mxu1 %vm5389_vm8, %v12646_v33  ;;  %v5623_v39 = vpop.f32.mrf.mxu1  ;;  %vm12746_vm14 = vmand %vm12745_vm6, %vm12744_vm5 }
 0x237   : > { %v2802_v25 = vpop.permute.xlu0 %2801  ;;  %4214 = vmatmul.mubr.bf16.gmra.mxu1 %v12499_v23  ;;  %v10259_v29 = vadd.f32 %v5623_v39, %v5622_v3  ;;  %v3011_v27 = vsel %vm12746_vm14, 1, %v11854_v47  ;;  %vm10272_vm10 = vmand %vm2445_vm9, %vm2477_vm15 }
 0x238   : > { %vm2888_vm1 = vcmp.eq.s32.totalorder %v2802_v25, 1  ;;  %2647 = vperm.xlu0 %6325, %v2570_v35   ;;  %v2597_v36 = vpop.permute.xlu1 %2596  ;;  %v5625_v62 = vpop.f32.mrf.mxu1  ;;  %v2781_v18 = vsel %vm10272_vm10, 1, %v11854_v47  ;;  %vm10283_vm5 = vmand %vm2444_vm7, %vm2476_vm12  ;;  %vm12760_vm7 = vnez %v12667_v10 }
 0x239   : > { %vm5422_vm8 = vmpackc.low %vm2889_vm4, %vm2888_vm1  ;;  %3068 = vperm.xlu1 %6326, %v3009_v53   ;;  %vm2681_vm11 = vcmp.eq.s32.totalorder %v2597_v36, 1  ;;  %vm12747_vm4 = vnez %v12428_v0  ;;  %vm12748_vm1 = vnez %v12658_v9  ;;  %v12751_v9 = vld [vmem:[#allocation66_spill] sm:$0xff]  ;;  %v12754_v53 = vld [vmem:[#allocation39_spill] sm:$0xff]  ;;  %v2780_v25 = vsel %vm10283_vm5, 1, %v11854_v47 }
 0x23a   : > { %5424 = vmatprep.mubr.msk.bf16.mxu0 %vm5422_vm8, %v12672_v41  ;;  %vm2978_vm0 = vmand %vm12748_vm1, %vm12747_vm4  ;;  %v5626_v41 = vpop.f32.mrf.mxu1  ;;  %vm12755_vm6 = vnez %v12754_v53  ;;  %v12756_v36 = vld [vmem:[#allocation41_spill] sm:$0xff] }
 0x23b   : > { %v2594_v22 = vpop.permute.xlu0 %2593  ;;  %v3010_v44 = vsel %vm2978_vm0, 1, %v11854_v47  ;;  %v10277_v0 = vadd.f32 %v5626_v41, %v5625_v62  ;;  %vm2541_vm0 = vmand %vm10272_vm10, %vm12755_vm6  ;;  %vm12757_vm15 = vnez %v12756_v36  ;;  %v12761_v62 = vld [vmem:[#allocation110_spill] sm:$0xff] }
 0x23c   : > { %vm2680_vm8 = vcmp.eq.s32.totalorder %v2594_v22, 1  ;;  %3065 = vperm.xlu0 %6325, %v3008_v40   ;;  %v2277_v6 = vpop.permute.xlu1 %2276  ;;  %v5628_v28 = vpop.f32.mrf.mxu1  ;;  %v2573_v52 = vsel %vm2541_vm0, 1, %v11854_v47  ;;  %vm2540_vm4 = vmand %vm10283_vm5, %vm12757_vm15 }
 0x23d   : > { %vm5425_vm13 = vmpackc.low %vm2681_vm11, %vm2680_vm8  ;;  %3074 = vperm.xlu1 %6326, %v3011_v27   ;;  %vm2329_vm14 = vcmp.eq.s32.totalorder %v2277_v6, 1  ;;  %v12758_v27 = vld [vmem:[#allocation99_spill] sm:$0xff] }
 0x23e   : > { %5427 = vmatmul.mubr.msk.bf16.gmra.mxu0 %vm5425_vm13, %v12751_v9  ;;  %v5629_v3 = vpop.f32.mrf.mxu1  ;;  %vm12759_vm1 = vnez %v12758_v27  ;;  %v6474_v6 = vld [vmem:[%s11198_s0 + $0xd8] sm:$0xff]  ;;  %v2572_v9 = vsel %vm2540_vm4, 1, %v11854_v47 }
 0x23f   : > { %v2274_v35 = vpop.permute.xlu0 %2273  ;;  %v10294_v58 = vadd.f32 %v5629_v3, %v5628_v28  ;;  %vm2981_vm12 = vmand %vm12760_vm7, %vm12759_vm1  ;;  %v2415_v41 = vadd.s32 1, %v6474_v6  ;;  %v12762_v28 = vld [vmem:[#allocation100_spill] sm:$0xff]  ;;  %v6475_v3 = vld [vmem:[%s11198_s0 + $0xd0] sm:$0xff] }
 0x240   : > { %vm2328_vm11 = vcmp.eq.s32.totalorder %v2274_v35, 1  ;;  %3071 = vperm.xlu0 %6325, %v3010_v44   ;;  %v2811_v12 = vpop.permute.xlu1 %2810  ;;  %v5631_v39 = vpop.f32.mrf.mxu1  ;;  %v3013_v10 = vsel %vm2981_vm12, 1, %v11854_v47  ;;  %vm12763_vm0 = vnez %v12762_v28 }
 0x241   : > { %vm5392_vm13 = vmpackc.low %vm2329_vm14, %vm2328_vm11  ;;  %2864 = vperm.xlu1 %6326, %v2781_v18   ;;  %vm2891_vm9 = vcmp.eq.s32.totalorder %v2811_v12, 1  ;;  %vm12764_vm11 = vnez %v12669_v50  ;;  %v12765_v12 = vld [vmem:[#allocation103_spill] sm:$0xff]  ;;  %vm2447_vm1 = vcmp.ge.s32.totalorder %v2415_v41, 0  ;;  %vm2479_vm7 = vcmp.lt.s32.totalorder %v2415_v41, 16 }
 0x242   : > { %5394 = vmatprep.mubr.msk.bf16.mxu1 %vm5392_vm13, %v12652_v5  ;;  %v5632_v44 = vpop.f32.mrf.mxu1  ;;  %vm2980_vm13 = vmand %vm12764_vm11, %vm12763_vm0  ;;  %vm12766_vm15 = vnez %v12765_v12  ;;  %v12777_v12 = vld [vmem:[#allocation109_spill] sm:$0xff] }
 0x243   : > { %v2808_v40 = vpop.permute.xlu0 %2807  ;;  %4222 = vmatmul.mubr.bf16.gmra.mxu1 %v12761_v62  ;;  %v10311_v18 = vadd.f32 %v5632_v44, %v5631_v39  ;;  %v3012_v50 = vsel %vm2980_vm13, 1, %v11854_v47  ;;  %v12767_v39 = vld [vmem:[#allocation53_spill] sm:$0xff]  ;;  %vm10337_vm11 = vmand %vm2447_vm1, %vm2479_vm7 }
 0x244   : > { %vm2890_vm8 = vcmp.eq.s32.totalorder %v2808_v40, 1  ;;  %2861 = vperm.xlu0 %6325, %v2780_v25   ;;  %v2603_v22 = vpop.permute.xlu1 %2602  ;;  %v5634_v35 = vpop.f32.mrf.mxu1  ;;  %v12768_v40 = vld [vmem:[#allocation107_spill] sm:$0xff] }
 0x245   : > { %vm5428_vm14 = vmpackc.low %vm2891_vm9, %vm2890_vm8  ;;  %2656 = vperm.xlu1 %6326, %v2573_v52   ;;  %vm2683_vm6 = vcmp.eq.s32.totalorder %v2603_v22, 1  ;;  %vm12769_vm8 = vnez %v12768_v40 }
 0x246   : > { %5430 = vmatprep.mubr.msk.bf16.mxu0 %vm5428_vm14, %v12683_v31  ;;  %vm2983_vm9 = vmand %vm10084_vm3, %vm12766_vm15  ;;  %v2414_v31 = vadd.s32 1, %v6475_v3  ;;  %v5635_v52 = vpop.f32.mrf.mxu1  ;;  %vm12770_vm14 = vnez %v12693_v54  ;;  %v2783_v54 = vsel %vm10337_vm11, 1, %v11854_v47 }
 0x247   : > { %v2600_v53 = vpop.permute.xlu0 %2599  ;;  %v10327_v36 = vadd.f32 %v5635_v52, %v5634_v35  ;;  %v3015_v48 = vsel %vm2983_vm9, 1, %v11854_v47  ;;  %vm2982_vm0 = vmand %vm12770_vm14, %vm12769_vm8 }
 0x248   : > { %vm2682_vm4 = vcmp.eq.s32.totalorder %v2600_v53, 1  ;;  %2653 = vperm.xlu0 %6325, %v2572_v9   ;;  %v2283_v25 = vpop.permute.xlu1 %2282  ;;  %v10335_v27 = vpop.f32.mrf.mxu1  ;;  %vm2478_vm13 = vcmp.lt.s32.totalorder %v2414_v31, 16  ;;  %v3014_v9 = vsel %vm2982_vm0, 1, %v11854_v47  ;;  %v12775_v53 = vld [vmem:[#allocation43_spill] sm:$0xff] }
 0x249   : > { %vm5431_vm12 = vmpackc.low %vm2683_vm6, %vm2682_vm4  ;;  %3080 = vperm.xlu1 %6326, %v3013_v10   ;;  %vm2331_vm3 = vcmp.eq.s32.totalorder %v2283_v25, 1  ;;  %vm2446_vm6 = vcmp.ge.s32.totalorder %v2414_v31, 0  ;;  %vm12776_vm7 = vnez %v12775_v53  ;;  %v12783_v53 = vld [vmem:[#allocation116_spill] sm:$0xff] }
 0x24a   : > { %5433 = vmatmul.mubr.msk.bf16.gmra.mxu0 %vm5431_vm12, %v12767_v39  ;;  %v10341_v44 = vpop.f32.mrf.mxu1  ;;  %vm10347_vm1 = vmand %vm2446_vm6, %vm2478_vm13  ;;  %v12778_v39 = vld [vmem:[#allocation45_spill] sm:$0xff] }
 0x24b   : > { %v2280_v22 = vpop.permute.xlu0 %2279  ;;  %vm2543_vm12 = vmand %vm10337_vm11, %vm12776_vm7  ;;  %v2782_v25 = vsel %vm10347_vm1, 1, %v11854_v47  ;;  %vm12779_vm0 = vnez %v12778_v39  ;;  %v6477_v39 = vld [vmem:[%s11198_s0 + $0xe0] sm:$0xff] }
 0x24c   : > { %vm2330_vm15 = vcmp.eq.s32.totalorder %v2280_v22, 1  ;;  %3077 = vperm.xlu0 %6325, %v3012_v50   ;;  %v2817_v41 = vpop.permute.xlu1 %2816  ;;  %v5640_v28 = vpop.f32.mrf.mxu1  ;;  %v2575_v50 = vsel %vm2543_vm12, 1, %v11854_v47  ;;  %vm2542_vm6 = vmand %vm10347_vm1, %vm12779_vm0  ;;  %v12780_v22 = vld [vmem:[#allocation111_spill] sm:$0xff]  ;;  %vm12785_vm12 = vnez %v12715_v61 }
 0x24d   : > { %vm5395_vm9 = vmpackc.low %vm2331_vm3, %vm2330_vm15  ;;  %3086 = vperm.xlu1 %6326, %v3015_v48   ;;  %vm2893_vm4 = vcmp.eq.s32.totalorder %v2817_v41, 1  ;;  %vm12781_vm13 = vnez %v12780_v22 }
 0x24e   : > { %5397 = vmatprep.mubr.msk.bf16.mxu1 %vm5395_vm9, %v9054_v46  ;;  %v5641_v31 = vpop.f32.mrf.mxu1  ;;  %vm2985_vm15 = vmand %vm10140_vm2, %vm12781_vm13  ;;  %vm12784_vm2 = vnez %v12783_v53 }
 0x24f   : > { %v2814_v35 = vpop.permute.xlu0 %2813  ;;  %4230 = vmatmul.mubr.bf16.gmra.mxu1 %v12777_v12  ;;  %v10360_v52 = vadd.f32 %v5641_v31, %v5640_v28  ;;  %v2574_v28 = vsel %vm2542_vm6, 1, %v11854_v47  ;;  %v3017_v49 = vsel %vm2985_vm15, 1, %v11854_v47  ;;  %v10389_v31 = vld [vmem:[%s11204_s6] ss:$0 sm:$0xff] }
 0x250   : > { %vm2892_vm3 = vcmp.eq.s32.totalorder %v2814_v35, 1  ;;  %3083 = vperm.xlu0 %6325, %v3014_v9   ;;  %v2609_v3 = vpop.permute.xlu1 %2608  ;;  %v10368_v48 = vpop.f32.mrf.mxu1  ;;  %v12782_v35 = vld [vmem:[#allocation118_spill] sm:$0xff]  ;;  %v3849_v53 = vadd.f32 %v10311_v18, %v10389_v31 }
 0x251   : > { %vm5434_vm8 = vmpackc.low %vm2893_vm4, %vm2892_vm3  ;;  %2870 = vperm.xlu1 %6326, %v2783_v54   ;;  %vm2685_vm14 = vcmp.eq.s32.totalorder %v2609_v3, 1 }
 0x252   : > { %5436 = vmatprep.mubr.msk.bf16.mxu0 %vm5434_vm8, %v12694_v7  ;;  %v6476_v7 = vld [vmem:[%s11198_s0 + $0xe8] sm:$0xff]  ;;  %v10377_v54 = vpop.f32.mrf.mxu1  ;;  %vm2984_vm3 = vmand %vm12785_vm12, %vm12784_vm2  ;;  %vm12786_vm8 = vnez %v12586_v34 }
 0x253   : > { %v2606_v40 = vpop.permute.xlu0 %2605  ;;  %v2417_v9 = vadd.s32 1, %v6476_v7  ;;  %v3016_v30 = vsel %vm2984_vm3, 1, %v11854_v47  ;;  %v12792_v34 = vld [vmem:[#allocation121_spill] sm:$0xff] }
 0x254   : > { %vm2684_vm9 = vcmp.eq.s32.totalorder %v2606_v40, 1  ;;  %2867 = vperm.xlu0 %6325, %v2782_v25   ;;  %v2289_v41 = vpop.permute.xlu1 %2288  ;;  %v5646_v3 = vpop.f32.mrf.mxu1  ;;  %v2416_v40 = vadd.s32 1, %v6477_v39 }
 0x255   : > { %vm5437_vm4 = vmpackc.low %vm2685_vm14, %vm2684_vm9  ;;  %2662 = vperm.xlu1 %6326, %v2575_v50   ;;  %vm2333_vm7 = vcmp.eq.s32.totalorder %v2289_v41, 1  ;;  %v5722_v50 = vpop.f32.mrf.mxu0  ;;  %vm12787_vm14 = vnez %v12732_v2  ;;  %vm2449_vm13 = vcmp.ge.s32.totalorder %v2417_v9, 0  ;;  %vm2481_vm15 = vcmp.lt.s32.totalorder %v2417_v9, 16 }
 0x256   : > { %5439 = vmatmul.mubr.msk.bf16.gmra.mxu0 %vm5437_vm4, %v12782_v35  ;;  %vm2987_vm0 = vmand %vm12787_vm14, %vm12786_vm8  ;;  %v5647_v7 = vpop.f32.mrf.mxu1  ;;  %vm2448_vm3 = vcmp.ge.s32.totalorder %v2416_v40, 0  ;;  %vm2480_vm8 = vcmp.lt.s32.totalorder %v2416_v40, 16 }
 0x257   : > { %v2286_v25 = vpop.permute.xlu0 %2285  ;;  %v5723_v35 = vpop.f32.mrf.mxu0  ;;  %v10405_v46 = vadd.f32 %v5647_v7, %v5646_v3  ;;  %v3019_v41 = vsel %vm2987_vm0, 1, %v11854_v47  ;;  %vm10424_vm12 = vmand %vm2449_vm13, %vm2481_vm15  ;;  %v3825_v7 = vadd.f32 %v10203_v51, %v10389_v31 }
 0x258   : > { %vm2332_vm6 = vcmp.eq.s32.totalorder %v2286_v25, 1  ;;  %2659 = vperm.xlu0 %6325, %v2574_v28   ;;  %v2823_v22 = vpop.permute.xlu1 %2822  ;;  %v3822_v28 = vadd.f32 %v10189_v4, %v10389_v31  ;;  %v5724_v25 = vadd.f32 %v5723_v35, %v5722_v50  ;;  %v10420_v61 = vpop.f32.mrf.mxu1  ;;  %vm10448_vm15 = vmand %vm2448_vm3, %vm2480_vm8 }
 0x259   : > { %vm5398_vm9 = vmpackc.low %vm2333_vm7, %vm2332_vm6  ;;  %3092 = vperm.xlu1 %6326, %v3017_v49   ;;  %vm2895_vm4 = vcmp.eq.s32.totalorder %v2823_v22, 1  ;;  %vm12788_vm7 = vnez %v12594_v60  ;;  %vm12789_vm6 = vnez %v12734_v55  ;;  %v5725_v4 = vpop.f32.mrf.mxu0 }
 0x25a   : > { %vm2986_vm2 = vmand %vm12789_vm6, %vm12788_vm7  ;;  %5400 = vmatprep.mubr.msk.bf16.mxu1 %vm5398_vm9, %v9142_v24  ;;  %v10429_v2 = vadd.f32 %v5724_v25, %v3822_v28  ;;  %v10431_v50 = vpop.f32.mrf.mxu1  ;;  %v12795_v25 = vld [vmem:[#allocation47_spill] sm:$0xff] }
 0x25b   : > { %v2820_v49 = vpop.permute.xlu0 %2819  ;;  %4238 = vmatmul.mubr.bf16.gmra.mxu1 %v12792_v34  ;;  %v5726_v39 = vpop.f32.mrf.mxu0  ;;  %v3018_v9 = vsel %vm2986_vm2, 1, %v11854_v47  ;;  %vm12796_vm9 = vnez %v12795_v25  ;;  %v12797_v25 = vld [vmem:[#allocation125_spill] sm:$0xff] }
 0x25c   : > { %vm2894_vm14 = vcmp.eq.s32.totalorder %v2820_v49, 1  ;;  %3089 = vperm.xlu0 %6325, %v3016_v30   ;;  %v2615_v3 = vpop.permute.xlu1 %2614  ;;  %v5727_v35 = vadd.f32 %v5726_v39, %v5725_v4  ;;  %v2785_v30 = vsel %vm10424_vm12, 1, %v11854_v47  ;;  %v5652_v60 = vpop.f32.mrf.mxu1  ;;  %v2784_v49 = vsel %vm10448_vm15, 1, %v11854_v47 }
 0x25d   : > { %vm5440_vm0 = vmpackc.low %vm2895_vm4, %vm2894_vm14  ;;  %3098 = vperm.xlu1 %6326, %v3019_v41   ;;  %vm2687_vm13 = vcmp.eq.s32.totalorder %v2615_v3, 1  ;;  %v5728_v28 = vpop.f32.mrf.mxu0  ;;  %v3830_v3 = vadd.f32 %v10220_v32, %v10389_v31  ;;  %vm12800_vm14 = vnez %v12620_v26  ;;  %v6479_v26 = vld [vmem:[%s11198_s0 + $0xf0] sm:$0xff] }
 0x25e   : > { %5442 = vmatprep.mubr.msk.bf16.mxu0 %vm5440_vm0, %v9086_v38  ;;  %vm2545_vm4 = vmand %vm10424_vm12, %vm12796_vm9  ;;  %v10456_v38 = vadd.f32 %v5727_v35, %v3825_v7  ;;  %v5653_v41 = vpop.f32.mrf.mxu1  ;;  %v12798_v7 = vld [vmem:[#allocation49_spill] sm:$0xff]  ;;  %v2418_v43 = vadd.s32 1, %v6479_v26 }
 0x25f   : > { %v2612_v55 = vpop.permute.xlu0 %2611  ;;  %v5729_v40 = vpop.f32.mrf.mxu0  ;;  %v10461_v4 = vadd.f32 %v5653_v41, %v5652_v60  ;;  %vm12799_vm3 = vnez %v12798_v7  ;;  %vm2989_vm0 = vmand %vm10272_vm10, %vm12800_vm14  ;;  %v3833_v7 = vadd.f32 %v10236_v59, %v10389_v31  ;;  %v12803_v59 = vld [vmem:[#allocation117_spill] sm:$0xff] }
 0x260   : > { %vm2686_vm7 = vcmp.eq.s32.totalorder %v2612_v55, 1  ;;  %3095 = vperm.xlu0 %6325, %v3018_v9   ;;  %v2295_v51 = vpop.permute.xlu1 %2294  ;;  %v5730_v39 = vadd.f32 %v5729_v40, %v5728_v28  ;;  %v2577_v9 = vsel %vm2545_vm4, 1, %v11854_v47  ;;  %vm2544_vm8 = vmand %vm10448_vm15, %vm12799_vm3  ;;  %v10471_v35 = vpop.f32.mrf.mxu1  ;;  %v6478_v28 = vld [vmem:[%s11198_s0 + $0xf8] sm:$0xff] }
 0x261   : > { %vm5443_vm6 = vmpackc.low %vm2687_vm13, %vm2686_vm7  ;;  %2876 = vperm.xlu1 %6326, %v2785_v30   ;;  %vm2335_vm2 = vcmp.eq.s32.totalorder %v2295_v51, 1  ;;  %v5731_v55 = vpop.f32.mrf.mxu0  ;;  %v2419_v51 = vadd.s32 1, %v6478_v28  ;;  %vm12801_vm7 = vnez %v12625_v45 }
 0x262   : > { %5445 = vmatmul.mubr.msk.bf16.gmra.mxu0 %vm5443_vm6, %v12797_v25  ;;  %v10477_v32 = vadd.f32 %v5730_v39, %v3830_v3  ;;  %v10482_v41 = vpop.f32.mrf.mxu1  ;;  %v2576_v25 = vsel %vm2544_vm8, 1, %v11854_v47  ;;  %vm2988_vm6 = vmand %vm10283_vm5, %vm12801_vm7  ;;  %vm2450_vm7 = vcmp.ge.s32.totalorder %v2418_v43, 0 }
 0x263   : > { %v2292_v30 = vpop.permute.xlu0 %2291  ;;  %v5732_v40 = vpop.f32.mrf.mxu0  ;;  %vm2451_vm8 = vcmp.ge.s32.totalorder %v2419_v51, 0  ;;  %vm2483_vm14 = vcmp.lt.s32.totalorder %v2419_v51, 16  ;;  %v3020_v24 = vsel %vm2988_vm6, 1, %v11854_v47  ;;  %vm2482_vm6 = vcmp.lt.s32.totalorder %v2418_v43, 16 }
 0x264   : > { %vm2334_vm13 = vcmp.eq.s32.totalorder %v2292_v30, 1  ;;  %2873 = vperm.xlu0 %6325, %v2784_v49   ;;  %v2829_v60 = vpop.permute.xlu1 %2828  ;;  %v5733_v3 = vadd.f32 %v5732_v40, %v5731_v55  ;;  %v3021_v49 = vsel %vm2989_vm0, 1, %v11854_v47  ;;  %v5658_v39 = vpop.f32.mrf.mxu1  ;;  %v3841_v51 = vadd.f32 %v10277_v0, %v10389_v31 }
 0x265   : > { %vm5401_vm9 = vmpackc.low %vm2335_vm2, %vm2334_vm13  ;;  %2668 = vperm.xlu1 %6326, %v2577_v9   ;;  %vm2897_vm4 = vcmp.eq.s32.totalorder %v2829_v60, 1  ;;  %vm12802_vm2 = vnez %v12635_v56 }
 0x266   : > { %5403 = vmatprep.mubr.msk.bf16.mxu1 %vm5401_vm9, %v9203_v8  ;;  %vm2991_vm3 = vmand %vm10337_vm11, %vm12802_vm2  ;;  %v10506_v55 = vadd.f32 %v5733_v3, %v3833_v7  ;;  %v5659_v40 = vpop.f32.mrf.mxu1  ;;  %vm12804_vm9 = vnez %v12643_v57 }
 0x267   : > { %v2826_v9 = vpop.permute.xlu0 %2825  ;;  %v5734_v30 = vpop.f32.mrf.mxu0  ;;  %4246 = vmatmul.mubr.bf16.gmra.mxu1 %v12803_v59  ;;  %v10515_v26 = vadd.f32 %v5659_v40, %v5658_v39  ;;  %v3023_v21 = vsel %vm2991_vm3, 1, %v11854_v47  ;;  %vm2990_vm5 = vmand %vm10347_vm1, %vm12804_vm9  ;;  %v12810_v40 = vld [vmem:[#allocation51_spill] sm:$0xff] }
 0x268   : > { %vm2896_vm10 = vcmp.eq.s32.totalorder %v2826_v9, 1  ;;  %2665 = vperm.xlu0 %6325, %v2576_v25   ;;  %v2621_v28 = vpop.permute.xlu1 %2620  ;;  %v3838_v25 = vadd.f32 %v10259_v29, %v10389_v31  ;;  %v10530_v45 = vpop.f32.mrf.mxu1  ;;  %v3022_v10 = vsel %vm2990_vm5, 1, %v11854_v47  ;;  %vm10551_vm3 = vmand %vm2450_vm7, %vm2482_vm6  ;;  %vm12814_vm7 = vnez %v12649_v16 }
 0x269   : > { %vm5446_vm0 = vmpackc.low %vm2897_vm4, %vm2896_vm10  ;;  %v5735_v8 = vpop.f32.mrf.mxu0  ;;  %3104 = vperm.xlu1 %6326, %v3021_v49   ;;  %vm2689_vm13 = vcmp.eq.s32.totalorder %v2621_v28, 1  ;;  %v12807_v49 = vld [vmem:[#allocation126_spill] sm:$0xff]  ;;  %vm12811_vm10 = vnez %v12810_v40 }
 0x26a   : > { %v5736_v7 = vadd.f32 %v5735_v8, %v5734_v30  ;;  %5448 = vmatprep.mubr.msk.bf16.mxu0 %vm5446_vm0, %v9191_v15  ;;  %vm10534_vm4 = vmand %vm2451_vm8, %vm2483_vm14  ;;  %v10540_v57 = vpop.f32.mrf.mxu1 }
 0x26b   : > { %v2618_v60 = vpop.permute.xlu0 %2617  ;;  %v5737_v29 = vpop.f32.mrf.mxu0  ;;  %v2787_v39 = vsel %vm10534_vm4, 1, %v11854_v47  ;;  %vm2547_vm8 = vmand %vm10534_vm4, %vm12811_vm10 }
 0x26c   : > { %v10538_v8 = vadd.f32 %v5736_v7, %v3838_v25  ;;  %vm2688_vm11 = vcmp.eq.s32.totalorder %v2618_v60, 1  ;;  %3101 = vperm.xlu0 %6325, %v3020_v24   ;;  %v2301_v56 = vpop.permute.xlu1 %2300  ;;  %v5664_v9 = vpop.f32.mrf.mxu1  ;;  %vm2993_vm6 = vmand %vm10424_vm12, %vm12814_vm7 }
 0x26d   : > { %vm5449_vm1 = vmpackc.low %vm2689_vm13, %vm2688_vm11  ;;  %v5738_v6 = vpop.f32.mrf.mxu0  ;;  %3110 = vperm.xlu1 %6326, %v3023_v21   ;;  %vm2337_vm2 = vcmp.eq.s32.totalorder %v2301_v56, 1  ;;  %v2786_v21 = vsel %vm10551_vm3, 1, %v11854_v47  ;;  %v3025_v40 = vsel %vm2993_vm6, 1, %v11854_v47 }
 0x26e   : > { %v5739_v3 = vadd.f32 %v5738_v6, %v5737_v29  ;;  %5451 = vmatmul.mubr.msk.bf16.gmra.mxu0 %vm5449_vm1, %v12807_v49  ;;  %v5665_v7 = vpop.f32.mrf.mxu1  ;;  %v3846_v29 = vadd.f32 %v10294_v58, %v10389_v31  ;;  %v2579_v6 = vsel %vm2547_vm8, 1, %v11854_v47  ;;  %vm12815_vm1 = vnez %v12655_v17 }
 0x26f   : > { %v2298_v30 = vpop.permute.xlu0 %2297  ;;  %v5740_v28 = vpop.f32.mrf.mxu0  ;;  %v10564_v60 = vadd.f32 %v5665_v7, %v5664_v9  ;;  %vm12816_vm8 = vnez %v12664_v37 }
 0x270   : > { %v10559_v0 = vadd.f32 %v5739_v3, %v3841_v51  ;;  %vm2336_vm14 = vcmp.eq.s32.totalorder %v2298_v30, 1  ;;  %3107 = vperm.xlu0 %6325, %v3022_v10   ;;  %v2835_v25 = vpop.permute.xlu1 %2834  ;;  %v12812_v10 = vld [vmem:[#allocation52_spill] sm:$0xff]  ;;  %v10574_v51 = vpop.f32.mrf.mxu1 }
 0x271   : > { %vm5404_vm0 = vmpackc.low %vm2337_vm2, %vm2336_vm14  ;;  %v5741_v43 = vpop.f32.mrf.mxu0  ;;  %2882 = vperm.xlu1 %6326, %v2787_v39   ;;  %vm2899_vm13 = vcmp.eq.s32.totalorder %v2835_v25, 1  ;;  %vm12813_vm9 = vnez %v12812_v10  ;;  %v5639_v10 = vadd.f32 %v10341_v44, %v10335_v27 }
 0x272   : > { %v5742_v56 = vadd.f32 %v5741_v43, %v5740_v28  ;;  %5406 = vmatprep.mubr.msk.bf16.mxu1 %vm5404_vm0, %v9242_v1  ;;  %vm2546_vm5 = vmand %vm10551_vm3, %vm12813_vm9  ;;  %v10587_v9 = vpop.f32.mrf.mxu1 }
 0x273   : > { %v2832_v3 = vpop.permute.xlu0 %2831  ;;  %v5743_v49 = vpop.f32.mrf.mxu0  ;;  %4254 = vmatmul.mubr.bf16.gmra.mxu1 %v12622_v13  ;;  %vm2992_vm2 = vmand %vm10448_vm15, %vm12815_vm1  ;;  %v2578_v16 = vsel %vm2546_vm5, 1, %v11854_v47 }
 0x274   : > { %v10581_v58 = vadd.f32 %v5742_v56, %v3846_v29  ;;  %vm2898_vm11 = vcmp.eq.s32.totalorder %v2832_v3, 1  ;;  %2879 = vperm.xlu0 %6325, %v2786_v21   ;;  %v2627_v39 = vpop.permute.xlu1 %2626  ;;  %vm2995_vm14 = vmand %vm10534_vm4, %vm12816_vm8  ;;  %v5670_v25 = vpop.f32.mrf.mxu1 }
 0x275   : > { %vm5452_vm10 = vmpackc.low %vm2899_vm13, %vm2898_vm11  ;;  %v5744_v30 = vpop.f32.mrf.mxu0  ;;  %2674 = vperm.xlu1 %6326, %v2579_v6   ;;  %vm2691_vm12 = vcmp.eq.s32.totalorder %v2627_v39, 1  ;;  %v3027_v37 = vsel %vm2995_vm14, 1, %v11854_v47  ;;  %v3854_v6 = vadd.f32 %v10327_v36, %v10389_v31  ;;  %v12818_v39 = vld [vmem:[#allocation59_spill] sm:$0xff] }
 0x276   : > { %v5745_v28 = vadd.f32 %v5744_v30, %v5743_v49  ;;  %5454 = vmatprep.mubr.msk.bf16.mxu0 %vm5452_vm10, %v12468_v19  ;;  %v5671_v18 = vpop.f32.mrf.mxu1  ;;  %v3024_v19 = vsel %vm2992_vm2, 1, %v11854_v47  ;;  %v12817_v49 = vld [vmem:[#allocation151_spill] sm:$0xff]  ;;  %vm12819_vm9 = vnez %v12818_v39 }
 0x277   : > { %v2624_v7 = vpop.permute.xlu0 %2623  ;;  %v5746_v43 = vpop.f32.mrf.mxu0  ;;  %v10607_v15 = vadd.f32 %v5671_v18, %v5670_v25  ;;  %vm2994_vm15 = vmand %vm10551_vm3, %vm12819_vm9 }
 0x278   : > { %v10598_v21 = vadd.f32 %v5745_v28, %v3849_v53  ;;  %vm2690_vm0 = vcmp.eq.s32.totalorder %v2624_v7, 1  ;;  %2671 = vperm.xlu0 %6325, %v2578_v16   ;;  %v2307_v29 = vpop.permute.xlu1 %2306  ;;  %v10618_v17 = vpop.f32.mrf.mxu1  ;;  %v3026_v44 = vsel %vm2994_vm15, 1, %v11854_v47  ;;  %v3857_v28 = vadd.f32 %v5639_v10, %v10389_v31 }
 0x279   : > { %vm5455_vm13 = vmpackc.low %vm2691_vm12, %vm2690_vm0  ;;  %v5747_v56 = vpop.f32.mrf.mxu0  ;;  %3116 = vperm.xlu1 %6326, %v3025_v40   ;;  %vm2339_vm4 = vcmp.eq.s32.totalorder %v2307_v29, 1  ;;  %v12820_v40 = vld [vmem:[#allocation130_spill] sm:$0xff]  ;;  %v5645_v10 = vadd.f32 %v10377_v54, %v10368_v48 }
 0x27a   : > { %v5748_v3 = vadd.f32 %v5747_v56, %v5746_v43  ;;  %5457 = vmatmul.mubr.msk.bf16.gmra.mxu0 %vm5455_vm13, %v12817_v49  ;;  %v10622_v53 = vpop.f32.mrf.mxu1  ;;  %v12821_v29 = vld [vmem:[#allocation34_spill] sm:$0xff] }
 0x27b   : > { %v2304_v22 = vpop.permute.xlu0 %2303  ;;  %v5749_v30 = vpop.f32.mrf.mxu0  ;;  %v12822_v48 = vld [vmem:[#allocation114_spill] sm:$0xff] }
 0x27c   : > { %v10620_v16 = vadd.f32 %v5748_v3, %v3854_v6  ;;  %vm2338_vm5 = vcmp.eq.s32.totalorder %v2304_v22, 1  ;;  %3113 = vperm.xlu0 %6325, %v3024_v19   ;;  %v2841_v36 = vpop.permute.xlu1 %2840  ;;  %v3862_v6 = vadd.f32 %v10360_v52, %v10389_v31  ;;  %v3865_v52 = vadd.f32 %v5645_v10, %v10389_v31 }
 0x27d   : > { %vm5407_vm7 = vmpackc.low %vm2339_vm4, %vm2338_vm5  ;;  %v5750_v27 = vpop.f32.mrf.mxu0  ;;  %3122 = vperm.xlu1 %6326, %v3027_v37   ;;  %vm2901_vm3 = vcmp.eq.s32.totalorder %v2841_v36, 1  ;;  %v5676_v25 = vpop.f32.mrf.mxu1 }
 0x27e   : > { %v5751_v24 = vadd.f32 %v5750_v27, %v5749_v30  ;;  %5409 = vmatprep.mubr.msk.bf16.mxu1 %vm5407_vm7, %v12820_v40 }
 0x27f   : > { %v2838_v7 = vpop.permute.xlu0 %2837  ;;  %v5752_v43 = vpop.f32.mrf.mxu0  ;;  %4262 = vmatmul.mubr.bf16.gmra.mxu1 %v12821_v29 }
 0x280   : > { %v10628_v18 = vadd.f32 %v5751_v24, %v3857_v28  ;;  %vm2900_vm6 = vcmp.eq.s32.totalorder %v2838_v7, 1  ;;  %3119 = vperm.xlu0 %6325, %v3026_v44   ;;  %v2633_v56 = vpop.permute.xlu1 %2632  ;;  %v5677_v19 = vpop.f32.mrf.mxu1 }
 0x281   : > { %vm5458_vm11 = vmpackc.low %vm2901_vm3, %vm2900_vm6  ;;  %v5753_v37 = vpop.f32.mrf.mxu0  ;;  %v10630_v47 = vadd.f32 %v5677_v19, %v5676_v25  ;;  %vm2693_vm1 = vcmp.eq.s32.totalorder %v2633_v56, 1 }
 0x282   : > { %v5754_v3 = vadd.f32 %v5753_v37, %v5752_v43  ;;  %5460 = vmatprep.mubr.msk.bf16.mxu0 %vm5458_vm11, %v12499_v23  ;;  %v10637_v49 = vpop.f32.mrf.mxu1  ;;  %v3870_v37 = vadd.f32 %v10405_v46, %v10389_v31 }
 0x283   : > { %v2630_v39 = vpop.permute.xlu0 %2629  ;;  %v5755_v22 = vpop.f32.mrf.mxu0 }
 0x284   : > { %v10639_v30 = vadd.f32 %v5754_v3, %v3862_v6  ;;  %vm2692_vm2 = vcmp.eq.s32.totalorder %v2630_v39, 1  ;;  %v3033_v36 = vpop.permute.xlu1 %3032  ;;  %v10641_v27 = vpop.f32.mrf.mxu1  ;;  %v5651_v6 = vadd.f32 %v10431_v50, %v10420_v61  ;;  %v12823_v3 = vld [vmem:[#allocation55_spill] sm:$0xff]  ;;  %v12824_v61 = vld [vmem:[#allocation124_spill] sm:$0xff] }
 0x285   : > { %vm5461_vm10 = vmpackc.low %vm2693_vm1, %vm2692_vm2  ;;  %v5756_v44 = vpop.f32.mrf.mxu0  ;;  %vm3125_vm12 = vcmp.eq.s32.totalorder %v3033_v36, 1 }
 0x286   : > { %v5757_v28 = vadd.f32 %v5756_v44, %v5755_v22  ;;  %5463 = vmatmul.mubr.msk.bf16.gmra.mxu0 %vm5461_vm10, %v12822_v48  ;;  %v5682_v23 = vpop.f32.mrf.mxu1  ;;  %v3873_v46 = vadd.f32 %v5651_v6, %v10389_v31  ;;  %v3878_v6 = vadd.f32 %v10461_v4, %v10389_v31 }
 0x287   : > { %v3030_v54 = vpop.permute.xlu0 %3029  ;;  %v5758_v24 = vpop.f32.mrf.mxu0 }
 0x288   : > { %v10645_v25 = vadd.f32 %v5757_v28, %v3865_v52  ;;  %vm3124_vm8 = vcmp.eq.s32.totalorder %v3030_v54, 1  ;;  %v3039_v7 = vpop.permute.xlu1 %3038  ;;  %v5683_v43 = vpop.f32.mrf.mxu1 }
 0x289   : > { %vm5506_vm14 = vmpackc.low %vm3125_vm12, %vm3124_vm8  ;;  %v5759_v56 = vpop.f32.mrf.mxu0  ;;  %v10647_v19 = vadd.f32 %v5683_v43, %v5682_v23  ;;  %vm3127_vm0 = vcmp.eq.s32.totalorder %v3039_v7, 1 }
 0x28a   : > { %v5760_v10 = vadd.f32 %v5759_v56, %v5758_v24  ;;  %6154 = vmatprep.mubr.msk.bf16.mxu1 %vm5506_vm14, %v12823_v3  ;;  %v5685_v39 = vpop.f32.mrf.mxu1 }
 0x28b   : > { %v3036_v22 = vpop.permute.xlu0 %3035  ;;  %v5761_v36 = vpop.f32.mrf.mxu0 }
 0x28c   : > { %v10654_v44 = vadd.f32 %v5760_v10, %v3870_v37  ;;  %vm3126_vm13 = vcmp.eq.s32.totalorder %v3036_v22, 1  ;;  %v2847_v52 = vpop.permute.xlu1 %2846  ;;  %v5686_v28 = vpop.f32.mrf.mxu1  ;;  %v5657_v22 = vadd.f32 %v10482_v41, %v10471_v35 }
 0x28d   : > { %vm5509_vm4 = vmpackc.low %vm3127_vm0, %vm3126_vm13  ;;  %v5762_v48 = vpop.f32.mrf.mxu0  ;;  %v10656_v23 = vadd.f32 %v5686_v28, %v5685_v39  ;;  %vm2903_vm9 = vcmp.eq.s32.totalorder %v2847_v52, 1  ;;  %v6407_v39 = vld [vmem:[#allocation7 + $0x38] sm:$0xff]  }
 0x28e   : > { %v5763_v54 = vadd.f32 %v5762_v48, %v5761_v36  ;;  %6155 = vmatmul.mubr.msk.bf16.vlgmr.msra.gmra.mxu1 %vm5509_vm4, %v12824_v61  ;;  %v5688_v50 = vpop.f32.mrf.mxu1  ;;  %6186 = vmatprep.subr.bf16.mxu0 %v6407_v39  ;;  %v3881_v35 = vadd.f32 %v5657_v22, %v10389_v31  ;;  %v5663_v22 = vadd.f32 %v10540_v57, %v10530_v45  ;;  %v12827_v45 = vld [vmem:[#allocation57_spill] sm:$0xff] }
 0x28f   : > { %v2844_v24 = vpop.permute.xlu0 %2843  ;;  %v5764_v7 = vpop.f32.mrf.mxu0  ;;  %6187 = vmatpush3.bf16.msra.mxu0 %v6407_v39 }
 0x290   : > { %v10660_v43 = vadd.f32 %v5763_v54, %v3873_v46  ;;  %vm2902_vm15 = vcmp.eq.s32.totalorder %v2844_v24, 1  ;;  %v2639_v56 = vpop.permute.xlu1 %2638  ;;  %v5689_v37 = vpop.f32.mrf.mxu1  ;;  %v12825_v24 = vld [vmem:[#allocation108_spill] sm:$0xff] }
 0x291   : > { %vm5464_vm5 = vmpackc.low %vm2903_vm9, %vm2902_vm15  ;;  %v5765_v10 = vpop.f32.mrf.mxu0  ;;  %v10662_v3 = vadd.f32 %v5689_v37, %v5688_v50  ;;  %vm2695_vm7 = vcmp.eq.s32.totalorder %v2639_v56, 1 }
 0x292   : > { %v5766_v36 = vadd.f32 %v5765_v10, %v5764_v7  ;;  %5466 = vmatprep.mubr.msk.bf16.mxu0 %vm5464_vm5, %v12761_v62  ;;  %v5691_v52 = vpop.f32.mrf.mxu1 }
 0x293   : > { %v2636_v28 = vpop.permute.xlu0 %2635  ;;  %v5767_v48 = vpop.f32.mrf.mxu0 }
 0x294   : > { %v10669_v46 = vadd.f32 %v5766_v36, %v3878_v6  ;;  %vm2694_vm3 = vcmp.eq.s32.totalorder %v2636_v28, 1  ;;  %v3045_v54 = vpop.permute.xlu1 %3044  ;;  %v5692_v61 = vpop.f32.mrf.mxu1 }
 0x295   : > { %vm5467_vm6 = vmpackc.low %vm2695_vm7, %vm2694_vm3  ;;  %v5768_v50 = vpop.f32.mrf.mxu0  ;;  %v10671_v4 = vadd.f32 %v5692_v61, %v5691_v52  ;;  %vm3129_vm11 = vcmp.eq.s32.totalorder %v3045_v54, 1  ;;  %v3886_v52 = vadd.f32 %v10515_v26, %v10389_v31  ;;  %v3889_v26 = vadd.f32 %v5663_v22, %v10389_v31 }
 0x296   : > { %v5769_v41 = vadd.f32 %v5768_v50, %v5767_v48  ;;  %5469 = vmatmul.mubr.msk.bf16.gmra.mxu0 %vm5467_vm6, %v12825_v24  ;;  %v5694_v62 = vpop.f32.mrf.mxu1  ;;  %v12826_v48 = vld [vmem:[#allocation94_spill] sm:$0xff]  ;;  %v5669_v22 = vadd.f32 %v10587_v9, %v10574_v51 }
 0x297   : > { %v3042_v7 = vpop.permute.xlu0 %3041  ;;  %v5770_v56 = vpop.f32.mrf.mxu0 }
 0x298   : > { %v10675_v37 = vadd.f32 %v5769_v41, %v3881_v35  ;;  %vm3128_vm1 = vcmp.eq.s32.totalorder %v3042_v7, 1  ;;  %v3051_v10 = vpop.permute.xlu1 %3050  ;;  %v5695_v6 = vpop.f32.mrf.mxu1  ;;  %v3897_v51 = vadd.f32 %v5669_v22, %v10389_v31  ;;  %v5675_v22 = vadd.f32 %v10622_v53, %v10618_v17 }
 0x299   : > { %vm5512_vm2 = vmpackc.low %vm3129_vm11, %vm3128_vm1  ;;  %v5771_v39 = vpop.f32.mrf.mxu0  ;;  %v10677_v36 = vadd.f32 %v5695_v6, %v5694_v62  ;;  %vm3131_vm10 = vcmp.eq.s32.totalorder %v3051_v10, 1 }
 0x29a   : > { %v5772_v28 = vadd.f32 %v5771_v39, %v5770_v56  ;;  %6158 = vmatprep.mubr.msk.bf16.mxu1 %vm5512_vm2, %v12826_v48  ;;  %v5697_v54 = vpop.f32.mrf.mxu1  ;;  %v3905_v17 = vadd.f32 %v5675_v22, %v10389_v31  ;;  %v3910_v22 = vadd.f32 %v10630_v47, %v10389_v31 }
 0x29b   : > { %v3048_v61 = vpop.permute.xlu0 %3047  ;;  %v5773_v50 = vpop.f32.mrf.mxu0 }
 0x29c   : > { %v10684_v35 = vadd.f32 %v5772_v28, %v3886_v52  ;;  %vm3130_vm12 = vcmp.eq.s32.totalorder %v3048_v61, 1  ;;  %v2853_v41 = vpop.permute.xlu1 %2852  ;;  %v5698_v24 = vpop.f32.mrf.mxu1 }
 0x29d   : > { %vm5515_vm8 = vmpackc.low %vm3131_vm10, %vm3130_vm12  ;;  %v5774_v62 = vpop.f32.mrf.mxu0  ;;  %v10686_v7 = vadd.f32 %v5698_v24, %v5697_v54  ;;  %vm2905_vm14 = vcmp.eq.s32.totalorder %v2853_v41, 1  ;;  %v3894_v54 = vadd.f32 %v10564_v60, %v10389_v31  ;;  %v6408_v24 = vld [vmem:[#allocation7 + $0x30] sm:$0xff]  }
 0x29e   : > { %v5775_v6 = vadd.f32 %v5774_v62, %v5773_v50  ;;  %6159 = vmatmul.mubr.msk.bf16.gmra.mxu1 %vm5515_vm8, %v12827_v45  ;;  %v5700_v57 = vpop.f32.mrf.mxu1  ;;  %6188 = vmatprep.subr.bf16.mxu0 %v6408_v24 }
 0x29f   : > { %v2850_v56 = vpop.permute.xlu0 %2849  ;;  %v5776_v10 = vpop.f32.mrf.mxu0  ;;  %6189 = vmatpush3.bf16.msra.mxu0 %v6408_v24 }
 0x2a0   : > { %v10690_v39 = vadd.f32 %v5775_v6, %v3889_v26  ;;  %vm2904_vm0 = vcmp.eq.s32.totalorder %v2850_v56, 1  ;;  %v2645_v52 = vpop.permute.xlu1 %2644  ;;  %v5701_v28 = vpop.f32.mrf.mxu1 }
 0x2a1   : > { %vm5470_vm13 = vmpackc.low %vm2905_vm14, %vm2904_vm0  ;;  %v5777_v48 = vpop.f32.mrf.mxu0  ;;  %v10692_v61 = vadd.f32 %v5701_v28, %v5700_v57  ;;  %vm2697_vm4 = vcmp.eq.s32.totalorder %v2645_v52, 1 }
 0x2a2   : > { %v5778_v50 = vadd.f32 %v5777_v48, %v5776_v10  ;;  %5472 = vmatprep.mubr.msk.bf16.mxu0 %vm5470_vm13, %v12777_v12  ;;  %v5703_v41 = vpop.f32.mrf.mxu1  ;;  %v12829_v12 = vld [vmem:[#allocation101_spill] sm:$0xff] }
 0x2a3   : > { %v2642_v62 = vpop.permute.xlu0 %2641  ;;  %v5779_v26 = vpop.f32.mrf.mxu0 }
 0x2a4   : > { %v10699_v6 = vadd.f32 %v5778_v50, %v3894_v54  ;;  %vm2696_vm9 = vcmp.eq.s32.totalorder %v2642_v62, 1  ;;  %v3057_v45 = vpop.permute.xlu1 %3056  ;;  %v5704_v57 = vpop.f32.mrf.mxu1 }
 0x2a5   : > { %vm5473_vm15 = vmpackc.low %vm2697_vm4, %vm2696_vm9  ;;  %v5780_v56 = vpop.f32.mrf.mxu0  ;;  %v10701_v60 = vadd.f32 %v5704_v57, %v5703_v41  ;;  %vm3133_vm5 = vcmp.eq.s32.totalorder %v3057_v45, 1  ;;  %v3902_v41 = vadd.f32 %v10607_v15, %v10389_v31 }
 0x2a6   : > { %12828 = vst [vmem:[#allocation141_spill] sm:$0xff] %v10699_v6  ;;  %v5781_v9 = vadd.f32 %v5780_v56, %v5779_v26  ;;  %5475 = vmatmul.mubr.msk.bf16.gmra.mxu0 %vm5473_vm15, %v12829_v12  ;;  %v5834_v10 = vpop.f32.mrf.mxu1 }
 0x2a7   : > { %v3054_v52 = vpop.permute.xlu0 %3053  ;;  %v5782_v28 = vpop.f32.mrf.mxu0 }
 0x2a8   : > { %v10705_v48 = vadd.f32 %v5781_v9, %v3897_v51  ;;  %vm3132_vm7 = vcmp.eq.s32.totalorder %v3054_v52, 1  ;;  %v3063_v54 = vpop.permute.xlu1 %3062  ;;  %v5835_v50 = vpop.f32.mrf.mxu1 }
 0x2a9   : > { %vm5518_vm3 = vmpackc.low %vm3133_vm5, %vm3132_vm7  ;;  %v5783_v62 = vpop.f32.mrf.mxu0  ;;  %v5836_v6 = vadd.f32 %v5835_v50, %v5834_v10  ;;  %vm3135_vm6 = vcmp.eq.s32.totalorder %v3063_v54, 1 }
 0x2aa   : > { %v5784_v24 = vadd.f32 %v5783_v62, %v5782_v28  ;;  %6162 = vmatprep.mubr.msk.bf16.mxu1 %vm5518_vm3, %v9652_v42  ;;  %v5837_v26 = vpop.f32.mrf.mxu1 }
 0x2ab   : > { %v3060_v45 = vpop.permute.xlu0 %3059  ;;  %v5785_v57 = vpop.f32.mrf.mxu0  ;;  %v10713_v56 = vadd.f32 %v5836_v6, %v10429_v2 }
 0x2ac   : > { %v10715_v51 = vadd.f32 %v5784_v24, %v3902_v41  ;;  %vm3134_vm11 = vcmp.eq.s32.totalorder %v3060_v45, 1  ;;  %v2859_v9 = vpop.permute.xlu1 %2858  ;;  %v5838_v12 = vpop.f32.mrf.mxu1 }
 0x2ad   : > { %vm5521_vm1 = vmpackc.low %vm3135_vm6, %vm3134_vm11  ;;  %v5786_v15 = vpop.f32.mrf.mxu0  ;;  %v5839_v10 = vadd.f32 %v5838_v12, %v5837_v26  ;;  %vm2907_vm2 = vcmp.eq.s32.totalorder %v2859_v9, 1  ;;  %v6409_v26 = vld [vmem:[#allocation7 + $0x28] sm:$0xff]  }
 0x2ae   : > { %v5787_v53 = vadd.f32 %v5786_v15, %v5785_v57  ;;  %6163 = vmatmul.mubr.msk.bf16.gmra.mxu1 %vm5521_vm1, %v9743_v11  ;;  %v5840_v42 = vpop.f32.mrf.mxu1  ;;  %v5681_v11 = vadd.f32 %v10641_v27, %v10637_v49  ;;  %6190 = vmatprep.subr.bf16.mxu0 %v6409_v26 }
 0x2af   : > { %v2856_v52 = vpop.permute.xlu0 %2855  ;;  %v5788_v28 = vpop.f32.mrf.mxu0  ;;  %v10720_v2 = vadd.f32 %v5839_v10, %v10456_v38  ;;  %6191 = vmatpush3.bf16.msra.mxu0 %v6409_v26 }
 0x2b0   : > { %v10722_v6 = vadd.f32 %v5787_v53, %v3905_v17  ;;  %vm2906_vm10 = vcmp.eq.s32.totalorder %v2856_v52, 1  ;;  %v2651_v54 = vpop.permute.xlu1 %2650  ;;  %v5841_v50 = vpop.f32.mrf.mxu1  ;;  %v12830_v17 = vld [vmem:[#allocation71_spill] sm:$0xff] }
 0x2b1   : > { %vm5476_vm12 = vmpackc.low %vm2907_vm2, %vm2906_vm10  ;;  %v5789_v62 = vpop.f32.mrf.mxu0  ;;  %v5842_v41 = vadd.f32 %v5841_v50, %v5840_v42  ;;  %vm2699_vm8 = vcmp.eq.s32.totalorder %v2651_v54, 1 }
 0x2b2   : > { %v5790_v24 = vadd.f32 %v5789_v62, %v5788_v28  ;;  %5478 = vmatprep.mubr.msk.bf16.mxu0 %vm5476_vm12, %v12792_v34  ;;  %v5843_v38 = vpop.f32.mrf.mxu1  ;;  %v3913_v34 = vadd.f32 %v5681_v11, %v10389_v31 }
 0x2b3   : > { %v2648_v45 = vpop.permute.xlu0 %2647  ;;  %v5791_v57 = vpop.f32.mrf.mxu0  ;;  %v10730_v9 = vadd.f32 %v5842_v41, %v10477_v32 }
 0x2b4   : > { %v10732_v12 = vadd.f32 %v5790_v24, %v3910_v22  ;;  %vm2698_vm14 = vcmp.eq.s32.totalorder %v2648_v45, 1  ;;  %v3069_v15 = vpop.permute.xlu1 %3068  ;;  %v5844_v10 = vpop.f32.mrf.mxu1  ;;  %v3918_v22 = vadd.f32 %v10647_v19, %v10389_v31  ;;  %v3921_v19 = vadd.f32 %v10656_v23, %v10389_v31 }
 0x2b5   : > { %vm5479_vm0 = vmpackc.low %vm2699_vm8, %vm2698_vm14  ;;  %v5792_v47 = vpop.f32.mrf.mxu0  ;;  %v5845_v49 = vadd.f32 %v5844_v10, %v5843_v38  ;;  %vm3137_vm13 = vcmp.eq.s32.totalorder %v3069_v15, 1 }
 0x2b6   : > { %v5793_v27 = vadd.f32 %v5792_v47, %v5791_v57  ;;  %5481 = vmatmul.mubr.msk.bf16.gmra.mxu0 %vm5479_vm0, %v12830_v17  ;;  %v5846_v53 = vpop.f32.mrf.mxu1 }
 0x2b7   : > { %v3066_v42 = vpop.permute.xlu0 %3065  ;;  %v5794_v32 = vpop.f32.mrf.mxu0  ;;  %v10737_v52 = vadd.f32 %v5845_v49, %v10506_v55 }
 0x2b8   : > { %v10739_v28 = vadd.f32 %v5793_v27, %v3913_v34  ;;  %vm3136_vm4 = vcmp.eq.s32.totalorder %v3066_v42, 1  ;;  %v3075_v54 = vpop.permute.xlu1 %3074  ;;  %v5847_v50 = vpop.f32.mrf.mxu1 }
 0x2b9   : > { %vm5524_vm9 = vmpackc.low %vm3137_vm13, %vm3136_vm4  ;;  %v5795_v62 = vpop.f32.mrf.mxu0  ;;  %v5848_v41 = vadd.f32 %v5847_v50, %v5846_v53  ;;  %vm3139_vm15 = vcmp.eq.s32.totalorder %v3075_v54, 1 }
 0x2ba   : > { %v5796_v11 = vadd.f32 %v5795_v62, %v5794_v32  ;;  %6166 = vmatprep.mubr.msk.bf16.mxu1 %vm5524_vm9, %v9822_v63  ;;  %v5849_v24 = vpop.f32.mrf.mxu1  ;;  %v6410_v62 = vld [vmem:[#allocation7 + $0x20] sm:$0xff]  }
 0x2bb   : > { %v3072_v38 = vpop.permute.xlu0 %3071  ;;  %v5797_v26 = vpop.f32.mrf.mxu0  ;;  %v10745_v55 = vadd.f32 %v5848_v41, %v10538_v8  ;;  %v3926_v41 = vadd.f32 %v10662_v3, %v10389_v31  ;;  %6192 = vmatprep.subr.bf16.mxu0 %v6410_v62  ;;  %v3929_v3 = vadd.f32 %v10671_v4, %v10389_v31 }
 0x2bc   : > { %v10747_v45 = vadd.f32 %v5796_v11, %v3918_v22  ;;  %vm3138_vm5 = vcmp.eq.s32.totalorder %v3072_v38, 1  ;;  %v2865_v57 = vpop.permute.xlu1 %2864  ;;  %v5850_v15 = vpop.f32.mrf.mxu1  ;;  %v12831_v38 = vld [vmem:[#allocation113_spill] sm:$0xff]  ;;  %6193 = vmatpush3.bf16.msra.mxu0 %v6410_v62 }
 0x2bd   : > { %vm5527_vm7 = vmpackc.low %vm3139_vm15, %vm3138_vm5  ;;  %v5798_v10 = vpop.f32.mrf.mxu0  ;;  %v5851_v47 = vadd.f32 %v5850_v15, %v5849_v24  ;;  %vm2909_vm3 = vcmp.eq.s32.totalorder %v2865_v57, 1 }
 0x2be   : > { %v5799_v49 = vadd.f32 %v5798_v10, %v5797_v26  ;;  %6167 = vmatmul.mubr.msk.bf16.gmra.mxu1 %vm5527_vm7, %v12633_v14  ;;  %v5852_v63 = vpop.f32.mrf.mxu1 }
 0x2bf   : > { %v2862_v34 = vpop.permute.xlu0 %2861  ;;  %v10753_v8 = vadd.f32 %v5851_v47, %v10559_v0 }
 0x2c0   : > { %v10755_v27 = vadd.f32 %v5799_v49, %v3921_v19  ;;  %vm2908_vm6 = vcmp.eq.s32.totalorder %v2862_v34, 1  ;;  %v2657_v17 = vpop.permute.xlu1 %2656  ;;  %v5853_v53 = vpop.f32.mrf.mxu1  ;;  %v6411_v34 = vld [vmem:[#allocation7 + $0x18] sm:$0xff]  }
 0x2c1   : > { %vm5482_vm11 = vmpackc.low %vm2909_vm3, %vm2908_vm6  ;;  %v5854_v42 = vadd.f32 %v5853_v53, %v5852_v63  ;;  %v5800_v32 = vpop.f32.mrf.mxu0  ;;  %vm2701_vm1 = vcmp.eq.s32.totalorder %v2657_v17, 1  ;;  %6194 = vmatprep.subr.bf16.mxu0 %v6411_v34 }
 0x2c2   : > { %5484 = vmatprep.mubr.msk.bf16.mxu0 %vm5482_vm11, %v12803_v59  ;;  %v5855_v23 = vpop.f32.mrf.mxu1  ;;  %6195 = vmatpush3.bf16.msra.mxu0 %v6411_v34 }
 0x2c3   : > { %v2654_v54 = vpop.permute.xlu0 %2653  ;;  %v10759_v14 = vadd.f32 %v5854_v42, %v10581_v58  ;;  %v5801_v50 = vpop.f32.mrf.mxu0 }
 0x2c4   : > { %vm2700_vm2 = vcmp.eq.s32.totalorder %v2654_v54, 1  ;;  %v3081_v0 = vpop.permute.xlu1 %3080  ;;  %v5802_v22 = vadd.f32 %v5801_v50, %v5800_v32  ;;  %v5856_v11 = vpop.f32.mrf.mxu1 }
 0x2c5   : > { %vm5485_vm10 = vmpackc.low %vm2701_vm1, %vm2700_vm2  ;;  %v5803_v24 = vpop.f32.mrf.mxu0  ;;  %vm3141_vm12 = vcmp.eq.s32.totalorder %v3081_v0, 1  ;;  %v5857_v59 = vadd.f32 %v5856_v11, %v5855_v23  ;;  %v6412_v23 = vld [vmem:[#allocation7 + $0x10] sm:$0xff]  }
 0x2c6   : > { %5487 = vmatmul.mubr.msk.bf16.gmra.mxu0 %vm5485_vm10, %v12831_v38  ;;  %v10764_v26 = vadd.f32 %v5802_v22, %v3926_v41  ;;  %v5858_v57 = vpop.f32.mrf.mxu1  ;;  %6196 = vmatprep.subr.bf16.mxu0 %v6412_v23 }
 0x2c7   : > { %v3078_v58 = vpop.permute.xlu0 %3077  ;;  %v5804_v15 = vpop.f32.mrf.mxu0  ;;  %v10767_v47 = vadd.f32 %v5857_v59, %v10598_v21  ;;  %6197 = vmatpush3.bf16.msra.mxu0 %v6412_v23 }
 0x2c8   : > { %vm3140_vm8 = vcmp.eq.s32.totalorder %v3078_v58, 1  ;;  %v3087_v10 = vpop.permute.xlu1 %3086  ;;  %v5805_v19 = vadd.f32 %v5804_v15, %v5803_v24  ;;  %v5859_v49 = vpop.f32.mrf.mxu1 }
 0x2c9   : > { %vm5530_vm14 = vmpackc.low %vm3141_vm12, %vm3140_vm8  ;;  %vm3143_vm0 = vcmp.eq.s32.totalorder %v3087_v10, 1  ;;  %v5860_v63 = vadd.f32 %v5859_v49, %v5858_v57 }
 0x2ca   : > { %6170 = vmatprep.mubr.msk.bf16.mxu1 %vm5530_vm14, %v12646_v33  ;;  %v10772_v17 = vadd.f32 %v5805_v19, %v3929_v3  ;;  %v5861_v42 = vpop.f32.mrf.mxu1 }
 0x2cb   : > { %v3084_v53 = vpop.permute.xlu0 %3083  ;;  %v10775_v21 = vadd.f32 %v5860_v63, %v10620_v16  ;;  %v10784_v16 = vld [vmem:[%s11204_s6] ss:$0 sm:$0xff] }
 0x2cc   : > { %vm3142_vm13 = vcmp.eq.s32.totalorder %v3084_v53, 1  ;;  %v2871_v32 = vpop.permute.xlu1 %2870  ;;  %v5862_v31 = vpop.f32.mrf.mxu1  ;;  %v6414_v63 = vld [vmem:[#allocation7] sm:$0xff]  }
 0x2cd   : > { %vm5533_vm4 = vmpackc.low %vm3143_vm0, %vm3142_vm13  ;;  %v5806_v4 = vpop.f32.mrf.mxu0  ;;  %vm2911_vm9 = vcmp.eq.s32.totalorder %v2871_v32, 1  ;;  %v5863_v33 = vadd.f32 %v5862_v31, %v5861_v42 }
 0x2ce   : > { %6171 = vmatmul.mubr.msk.bf16.gmra.mxu1 %vm5533_vm4, %v12652_v5  ;;  %v5864_v50 = vpop.f32.mrf.mxu1  ;;  %v3934_v5 = vadd.f32 %v10784_v16, %v10677_v36  ;;  %v3937_v36 = vadd.f32 %v10784_v16, %v10686_v7 }
 0x2cf   : > { %v2868_v54 = vpop.permute.xlu0 %2867  ;;  %v5807_v0 = vpop.f32.mrf.mxu0  ;;  %v10779_v41 = vadd.f32 %v5863_v33, %v10628_v18  ;;  %v6413_v18 = vld [vmem:[#allocation7 + $0x8] sm:$0xff]  }
 0x2d0   : > { %vm2910_vm15 = vcmp.eq.s32.totalorder %v2868_v54, 1  ;;  %v2663_v62 = vpop.permute.xlu1 %2662  ;;  %v5808_v22 = vadd.f32 %v5807_v0, %v5806_v4  ;;  %v5865_v11 = vpop.f32.mrf.mxu1  ;;  %6198 = vmatprep.subr.bf16.mxu0 %v6413_v18  ;;  %v12832_v4 = vld [vmem:[#allocation123_spill] sm:$0xff] }
 0x2d1   : > { %vm5488_vm5 = vmpackc.low %vm2911_vm9, %vm2910_vm15  ;;  %v5809_v24 = vpop.f32.mrf.mxu0  ;;  %vm2703_vm7 = vcmp.eq.s32.totalorder %v2663_v62, 1  ;;  %v5866_v38 = vadd.f32 %v5865_v11, %v5864_v50  ;;  %6199 = vmatpush3.bf16.msra.mxu0 %v6413_v18  ;;  %v12833_v11 = vld [vmem:[#allocation74_spill] sm:$0xff] }
 0x2d2   : > { %5490 = vmatprep.mubr.msk.bf16.mxu0 %vm5488_vm5, %v12622_v13  ;;  %v10789_v59 = vadd.f32 %v5808_v22, %v3934_v5  ;;  %v5867_v57 = vpop.f32.mrf.mxu1  ;;  %6200 = vmatprep.subr.bf16.mxu0 %v6414_v63 }
 0x2d3   : > { %v2660_v58 = vpop.permute.xlu0 %2659  ;;  %v5810_v15 = vpop.f32.mrf.mxu0  ;;  %v10792_v3 = vadd.f32 %v5866_v38, %v10639_v30 }
 0x2d4   : > { %vm2702_vm3 = vcmp.eq.s32.totalorder %v2660_v58, 1  ;;  %v3093_v10 = vpop.permute.xlu1 %3092  ;;  %v5811_v19 = vadd.f32 %v5810_v15, %v5809_v24  ;;  %v5868_v13 = vpop.f32.mrf.mxu1 }
 0x2d5   : > { %vm5491_vm6 = vmpackc.low %vm2703_vm7, %vm2702_vm3  ;;  %vm3145_vm11 = vcmp.eq.s32.totalorder %v3093_v10, 1  ;;  %v5869_v49 = vadd.f32 %v5868_v13, %v5867_v57  ;;  %6201 = vmatpush3.bf16.msra.mxu0 %v6414_v63 }
 0x2d6   : > { %5493 = vmatmul.mubr.msk.bf16.gmra.mxu0 %vm5491_vm6, %v9120_v20  ;;  %v10797_v34 = vadd.f32 %v5811_v19, %v3937_v36  ;;  %v5870_v42 = vpop.f32.mrf.mxu1 }
 0x2d7   : > { %v3090_v53 = vpop.permute.xlu0 %3089  ;;  %v10800_v32 = vadd.f32 %v5869_v49, %v10645_v25  ;;  %v3942_v25 = vadd.f32 %v10784_v16, %v10692_v61  ;;  %v3945_v61 = vadd.f32 %v10784_v16, %v10701_v60  ;;  %v12834_v60 = vld [vmem:[#allocation133_spill] sm:$0xff] }
 0x2d8   : > { %vm3144_vm1 = vcmp.eq.s32.totalorder %v3090_v53, 1  ;;  %v3099_v30 = vpop.permute.xlu1 %3098  ;;  %v5871_v7 = vpop.f32.mrf.mxu1 }
 0x2d9   : > { %vm5536_vm2 = vmpackc.low %vm3145_vm11, %vm3144_vm1  ;;  %v5812_v31 = vpop.f32.mrf.mxu0  ;;  %vm3147_vm10 = vcmp.eq.s32.totalorder %v3099_v30, 1  ;;  %v5872_v20 = vadd.f32 %v5871_v7, %v5870_v42 }
 0x2da   : > { %6174 = vmatprep.mubr.msk.bf16.mxu1 %vm5536_vm2, %v12832_v4  ;;  %v5873_v23 = vpop.f32.mrf.mxu1 }
 0x2db   : > { %v3096_v33 = vpop.permute.xlu0 %3095  ;;  %v5813_v54 = vpop.f32.mrf.mxu0  ;;  %v10804_v0 = vadd.f32 %v5872_v20, %v10654_v44  ;;  %v12835_v20 = vld [vmem:[#allocation54_spill] sm:$0xff] }
 0x2dc   : > { %vm3146_vm12 = vcmp.eq.s32.totalorder %v3096_v33, 1  ;;  %v2877_v50 = vpop.permute.xlu1 %2876  ;;  %v5814_v62 = vadd.f32 %v5813_v54, %v5812_v31  ;;  %v5874_v5 = vpop.f32.mrf.mxu1 }
 0x2dd   : > { %vm5539_vm8 = vmpackc.low %vm3147_vm10, %vm3146_vm12  ;;  %v5815_v22 = vpop.f32.mrf.mxu0  ;;  %vm2913_vm14 = vcmp.eq.s32.totalorder %v2877_v50, 1  ;;  %v5875_v24 = vadd.f32 %v5874_v5, %v5873_v23 }
 0x2de   : > { %6175 = vmatmul.mubr.msk.bf16.gmra.mxu1 %vm5539_vm8, %v12833_v11  ;;  %v10809_v38 = vadd.f32 %v5814_v62, %v3942_v25  ;;  %v5876_v58 = vpop.f32.mrf.mxu1 }
 0x2df   : > { %v2874_v18 = vpop.permute.xlu0 %2873  ;;  %v5816_v57 = vpop.f32.mrf.mxu0  ;;  %v10812_v44 = vadd.f32 %v5875_v24, %v10660_v43 }
 0x2e0   : > { %vm2912_vm0 = vcmp.eq.s32.totalorder %v2874_v18, 1  ;;  %v2669_v15 = vpop.permute.xlu1 %2668  ;;  %v5817_v10 = vadd.f32 %v5816_v57, %v5815_v22  ;;  %v5877_v36 = vpop.f32.mrf.mxu1 }
 0x2e1   : > { %vm5494_vm13 = vmpackc.low %vm2913_vm14, %vm2912_vm0  ;;  %vm2705_vm4 = vcmp.eq.s32.totalorder %v2669_v15, 1  ;;  %v5878_v19 = vadd.f32 %v5877_v36, %v5876_v58  ;;  %v12836_v58 = vld [vmem:[#allocation134_spill] sm:$0xff] }
 0x2e2   : > { %5496 = vmatprep.mubr.msk.bf16.mxu0 %vm5494_vm13, %v12821_v29  ;;  %v10817_v13 = vadd.f32 %v5817_v10, %v3945_v61  ;;  %v5879_v63 = vpop.f32.mrf.mxu1  ;;  %v12837_v36 = vld [vmem:[#allocation138_spill] sm:$0xff] }
 0x2e3   : > { %v2666_v49 = vpop.permute.xlu0 %2665  ;;  %v10820_v42 = vadd.f32 %v5878_v19, %v10669_v46 }
 0x2e4   : > { %vm2704_vm9 = vcmp.eq.s32.totalorder %v2666_v49, 1  ;;  %v3105_v53 = vpop.permute.xlu1 %3104  ;;  %v5880_v43 = vpop.f32.mrf.mxu1 }
 0x2e5   : > { %vm5497_vm15 = vmpackc.low %vm2705_vm4, %vm2704_vm9  ;;  %v10822_v30 = vpop.f32.mrf.mxu0  ;;  %vm3149_vm5 = vcmp.eq.s32.totalorder %v3105_v53, 1  ;;  %v5881_v16 = vadd.f32 %v5880_v43, %v5879_v63 }
 0x2e6   : > { %5499 = vmatmul.mubr.msk.bf16.gmra.mxu0 %vm5497_vm15, %v12834_v60 }
 0x2e7   : > { %v3102_v29 = vpop.permute.xlu0 %3101  ;;  %v10825_v7 = vpop.f32.mrf.mxu0  ;;  %v10828_v4 = vadd.f32 %v5881_v16, %v10675_v37  ;;  %v12838_v16 = vld [vmem:[#allocation141_spill] sm:$0xff] }
 0x2e8   : > { %vm3148_vm7 = vcmp.eq.s32.totalorder %v3102_v29, 1  ;;  %v3111_v31 = vpop.permute.xlu1 %3110 }
 0x2e9   : > { %vm5542_vm3 = vmpackc.low %vm3149_vm5, %vm3148_vm7  ;;  %vm3151_vm6 = vcmp.eq.s32.totalorder %v3111_v31, 1  ;;  %v10831_v23 = vpop.f32.mrf.mxu0 }
 0x2ea   : > { %6178 = vmatprep.mubr.msk.bf16.mxu1 %vm5542_vm3, %v12835_v20  ;;  %v5882_v33 = vpop.f32.mrf.mxu1 }
 0x2eb   : > { %v3108_v46 = vpop.permute.xlu0 %3107  ;;  %v10834_v37 = vpop.f32.mrf.mxu0 }
 0x2ec   : > { %vm3150_vm11 = vcmp.eq.s32.totalorder %v3108_v46, 1  ;;  %v2883_v54 = vpop.permute.xlu1 %2882  ;;  %v5883_v50 = vpop.f32.mrf.mxu1  ;;  %v12839_v46 = vld [vmem:[#allocation76_spill] sm:$0xff] }
 0x2ed   : > { %vm5545_vm1 = vmpackc.low %vm3151_vm6, %vm3150_vm11  ;;  %vm2915_vm2 = vcmp.eq.s32.totalorder %v2883_v54, 1  ;;  %v5884_v25 = vadd.f32 %v5883_v50, %v5882_v33 }
 0x2ee   : > { %6179 = vmatmul.mubr.msk.bf16.gmra.mxu1 %vm5545_vm1, %v9242_v1  ;;  %v5885_v5 = vpop.f32.mrf.mxu1 }
 0x2ef   : > { %v2880_v62 = vpop.permute.xlu0 %2879  ;;  %v10837_v11 = vadd.f32 %v5884_v25, %v10684_v35 }
 0x2f0   : > { %vm2914_vm10 = vcmp.eq.s32.totalorder %v2880_v62, 1  ;;  %v2675_v22 = vpop.permute.xlu1 %2674  ;;  %v5886_v24 = vpop.f32.mrf.mxu1 }
 0x2f1   : > { %vm5500_vm12 = vmpackc.low %vm2915_vm2, %vm2914_vm10  ;;  %vm2707_vm8 = vcmp.eq.s32.totalorder %v2675_v22, 1  ;;  %v5887_v57 = vadd.f32 %v5886_v24, %v5885_v5 }
 0x2f2   : > { %v10839_v18 = vpop.f32.mrf.mxu0  ;;  %5502 = vmatprep.mubr.msk.bf16.mxu0 %vm5500_vm12, %v12836_v58 }
 0x2f3   : > { %v2672_v1 = vpop.permute.xlu0 %2671  ;;  %v10843_v61 = vadd.f32 %v5887_v57, %v10690_v39 }
 0x2f4   : > { %vm2706_vm14 = vcmp.eq.s32.totalorder %v2672_v1, 1  ;;  %v3117_v15 = vpop.permute.xlu1 %3116  ;;  %v10845_v10 = vpop.f32.mrf.mxu0 }
 0x2f5   : > { %vm5503_vm0 = vmpackc.low %vm2707_vm8, %vm2706_vm14  ;;  %vm3153_vm13 = vcmp.eq.s32.totalorder %v3117_v15, 1 }
 0x2f6   : > { %5505 = vmatmul.mubr.msk.bf16.gmra.mxu0 %vm5503_vm0, %v12837_v36  ;;  %v10848_v53 = vpop.f32.mrf.mxu0 }
 0x2f7   : > { %v3114_v35 = vpop.permute.xlu0 %3113  ;;  %v5888_v19 = vpop.f32.mrf.mxu1 }
 0x2f8   : > { %vm3152_vm4 = vcmp.eq.s32.totalorder %v3114_v35, 1  ;;  %v3123_v49 = vpop.permute.xlu1 %3122  ;;  %v10854_v20 = vpop.f32.mrf.mxu0 }
 0x2f9   : > { %vm5548_vm9 = vmpackc.low %vm3153_vm13, %vm3152_vm4  ;;  %v5889_v63 = vpop.f32.mrf.mxu1  ;;  %vm3155_vm15 = vcmp.eq.s32.totalorder %v3123_v49, 1 }
 0x2fa   : > { %6182 = vmatprep.mubr.msk.bf16.mxu1 %vm5548_vm9, %v12820_v40  ;;  %v5890_v43 = vadd.f32 %v5889_v63, %v5888_v19 }
 0x2fb   : > { %v3120_v39 = vpop.permute.xlu0 %3119  ;;  %v5891_v60 = vpop.f32.mrf.mxu1 }
 0x2fc   : > { %vm3154_vm5 = vcmp.eq.s32.totalorder %v3120_v39, 1  ;;  %v10852_v29 = vadd.f32 %v5890_v43, %v12838_v16 }
 0x2fd   : > { %vm5551_vm7 = vmpackc.low %vm3155_vm15, %vm3154_vm5  ;;  %v5892_v31 = vpop.f32.mrf.mxu1 }
 0x2fe   : > { %6183 = vmatmul.mubr.msk.bf16.gmra.mxu1 %vm5551_vm7, %v12839_v46  ;;  %v5893_v33 = vadd.f32 %v5892_v31, %v5891_v60  ;;  %v10857_v54 = vpop.f32.mrf.mxu0 }
 0x300   : > { %v10860_v50 = vadd.f32 %v5893_v33, %v10705_v48  ;;  %v10862_v25 = vpop.f32.mrf.mxu0 }
 0x302   : > { %v10864_v24 = vpop.f32.mrf.mxu0 }
 0x303   : > { %v5894_v40 = vpop.f32.mrf.mxu1 }
 0x304   : > { %v10869_v15 = vpop.f32.mrf.mxu0 }
 0x305   : > { %v5895_v62 = vpop.f32.mrf.mxu1 }
 0x306   : > { %v5896_v5 = vadd.f32 %v5895_v62, %v5894_v40 }
 0x307   : > { %v5897_v22 = vpop.f32.mrf.mxu1 }
 0x308   : > { %v10867_v58 = vadd.f32 %v5896_v5, %v10715_v51 }
 0x309   : > { %v5898_v57 = vpop.f32.mrf.mxu1 }
 0x30a   : > { %12840 = vst [vmem:[#allocation15_spill] sm:$0xff] %v10867_v58  ;;  %v5899_v1 = vadd.f32 %v5898_v57, %v5897_v22  ;;  %v10874_v48 = vpop.f32.mrf.mxu0 }
 0x30c   : > { %v10872_v36 = vadd.f32 %v5899_v1, %v10722_v6  ;;  %v10876_v49 = vpop.f32.mrf.mxu0 }
 0x30e   : > { %12841 = vst [vmem:[#allocation96_spill] sm:$0xff] %v10872_v36  ;;  %v10881_v60 = vpop.f32.mrf.mxu0 }
 0x30f   : > { %v5900_v35 = vpop.f32.mrf.mxu1 }
 0x310   : > { %v10886_v6 = vpop.f32.mrf.mxu0 }
 0x311   : > { %v5901_v19 = vpop.f32.mrf.mxu1 }
 0x312   : > { %v5902_v63 = vadd.f32 %v5901_v19, %v5900_v35 }
 0x313   : > { %v5903_v43 = vpop.f32.mrf.mxu1 }
 0x314   : > { %v10879_v39 = vadd.f32 %v5902_v63, %v10732_v12 }
 0x315   : > { %v5904_v51 = vpop.f32.mrf.mxu1 }
 0x316   : > { %v5905_v16 = vadd.f32 %v5904_v51, %v5903_v43  ;;  %v10888_v33 = vpop.f32.mrf.mxu0 }
 0x318   : > { %v10884_v31 = vadd.f32 %v5905_v16, %v10739_v28  ;;  %v10890_v22 = vpop.f32.mrf.mxu0 }
 0x31a   : > { %12842 = vst [vmem:[#allocation77_spill] sm:$0xff] %v10884_v31  ;;  %v10895_v35 = vpop.f32.mrf.mxu0 }
 0x31b   : > { %v5906_v46 = vpop.f32.mrf.mxu1 }
 0x31c   : > { %v10900_v63 = vpop.f32.mrf.mxu0 }
 0x31d   : > { %v5907_v40 = vpop.f32.mrf.mxu1 }
 0x31e   : > { %v5908_v62 = vadd.f32 %v5907_v40, %v5906_v46 }
 0x31f   : > { %v5909_v5 = vpop.f32.mrf.mxu1 }
 0x320   : > { %v10893_v12 = vadd.f32 %v5908_v62, %v10747_v45 }
 0x321   : > { %v5910_v57 = vpop.f32.mrf.mxu1 }
 0x322   : > { %12843 = vst [vmem:[#allocation78_spill] sm:$0xff] %v10893_v12  ;;  %v5911_v1 = vadd.f32 %v5910_v57, %v5909_v5  ;;  %v10902_v51 = vpop.f32.mrf.mxu0 }
 0x324   : > { %v10898_v28 = vadd.f32 %v5911_v1, %v10755_v27  ;;  %v10907_v62 = vpop.f32.mrf.mxu0 }
 0x326   : > { %12844 = vst [vmem:[#allocation50_spill] sm:$0xff] %v10898_v28  ;;  %v10912_v27 = vpop.f32.mrf.mxu0 }
 0x327   : > { %v5912_v19 = vpop.f32.mrf.mxu1 }
 0x328   : > { %v10914_v12 = vpop.f32.mrf.mxu0 }
 0x329   : > { %v5913_v43 = vpop.f32.mrf.mxu1 }
 0x32a   : > { %v5914_v16 = vadd.f32 %v5913_v43, %v5912_v19 }
 0x32b   : > { %v5915_v46 = vpop.f32.mrf.mxu1 }
 0x32c   : > { %v10905_v40 = vadd.f32 %v5914_v16, %v10764_v26 }
 0x32d   : > { %v5916_v45 = vpop.f32.mrf.mxu1 }
 0x32e   : > { %12845 = vst [vmem:[#allocation127_spill] sm:$0xff] %v10905_v40  ;;  %v5917_v5 = vadd.f32 %v5916_v45, %v5915_v46  ;;  %v10916_v19 = vpop.f32.mrf.mxu0 }
 0x330   : > { %v10910_v57 = vadd.f32 %v5917_v5, %v10772_v17  ;;  %v10921_v40 = vpop.f32.mrf.mxu0 }
 0x332   : > { %12846 = vst [vmem:[#allocation131_spill] sm:$0xff] %v10910_v57  ;;  %v10926_v45 = vpop.f32.mrf.mxu0 }
 0x333   : > { %v5918_v1 = vpop.f32.mrf.mxu1 }
 0x335   : > { %v5919_v28 = vpop.f32.mrf.mxu1 }
 0x336   : > { %v5920_v36 = vadd.f32 %v5919_v28, %v5918_v1  ;;  %v10928_v28 = vpop.f32.mrf.mxu0 }
 0x337   : > { %v5921_v31 = vpop.f32.mrf.mxu1 }
 0x338   : > { %v10919_v26 = vadd.f32 %v5920_v36, %v10789_v59 }
 0x339   : > { %v5922_v43 = vpop.f32.mrf.mxu1 }
 0x33a   : > { %12847 = vst [vmem:[#allocation13_spill] sm:$0xff] %v10919_v26  ;;  %v5923_v16 = vadd.f32 %v5922_v43, %v5921_v31  ;;  %v10933_v36 = vpop.f32.mrf.mxu0 }
 0x33c   : > { %v10924_v17 = vadd.f32 %v5923_v16, %v10797_v34  ;;  %v10938_v34 = vpop.f32.mrf.mxu0  ;;  %v5954_v16 = vadd.f32 %v10845_v10, %v10839_v18 }
 0x33e   : > { %12848 = vst [vmem:[#allocation146_spill] sm:$0xff] %v10924_v17 }
 0x33f   : > { %v5924_v46 = vpop.f32.mrf.mxu1 }
 0x341   : > { %v5925_v5 = vpop.f32.mrf.mxu1 }
 0x342   : > { %v5926_v57 = vadd.f32 %v5925_v5, %v5924_v46  ;;  %v5948_v46 = vadd.f32 %v10825_v7, %v10822_v30  ;;  %v5957_v5 = vadd.f32 %v10854_v20, %v10848_v53 }
 0x343   : > { %v5927_v58 = vpop.f32.mrf.mxu1 }
 0x344   : > { %v10931_v1 = vadd.f32 %v5926_v57, %v10809_v38  ;;  %v10946_v38 = vpop.f32.mrf.mxu0  ;;  %v4305_v17 = vadd.f32 %v5948_v46, %v10713_v56  ;;  %v4316_v18 = vadd.f32 %v5957_v5, %v10737_v52  ;;  %v5966_v52 = vadd.f32 %v10876_v49, %v10874_v48 }
 0x345   : > { %v5928_v59 = vpop.f32.mrf.mxu1 }
 0x346   : > { %12849 = vst [vmem:[#allocation143_spill] sm:$0xff] %v10931_v1  ;;  %v5929_v31 = vadd.f32 %v5928_v59, %v5927_v58  ;;  %v5951_v58 = vadd.f32 %v10834_v37, %v10831_v23  ;;  %v10953_v10 = vpop.f32.mrf.mxu0  ;;  %v4329_v46 = vadd.f32 %v5966_v52, %v10759_v14 }
 0x348   : > { %v10936_v43 = vadd.f32 %v5929_v31, %v10817_v13  ;;  %v4313_v13 = vadd.f32 %v5954_v16, %v10730_v9  ;;  %v4308_v53 = vadd.f32 %v5951_v58, %v10720_v2  ;;  %v10956_v20 = vpop.f32.mrf.mxu0  ;;  %v5960_v2 = vadd.f32 %v10862_v25, %v10857_v54 }
 0x34a   : > { %12850 = vst [vmem:[#allocation79_spill] sm:$0xff] %v10936_v43  ;;  %v4321_v49 = vadd.f32 %v5960_v2, %v10745_v55 }
 0x34e   : > { %v6156_v57 = vpop.f32.mrf.mxu1 }
 0x34f   : > { %v4474_v31 = vadd.f32 %v6156_v57, %v4313_v13  ;;  %v10958_v13 = vpop.f32.mrf.mxu0 }
 0x350   : > { %v4465_v59 = vpop.f32.mrf.mxu1 }
 0x351   : > { %v4466_v7 = vadd.f32 %v4465_v59, %v4305_v17  ;;  %v4594_v1 = vmax.f32 %v4474_v31, 0.0  ;;  %v10962_v17 = vpop.f32.mrf.mxu0 }
 0x352   : > { %v6157_v30 = vpop.f32.mrf.mxu1 }
 0x353   : > { %v4477_v43 = vadd.f32 %v6157_v30, %v4316_v18  ;;  %v4592_v9 = vmax.f32 %v4466_v7, 0.0  ;;  %v10971_v5 = vpop.f32.mrf.mxu0 }
 0x354   : > { %v4468_v26 = vpop.f32.mrf.mxu1 }
 0x355   : > { %v4595_v23 = vmax.f32 %v4477_v43, 0.0  ;;  %v4469_v37 = vadd.f32 %v4468_v26, %v4308_v53  ;;  %v5969_v43 = vadd.f32 %v10886_v6, %v10881_v60 }
 0x356   : > { %v10975_v31 = vpop.f32.mrf.mxu0 }
 0x357   : > { %v4625_v16 = vpack.c.bf16 %v4595_v23, %v4594_v1  ;;  %v4593_v57 = vmax.f32 %v4469_v37, 0.0  ;;  %v5963_v1 = vadd.f32 %v10869_v15, %v10864_v24  ;;  %v4332_v59 = vadd.f32 %v5969_v43, %v10767_v47 }
 0x358   : > { %v10978_v14 = vpop.f32.mrf.mxu0  ;;  %v5978_v47 = vadd.f32 %v10907_v62, %v10902_v51 }
 0x359   : > { %v4624_v56 = vpack.c.bf16 %v4593_v57, %v4592_v9  ;;  %v4324_v60 = vadd.f32 %v5963_v1, %v10753_v8  ;;  %v5972_v8 = vadd.f32 %v10890_v22, %v10888_v33  ;;  %v5981_v9 = vadd.f32 %v10914_v12, %v10912_v27 }
 0x35a   : > { %v10980_v55 = vpop.f32.mrf.mxu0  ;;  %v4345_v52 = vadd.f32 %v5978_v47, %v10792_v3 }
 0x35b   : > { %6202 = vmatprep.mubr.bf16.mxu0 %v4624_v56  ;;  %v5975_v56 = vadd.f32 %v10900_v63, %v10895_v35  ;;  %v4337_v51 = vadd.f32 %v5972_v8, %v10775_v21  ;;  %v4348_v62 = vadd.f32 %v5981_v9, %v10800_v32  ;;  %v5990_v21 = vadd.f32 %v10938_v34, %v10933_v36 }
 0x35c   : > { %6203 = vmatmul.mubr.bf16.vlgmr.msra.gmra.mxu0 %v4625_v16  ;;  %v6004_v16 = vpop.f32.mrf.mxu0 }
 0x35d   : > { %v4340_v12 = vadd.f32 %v5975_v56, %v10779_v41  ;;  %v5984_v41 = vadd.f32 %v10921_v40, %v10916_v19  ;;  %v5996_v56 = vadd.f32 %v10958_v13, %v10956_v20 }
 0x35e   : > { %v6160_v26 = vpop.f32.mrf.mxu1 }
 0x35f   : > { %v4490_v48 = vadd.f32 %v6160_v26, %v4329_v46  ;;  %v4353_v36 = vadd.f32 %v5984_v41, %v10804_v0  ;;  %v6002_v0 = vadd.f32 %v10978_v14, %v10975_v31 }
 0x360   : > { %v4481_v58 = vpop.f32.mrf.mxu1 }
 0x361   : > { %v4482_v25 = vadd.f32 %v4481_v58, %v4321_v49  ;;  %v4598_v30 = vmax.f32 %v4490_v48, 0.0 }
 0x362   : > { %v6161_v54 = vpop.f32.mrf.mxu1 }
 0x363   : > { %v4493_v18 = vadd.f32 %v6161_v54, %v4332_v59  ;;  %v4596_v7 = vmax.f32 %v4482_v25, 0.0  ;;  %v5993_v25 = vadd.f32 %v10953_v10, %v10946_v38 }
 0x364   : > { %v4484_v6 = vpop.f32.mrf.mxu1 }
 0x365   : > { %v4599_v24 = vmax.f32 %v4493_v18, 0.0  ;;  %v4485_v15 = vadd.f32 %v4484_v6, %v4324_v60  ;;  %v5987_v6 = vadd.f32 %v10928_v28, %v10926_v45  ;;  %v4364_v34 = vadd.f32 %v5993_v25, %v10828_v4 }
 0x366   : > { %v10991_v2 = vpop.f32.mrf.mxu0 }
 0x367   : > { %v4627_v53 = vpack.c.bf16 %v4599_v24, %v4598_v30  ;;  %v4597_v23 = vmax.f32 %v4485_v15, 0.0  ;;  %v4361_v30 = vadd.f32 %v5990_v21, %v10820_v42  ;;  %v4356_v19 = vadd.f32 %v5987_v6, %v10812_v44 }
 0x368   : > { %v10996_v27 = vpop.f32.mrf.mxu0  ;;  %v6005_v44 = vadd.f32 %v6004_v16, %v10980_v55 }
 0x369   : > { %v4626_v37 = vpack.c.bf16 %v4597_v23, %v4596_v7 }
 0x36a   : > { %v10998_v59 = vpop.f32.mrf.mxu0  ;;  %v4380_v31 = vadd.f32 %v6005_v44, %v10860_v50 }
 0x36b   : > { %6206 = vmatprep.mubr.bf16.mxu0 %v4626_v37 }
 0x36c   : > { %6207 = vmatmul.mubr.bf16.gmra.mxu0 %v4627_v53  ;;  %v11002_v32 = vpop.f32.mrf.mxu0 }
 0x36e   : > { %v6164_v57 = vpop.f32.mrf.mxu1 }
 0x36f   : > { %v4506_v26 = vadd.f32 %v6164_v57, %v4345_v52 }
 0x370   : > { %v4497_v43 = vpop.f32.mrf.mxu1 }
 0x371   : > { %v4498_v33 = vadd.f32 %v4497_v43, %v4337_v51  ;;  %v4602_v58 = vmax.f32 %v4506_v26, 0.0  ;;  %v5999_v43 = vadd.f32 %v10971_v5, %v10962_v17  ;;  %v4377_v26 = vadd.f32 %v6002_v0, %v10852_v29 }
 0x372   : > { %v6165_v1 = vpop.f32.mrf.mxu1 }
 0x373   : > { %v4509_v22 = vadd.f32 %v6165_v1, %v4348_v62  ;;  %v4600_v3 = vmax.f32 %v4498_v33, 0.0  ;;  %v4369_v33 = vadd.f32 %v5996_v56, %v10837_v11  ;;  %v4372_v20 = vadd.f32 %v5999_v43, %v10843_v61 }
 0x374   : > { %v4500_v46 = vpop.f32.mrf.mxu1  ;;  %v6008_v11 = vadd.f32 %v10996_v27, %v10991_v2 }
 0x375   : > { %v4603_v35 = vmax.f32 %v4509_v22, 0.0  ;;  %v4501_v63 = vadd.f32 %v4500_v46, %v4340_v12 }
 0x376   : > { %v6012_v18 = vpop.f32.mrf.mxu0 }
 0x377   : > { %v4629_v48 = vpack.c.bf16 %v4603_v35, %v4602_v58  ;;  %v4601_v49 = vmax.f32 %v4501_v63, 0.0 }
 0x378   : > { %v6013_v7 = vpop.f32.mrf.mxu0 }
 0x379   : > { %v4628_v54 = vpack.c.bf16 %v4601_v49, %v4600_v3 }
 0x37a   : > { %v6015_v8 = vpop.f32.mrf.mxu0 }
 0x37b   : > { %6210 = vmatprep.mubr.bf16.mxu0 %v4628_v54  ;;  %v6011_v54 = vadd.f32 %v11002_v32, %v10998_v59 }
 0x37c   : > { %6211 = vmatmul.mubr.bf16.gmra.mxu0 %v4629_v48  ;;  %v6016_v57 = vpop.f32.mrf.mxu0  ;;  %v6014_v48 = vadd.f32 %v6013_v7, %v6012_v18  ;;  %v12853_v7 = vld [vmem:[#allocation96_spill] sm:$0xff] }
 0x37d   : > { %v6017_v50 = vadd.f32 %v6016_v57, %v6015_v8  ;;  %v4388_v2 = vadd.f32 %v6011_v54, %v12853_v7 }
 0x37e   : > { %v6168_v60 = vpop.f32.mrf.mxu1  ;;  %v4393_v21 = vadd.f32 %v6014_v48, %v10879_v39 }
 0x37f   : > { %v4522_v15 = vadd.f32 %v6168_v60, %v4361_v30  ;;  %v12851_v60 = vld [vmem:[#allocation15_spill] sm:$0xff]  ;;  %v12852_v30 = vld [vmem:[#allocation77_spill] sm:$0xff] }
 0x380   : > { %v4513_v24 = vpop.f32.mrf.mxu1  ;;  %v4385_v6 = vadd.f32 %v6008_v11, %v12851_v60  ;;  %v12860_v60 = vld [vmem:[#allocation79_spill] sm:$0xff] }
 0x381   : > { %v4514_v23 = vadd.f32 %v4513_v24, %v4353_v36  ;;  %v4606_v10 = vmax.f32 %v4522_v15, 0.0  ;;  %v4396_v24 = vadd.f32 %v6017_v50, %v12852_v30 }
 0x382   : > { %v6169_v53 = vpop.f32.mrf.mxu1 }
 0x383   : > { %v4525_v40 = vadd.f32 %v6169_v53, %v4364_v34  ;;  %v4604_v45 = vmax.f32 %v4514_v23, 0.0 }
 0x384   : > { %v4516_v38 = vpop.f32.mrf.mxu1 }
 0x385   : > { %v4607_v37 = vmax.f32 %v4525_v40, 0.0  ;;  %v4517_v47 = vadd.f32 %v4516_v38, %v4356_v19 }
 0x386   : > { %v6018_v4 = vpop.f32.mrf.mxu0 }
 0x387   : > { %v4631_v28 = vpack.c.bf16 %v4607_v37, %v4606_v10  ;;  %v4605_v42 = vmax.f32 %v4517_v47, 0.0 }
 0x388   : > { %v6019_v51 = vpop.f32.mrf.mxu0 }
 0x389   : > { %v4630_v9 = vpack.c.bf16 %v4605_v42, %v4604_v45  ;;  %v6020_v8 = vadd.f32 %v6019_v51, %v6018_v4 }
 0x38a   : > { %v6021_v13 = vpop.f32.mrf.mxu0 }
 0x38b   : > { %6214 = vmatprep.mubr.bf16.mxu0 %v4630_v9  ;;  %v12854_v9 = vld [vmem:[#allocation127_spill] sm:$0xff] }
 0x38c   : > { %6215 = vmatmul.mubr.bf16.gmra.mxu0 %v4631_v28  ;;  %v6022_v35 = vpop.f32.mrf.mxu0 }
 0x38d   : > { %v6023_v42 = vadd.f32 %v6022_v35, %v6021_v13 }
 0x38e   : > { %v6172_v52 = vpop.f32.mrf.mxu1 }
 0x38f   : > { %v4538_v1 = vadd.f32 %v6172_v52, %v4377_v26  ;;  %v12855_v52 = vld [vmem:[#allocation78_spill] sm:$0xff]  ;;  %v12856_v26 = vld [vmem:[#allocation131_spill] sm:$0xff] }
 0x390   : > { %v4529_v62 = vpop.f32.mrf.mxu1  ;;  %v4401_v43 = vadd.f32 %v6020_v8, %v12855_v52 }
 0x391   : > { %v4530_v22 = vadd.f32 %v4529_v62, %v4369_v33  ;;  %v4610_v16 = vmax.f32 %v4538_v1, 0.0 }
 0x392   : > { %v6173_v14 = vpop.f32.mrf.mxu1 }
 0x393   : > { %v4541_v12 = vadd.f32 %v6173_v14, %v4380_v31  ;;  %v4608_v17 = vmax.f32 %v4530_v22, 0.0  ;;  %v12857_v14 = vld [vmem:[#allocation50_spill] sm:$0xff] }
 0x394   : > { %v4532_v55 = vpop.f32.mrf.mxu1  ;;  %v4404_v22 = vadd.f32 %v6023_v42, %v12857_v14 }
 0x395   : > { %v4611_v46 = vmax.f32 %v4541_v12, 0.0  ;;  %v4533_v58 = vadd.f32 %v4532_v55, %v4372_v20 }
 0x396   : > { %v6024_v3 = vpop.f32.mrf.mxu0 }
 0x397   : > { %v4633_v5 = vpack.c.bf16 %v4611_v46, %v4610_v16  ;;  %v4609_v29 = vmax.f32 %v4533_v58, 0.0 }
 0x398   : > { %v6025_v49 = vpop.f32.mrf.mxu0 }
 0x399   : > { %v4632_v63 = vpack.c.bf16 %v4609_v29, %v4608_v17  ;;  %v6026_v37 = vadd.f32 %v6025_v49, %v6024_v3  ;;  %v12858_v49 = vld [vmem:[#allocation143_spill] sm:$0xff] }
 0x39a   : > { %v6027_v18 = vpop.f32.mrf.mxu0 }
 0x39b   : > { %6218 = vmatprep.mubr.bf16.mxu0 %v4632_v63  ;;  %v4409_v57 = vadd.f32 %v6026_v37, %v12854_v9 }
 0x39c   : > { %6219 = vmatmul.mubr.bf16.gmra.mxu0 %v4633_v5  ;;  %v6028_v19 = vpop.f32.mrf.mxu0 }
 0x39d   : > { %v6029_v45 = vadd.f32 %v6028_v19, %v6027_v18 }
 0x39e   : > { %v6176_v61 = vpop.f32.mrf.mxu1 }
 0x39f   : > { %v4554_v25 = vadd.f32 %v6176_v61, %v4393_v21  ;;  %v4412_v62 = vadd.f32 %v6029_v45, %v12856_v26  ;;  %v6484_v26 = vld [vmem:[%s6998_s17 + $0x8] sm:$0xff] }
 0x3a0   : > { %v4545_v41 = vpop.f32.mrf.mxu1 }
 0x3a1   : > { %v4546_v36 = vadd.f32 %v4545_v41, %v4385_v6  ;;  %v4614_v53 = vmax.f32 %v4554_v25, 0.0  ;;  %v12859_v41 = vld [vmem:[#allocation13_spill] sm:$0xff] }
 0x3a2   : > { %v6177_v15 = vpop.f32.mrf.mxu1 }
 0x3a3   : > { %v4557_v34 = vadd.f32 %v6177_v15, %v4396_v24  ;;  %v4612_v59 = vmax.f32 %v4546_v36, 0.0  ;;  %v12861_v15 = vld [vmem:[#allocation146_spill] sm:$0xff] }
 0x3a4   : > { %v4548_v27 = vpop.f32.mrf.mxu1 }
 0x3a5   : > { %v4615_v23 = vmax.f32 %v4557_v34, 0.0  ;;  %v4549_v40 = vadd.f32 %v4548_v27, %v4388_v2 }
 0x3a6   : > { %v6030_v38 = vpop.f32.mrf.mxu0 }
 0x3a7   : > { %v4635_v32 = vpack.c.bf16 %v4615_v23, %v4614_v53  ;;  %v4613_v39 = vmax.f32 %v4549_v40, 0.0 }
 0x3a8   : > { %v6031_v47 = vpop.f32.mrf.mxu0 }
 0x3a9   : > { %v4634_v10 = vpack.c.bf16 %v4613_v39, %v4612_v59  ;;  %v6032_v3 = vadd.f32 %v6031_v47, %v6030_v38  ;;  %v11045_v59 = vld [vmem:[%s11206_s8] ss:$0 sm:$0xff] }
 0x3aa   : > { %v6033_v0 = vpop.f32.mrf.mxu0 }
 0x3ab   : > { %6222 = vmatprep.mubr.bf16.mxu0 %v4634_v10  ;;  %v4417_v25 = vadd.f32 %v6032_v3, %v12859_v41  ;;  %v6481_v10 = vld [vmem:[%s6998_s17 + $0x10] sm:$0xff] }
 0x3ac   : > { %6223 = vmatmul.mubr.bf16.gmra.mxu0 %v4635_v32  ;;  %v6034_v12 = vpop.f32.mrf.mxu0 }
 0x3ad   : > { %v6035_v50 = vadd.f32 %v6034_v12, %v6033_v0 }
 0x3ae   : > { %v6180_v28 = vpop.f32.mrf.mxu1 }
 0x3af   : > { %v4570_v44 = vadd.f32 %v6180_v28, %v4409_v57  ;;  %v4420_v36 = vadd.f32 %v6035_v50, %v12861_v15  ;;  %v6482_v28 = vld [vmem:[%s6998_s17] sm:$0xff]  ;;  %v6491_v15 = vld [vmem:[%s6998_s17 + $0x58] sm:$0xff] }
 0x3b0   : > { %v4561_v56 = vpop.f32.mrf.mxu1 }
 0x3b1   : > { %v4562_v33 = vadd.f32 %v4561_v56, %v4401_v43  ;;  %v4618_v4 = vmax.f32 %v4570_v44, 0.0  ;;  %v6483_v56 = vld [vmem:[%s6998_s17 + $0x18] sm:$0xff] }
 0x3b2   : > { %v6181_v1 = vpop.f32.mrf.mxu1 }
 0x3b3   : > { %v4573_v31 = vadd.f32 %v6181_v1, %v4412_v62  ;;  %v4616_v16 = vmax.f32 %v4562_v33, 0.0 }
 0x3b4   : > { %v4564_v20 = vpop.f32.mrf.mxu1 }
 0x3b5   : > { %v4619_v51 = vmax.f32 %v4573_v31, 0.0  ;;  %v4565_v55 = vadd.f32 %v4564_v20, %v4404_v22  ;;  %v6485_v22 = vld [vmem:[%s6998_s17 + $0x30] sm:$0xff] }
 0x3b6   : > { %v6036_v13 = vpop.f32.mrf.mxu0 }
 0x3b7   : > { %v4637_v46 = vpack.c.bf16 %v4619_v51, %v4618_v4  ;;  %v4617_v58 = vmax.f32 %v4565_v55, 0.0  ;;  %v6486_v55 = vld [vmem:[%s6998_s17 + $0x20] sm:$0xff] }
 0x3b8   : > { %v6037_v17 = vpop.f32.mrf.mxu0 }
 0x3b9   : > { %v4636_v5 = vpack.c.bf16 %v4617_v58, %v4616_v16  ;;  %v6038_v35 = vadd.f32 %v6037_v17, %v6036_v13  ;;  %v6487_v17 = vld [vmem:[%s6998_s17 + $0x38] sm:$0xff] }
 0x3ba   : > { %v6039_v29 = vpop.f32.mrf.mxu0 }
 0x3bb   : > { %6226 = vmatprep.mubr.bf16.mxu0 %v4636_v5  ;;  %v4425_v61 = vadd.f32 %v6038_v35, %v12858_v49 }
 0x3bc   : > { %v6040_v63 = vpop.f32.mrf.mxu0  ;;  %6227 = vmatmul.mubr.bf16.gmra.mxu0 %v4637_v46 }
 0x3bd   : > { %v6041_v48 = vadd.f32 %v6040_v63, %v6039_v29  ;;  %v6488_v63 = vld [vmem:[%s6998_s17 + $0x28] sm:$0xff] }
 0x3be   : > { %v6184_v11 = vpop.f32.mrf.mxu1 }
 0x3bf   : > { %v4586_v21 = vadd.f32 %v6184_v11, %v4425_v61  ;;  %v4428_v6 = vadd.f32 %v6041_v48, %v12860_v60  ;;  %v6489_v61 = vld [vmem:[%s6998_s17 + $0x50] sm:$0xff]  ;;  %v6490_v60 = vld [vmem:[%s6998_s17 + $0x40] sm:$0xff] }
 0x3c0   : > { %v4577_v54 = vpop.f32.mrf.mxu1 }
 0x3c1   : > { %v4578_v24 = vadd.f32 %v4577_v54, %v4417_v25  ;;  %v4622_v7 = vmax.f32 %v4586_v21, 0.0 }
 0x3c2   : > { %v6185_v30 = vpop.f32.mrf.mxu1 }
 0x3c3   : > { %v4589_v18 = vadd.f32 %v6185_v30, %v4428_v6  ;;  %v4620_v53 = vmax.f32 %v4578_v24, 0.0 }
 0x3c4   : > { %v4580_v34 = vpop.f32.mrf.mxu1 }
 0x3c5   : > { %v4623_v2 = vmax.f32 %v4589_v18, 0.0  ;;  %v4581_v27 = vadd.f32 %v4580_v34, %v4420_v36 }
 0x3c7   : > { %v4639_v23 = vpack.c.bf16 %v4623_v2, %v4622_v7  ;;  %v4621_v40 = vmax.f32 %v4581_v27, 0.0  ;;  %v6492_v2 = vld [vmem:[%s6998_s17 + $0x48] sm:$0xff] }
 0x3c9   : > { %v4638_v19 = vpack.c.bf16 %v4621_v40, %v4620_v53 }
 0x3cb   : > { %6230 = vmatprep.mubr.bf16.mxu0 %v4638_v19 }
 0x3cc   : > { %6231 = vmatmul.mubr.bf16.gmra.mxu0 %v4639_v23 }
 0x41c   : > { %v6204_v32 = vpop.f32.mrf.mxu0 }
 0x41d   : > { %v4754_v39 = vadd.f32 %v6204_v32, %v11045_v59  ;;  %v6493_v32 = vld [vmem:[%s6998_s17 + $0x70] sm:$0xff] }
 0x41e   : > { %v4745_v38 = vpop.f32.mrf.mxu0 }
 0x41f   : > { %v4874_v37 = vadd.f32 %v6481_v10, %v4754_v39  ;;  %v4746_v47 = vadd.f32 %v11045_v59, %v4745_v38 }
 0x420   : > { %v6205_v8 = vpop.f32.mrf.mxu0 }
 0x421   : > { %v4906_v45 = vmax.f32 %v4874_v37, 0.0  ;;  %v4872_v42 = vadd.f32 %v6482_v28, %v4746_v47  ;;  %v4757_v9 = vadd.f32 %v6205_v8, %v11045_v59  ;;  %v6494_v47 = vld [vmem:[%s6998_s17 + $0x60] sm:$0xff] }
 0x422   : > { %v4748_v57 = vpop.f32.mrf.mxu0 }
 0x423   : > { %4938 = vst [vmem:[%s11054_s16 + $0x10] sm:$0xff] %v4906_v45  ;;  %v4904_v0 = vmax.f32 %v4872_v42, 0.0  ;;  %v4875_v44 = vadd.f32 %v6483_v56, %v4757_v9  ;;  %v4749_v52 = vadd.f32 %v11045_v59, %v4748_v57  ;;  %v6495_v9 = vld [vmem:[%s6998_s17 + $0x78] sm:$0xff] }
 0x425   : > { %4936 = vst [vmem:[%s11054_s16] sm:$0xff] %v4904_v0  ;;  %v4907_v43 = vmax.f32 %v4875_v44, 0.0  ;;  %v4873_v62 = vadd.f32 %v6484_v26, %v4749_v52  ;;  %v6496_v44 = vld [vmem:[%s6998_s17 + $0x68] sm:$0xff] }
 0x427   : > { %4939 = vst [vmem:[%s11054_s16 + $0x18] sm:$0xff] %v4907_v43  ;;  %v4905_v1 = vmax.f32 %v4873_v62, 0.0 }
 0x429   : > { %4937 = vst [vmem:[%s11054_s16 + $0x8] sm:$0xff] %v4905_v1 }
 0x42c   : > { %v6208_v33 = vpop.f32.mrf.mxu0 }
 0x42d   : > { %v4770_v31 = vadd.f32 %v6208_v33, %v11045_v59  ;;  %v6497_v33 = vld [vmem:[%s6998_s17 + $0x90] sm:$0xff] }
 0x42e   : > { %v4761_v14 = vpop.f32.mrf.mxu0 }
 0x42f   : > { %v4878_v12 = vadd.f32 %v6485_v22, %v4770_v31  ;;  %v4762_v20 = vadd.f32 %v11045_v59, %v4761_v14 }
 0x430   : > { %v6209_v4 = vpop.f32.mrf.mxu0 }
 0x431   : > { %v4910_v51 = vmax.f32 %v4878_v12, 0.0  ;;  %v4876_v13 = vadd.f32 %v6486_v55, %v4762_v20  ;;  %v4773_v16 = vadd.f32 %v6209_v4, %v11045_v59  ;;  %v6498_v20 = vld [vmem:[%s6998_s17 + $0x80] sm:$0xff] }
 0x432   : > { %v4764_v46 = vpop.f32.mrf.mxu0 }
 0x433   : > { %4942 = vst [vmem:[%s11054_s16 + $0x30] sm:$0xff] %v4910_v51  ;;  %v4908_v58 = vmax.f32 %v4876_v13, 0.0  ;;  %v4879_v5 = vadd.f32 %v6487_v17, %v4773_v16  ;;  %v4765_v29 = vadd.f32 %v11045_v59, %v4764_v46  ;;  %v6499_v16 = vld [vmem:[%s6998_s17 + $0x98] sm:$0xff] }
 0x435   : > { %4940 = vst [vmem:[%s11054_s16 + $0x20] sm:$0xff] %v4908_v58  ;;  %v4911_v35 = vmax.f32 %v4879_v5, 0.0  ;;  %v4877_v3 = vadd.f32 %v6488_v63, %v4765_v29  ;;  %v6500_v5 = vld [vmem:[%s6998_s17 + $0x88] sm:$0xff] }
 0x437   : > { %4943 = vst [vmem:[%s11054_s16 + $0x38] sm:$0xff] %v4911_v35  ;;  %v4909_v48 = vmax.f32 %v4877_v3, 0.0 }
 0x439   : > { %4941 = vst [vmem:[%s11054_s16 + $0x28] sm:$0xff] %v4909_v48 }
 0x43c   : > { %v6212_v11 = vpop.f32.mrf.mxu0 }
 0x43d   : > { %v4786_v50 = vadd.f32 %v6212_v11, %v11045_v59  ;;  %v6501_v11 = vld [vmem:[%s6998_s17 + $0xb0] sm:$0xff] }
 0x43e   : > { %v4777_v49 = vpop.f32.mrf.mxu0 }
 0x43f   : > { %v4882_v54 = vadd.f32 %v6489_v61, %v4786_v50  ;;  %v4778_v21 = vadd.f32 %v11045_v59, %v4777_v49 }
 0x440   : > { %v6213_v41 = vpop.f32.mrf.mxu0 }
 0x441   : > { %v4914_v25 = vmax.f32 %v4882_v54, 0.0  ;;  %v4880_v6 = vadd.f32 %v6490_v60, %v4778_v21  ;;  %v4789_v30 = vadd.f32 %v6213_v41, %v11045_v59  ;;  %v6502_v21 = vld [vmem:[%s6998_s17 + $0xa0] sm:$0xff] }
 0x442   : > { %v4780_v24 = vpop.f32.mrf.mxu0 }
 0x443   : > { %4946 = vst [vmem:[%s11054_s16 + $0x50] sm:$0xff] %v4914_v25  ;;  %v4912_v18 = vmax.f32 %v4880_v6, 0.0  ;;  %v4883_v36 = vadd.f32 %v6491_v15, %v4789_v30  ;;  %v4781_v34 = vadd.f32 %v11045_v59, %v4780_v24  ;;  %v6503_v30 = vld [vmem:[%s6998_s17 + $0xb8] sm:$0xff] }
 0x445   : > { %4944 = vst [vmem:[%s11054_s16 + $0x40] sm:$0xff] %v4912_v18  ;;  %v4915_v7 = vmax.f32 %v4883_v36, 0.0  ;;  %v4881_v27 = vadd.f32 %v6492_v2, %v4781_v34  ;;  %v6504_v36 = vld [vmem:[%s6998_s17 + $0xa8] sm:$0xff] }
 0x447   : > { %4947 = vst [vmem:[%s11054_s16 + $0x58] sm:$0xff] %v4915_v7  ;;  %v4913_v53 = vmax.f32 %v4881_v27, 0.0 }
 0x449   : > { %4945 = vst [vmem:[%s11054_s16 + $0x48] sm:$0xff] %v4913_v53 }
 0x44c   : > { %v6216_v23 = vpop.f32.mrf.mxu0 }
 0x44d   : > { %v4802_v40 = vadd.f32 %v6216_v23, %v11045_v59  ;;  %v6505_v23 = vld [vmem:[%s6998_s17 + $0xd0] sm:$0xff] }
 0x44e   : > { %v4793_v19 = vpop.f32.mrf.mxu0 }
 0x44f   : > { %v4886_v39 = vadd.f32 %v6493_v32, %v4802_v40  ;;  %v4794_v38 = vadd.f32 %v11045_v59, %v4793_v19 }
 0x450   : > { %v6217_v10 = vpop.f32.mrf.mxu0 }
 0x451   : > { %v4918_v37 = vmax.f32 %v4886_v39, 0.0  ;;  %v4884_v8 = vadd.f32 %v6494_v47, %v4794_v38  ;;  %v4805_v45 = vadd.f32 %v6217_v10, %v11045_v59  ;;  %v6506_v38 = vld [vmem:[%s6998_s17 + $0xc0] sm:$0xff] }
 0x452   : > { %v4796_v28 = vpop.f32.mrf.mxu0 }
 0x453   : > { %4950 = vst [vmem:[%s11054_s16 + $0x70] sm:$0xff] %v4918_v37  ;;  %v4916_v42 = vmax.f32 %v4884_v8, 0.0  ;;  %v4887_v57 = vadd.f32 %v6495_v9, %v4805_v45  ;;  %v4797_v0 = vadd.f32 %v11045_v59, %v4796_v28  ;;  %v6507_v45 = vld [vmem:[%s6998_s17 + $0xd8] sm:$0xff] }
 0x455   : > { %4948 = vst [vmem:[%s11054_s16 + $0x60] sm:$0xff] %v4916_v42  ;;  %v4919_v56 = vmax.f32 %v4887_v57, 0.0  ;;  %v4885_v52 = vadd.f32 %v6496_v44, %v4797_v0  ;;  %v6508_v57 = vld [vmem:[%s6998_s17 + $0xc8] sm:$0xff] }
 0x457   : > { %4951 = vst [vmem:[%s11054_s16 + $0x78] sm:$0xff] %v4919_v56  ;;  %v4917_v43 = vmax.f32 %v4885_v52, 0.0 }
 0x459   : > { %4949 = vst [vmem:[%s11054_s16 + $0x68] sm:$0xff] %v4917_v43 }
 0x45c   : > { %v6220_v26 = vpop.f32.mrf.mxu0 }
 0x45d   : > { %v4818_v62 = vadd.f32 %v6220_v26, %v11045_v59  ;;  %v6509_v26 = vld [vmem:[%s6998_s17 + $0xf0] sm:$0xff] }
 0x45e   : > { %v4809_v1 = vpop.f32.mrf.mxu0 }
 0x45f   : > { %v4890_v31 = vadd.f32 %v6497_v33, %v4818_v62  ;;  %v4810_v14 = vadd.f32 %v11045_v59, %v4809_v1 }
 0x460   : > { %v6221_v22 = vpop.f32.mrf.mxu0 }
 0x461   : > { %v4922_v12 = vmax.f32 %v4890_v31, 0.0  ;;  %v4888_v4 = vadd.f32 %v6498_v20, %v4810_v14  ;;  %v4821_v51 = vadd.f32 %v6221_v22, %v11045_v59  ;;  %v6510_v14 = vld [vmem:[%s6998_s17 + $0xe0] sm:$0xff] }
 0x462   : > { %v4812_v55 = vpop.f32.mrf.mxu0 }
 0x463   : > { %4954 = vst [vmem:[%s11054_s16 + $0x90] sm:$0xff] %v4922_v12  ;;  %v4920_v13 = vmax.f32 %v4888_v4, 0.0  ;;  %v4891_v46 = vadd.f32 %v6499_v16, %v4821_v51  ;;  %v4813_v58 = vadd.f32 %v11045_v59, %v4812_v55  ;;  %v6511_v51 = vld [vmem:[%s6998_s17 + $0xf8] sm:$0xff] }
 0x465   : > { %4952 = vst [vmem:[%s11054_s16 + $0x80] sm:$0xff] %v4920_v13  ;;  %v4923_v17 = vmax.f32 %v4891_v46, 0.0  ;;  %v4889_v29 = vadd.f32 %v6500_v5, %v4813_v58  ;;  %v6512_v46 = vld [vmem:[%s6998_s17 + $0xe8] sm:$0xff]  ;;  %s6667_s17 = smov [#allocation8]  }
 0x466   : > { %s6595_s26 = sshll.u32 %s6667_s17, 4  ;;  %s6596_s26 = int_to_ptr.vmem [resolvable:$false] %s6595_s26 }
 0x467   : > { %4955 = vst [vmem:[%s11054_s16 + $0x98] sm:$0xff] %v4923_v17  ;;  %v4921_v35 = vmax.f32 %v4889_v29, 0.0  ;;  %s6597_s28 = scalar_lea.vmem %s6596_s26, 8192  ;;  %p6598_p7 = scmp.lt.s32.totalorder %s11152_s27, %s6596_s26 }
 0x468   : > { %p6599_p8 = scmp.lt.s32.totalorder %s6597_s28, %s6591_s21 }
 0x469   : > { %4953 = vst [vmem:[%s11054_s16 + $0x88] sm:$0xff] %v4921_v35 }
 0x46a   : > { %p6600_p11 = por %p6599_p8, %p6598_p7 }
 0x46c   : > { %v6224_v63 = vpop.f32.mrf.mxu0  ;;  %p6601_p0 = pnand %p6600_p11, %p6594_p4 }
 0x46d   : > { %v4834_v3 = vadd.f32 %v6224_v63, %v11045_v59 }
 0x46e   : > { %v4825_v48 = vpop.f32.mrf.mxu0 }
 0x46f   : > { %v4894_v50 = vadd.f32 %v6501_v11, %v4834_v3  ;;  %v4826_v49 = vadd.f32 %v11045_v59, %v4825_v48 }
 0x470   : > { %v6225_v61 = vpop.f32.mrf.mxu0 }
 0x471   : > { %v4926_v54 = vmax.f32 %v4894_v50, 0.0  ;;  %v4892_v41 = vadd.f32 %v6502_v21, %v4826_v49  ;;  %v4837_v25 = vadd.f32 %v6225_v61, %v11045_v59 }
 0x472   : > { %v4828_v60 = vpop.f32.mrf.mxu0 }
 0x473   : > { %4958 = vst [vmem:[%s11054_s16 + $0xb0] sm:$0xff] %v4926_v54  ;;  %v4924_v6 = vmax.f32 %v4892_v41, 0.0  ;;  %v4895_v24 = vadd.f32 %v6503_v30, %v4837_v25  ;;  %v4829_v18 = vadd.f32 %v11045_v59, %v4828_v60 }
 0x475   : > { %4956 = vst [vmem:[%s11054_s16 + $0xa0] sm:$0xff] %v4924_v6  ;;  %v4927_v15 = vmax.f32 %v4895_v24, 0.0  ;;  %v4893_v34 = vadd.f32 %v6504_v36, %v4829_v18 }
 0x477   : > { %4959 = vst [vmem:[%s11054_s16 + $0xb8] sm:$0xff] %v4927_v15  ;;  %v4925_v7 = vmax.f32 %v4893_v34, 0.0 }
 0x479   : > { %4957 = vst [vmem:[%s11054_s16 + $0xa8] sm:$0xff] %v4925_v7 }
 0x47c   : > { %v6228_v2 = vpop.f32.mrf.mxu0 }
 0x47d   : > { %v4850_v27 = vadd.f32 %v6228_v2, %v11045_v59 }
 0x47e   : > { %v4841_v53 = vpop.f32.mrf.mxu0 }
 0x47f   : > { %v4898_v40 = vadd.f32 %v6505_v23, %v4850_v27  ;;  %v4842_v19 = vadd.f32 %v11045_v59, %v4841_v53 }
 0x480   : > { %v6229_v32 = vpop.f32.mrf.mxu0 }
 0x481   : > { %v4930_v39 = vmax.f32 %v4898_v40, 0.0  ;;  %v4896_v10 = vadd.f32 %v6506_v38, %v4842_v19  ;;  %v4853_v37 = vadd.f32 %v6229_v32, %v11045_v59 }
 0x482   : > { %v4844_v47 = vpop.f32.mrf.mxu0 }
 0x483   : > { %4962 = vst [vmem:[%s11054_s16 + $0xd0] sm:$0xff] %v4930_v39  ;;  %v4928_v8 = vmax.f32 %v4896_v10, 0.0  ;;  %v4899_v28 = vadd.f32 %v6507_v45, %v4853_v37  ;;  %v4845_v42 = vadd.f32 %v11045_v59, %v4844_v47 }
 0x485   : > { %4960 = vst [vmem:[%s11054_s16 + $0xc0] sm:$0xff] %v4928_v8  ;;  %v4931_v9 = vmax.f32 %v4899_v28, 0.0  ;;  %v4897_v0 = vadd.f32 %v6508_v57, %v4845_v42 }
 0x487   : > { %4963 = vst [vmem:[%s11054_s16 + $0xd8] sm:$0xff] %v4931_v9  ;;  %v4929_v56 = vmax.f32 %v4897_v0, 0.0 }
 0x489   : > { %4961 = vst [vmem:[%s11054_s16 + $0xc8] sm:$0xff] %v4929_v56 }
 0x48c   : > { %v6232_v44 = vpop.f32.mrf.mxu0 }
 0x48d   : > { %v4866_v52 = vadd.f32 %v6232_v44, %v11045_v59 }
 0x48e   : > { %v4857_v43 = vpop.f32.mrf.mxu0 }
 0x48f   : > { %v4902_v62 = vadd.f32 %v6509_v26, %v4866_v52  ;;  %v4858_v1 = vadd.f32 %v11045_v59, %v4857_v43 }
 0x490   : > { %v6233_v33 = vpop.f32.mrf.mxu0 }
 0x491   : > { %v4934_v31 = vmax.f32 %v4902_v62, 0.0  ;;  %v4900_v22 = vadd.f32 %v6510_v14, %v4858_v1  ;;  %v4869_v12 = vadd.f32 %v6233_v33, %v11045_v59 }
 0x492   : > { %v4860_v20 = vpop.f32.mrf.mxu0 }
 0x493   : > { %4966 = vst [vmem:[%s11054_s16 + $0xf0] sm:$0xff] %v4934_v31  ;;  %v4932_v4 = vmax.f32 %v4900_v22, 0.0  ;;  %v4903_v55 = vadd.f32 %v6511_v51, %v4869_v12  ;;  %v4861_v13 = vadd.f32 %v11045_v59, %v4860_v20 }
 0x495   : > { %4964 = vst [vmem:[%s11054_s16 + $0xe0] sm:$0xff] %v4932_v4  ;;  %v4935_v16 = vmax.f32 %v4903_v55, 0.0  ;;  %v4901_v58 = vadd.f32 %v6512_v46, %v4861_v13 }
 0x497   : > { %4967 = vst [vmem:[%s11054_s16 + $0xf8] sm:$0xff] %v4935_v16  ;;  %v4933_v17 = vmax.f32 %v4901_v58, 0.0 }
 0x499   : > { %4965 = vst [vmem:[%s11054_s16 + $0xe8] sm:$0xff] %v4933_v17 }
 0x49a   : > { %6604 = shalt.err (!%p6601_p0)
}
 0x49b   : > { %s6605_s24 = scalar_lea.hbm %s11150_s22, 4096  ;;  %s6609_s25 = scalar_lea.hbm %s11207_s9, 8192 }
 0x49c   : > { %p6606_p6 = scmp.ne.s32.totalorder %s11150_s22, %s6605_s24  ;;  %p6610_p1 = scmp.lt.s32.totalorder %s11150_s22, %s11207_s9 }
 0x49d   : > { %p6611_p5 = scmp.lt.s32.totalorder %s6609_s25, %s6605_s24 }
 0x49e   : > { %p6607_p9 = pnand %p6606_p6, %p12862_p3 }
 0x49f   : > { %p6612_p10 = por %p6611_p5, %p6610_p1 }
 0x4a0   : > { %p6608_p13 = pneg %p6607_p9 }
 0x4a2   : > { %p6613_p12 = pnand %p6612_p10, %p6608_p13 }
 0x4a4   : > { %6616 = shalt.err (!%p6613_p12)
}
 0x4a5   : > { %s6668_s21 = smov 128   ;;  %s6669_s17 = smov 8  }
 0x4a6   : > { %6262 = dma.vmem_to_hbm [thread:$0]  (%p12862_p3), %s11152_s27, 4096, %s11150_s22, %s11158_s13, %s6668_s21, %s6668_s21, %s6669_s17  }
 0x4a7 PF: > { %p6284_p2 = scmp.ge.s32.totalorder %s6659_s12, 2  ;;  %s4997_s26 = sand.u32 1, %s6647_s30  }
 0x4a8   : > { %p12863_p4 = scmp.ne.s32.totalorder %s11681_s20, 0  ;;  %s4998_s28 = scalar_lea.sflag [#allocation4], %s4997_s26 }
 0x4aa   : > { %p6275_p7 = pnand %p6284_p2, %p12863_p4 }
 0x4ac   : > { %p6276_p8 = pneg %p6275_p7 }
 0x4ae   : > { %6642 = dma.done.wait (%p6276_p8), %s4998_s28, 4096  }
 0x4af   : > { %6644 = vsyncadd (%p6276_p8), %s4998_s28, 4294963200  ;;  %p21_p11 = scmp.ge.s32.totalorder %s6745_s15, 4   ;;  %s12864_s30 = smov %s6651_s10 }
 0x4b0   : > { %s12865_s10 = smov %s6655_s11  ;;  %s12866_s11 = smov %s6756_s18 }
 0x4b1   : > { %s12867_s12 = smov %s6745_s15  ;;  %23 = sbr.rel (!%p21_p11) target bundleno = 5 (0x5), region = 104 }
 0x4b6   :  { %5003 = vsyncpa [#allocation3], 1 }
 0x4b7   :  { %5005 = vsyncpa [#allocation3 + $0x1], 1 }
 0x4b8   :  { %5006 = vsyncpa [#allocation6], 1 }
 0x4b9   :  { %5007 = vsyncpa [#allocation4], 1 }
 0x4ba   :  { %5009 = vsyncpa [#allocation4 + $0x1], 1 }

</bundles_post_ra>
